<compile_context>
chip_gen: v6e
topology: v6e:2x2x1
jax: 0.10.0
libtpu: 0.0.40
codegen_flags: <defaults>
</compile_context>

<pallas_src>
import jax
import jax.numpy as jnp
from jax.experimental import pallas as pl
from jax.experimental.pallas import tpu as pltpu


def _leaky_relu(x, alpha=0.2):
    return jnp.where(x > 0, x, alpha * x)


def _round_up(n, m):
    return ((n + m - 1) // m) * m


def _device_kind():
    try:
        return jax.devices()[0].device_kind.lower()
    except Exception:
        return ""


def discriminator_kernel(
    x_ref,
    w1_ref, b1_ref,
    w2_ref, b2_ref,
    w3_ref, b3_ref,
    w4_ref, b4_ref,
    o_ref,
):
    # x tile: (TB, 896) bf16; weights bf16; biases f32; all matmuls accumulate in f32.
    h = jnp.dot(x_ref[...], w1_ref[...], preferred_element_type=jnp.float32)
    h = _leaky_relu(h + b1_ref[...]).astype(jnp.bfloat16)            # (TB, 1024)

    h = jnp.dot(h, w2_ref[...], preferred_element_type=jnp.float32)
    h = _leaky_relu(h + b2_ref[...]).astype(jnp.bfloat16)            # (TB, 512)

    h = jnp.dot(h, w3_ref[...], preferred_element_type=jnp.float32)
    h = _leaky_relu(h + b3_ref[...]).astype(jnp.bfloat16)            # (TB, 256)

    # final layer zero-padded to 128 output lanes -> lane-dense stores
    z = jnp.dot(h, w4_ref[...], preferred_element_type=jnp.float32) + b4_ref[...]  # (TB, 128)

    # numerically-stable sigmoid: one EUP exp + one EUP approx reciprocal, no divides
    e = jnp.exp(-jnp.abs(z))
    inv = pl.reciprocal(1.0 + e, approx=True)
    o_ref[...] = jnp.where(z >= 0.0, inv, e * inv)


def prepare_kernel_params(params):
    """Pad + cast PyTorch-layout params (w: (in,out), b: (1,out)) for the kernel.
       w1: (784,h1) -> (896,h1) zero-padded rows, bf16
       w4: (h3,1)   -> (h3,128) zero-padded cols, bf16
       biases stay f32; b4 zero-padded to (1,128)."""
    (w1, b1), (w2, b2), (w3, b3), (w4, b4) = (
        params[k] for k in ("fc1", "fc2", "fc3", "fc4")
    )
    k_pad = _round_up(w1.shape[0], 128)          # 784 -> 896
    n_pad = _round_up(w4.shape[1], 128)          # 1   -> 128
    w1p = jnp.pad(w1, ((0, k_pad - w1.shape[0]), (0, 0))).astype(jnp.bfloat16)
    w4p = jnp.pad(w4, ((0, 0), (0, n_pad - w4.shape[1]))).astype(jnp.bfloat16)
    b4p = jnp.pad(b4, ((0, 0), (0, n_pad - b4.shape[1]))).astype(jnp.float32)
    return dict(
        w1=w1p, b1=b1.astype(jnp.float32),
        w2=w2.astype(jnp.bfloat16), b2=b2.astype(jnp.float32),
        w3=w3.astype(jnp.bfloat16), b3=b3.astype(jnp.float32),
        w4=w4p, b4=b4p,
    )


def discriminator_forward(x, kp):
    """x: any shape reshapable to (-1, 784); kp: output of prepare_kernel_params."""
    x2d = jnp.reshape(x, (-1, 784)).astype(jnp.bfloat16)
    B = x2d.shape[0]

    k_pad = kp["w1"].shape[0]            # 896
    h1 = kp["w1"].shape[1]               # 1024
    h2 = kp["w2"].shape[1]               # 512
    h3 = kp["w3"].shape[1]               # 256
    n_out = kp["w4"].shape[1]            # 128 (padded)

    kind = _device_kind()
    # v5e: per-tile MXU work already amortizes grid overhead at 256 rows and the
    # VPU/EUP have no bf16 path; elsewhere 512 halves per-step overhead share.
    tb_cap = 256 if "v5" in kind else 512

    # Minimize dead-row padding: balanced tiles, each rounded up to the 8-sublane grain.
    ntiles = -(-B // tb_cap)                       # ceil(B / tb_cap)
    TB = _round_up(-(-B // ntiles), 8)             # round_up(ceil(B / ntiles), 8)
    B_pad = ntiles * TB
    grid = (ntiles,)

    xp = jnp.pad(x2d, ((0, B_pad - B), (0, k_pad - 784)))

    # v7x has 2 TensorCores; only CORE_PARALLEL actually shards the grid across them.
    if ("v7" in kind or "7x" in kind) and hasattr(pltpu, "CORE_PARALLEL") and ntiles >= 2:
        dim_sem = (pltpu.CORE_PARALLEL,)
    else:
        dim_sem = ("parallel",)

    # Advisory cost estimate so XLA schedules the surrounding pad/cast/slice sensibly.
    weight_bytes = sum(
        int(kp[k].size) * kp[k].dtype.itemsize
        for k in ("w1", "b1", "w2", "b2", "w3", "b3", "w4", "b4")
    )
    cost = pl.CostEstimate(
        flops=2 * B_pad * (k_pad * h1 + h1 * h2 + h2 * h3 + h3 * n_out),
        transcendentals=2 * B_pad * n_out,
        bytes_accessed=weight_bytes + int(xp.size) * 2 + B_pad * n_out * 4,
    )

    def _run(use_buffered):
        if use_buffered:
            def wspec(shape):
                # Invariant across batch tiles: single buffer, fetched once, VMEM-resident.
                return pl.BlockSpec(shape, lambda i: (0, 0),
                                    pipeline_mode=pl.Buffered(1))
        else:
            def wspec(shape):
                return pl.BlockSpec(shape, lambda i: (0, 0))

        return pl.pallas_call(
            discriminator_kernel,
            out_shape=jax.ShapeDtypeStruct((B_pad, n_out), jnp.float32),
            grid=grid,
            in_specs=[
                pl.BlockSpec((TB, k_pad), lambda i: (i, 0)),   # x: moves with batch tile
                wspec((k_pad, h1)), wspec((1, h1)),
                wspec((h1, h2)),    wspec((1, h2)),
                wspec((h2, h3)),    wspec((1, h3)),
                wspec((h3, n_out)), wspec((1, n_out)),
            ],
            out_specs=pl.BlockSpec((TB, n_out), lambda i: (i, 0)),
            compiler_params=pltpu.CompilerParams(
                dimension_semantics=dim_sem,
                vmem_limit_bytes=32 << 20,
            ),
            cost_estimate=cost,
        )(xp, kp["w1"], kp["b1"], kp["w2"], kp["b2"],
          kp["w3"], kp["b3"], kp["w4"], kp["b4"])

    if hasattr(pl, "Buffered"):
        try:
            out = _run(True)
        except Exception:
            out = _run(False)     # older JAX without pipeline_mode support
    else:
        out = _run(False)

    return out[:B, :1]


def init_params(key, hid1=1024, hid2=512, hid3=256):
    """Deterministic PyTorch-style uniform(-1/sqrt(fan_in), 1/sqrt(fan_in)) init.
    Weights stored as (in_features, out_features), biases as (1, out_features)."""
    sizes = [(784, hid1), (hid1, hid2), (hid2, hid3), (hid3, 1)]
    names = ["fc1", "fc2", "fc3", "fc4"]
    params = {}
    for name, (fin, fout) in zip(names, sizes):
        key, kw, kb = jax.random.split(key, 3)
        bound = 1.0 / jnp.sqrt(float(fin))
        w = jax.random.uniform(kw, (fin, fout), jnp.float32, -bound, bound)
        b = jax.random.uniform(kb, (1, fout), jnp.float32, -bound, bound)
        params[name] = (w, b)
    return params


def reference_forward(x, params):
    """Plain-JAX reference matching the PyTorch forward, with the same bf16
    matmul inputs / f32 accumulation the kernel uses."""
    h = jnp.reshape(x, (-1, 784)).astype(jnp.float32)
    for name in ("fc1", "fc2", "fc3"):
        w, b = params[name]
        h = jnp.dot(h.astype(jnp.bfloat16), w.astype(jnp.bfloat16),
                    preferred_element_type=jnp.float32) + b
        h = jnp.where(h > 0, h, 0.2 * h)
    w, b = params["fc4"]
    z = jnp.dot(h.astype(jnp.bfloat16), w.astype(jnp.bfloat16),
                preferred_element_type=jnp.float32) + b
    return jax.nn.sigmoid(z)


if __name__ == "__main__":
    key = jax.random.PRNGKey(0)
    key, kx = jax.random.split(key)

    # MNIST-like input: (batch=4, 1, 28, 28) NCHW; forward views it as (-1, 784)
    x = jax.random.normal(kx, (4, 1, 28, 28), jnp.float32)

    params = init_params(jax.random.PRNGKey(0))
    kparams = prepare_kernel_params(params)

    out = discriminator_forward(x, kparams)
    out = jax.block_until_ready(out)

    ref = reference_forward(x, params)
    assert out.shape == (4, 1), out.shape
    err = float(jnp.max(jnp.abs(out - ref)))
    assert err < 1e-3, f"max abs err {err}"

    print("KERNEL_OK")
</pallas_src>

<mosaic_0001>
module attributes {stable_mosaic.version = 11 : i64} {
  func.func @discriminator_kernel(%arg0: i32, %arg1: memref<8x896xbf16, #tpu.memory_space<vmem>>, %arg2: memref<896x1024xbf16, #tpu.memory_space<vmem>>, %arg3: memref<1x1024xf32, #tpu.memory_space<vmem>>, %arg4: memref<1024x512xbf16, #tpu.memory_space<vmem>>, %arg5: memref<1x512xf32, #tpu.memory_space<vmem>>, %arg6: memref<512x256xbf16, #tpu.memory_space<vmem>>, %arg7: memref<1x256xf32, #tpu.memory_space<vmem>>, %arg8: memref<256x128xbf16, #tpu.memory_space<vmem>>, %arg9: memref<1x128xf32, #tpu.memory_space<vmem>>, %arg10: memref<8x128xf32, #tpu.memory_space<vmem>>) attributes {dimension_semantics = [#tpu.dimension_semantics<parallel>], iteration_bounds = array<i64: 1>, scalar_prefetch = 0 : i64, scratch_operands = 0 : i64, tpu.core_type = #tpu.core_type<tc>, window_params = [{transform_indices = @transform_0, window_bounds = array<i64: 8, 896>}, {pipeline_mode = #tpu.pipeline_mode<synchronous>, transform_indices = @transform_1, window_bounds = array<i64: 896, 1024>}, {pipeline_mode = #tpu.pipeline_mode<synchronous>, transform_indices = @transform_2, window_bounds = array<i64: 1, 1024>}, {pipeline_mode = #tpu.pipeline_mode<synchronous>, transform_indices = @transform_3, window_bounds = array<i64: 1024, 512>}, {pipeline_mode = #tpu.pipeline_mode<synchronous>, transform_indices = @transform_4, window_bounds = array<i64: 1, 512>}, {pipeline_mode = #tpu.pipeline_mode<synchronous>, transform_indices = @transform_5, window_bounds = array<i64: 512, 256>}, {pipeline_mode = #tpu.pipeline_mode<synchronous>, transform_indices = @transform_6, window_bounds = array<i64: 1, 256>}, {pipeline_mode = #tpu.pipeline_mode<synchronous>, transform_indices = @transform_7, window_bounds = array<i64: 256, 128>}, {pipeline_mode = #tpu.pipeline_mode<synchronous>, transform_indices = @transform_8, window_bounds = array<i64: 1, 128>}, {transform_indices = @transform_9, window_bounds = array<i64: 8, 128>}]} {
    %c0 = arith.constant 0 : index
    %c0_0 = arith.constant 0 : index
    %0 = vector.load %arg1[%c0, %c0_0] : memref<8x896xbf16, #tpu.memory_space<vmem>>, vector<8x896xbf16>
    %c0_1 = arith.constant 0 : index
    %c0_2 = arith.constant 0 : index
    %1 = vector.load %arg2[%c0_1, %c0_2] : memref<896x1024xbf16, #tpu.memory_space<vmem>>, vector<896x1024xbf16>
    %cst = arith.constant dense<0.000000e+00> : vector<8x1024xf32>
    %2 = tpu.matmul %0, %1, %cst {dimension_numbers = #tpu.dot_dimension_numbers<[1], [0], [0], [1], [0, 0, 1, 1], [], []>} : vector<8x896xbf16>, vector<896x1024xbf16>, vector<8x1024xf32> -> vector<8x1024xf32>
    %c0_3 = arith.constant 0 : index
    %c0_4 = arith.constant 0 : index
    %3 = vector.load %arg3[%c0_3, %c0_4] : memref<1x1024xf32, #tpu.memory_space<vmem>>, vector<1x1024xf32>
    %4 = vector.broadcast %3 : vector<1x1024xf32> to vector<8x1024xf32>
    %5 = arith.addf %2, %4 : vector<8x1024xf32>
    %cst_5 = arith.constant 0.000000e+00 : f32
    %6 = vector.broadcast %cst_5 : f32 to vector<8x1024xf32>
    %7 = arith.cmpf ogt, %5, %6 : vector<8x1024xf32>
    %cst_6 = arith.constant 2.000000e-01 : f32
    %8 = vector.broadcast %cst_6 : f32 to vector<8x1024xf32>
    %9 = arith.mulf %8, %5 : vector<8x1024xf32>
    %10 = arith.select %7, %5, %9 : vector<8x1024xi1>, vector<8x1024xf32>
    %11 = arith.truncf %10 : vector<8x1024xf32> to vector<8x1024xbf16>
    %c0_7 = arith.constant 0 : index
    %c0_8 = arith.constant 0 : index
    %12 = vector.load %arg4[%c0_7, %c0_8] : memref<1024x512xbf16, #tpu.memory_space<vmem>>, vector<1024x512xbf16>
    %cst_9 = arith.constant dense<0.000000e+00> : vector<8x512xf32>
    %13 = tpu.matmul %11, %12, %cst_9 {dimension_numbers = #tpu.dot_dimension_numbers<[1], [0], [0], [1], [0, 0, 1, 1], [], []>} : vector<8x1024xbf16>, vector<1024x512xbf16>, vector<8x512xf32> -> vector<8x512xf32>
    %c0_10 = arith.constant 0 : index
    %c0_11 = arith.constant 0 : index
    %14 = vector.load %arg5[%c0_10, %c0_11] : memref<1x512xf32, #tpu.memory_space<vmem>>, vector<1x512xf32>
    %15 = vector.broadcast %14 : vector<1x512xf32> to vector<8x512xf32>
    %16 = arith.addf %13, %15 : vector<8x512xf32>
    %cst_12 = arith.constant 0.000000e+00 : f32
    %17 = vector.broadcast %cst_12 : f32 to vector<8x512xf32>
    %18 = arith.cmpf ogt, %16, %17 : vector<8x512xf32>
    %cst_13 = arith.constant 2.000000e-01 : f32
    %19 = vector.broadcast %cst_13 : f32 to vector<8x512xf32>
    %20 = arith.mulf %19, %16 : vector<8x512xf32>
    %21 = arith.select %18, %16, %20 : vector<8x512xi1>, vector<8x512xf32>
    %22 = arith.truncf %21 : vector<8x512xf32> to vector<8x512xbf16>
    %c0_14 = arith.constant 0 : index
    %c0_15 = arith.constant 0 : index
    %23 = vector.load %arg6[%c0_14, %c0_15] : memref<512x256xbf16, #tpu.memory_space<vmem>>, vector<512x256xbf16>
    %cst_16 = arith.constant dense<0.000000e+00> : vector<8x256xf32>
    %24 = tpu.matmul %22, %23, %cst_16 {dimension_numbers = #tpu.dot_dimension_numbers<[1], [0], [0], [1], [0, 0, 1, 1], [], []>} : vector<8x512xbf16>, vector<512x256xbf16>, vector<8x256xf32> -> vector<8x256xf32>
    %c0_17 = arith.constant 0 : index
    %c0_18 = arith.constant 0 : index
    %25 = vector.load %arg7[%c0_17, %c0_18] : memref<1x256xf32, #tpu.memory_space<vmem>>, vector<1x256xf32>
    %26 = vector.broadcast %25 : vector<1x256xf32> to vector<8x256xf32>
    %27 = arith.addf %24, %26 : vector<8x256xf32>
    %cst_19 = arith.constant 0.000000e+00 : f32
    %28 = vector.broadcast %cst_19 : f32 to vector<8x256xf32>
    %29 = arith.cmpf ogt, %27, %28 : vector<8x256xf32>
    %cst_20 = arith.constant 2.000000e-01 : f32
    %30 = vector.broadcast %cst_20 : f32 to vector<8x256xf32>
    %31 = arith.mulf %30, %27 : vector<8x256xf32>
    %32 = arith.select %29, %27, %31 : vector<8x256xi1>, vector<8x256xf32>
    %33 = arith.truncf %32 : vector<8x256xf32> to vector<8x256xbf16>
    %c0_21 = arith.constant 0 : index
    %c0_22 = arith.constant 0 : index
    %34 = vector.load %arg8[%c0_21, %c0_22] : memref<256x128xbf16, #tpu.memory_space<vmem>>, vector<256x128xbf16>
    %cst_23 = arith.constant dense<0.000000e+00> : vector<8x128xf32>
    %35 = tpu.matmul %33, %34, %cst_23 {dimension_numbers = #tpu.dot_dimension_numbers<[1], [0], [0], [1], [0, 0, 1, 1], [], []>} : vector<8x256xbf16>, vector<256x128xbf16>, vector<8x128xf32> -> vector<8x128xf32>
    %c0_24 = arith.constant 0 : index
    %c0_25 = arith.constant 0 : index
    %36 = vector.load %arg9[%c0_24, %c0_25] : memref<1x128xf32, #tpu.memory_space<vmem>>, vector<1x128xf32>
    %37 = vector.broadcast %36 : vector<1x128xf32> to vector<8x128xf32>
    %38 = arith.addf %35, %37 : vector<8x128xf32>
    %39 = math.absf %38 : vector<8x128xf32>
    %cst_26 = arith.constant 0.000000e+00 : f32
    %40 = vector.broadcast %cst_26 : f32 to vector<8x128xf32>
    %41 = arith.subf %40, %39 : vector<8x128xf32>
    %42 = math.exp %41 : vector<8x128xf32>
    %cst_27 = arith.constant 1.000000e+00 : f32
    %43 = vector.broadcast %cst_27 : f32 to vector<8x128xf32>
    %44 = arith.addf %43, %42 : vector<8x128xf32>
    %45 = tpu.reciprocal %44 {approx = true} : vector<8x128xf32> -> vector<8x128xf32>
    %cst_28 = arith.constant 0.000000e+00 : f32
    %46 = vector.broadcast %cst_28 : f32 to vector<8x128xf32>
    %47 = arith.cmpf oge, %38, %46 : vector<8x128xf32>
    %48 = arith.mulf %42, %45 : vector<8x128xf32>
    %49 = arith.select %47, %45, %48 : vector<8x128xi1>, vector<8x128xf32>
    %c0_29 = arith.constant 0 : index
    %c0_30 = arith.constant 0 : index
    %50 = vector.load %arg10[%c0_29, %c0_30] : memref<8x128xf32, #tpu.memory_space<vmem>>, vector<8x128xf32>
    tpu.vector_store %arg10[%c0_29, %c0_30], %49 {strides = array<i32>} : memref<8x128xf32, #tpu.memory_space<vmem>>, vector<8x128xf32>,
    return
  }
  func.func @transform_0(%arg0: i32) -> (i32, i32) {
    %c0_i32 = arith.constant 0 : i32
    %c0_i32_0 = arith.constant 0 : i32
    return %arg0, %c0_i32 : i32, i32
  }
  func.func @transform_1(%arg0: i32) -> (i32, i32) {
    %c0_i32 = arith.constant 0 : i32
    %c0_i32_0 = arith.constant 0 : i32
    %c0_i32_1 = arith.constant 0 : i32
    return %c0_i32, %c0_i32_0 : i32, i32
  }
  func.func @transform_2(%arg0: i32) -> (i32, i32) {
    %c0_i32 = arith.constant 0 : i32
    %c0_i32_0 = arith.constant 0 : i32
    %c0_i32_1 = arith.constant 0 : i32
    return %c0_i32, %c0_i32_0 : i32, i32
  }
  func.func @transform_3(%arg0: i32) -> (i32, i32) {
    %c0_i32 = arith.constant 0 : i32
    %c0_i32_0 = arith.constant 0 : i32
    %c0_i32_1 = arith.constant 0 : i32
    return %c0_i32, %c0_i32_0 : i32, i32
  }
  func.func @transform_4(%arg0: i32) -> (i32, i32) {
    %c0_i32 = arith.constant 0 : i32
    %c0_i32_0 = arith.constant 0 : i32
    %c0_i32_1 = arith.constant 0 : i32
    return %c0_i32, %c0_i32_0 : i32, i32
  }
  func.func @transform_5(%arg0: i32) -> (i32, i32) {
    %c0_i32 = arith.constant 0 : i32
    %c0_i32_0 = arith.constant 0 : i32
    %c0_i32_1 = arith.constant 0 : i32
    return %c0_i32, %c0_i32_0 : i32, i32
  }
  func.func @transform_6(%arg0: i32) -> (i32, i32) {
    %c0_i32 = arith.constant 0 : i32
    %c0_i32_0 = arith.constant 0 : i32
    %c0_i32_1 = arith.constant 0 : i32
    return %c0_i32, %c0_i32_0 : i32, i32
  }
  func.func @transform_7(%arg0: i32) -> (i32, i32) {
    %c0_i32 = arith.constant 0 : i32
    %c0_i32_0 = arith.constant 0 : i32
    %c0_i32_1 = arith.constant 0 : i32
    return %c0_i32, %c0_i32_0 : i32, i32
  }
  func.func @transform_8(%arg0: i32) -> (i32, i32) {
    %c0_i32 = arith.constant 0 : i32
    %c0_i32_0 = arith.constant 0 : i32
    %c0_i32_1 = arith.constant 0 : i32
    return %c0_i32, %c0_i32_0 : i32, i32
  }
  func.func @transform_9(%arg0: i32) -> (i32, i32) {
    %c0_i32 = arith.constant 0 : i32
    %c0_i32_0 = arith.constant 0 : i32
    return %arg0, %c0_i32 : i32, i32
  }
}

module attributes {stable_mosaic.version = 11 : i64} {
  func.func @discriminator_kernel(%arg0: i32, %arg1: memref<8x896xbf16, #tpu.memory_space<vmem>>, %arg2: memref<896x1024xbf16, #tpu.memory_space<vmem>>, %arg3: memref<1x1024xf32, #tpu.memory_space<vmem>>, %arg4: memref<1024x512xbf16, #tpu.memory_space<vmem>>, %arg5: memref<1x512xf32, #tpu.memory_space<vmem>>, %arg6: memref<512x256xbf16, #tpu.memory_space<vmem>>, %arg7: memref<1x256xf32, #tpu.memory_space<vmem>>, %arg8: memref<256x128xbf16, #tpu.memory_space<vmem>>, %arg9: memref<1x128xf32, #tpu.memory_space<vmem>>, %arg10: memref<8x128xf32, #tpu.memory_space<vmem>>) attributes {dimension_semantics = [#tpu.dimension_semantics<parallel>], iteration_bounds = array<i64: 1>, scalar_prefetch = 0 : i64, scratch_operands = 0 : i64, tpu.core_type = #tpu.core_type<tc>, window_params = [{transform_indices = @transform_0, window_bounds = array<i64: 8, 896>}, {pipeline_mode = #tpu.pipeline_mode<synchronous>, transform_indices = @transform_1, window_bounds = array<i64: 896, 1024>}, {pipeline_mode = #tpu.pipeline_mode<synchronous>, transform_indices = @transform_2, window_bounds = array<i64: 1, 1024>}, {pipeline_mode = #tpu.pipeline_mode<synchronous>, transform_indices = @transform_3, window_bounds = array<i64: 1024, 512>}, {pipeline_mode = #tpu.pipeline_mode<synchronous>, transform_indices = @transform_4, window_bounds = array<i64: 1, 512>}, {pipeline_mode = #tpu.pipeline_mode<synchronous>, transform_indices = @transform_5, window_bounds = array<i64: 512, 256>}, {pipeline_mode = #tpu.pipeline_mode<synchronous>, transform_indices = @transform_6, window_bounds = array<i64: 1, 256>}, {pipeline_mode = #tpu.pipeline_mode<synchronous>, transform_indices = @transform_7, window_bounds = array<i64: 256, 128>}, {pipeline_mode = #tpu.pipeline_mode<synchronous>, transform_indices = @transform_8, window_bounds = array<i64: 1, 128>}, {transform_indices = @transform_9, window_bounds = array<i64: 8, 128>}]} {
    %c0 = arith.constant 0 : index
    %c0_0 = arith.constant 0 : index
    %0 = vector.load %arg1[%c0, %c0_0] : memref<8x896xbf16, #tpu.memory_space<vmem>>, vector<8x896xbf16>
    %c0_1 = arith.constant 0 : index
    %c0_2 = arith.constant 0 : index
    %1 = vector.load %arg2[%c0_1, %c0_2] : memref<896x1024xbf16, #tpu.memory_space<vmem>>, vector<896x1024xbf16>
    %cst = arith.constant dense<0.000000e+00> : vector<8x1024xf32>
    %2 = tpu.matmul %0, %1, %cst {dimension_numbers = #tpu.dot_dimension_numbers<[1], [0], [0], [1], [0, 0, 1, 1], [], []>} : vector<8x896xbf16>, vector<896x1024xbf16>, vector<8x1024xf32> -> vector<8x1024xf32>
    %c0_3 = arith.constant 0 : index
    %c0_4 = arith.constant 0 : index
    %3 = vector.load %arg3[%c0_3, %c0_4] : memref<1x1024xf32, #tpu.memory_space<vmem>>, vector<1x1024xf32>
    %4 = vector.broadcast %3 : vector<1x1024xf32> to vector<8x1024xf32>
    %5 = arith.addf %2, %4 : vector<8x1024xf32>
    %cst_5 = arith.constant 0.000000e+00 : f32
    %6 = vector.broadcast %cst_5 : f32 to vector<8x1024xf32>
    %7 = arith.cmpf ogt, %5, %6 : vector<8x1024xf32>
    %cst_6 = arith.constant 2.000000e-01 : f32
    %8 = vector.broadcast %cst_6 : f32 to vector<8x1024xf32>
    %9 = arith.mulf %8, %5 : vector<8x1024xf32>
    %10 = arith.select %7, %5, %9 : vector<8x1024xi1>, vector<8x1024xf32>
    %11 = arith.truncf %10 : vector<8x1024xf32> to vector<8x1024xbf16>
    %c0_7 = arith.constant 0 : index
    %c0_8 = arith.constant 0 : index
    %12 = vector.load %arg4[%c0_7, %c0_8] : memref<1024x512xbf16, #tpu.memory_space<vmem>>, vector<1024x512xbf16>
    %cst_9 = arith.constant dense<0.000000e+00> : vector<8x512xf32>
    %13 = tpu.matmul %11, %12, %cst_9 {dimension_numbers = #tpu.dot_dimension_numbers<[1], [0], [0], [1], [0, 0, 1, 1], [], []>} : vector<8x1024xbf16>, vector<1024x512xbf16>, vector<8x512xf32> -> vector<8x512xf32>
    %c0_10 = arith.constant 0 : index
    %c0_11 = arith.constant 0 : index
    %14 = vector.load %arg5[%c0_10, %c0_11] : memref<1x512xf32, #tpu.memory_space<vmem>>, vector<1x512xf32>
    %15 = vector.broadcast %14 : vector<1x512xf32> to vector<8x512xf32>
    %16 = arith.addf %13, %15 : vector<8x512xf32>
    %cst_12 = arith.constant 0.000000e+00 : f32
    %17 = vector.broadcast %cst_12 : f32 to vector<8x512xf32>
    %18 = arith.cmpf ogt, %16, %17 : vector<8x512xf32>
    %cst_13 = arith.constant 2.000000e-01 : f32
    %19 = vector.broadcast %cst_13 : f32 to vector<8x512xf32>
    %20 = arith.mulf %19, %16 : vector<8x512xf32>
    %21 = arith.select %18, %16, %20 : vector<8x512xi1>, vector<8x512xf32>
    %22 = arith.truncf %21 : vector<8x512xf32> to vector<8x512xbf16>
    %c0_14 = arith.constant 0 : index
    %c0_15 = arith.constant 0 : index
    %23 = vector.load %arg6[%c0_14, %c0_15] : memref<512x256xbf16, #tpu.memory_space<vmem>>, vector<512x256xbf16>
    %cst_16 = arith.constant dense<0.000000e+00> : vector<8x256xf32>
    %24 = tpu.matmul %22, %23, %cst_16 {dimension_numbers = #tpu.dot_dimension_numbers<[1], [0], [0], [1], [0, 0, 1, 1], [], []>} : vector<8x512xbf16>, vector<512x256xbf16>, vector<8x256xf32> -> vector<8x256xf32>
    %c0_17 = arith.constant 0 : index
    %c0_18 = arith.constant 0 : index
    %25 = vector.load %arg7[%c0_17, %c0_18] : memref<1x256xf32, #tpu.memory_space<vmem>>, vector<1x256xf32>
    %26 = vector.broadcast %25 : vector<1x256xf32> to vector<8x256xf32>
    %27 = arith.addf %24, %26 : vector<8x256xf32>
    %cst_19 = arith.constant 0.000000e+00 : f32
    %28 = vector.broadcast %cst_19 : f32 to vector<8x256xf32>
    %29 = arith.cmpf ogt, %27, %28 : vector<8x256xf32>
    %cst_20 = arith.constant 2.000000e-01 : f32
    %30 = vector.broadcast %cst_20 : f32 to vector<8x256xf32>
    %31 = arith.mulf %30, %27 : vector<8x256xf32>
    %32 = arith.select %29, %27, %31 : vector<8x256xi1>, vector<8x256xf32>
    %33 = arith.truncf %32 : vector<8x256xf32> to vector<8x256xbf16>
    %c0_21 = arith.constant 0 : index
    %c0_22 = arith.constant 0 : index
    %34 = vector.load %arg8[%c0_21, %c0_22] : memref<256x128xbf16, #tpu.memory_space<vmem>>, vector<256x128xbf16>
    %cst_23 = arith.constant dense<0.000000e+00> : vector<8x128xf32>
    %35 = tpu.matmul %33, %34, %cst_23 {dimension_numbers = #tpu.dot_dimension_numbers<[1], [0], [0], [1], [0, 0, 1, 1], [], []>} : vector<8x256xbf16>, vector<256x128xbf16>, vector<8x128xf32> -> vector<8x128xf32>
    %c0_24 = arith.constant 0 : index
    %c0_25 = arith.constant 0 : index
    %36 = vector.load %arg9[%c0_24, %c0_25] : memref<1x128xf32, #tpu.memory_space<vmem>>, vector<1x128xf32>
    %37 = vector.broadcast %36 : vector<1x128xf32> to vector<8x128xf32>
    %38 = arith.addf %35, %37 : vector<8x128xf32>
    %39 = math.absf %38 : vector<8x128xf32>
    %cst_26 = arith.constant 0.000000e+00 : f32
    %40 = vector.broadcast %cst_26 : f32 to vector<8x128xf32>
    %41 = arith.subf %40, %39 : vector<8x128xf32>
    %42 = math.exp %41 : vector<8x128xf32>
    %cst_27 = arith.constant 1.000000e+00 : f32
    %43 = vector.broadcast %cst_27 : f32 to vector<8x128xf32>
    %44 = arith.addf %43, %42 : vector<8x128xf32>
    %45 = tpu.reciprocal %44 {approx = true} : vector<8x128xf32> -> vector<8x128xf32>
    %cst_28 = arith.constant 0.000000e+00 : f32
    %46 = vector.broadcast %cst_28 : f32 to vector<8x128xf32>
    %47 = arith.cmpf oge, %38, %46 : vector<8x128xf32>
    %48 = arith.mulf %42, %45 : vector<8x128xf32>
    %49 = arith.select %47, %45, %48 : vector<8x128xi1>, vector<8x128xf32>
    %c0_29 = arith.constant 0 : index
    %c0_30 = arith.constant 0 : index
    %50 = vector.load %arg10[%c0_29, %c0_30] : memref<8x128xf32, #tpu.memory_space<vmem>>, vector<8x128xf32>
    tpu.vector_store %arg10[%c0_29, %c0_30], %49 {strides = array<i32>} : memref<8x128xf32, #tpu.memory_space<vmem>>, vector<8x128xf32>,
    return
  }
  func.func @transform_0(%arg0: i32) -> (i32, i32) {
    %c0_i32 = arith.constant 0 : i32
    %c0_i32_0 = arith.constant 0 : i32
    return %arg0, %c0_i32 : i32, i32
  }
  func.func @transform_1(%arg0: i32) -> (i32, i32) {
    %c0_i32 = arith.constant 0 : i32
    %c0_i32_0 = arith.constant 0 : i32
    %c0_i32_1 = arith.constant 0 : i32
    return %c0_i32, %c0_i32_0 : i32, i32
  }
  func.func @transform_2(%arg0: i32) -> (i32, i32) {
    %c0_i32 = arith.constant 0 : i32
    %c0_i32_0 = arith.constant 0 : i32
    %c0_i32_1 = arith.constant 0 : i32
    return %c0_i32, %c0_i32_0 : i32, i32
  }
  func.func @transform_3(%arg0: i32) -> (i32, i32) {
    %c0_i32 = arith.constant 0 : i32
    %c0_i32_0 = arith.constant 0 : i32
    %c0_i32_1 = arith.constant 0 : i32
    return %c0_i32, %c0_i32_0 : i32, i32
  }
  func.func @transform_4(%arg0: i32) -> (i32, i32) {
    %c0_i32 = arith.constant 0 : i32
    %c0_i32_0 = arith.constant 0 : i32
    %c0_i32_1 = arith.constant 0 : i32
    return %c0_i32, %c0_i32_0 : i32, i32
  }
  func.func @transform_5(%arg0: i32) -> (i32, i32) {
    %c0_i32 = arith.constant 0 : i32
    %c0_i32_0 = arith.constant 0 : i32
    %c0_i32_1 = arith.constant 0 : i32
    return %c0_i32, %c0_i32_0 : i32, i32
  }
  func.func @transform_6(%arg0: i32) -> (i32, i32) {
    %c0_i32 = arith.constant 0 : i32
    %c0_i32_0 = arith.constant 0 : i32
    %c0_i32_1 = arith.constant 0 : i32
    return %c0_i32, %c0_i32_0 : i32, i32
  }
  func.func @transform_7(%arg0: i32) -> (i32, i32) {
    %c0_i32 = arith.constant 0 : i32
    %c0_i32_0 = arith.constant 0 : i32
    %c0_i32_1 = arith.constant 0 : i32
    return %c0_i32, %c0_i32_0 : i32, i32
  }
  func.func @transform_8(%arg0: i32) -> (i32, i32) {
    %c0_i32 = arith.constant 0 : i32
    %c0_i32_0 = arith.constant 0 : i32
    %c0_i32_1 = arith.constant 0 : i32
    return %c0_i32, %c0_i32_0 : i32, i32
  }
  func.func @transform_9(%arg0: i32) -> (i32, i32) {
    %c0_i32 = arith.constant 0 : i32
    %c0_i32_0 = arith.constant 0 : i32
    return %arg0, %c0_i32 : i32, i32
  }
}

</mosaic_0001>

<bundles_post_ra>
// kernel: tpu_custom_call.1
= control target key start
LH: loop header
LB: loop body
LE: loop exit
PB: predicated region body
PF: predicated region fallthrough
CT: control target
= control target key end

     0   :  { %14 = vsyncpa [#allocation3], 0  ;;  %s8054_s0 = inlined_call_operand.hbm [shape: bf16[8,896], index: 0, kind: input, shape index: {}]   ;;  %s8055_s1 = inlined_call_operand.hbm [shape: bf16[896,1024], index: 1, kind: input, shape index: {}]   ;;  %s8056_s2 = inlined_call_operand.hbm [shape: f32[1,1024], index: 2, kind: input, shape index: {}]   ;;  %s8057_s3 = inlined_call_operand.hbm [shape: bf16[1024,512], index: 3, kind: input, shape index: {}]   ;;  %s8058_s4 = inlined_call_operand.hbm [shape: f32[1,512], index: 4, kind: input, shape index: {}]   ;;  %s8059_s5 = inlined_call_operand.hbm [shape: bf16[512,256], index: 5, kind: input, shape index: {}]   ;;  %s8060_s6 = inlined_call_operand.hbm [shape: f32[1,256], index: 6, kind: input, shape index: {}]   ;;  %s8061_s7 = inlined_call_operand.hbm [shape: bf16[256,128], index: 7, kind: input, shape index: {}]   ;;  %s8062_s8 = inlined_call_operand.hbm [shape: f32[1,128], index: 8, kind: input, shape index: {}]   ;;  %s8063_s9 = inlined_call_operand.hbm [shape: f32[8,128], index: 9, kind: output, shape index: {}]  }
   0x1   :  { %15 = vsyncpa [#allocation6], 0 }
   0x2   :  { %16 = vsyncpa [#allocation9], 0 }
   0x3   :  { %17 = vsyncpa [#allocation12], 0 }
   0x4   :  { %18 = vsyncpa [#allocation15], 0 }
   0x5   :  { %19 = vsyncpa [#allocation4], 0  ;;  %s7740_s30 = smov [#allocation5]  }
   0x6   :  { %s35_s10 = sshll.u32 %s7740_s30, 4  ;;  %s36_s10 = int_to_ptr.vmem [resolvable:$true] %s35_s10 }
   0x7   :  { %s7536_s11 = scalar_lea.vmem %s36_s10, 57344  ;;  %p7541_p1 = scmp.lt.s32.totalorder %s36_s10, %s36_s10 }
   0x8   :  { %p7537_p0 = scmp.ne.s32.totalorder %s36_s10, %s7536_s11  ;;  %p7542_p2 = scmp.lt.s32.totalorder %s7536_s11, %s7536_s11 }
   0xa   :  { %p7543_p3 = por %p7542_p2, %p7541_p1 }
   0xc   :  { %p7544_p4 = pnand %p7543_p3, %p7537_p0 }
   0xe   :  { %7547 = shalt.err (!%p7544_p4)
}
   0xf   :  { %s7741_s12 = smov 512   ;;  %s7742_s13 = smov 32  }
  0x10   :  { %41 = dma.hbm_to_vmem [thread:$0]  %s8055_s1, 57344, %s36_s10, [#allocation6], %s7741_s12, %s7741_s12, %s7742_s13  }
  0x11   :  { %s7743_s16 = smov [#allocation8]  }
  0x12   :  { %s57_s17 = sshll.u32 %s7743_s16, 4  ;;  %s58_s17 = int_to_ptr.vmem [resolvable:$true] %s57_s17 }
  0x13   :  { %s7556_s18 = scalar_lea.vmem %s58_s17, 32768  ;;  %p7561_p6 = scmp.lt.s32.totalorder %s58_s17, %s58_s17 }
  0x14   :  { %p7557_p5 = scmp.ne.s32.totalorder %s58_s17, %s7556_s18  ;;  %p7562_p7 = scmp.lt.s32.totalorder %s7556_s18, %s7556_s18 }
  0x16   :  { %p7563_p8 = por %p7562_p7, %p7561_p6 }
  0x18   :  { %p7564_p9 = pnand %p7563_p8, %p7557_p5 }
  0x1a   :  { %7567 = shalt.err (!%p7564_p9)
}
  0x1b   :  { %s7744_s19 = smov 256   ;;  %s7745_s20 = smov 16  }
  0x1c   :  { %63 = dma.hbm_to_vmem [thread:$0]  %s8057_s3, 32768, %s58_s17, [#allocation9], %s7744_s19, %s7744_s19, %s7745_s20  }
  0x1d   :  { %s7746_s23 = smov [#allocation11]  }
  0x1e   :  { %s79_s24 = sshll.u32 %s7746_s23, 4  ;;  %s80_s24 = int_to_ptr.vmem [resolvable:$true] %s79_s24 }
  0x1f   :  { %s7576_s1 = scalar_lea.vmem %s80_s24, 8192  ;;  %p7581_p11 = scmp.lt.s32.totalorder %s80_s24, %s80_s24 }
  0x20   :  { %p7577_p10 = scmp.ne.s32.totalorder %s80_s24, %s7576_s1  ;;  %p7582_p12 = scmp.lt.s32.totalorder %s7576_s1, %s7576_s1 }
  0x22   :  { %p7583_p13 = por %p7582_p12, %p7581_p11 }
  0x24   :  { %p7584_p0 = pnand %p7583_p13, %p7577_p10 }
  0x26   :  { %7587 = shalt.err (!%p7584_p0)
}
  0x27   :  { %s7747_s25 = smov 128   ;;  %s7748_s26 = smov 8  }
  0x28   :  { %85 = dma.hbm_to_vmem [thread:$0]  %s8059_s5, 8192, %s80_s24, [#allocation12], %s7747_s25, %s7747_s25, %s7748_s26  }
  0x29   :  { %s7749_s29 = smov [#allocation14]  }
  0x2a   :  { %s101_s30 = sshll.u32 %s7749_s29, 4  ;;  %s102_s30 = int_to_ptr.vmem [resolvable:$true] %s101_s30 }
  0x2b   :  { %s7596_s3 = scalar_lea.vmem %s102_s30, 2048  ;;  %p7601_p2 = scmp.lt.s32.totalorder %s102_s30, %s102_s30 }
  0x2c   :  { %p7597_p1 = scmp.ne.s32.totalorder %s102_s30, %s7596_s3  ;;  %p7602_p3 = scmp.lt.s32.totalorder %s7596_s3, %s7596_s3 }
  0x2e   :  { %p7603_p4 = por %p7602_p3, %p7601_p2 }
  0x30   :  { %p7604_p5 = pnand %p7603_p4, %p7597_p1 }
  0x32   :  { %7607 = shalt.err (!%p7604_p5)
}
  0x33   :  { %s7750_s10 = smov 64   ;;  %s7751_s11 = smov 4  }
  0x34   :  { %107 = dma.hbm_to_vmem [thread:$0]  %s8061_s7, 2048, %s102_s30, [#allocation15], %s7750_s10, %s7750_s10, %s7751_s11  }
  0x35   :  { %s7752_s14 = smov [#allocation2]   ;;  %s7753_s16 = smov [#allocation7]  }
  0x36   :  { %s26_s15 = sshll.u32 %s7752_s14, 4  ;;  %s48_s5 = sshll.u32 %s7753_s16, 4  ;;  %s27_s15 = int_to_ptr.vmem [resolvable:$true] %s26_s15  ;;  %s49_s5 = int_to_ptr.vmem [resolvable:$true] %s48_s5 }
  0x37   :  { %s7616_s17 = scalar_lea.vmem %s27_s15, 448  ;;  %p7621_p7 = scmp.lt.s32.totalorder %s27_s15, %s27_s15 }
  0x38   :  { %p7617_p6 = scmp.ne.s32.totalorder %s27_s15, %s7616_s17  ;;  %p7622_p8 = scmp.lt.s32.totalorder %s7616_s17, %s7616_s17 }
  0x3a   :  { %p7623_p9 = por %p7622_p8, %p7621_p7 }
  0x3c   :  { %p7624_p10 = pnand %p7623_p9, %p7617_p6 }
  0x3e   :  { %7627 = shalt.err (!%p7624_p10)
}
  0x3f   :  { %29 = dma.hbm_to_vmem [thread:$0]  %s8054_s0, 448, %s27_s15, [#allocation3]  }
  0x40   :  { %s7636_s20 = scalar_lea.vmem %s49_s5, 128  ;;  %p7641_p12 = scmp.lt.s32.totalorder %s49_s5, %s49_s5 }
  0x41   :  { %p7637_p11 = scmp.ne.s32.totalorder %s49_s5, %s7636_s20  ;;  %p7642_p13 = scmp.lt.s32.totalorder %s7636_s20, %s7636_s20 }
  0x43   :  { %p7643_p0 = por %p7642_p13, %p7641_p12 }
  0x45   :  { %p7644_p1 = pnand %p7643_p0, %p7637_p11 }
  0x47   :  { %7647 = shalt.err (!%p7644_p1)
}
  0x48   :  { %51 = dma.hbm_to_vmem [thread:$0]  %s8056_s2, 128, %s49_s5, [#allocation6]  }
  0x49   :  { %s7754_s22 = smov [#allocation10]   ;;  %s7755_s24 = smov [#allocation13]  }
  0x4a   :  { %s70_s23 = sshll.u32 %s7754_s22, 4  ;;  %s92_s1 = sshll.u32 %s7755_s24, 4  ;;  %s71_s23 = int_to_ptr.vmem [resolvable:$true] %s70_s23  ;;  %s93_s1 = int_to_ptr.vmem [resolvable:$true] %s92_s1 }
  0x4b   :  { %s7656_s25 = scalar_lea.vmem %s71_s23, 64  ;;  %p7661_p3 = scmp.lt.s32.totalorder %s71_s23, %s71_s23 }
  0x4c   :  { %p7657_p2 = scmp.ne.s32.totalorder %s71_s23, %s7656_s25  ;;  %p7662_p4 = scmp.lt.s32.totalorder %s7656_s25, %s7656_s25 }
  0x4e   :  { %p7663_p5 = por %p7662_p4, %p7661_p3 }
  0x50   :  { %p7664_p6 = pnand %p7663_p5, %p7657_p2 }
  0x52   :  { %7667 = shalt.err (!%p7664_p6)
}
  0x53   :  { %73 = dma.hbm_to_vmem [thread:$0]  %s8058_s4, 64, %s71_s23, [#allocation9]  }
  0x54   :  { %s7676_s27 = scalar_lea.vmem %s93_s1, 32  ;;  %p7681_p8 = scmp.lt.s32.totalorder %s93_s1, %s93_s1 }
  0x55   :  { %p7677_p7 = scmp.ne.s32.totalorder %s93_s1, %s7676_s27  ;;  %p7682_p9 = scmp.lt.s32.totalorder %s7676_s27, %s7676_s27 }
  0x57   :  { %p7683_p10 = por %p7682_p9, %p7681_p8 }
  0x59   :  { %p7684_p11 = pnand %p7683_p10, %p7677_p7 }
  0x5b   :  { %7687 = shalt.err (!%p7684_p11)
}
  0x5c   :  { %95 = dma.hbm_to_vmem [thread:$0]  %s8060_s6, 32, %s93_s1, [#allocation12]  }
  0x5d   :  { %s7756_s29 = smov [#allocation16]  }
  0x5e   :  { %s114_s30 = sshll.u32 %s7756_s29, 4  ;;  %s115_s30 = int_to_ptr.vmem [resolvable:$true] %s114_s30 }
  0x5f   :  { %s7696_s3 = scalar_lea.vmem %s115_s30, 16  ;;  %s7700_s10 = scalar_lea.vmem %s115_s30, 32 }
  0x60   :  { %p7697_p12 = scmp.ne.s32.totalorder %s115_s30, %s7696_s3  ;;  %p7701_p13 = scmp.lt.s32.totalorder %s115_s30, %s115_s30 }
  0x61   :  { %p7702_p0 = scmp.lt.s32.totalorder %s7700_s10, %s7696_s3 }
  0x63   :  { %p7703_p1 = por %p7702_p0, %p7701_p13 }
  0x65   :  { %p7704_p2 = pnand %p7703_p1, %p7697_p12 }
  0x67   :  { %7707 = shalt.err (!%p7704_p2)
}
  0x68   :  { %117 = dma.hbm_to_vmem [thread:$0]  %s8062_s8, 16, %s115_s30, [#allocation15]  }
  0x69   :  { %7728 = dma.done.wait [#allocation3], 448  }
  0x6a   :  { %7729 = vsyncadd [#allocation3], 4294966848 }
  0x6b   :  { %7730 = dma.done.wait [#allocation6], 57472  }
  0x6c   :  { %7731 = vsyncadd [#allocation6], 4294909824 }
  0x6d   :  { %7732 = dma.done.wait [#allocation9], 32832  }
  0x6e   :  { %7733 = vsyncadd [#allocation9], 4294934464 }
  0x6f   :  { %7734 = dma.done.wait [#allocation12], 8224  }
  0x70   :  { %7735 = vsyncadd [#allocation12], 4294959072 }
  0x71   :  { %7736 = dma.done.wait [#allocation15], 2064  }
  0x72   :  { %7737 = vsyncadd [#allocation15], 4294965232  ;;  %v206_v0 = vld [vmem:[#allocation5 + $0x1c0] sm:$0xff]  ;;  %v7838_v54 = vld [vmem:[#allocation2 + $0x8] sm:$0xff]  ;;  %s7758_s6 = smov [#allocation17]  }
  0x73   :  { %v210_v1 = vld [vmem:[#allocation5 + $0x1e0] sm:$0xff]  ;;  %v7846_v59 = vcombine.high %v7838_v54, %v7838_v54  ;;  %s6172_s8 = sshll.u32 %s7758_s6, 4  ;;  %s6173_s8 = int_to_ptr.vmem [resolvable:$true] %s6172_s8 }
  0x74   :  { %v334_v2 = vld [vmem:[#allocation5 + $0x5c0] sm:$0xff]  ;;  %v6249_v3 = vcombine.high %v206_v0, %v210_v1  ;;  %v6248_v5 = vcombine.low %v206_v0, %v210_v1  ;;  %s7708_s12 = scalar_lea.vmem %s6173_s8, 128  ;;  %p7713_p4 = scmp.lt.s32.totalorder %s6173_s8, %s6173_s8 }
  0x75   :  { %v338_v4 = vld [vmem:[#allocation5 + $0x5e0] sm:$0xff]  ;;  %2978 = vmatprep.mubr.bf16.mxu1 %v7846_v59  ;;  %p7709_p3 = scmp.ne.s32.totalorder %s6173_s8, %s7708_s12  ;;  %p7714_p5 = scmp.lt.s32.totalorder %s7708_s12, %s7708_s12 }
  0x76   :  { %v198_v6 = vld [vmem:[#allocation5 + $0x180] sm:$0xff]  ;;  %v6377_v8 = vcombine.high %v334_v2, %v338_v4  ;;  %v6376_v9 = vcombine.low %v334_v2, %v338_v4  ;;  %2905 = vmatprep.subr.bf16.mxu0 %v6249_v3 }
  0x77   :  { %v202_v7 = vld [vmem:[#allocation5 + $0x1a0] sm:$0xff]  ;;  %2906 = vmatpush1.bf16.msra.mxu0 %v6248_v5  ;;  %p7715_p6 = por %p7714_p5, %p7713_p4 }
  0x78   :  { %v6241_v10 = vcombine.high %v198_v6, %v202_v7  ;;  %v326_v11 = vld [vmem:[#allocation5 + $0x580] sm:$0xff]  ;;  %2946 = vmatprep.subr.bf16.mxu1 %v6377_v8  ;;  %v6240_v18 = vcombine.low %v198_v6, %v202_v7 }
  0x79   :  { %v330_v12 = vld [vmem:[#allocation5 + $0x5a0] sm:$0xff]  ;;  %2947 = vmatpush1.bf16.msra.mxu1 %v6376_v9  ;;  %p7716_p7 = pnand %p7715_p6, %p7709_p3 }
  0x7a   :  { %v190_v13 = vld [vmem:[#allocation5 + $0x140] sm:$0xff]  ;;  %v6369_v14 = vcombine.high %v326_v11, %v330_v12  ;;  %2907 = vmatprep.subr.bf16.mxu0 %v6241_v10  ;;  %v6368_v19 = vcombine.low %v326_v11, %v330_v12 }
  0x7b   :  { %v194_v15 = vld [vmem:[#allocation5 + $0x160] sm:$0xff]  ;;  %2908 = vmatpush1.bf16.msra.mxu0 %v6240_v18 }
  0x7c   :  { %v318_v16 = vld [vmem:[#allocation5 + $0x540] sm:$0xff]  ;;  %v6233_v20 = vcombine.high %v190_v13, %v194_v15  ;;  %2948 = vmatprep.subr.bf16.mxu1 %v6369_v14  ;;  %v6232_v26 = vcombine.low %v190_v13, %v194_v15 }
  0x7d   :  { %v322_v17 = vld [vmem:[#allocation5 + $0x560] sm:$0xff]  ;;  %2949 = vmatpush1.bf16.msra.mxu1 %v6368_v19 }
  0x7e   :  { %v6361_v21 = vcombine.high %v318_v16, %v322_v17  ;;  %v182_v22 = vld [vmem:[#allocation5 + $0x100] sm:$0xff]  ;;  %2909 = vmatprep.subr.bf16.mxu0 %v6233_v20  ;;  %v6360_v27 = vcombine.low %v318_v16, %v322_v17 }
  0x7f   :  { %v186_v23 = vld [vmem:[#allocation5 + $0x120] sm:$0xff]  ;;  %2910 = vmatpush1.bf16.msra.mxu0 %v6232_v26 }
  0x80   :  { %v310_v24 = vld [vmem:[#allocation5 + $0x500] sm:$0xff]  ;;  %v6225_v28 = vcombine.high %v182_v22, %v186_v23  ;;  %2950 = vmatprep.subr.bf16.mxu1 %v6361_v21  ;;  %v6224_v34 = vcombine.low %v182_v22, %v186_v23 }
  0x81   :  { %v314_v25 = vld [vmem:[#allocation5 + $0x520] sm:$0xff]  ;;  %2951 = vmatpush1.bf16.msra.mxu1 %v6360_v27 }
  0x82   :  { %v6353_v29 = vcombine.high %v310_v24, %v314_v25  ;;  %v174_v30 = vld [vmem:[#allocation5 + $0xc0] sm:$0xff]  ;;  %2911 = vmatprep.subr.bf16.mxu0 %v6225_v28  ;;  %v6352_v35 = vcombine.low %v310_v24, %v314_v25 }
  0x83   :  { %v178_v31 = vld [vmem:[#allocation5 + $0xe0] sm:$0xff]  ;;  %2912 = vmatpush1.bf16.msra.mxu0 %v6224_v34 }
  0x84   :  { %v302_v32 = vld [vmem:[#allocation5 + $0x4c0] sm:$0xff]  ;;  %v6217_v36 = vcombine.high %v174_v30, %v178_v31  ;;  %2952 = vmatprep.subr.bf16.mxu1 %v6353_v29  ;;  %v6216_v42 = vcombine.low %v174_v30, %v178_v31 }
  0x85   :  { %v306_v33 = vld [vmem:[#allocation5 + $0x4e0] sm:$0xff]  ;;  %2953 = vmatpush1.bf16.msra.mxu1 %v6352_v35 }
  0x86   :  { %v6345_v37 = vcombine.high %v302_v32, %v306_v33  ;;  %v166_v38 = vld [vmem:[#allocation5 + $0x80] sm:$0xff]  ;;  %2913 = vmatprep.subr.bf16.mxu0 %v6217_v36  ;;  %v6344_v43 = vcombine.low %v302_v32, %v306_v33 }
  0x87   :  { %v170_v39 = vld [vmem:[#allocation5 + $0xa0] sm:$0xff]  ;;  %2914 = vmatpush1.bf16.msra.mxu0 %v6216_v42 }
  0x88   :  { %v294_v40 = vld [vmem:[#allocation5 + $0x480] sm:$0xff]  ;;  %v6209_v44 = vcombine.high %v166_v38, %v170_v39  ;;  %2954 = vmatprep.subr.bf16.mxu1 %v6345_v37  ;;  %v6208_v50 = vcombine.low %v166_v38, %v170_v39 }
  0x89   :  { %v298_v41 = vld [vmem:[#allocation5 + $0x4a0] sm:$0xff]  ;;  %2955 = vmatpush1.bf16.msra.mxu1 %v6344_v43 }
  0x8a   :  { %v6337_v45 = vcombine.high %v294_v40, %v298_v41  ;;  %v158_v46 = vld [vmem:[#allocation5 + $0x40] sm:$0xff]  ;;  %2915 = vmatprep.subr.bf16.mxu0 %v6209_v44  ;;  %v6336_v51 = vcombine.low %v294_v40, %v298_v41 }
  0x8b   :  { %v162_v47 = vld [vmem:[#allocation5 + $0x60] sm:$0xff]  ;;  %2916 = vmatpush1.bf16.msra.mxu0 %v6208_v50 }
  0x8c   :  { %v286_v48 = vld [vmem:[#allocation5 + $0x440] sm:$0xff]  ;;  %v6201_v52 = vcombine.high %v158_v46, %v162_v47  ;;  %2956 = vmatprep.subr.bf16.mxu1 %v6337_v45  ;;  %v6200_v62 = vcombine.low %v158_v46, %v162_v47 }
  0x8d   :  { %v290_v49 = vld [vmem:[#allocation5 + $0x460] sm:$0xff]  ;;  %2957 = vmatpush1.bf16.msra.mxu1 %v6336_v51 }
  0x8e   :  { %v7836_v53 = vld [vmem:[#allocation2] sm:$0xff]  ;;  %v6329_v55 = vcombine.high %v286_v48, %v290_v49  ;;  %2917 = vmatprep.subr.bf16.mxu0 %v6201_v52  ;;  %v6328_v63 = vcombine.low %v286_v48, %v290_v49 }
  0x8f   :  { %v150_v56 = vld [vmem:[#allocation5] sm:$0xff]  ;;  %v7842_v58 = vcombine.high %v7836_v53, %v7836_v53  ;;  %2918 = vmatpush1.bf16.msra.mxu0 %v6200_v62 }
  0x90   :  { %v154_v57 = vld [vmem:[#allocation5 + $0x20] sm:$0xff]  ;;  %2958 = vmatprep.subr.bf16.mxu1 %v6329_v55 }
  0x91   :  { %v278_v60 = vld [vmem:[#allocation5 + $0x400] sm:$0xff]  ;;  %2937 = vmatprep.mubr.bf16.mxu0 %v7842_v58  ;;  %v6193_v0 = vcombine.high %v150_v56, %v154_v57  ;;  %v6192_v6 = vcombine.low %v150_v56, %v154_v57  ;;  %2959 = vmatpush1.bf16.msra.mxu1 %v6328_v63 }
  0x92   :  { %v282_v61 = vld [vmem:[#allocation5 + $0x420] sm:$0xff] }
  0x93   :  { %v6321_v1 = vcombine.high %v278_v60, %v282_v61  ;;  %v270_v2 = vld [vmem:[#allocation5 + $0x3c0] sm:$0xff]  ;;  %2919 = vmatprep.subr.bf16.mxu0 %v6193_v0  ;;  %v6320_v7 = vcombine.low %v278_v60, %v282_v61 }
  0x94   :  { %v274_v3 = vld [vmem:[#allocation5 + $0x3e0] sm:$0xff]  ;;  %2920 = vmatpush1.bf16.msra.mxu0 %v6192_v6 }
  0x95   :  { %v398_v4 = vld [vmem:[#allocation5 + $0x7c0] sm:$0xff]  ;;  %v6313_v8 = vcombine.high %v270_v2, %v274_v3  ;;  %2960 = vmatprep.subr.bf16.mxu1 %v6321_v1  ;;  %v6312_v14 = vcombine.low %v270_v2, %v274_v3 }
  0x96   :  { %v402_v5 = vld [vmem:[#allocation5 + $0x7e0] sm:$0xff]  ;;  %2961 = vmatpush1.bf16.msra.mxu1 %v6320_v7 }
  0x97   :  { %v6441_v9 = vcombine.high %v398_v4, %v402_v5  ;;  %v262_v10 = vld [vmem:[#allocation5 + $0x380] sm:$0xff]  ;;  %2921 = vmatprep.subr.bf16.mxu0 %v6313_v8  ;;  %v6440_v15 = vcombine.low %v398_v4, %v402_v5 }
  0x98   :  { %v266_v11 = vld [vmem:[#allocation5 + $0x3a0] sm:$0xff]  ;;  %2922 = vmatpush2.bf16.msra.mxu0 %v6312_v14 }
  0x99   :  { %v390_v12 = vld [vmem:[#allocation5 + $0x780] sm:$0xff]  ;;  %v6305_v16 = vcombine.high %v262_v10, %v266_v11  ;;  %2962 = vmatprep.subr.bf16.mxu1 %v6441_v9  ;;  %v6304_v22 = vcombine.low %v262_v10, %v266_v11 }
  0x9a   :  { %v394_v13 = vld [vmem:[#allocation5 + $0x7a0] sm:$0xff]  ;;  %2963 = vmatpush2.bf16.msra.mxu1 %v6440_v15 }
  0x9b   :  { %v6433_v17 = vcombine.high %v390_v12, %v394_v13  ;;  %v254_v18 = vld [vmem:[#allocation5 + $0x340] sm:$0xff]  ;;  %2923 = vmatprep.subr.bf16.mxu0 %v6305_v16  ;;  %v6432_v23 = vcombine.low %v390_v12, %v394_v13  ;;  %v7852_v16 = vcombine.low %v7836_v53, %v7836_v53 }
  0x9c   :  { %v258_v19 = vld [vmem:[#allocation5 + $0x360] sm:$0xff]  ;;  %2924 = vmatpush2.bf16.msra.mxu0 %v6304_v22 }
  0x9d   :  { %v382_v20 = vld [vmem:[#allocation5 + $0x740] sm:$0xff]  ;;  %v6297_v24 = vcombine.high %v254_v18, %v258_v19  ;;  %2964 = vmatprep.subr.bf16.mxu1 %v6433_v17  ;;  %v6296_v30 = vcombine.low %v254_v18, %v258_v19  ;;  %v7856_v19 = vcombine.low %v7838_v54, %v7838_v54 }
  0x9e   :  { %v386_v21 = vld [vmem:[#allocation5 + $0x760] sm:$0xff]  ;;  %2965 = vmatpush2.bf16.msra.mxu1 %v6432_v23 }
  0x9f   :  { %v6425_v25 = vcombine.high %v382_v20, %v386_v21  ;;  %v246_v26 = vld [vmem:[#allocation5 + $0x300] sm:$0xff]  ;;  %2925 = vmatprep.subr.bf16.mxu0 %v6297_v24  ;;  %v6424_v31 = vcombine.low %v382_v20, %v386_v21  ;;  %v7858_v21 = vld [vmem:[#allocation2 + $0x10] sm:$0xff] }
  0xa0   :  { %v250_v27 = vld [vmem:[#allocation5 + $0x320] sm:$0xff]  ;;  %2926 = vmatpush2.bf16.msra.mxu0 %v6296_v30 }
  0xa1   :  { %v374_v28 = vld [vmem:[#allocation5 + $0x700] sm:$0xff]  ;;  %v6289_v32 = vcombine.high %v246_v26, %v250_v27  ;;  %2966 = vmatprep.subr.bf16.mxu1 %v6425_v25  ;;  %v6288_v38 = vcombine.low %v246_v26, %v250_v27 }
  0xa2   :  { %v378_v29 = vld [vmem:[#allocation5 + $0x720] sm:$0xff]  ;;  %2967 = vmatpush2.bf16.msra.mxu1 %v6424_v31 }
  0xa3   :  { %v6417_v33 = vcombine.high %v374_v28, %v378_v29  ;;  %v238_v34 = vld [vmem:[#allocation5 + $0x2c0] sm:$0xff]  ;;  %2927 = vmatprep.subr.bf16.mxu0 %v6289_v32  ;;  %v6416_v39 = vcombine.low %v374_v28, %v378_v29  ;;  %v7863_v28 = vcombine.high %v7858_v21, %v7858_v21 }
  0xa4   :  { %v242_v35 = vld [vmem:[#allocation5 + $0x2e0] sm:$0xff]  ;;  %2928 = vmatpush2.bf16.msra.mxu0 %v6288_v38 }
  0xa5   :  { %v366_v36 = vld [vmem:[#allocation5 + $0x6c0] sm:$0xff]  ;;  %v6281_v40 = vcombine.high %v238_v34, %v242_v35  ;;  %2968 = vmatprep.subr.bf16.mxu1 %v6417_v33  ;;  %v6280_v46 = vcombine.low %v238_v34, %v242_v35 }
  0xa6   :  { %v370_v37 = vld [vmem:[#allocation5 + $0x6e0] sm:$0xff]  ;;  %2969 = vmatpush2.bf16.msra.mxu1 %v6416_v39 }
  0xa7   :  { %v6409_v41 = vcombine.high %v366_v36, %v370_v37  ;;  %v230_v42 = vld [vmem:[#allocation5 + $0x280] sm:$0xff]  ;;  %2929 = vmatprep.subr.bf16.mxu0 %v6281_v40  ;;  %v6408_v47 = vcombine.low %v366_v36, %v370_v37  ;;  %v7757_v36 = vmov 0  }
  0xa8   :  { %v234_v43 = vld [vmem:[#allocation5 + $0x2a0] sm:$0xff]  ;;  %2930 = vmatpush2.bf16.msra.mxu0 %v6280_v46 }
  0xa9   :  { %v358_v44 = vld [vmem:[#allocation5 + $0x680] sm:$0xff]  ;;  %v6273_v48 = vcombine.high %v230_v42, %v234_v43  ;;  %2970 = vmatprep.subr.bf16.mxu1 %v6409_v41  ;;  %v6272_v56 = vcombine.low %v230_v42, %v234_v43 }
  0xaa   :  { %v362_v45 = vld [vmem:[#allocation5 + $0x6a0] sm:$0xff]  ;;  %2971 = vmatpush2.bf16.msra.mxu1 %v6408_v47 }
  0xab   :  { %v6401_v49 = vcombine.high %v358_v44, %v362_v45  ;;  %v222_v50 = vld [vmem:[#allocation5 + $0x240] sm:$0xff]  ;;  %2931 = vmatprep.subr.bf16.mxu0 %v6273_v48  ;;  %v6400_v57 = vcombine.low %v358_v44, %v362_v45 }
  0xac   :  { %v226_v51 = vld [vmem:[#allocation5 + $0x260] sm:$0xff]  ;;  %2932 = vmatpush2.bf16.msra.mxu0 %v6272_v56 }
  0xad   :  { %v350_v52 = vld [vmem:[#allocation5 + $0x640] sm:$0xff]  ;;  %v6265_v60 = vcombine.high %v222_v50, %v226_v51  ;;  %2972 = vmatprep.subr.bf16.mxu1 %v6401_v49  ;;  %v6264_v2 = vcombine.low %v222_v50, %v226_v51 }
  0xae   :  { %v354_v55 = vld [vmem:[#allocation5 + $0x660] sm:$0xff]  ;;  %2973 = vmatpush2.bf16.msra.mxu1 %v6400_v57 }
  0xaf   :  { %v6393_v61 = vcombine.high %v350_v52, %v354_v55  ;;  %v214_v62 = vld [vmem:[#allocation5 + $0x200] sm:$0xff]  ;;  %2933 = vmatprep.subr.bf16.mxu0 %v6265_v60  ;;  %v6392_v3 = vcombine.low %v350_v52, %v354_v55 }
  0xb0   :  { %v218_v63 = vld [vmem:[#allocation5 + $0x220] sm:$0xff]  ;;  %2934 = vmatpush2.bf16.msra.mxu0 %v6264_v2 }
  0xb1   :  { %v342_v0 = vld [vmem:[#allocation5 + $0x600] sm:$0xff]  ;;  %v6257_v4 = vcombine.high %v214_v62, %v218_v63  ;;  %2974 = vmatprep.subr.bf16.mxu1 %v6393_v61  ;;  %v6256_v10 = vcombine.low %v214_v62, %v218_v63 }
  0xb2   :  { %v346_v1 = vld [vmem:[#allocation5 + $0x620] sm:$0xff]  ;;  %2975 = vmatpush2.bf16.msra.mxu1 %v6392_v3 }
  0xb3   :  { %v6385_v5 = vcombine.high %v342_v0, %v346_v1  ;;  %v462_v6 = vld [vmem:[#allocation5 + $0x9c0] sm:$0xff]  ;;  %2935 = vmatprep.subr.bf16.mxu0 %v6257_v4  ;;  %v6384_v11 = vcombine.low %v342_v0, %v346_v1 }
  0xb4   :  { %v466_v7 = vld [vmem:[#allocation5 + $0x9e0] sm:$0xff]  ;;  %2936 = vmatpush2.bf16.msra.mxu0 %v6256_v10 }
  0xb5   :  { %v590_v8 = vld [vmem:[#allocation5 + $0xdc0] sm:$0xff]  ;;  %v6505_v12 = vcombine.high %v462_v6, %v466_v7  ;;  %2976 = vmatprep.subr.bf16.mxu1 %v6385_v5  ;;  %v6504_v20 = vcombine.low %v462_v6, %v466_v7 }
  0xb6   :  { %v594_v9 = vld [vmem:[#allocation5 + $0xde0] sm:$0xff]  ;;  %2977 = vmatpush2.bf16.msra.mxu1 %v6384_v11 }
  0xb7   :  { %v6633_v13 = vcombine.high %v590_v8, %v594_v9  ;;  %v454_v14 = vld [vmem:[#allocation5 + $0x980] sm:$0xff]  ;;  %2987 = vmatprep.subr.bf16.mxu0 %v6505_v12  ;;  %v6632_v22 = vcombine.low %v590_v8, %v594_v9  ;;  %2938 = vmatmul.mubr.bf16.vlgmr.msra.gmra.mxu0 %v7852_v16 }
  0xb8   :  { %v458_v15 = vld [vmem:[#allocation5 + $0x9a0] sm:$0xff]  ;;  %2988 = vmatpush1.bf16.msra.mxu0 %v6504_v20  ;;  %3019 = vmatprep.mubr.bf16.mxu0 %v7863_v28 }
  0xb9   :  { %v582_v17 = vld [vmem:[#allocation5 + $0xd80] sm:$0xff]  ;;  %v6497_v23 = vcombine.high %v454_v14, %v458_v15  ;;  %3028 = vmatprep.subr.bf16.mxu1 %v6633_v13  ;;  %2979 = vmatmul.mubr.bf16.vlgmr.msra.gmra.mxu1 %v7856_v19  ;;  %v6496_v54 = vcombine.low %v454_v14, %v458_v15  ;;  %v207_v14 = vld [vmem:[#allocation5 + $0x1c8] sm:$0xff] }
  0xba   :  { %v586_v18 = vld [vmem:[#allocation5 + $0xda0] sm:$0xff]  ;;  %3029 = vmatpush1.bf16.msra.mxu1 %v6632_v22  ;;  %3060 = vmatprep.mubr.bf16.mxu1 %v7757_v36 }
  0xbb   :  { %v446_v24 = vld [vmem:[#allocation5 + $0x940] sm:$0xff]  ;;  %v6625_v25 = vcombine.high %v582_v17, %v586_v18  ;;  %2989 = vmatprep.subr.bf16.mxu0 %v6497_v23  ;;  %v6624_v29 = vcombine.low %v582_v17, %v586_v18  ;;  %v211_v17 = vld [vmem:[#allocation5 + $0x1e8] sm:$0xff] }
  0xbc   :  { %v450_v26 = vld [vmem:[#allocation5 + $0x960] sm:$0xff]  ;;  %2990 = vmatpush1.bf16.msra.mxu0 %v6496_v54 }
  0xbd   :  { %v574_v53 = vld [vmem:[#allocation5 + $0xd40] sm:$0xff]  ;;  %v6489_v30 = vcombine.high %v446_v24, %v450_v26  ;;  %3030 = vmatprep.subr.bf16.mxu1 %v6625_v25  ;;  %v6488_v37 = vcombine.low %v446_v24, %v450_v26  ;;  %v199_v25 = vld [vmem:[#allocation5 + $0x188] sm:$0xff]  ;;  %v7022_v26 = vld [vmem:[#allocation2 + $0x18] ss:$0 sps:$4 sm:$0xff]  }
  0xbe   :  { %v578_v27 = vld [vmem:[#allocation5 + $0xd60] sm:$0xff]  ;;  %3031 = vmatpush1.bf16.msra.mxu1 %v6624_v29  ;;  %v6250_v29 = vcombine.low %v207_v14, %v211_v17 }
  0xbf   :  { %v438_v31 = vld [vmem:[#allocation5 + $0x900] sm:$0xff]  ;;  %v6617_v34 = vcombine.high %v574_v53, %v578_v27  ;;  %2991 = vmatprep.subr.bf16.mxu0 %v6489_v30  ;;  %v6616_v38 = vcombine.low %v574_v53, %v578_v27  ;;  %v6251_v53 = vcombine.high %v207_v14, %v211_v17  ;;  %v203_v27 = vld [vmem:[#allocation5 + $0x1a8] sm:$0xff] }
  0xc0   :  { %v442_v32 = vld [vmem:[#allocation5 + $0x920] sm:$0xff]  ;;  %2992 = vmatpush1.bf16.msra.mxu0 %v6488_v37  ;;  %v151_v14 = vld [vmem:[#allocation5 + $0x8] sm:$0xff] }
  0xc1   :  { %v566_v33 = vld [vmem:[#allocation5 + $0xd00] sm:$0xff]  ;;  %v6481_v39 = vcombine.high %v438_v31, %v442_v32  ;;  %3032 = vmatprep.subr.bf16.mxu1 %v6617_v34  ;;  %v6480_v45 = vcombine.low %v438_v31, %v442_v32  ;;  %v6243_v34 = vcombine.high %v199_v25, %v203_v27  ;;  %v155_v17 = vld [vmem:[#allocation5 + $0x28] sm:$0xff] }
  0xc2   :  { %v570_v35 = vld [vmem:[#allocation5 + $0xd20] sm:$0xff]  ;;  %3033 = vmatpush1.bf16.msra.mxu1 %v6616_v38  ;;  %v6242_v38 = vcombine.low %v199_v25, %v203_v27  ;;  %v335_v25 = vld [vmem:[#allocation5 + $0x5c8] sm:$0xff] }
  0xc3   :  { %v430_v40 = vld [vmem:[#allocation5 + $0x8c0] sm:$0xff]  ;;  %v6609_v43 = vcombine.high %v566_v33, %v570_v35  ;;  %2993 = vmatprep.subr.bf16.mxu0 %v6481_v39  ;;  %v6608_v46 = vcombine.low %v566_v33, %v570_v35  ;;  %v191_v33 = vld [vmem:[#allocation5 + $0x148] sm:$0xff] }
  0xc4   :  { %v434_v41 = vld [vmem:[#allocation5 + $0x8e0] sm:$0xff]  ;;  %2994 = vmatpush1.bf16.msra.mxu0 %v6480_v45  ;;  %v195_v35 = vld [vmem:[#allocation5 + $0x168] sm:$0xff] }
  0xc5   :  { %v558_v42 = vld [vmem:[#allocation5 + $0xcc0] sm:$0xff]  ;;  %v6473_v47 = vcombine.high %v430_v40, %v434_v41  ;;  %3034 = vmatprep.subr.bf16.mxu1 %v6609_v43  ;;  %v6472_v55 = vcombine.low %v430_v40, %v434_v41  ;;  %v6235_v43 = vcombine.high %v191_v33, %v195_v35 }
  0xc6   :  { %v562_v44 = vld [vmem:[#allocation5 + $0xce0] sm:$0xff]  ;;  %3035 = vmatpush1.bf16.msra.mxu1 %v6608_v46  ;;  %v6234_v46 = vcombine.low %v191_v33, %v195_v35  ;;  %v7871_v35 = vcombine.low %v7858_v21, %v7858_v21 }
  0xc7   :  { %v422_v48 = vld [vmem:[#allocation5 + $0x880] sm:$0xff]  ;;  %v6601_v51 = vcombine.high %v558_v42, %v562_v44  ;;  %2995 = vmatprep.subr.bf16.mxu0 %v6473_v47  ;;  %v6600_v56 = vcombine.low %v558_v42, %v562_v44  ;;  %v183_v42 = vld [vmem:[#allocation5 + $0x108] sm:$0xff] }
  0xc8   :  { %v426_v49 = vld [vmem:[#allocation5 + $0x8a0] sm:$0xff]  ;;  %2996 = vmatpush1.bf16.msra.mxu0 %v6472_v55  ;;  %v187_v44 = vld [vmem:[#allocation5 + $0x128] sm:$0xff] }
  0xc9   :  { %v550_v50 = vld [vmem:[#allocation5 + $0xc80] sm:$0xff]  ;;  %v6465_v57 = vcombine.high %v422_v48, %v426_v49  ;;  %3036 = vmatprep.subr.bf16.mxu1 %v6601_v51  ;;  %v6464_v1 = vcombine.low %v422_v48, %v426_v49  ;;  %v6227_v51 = vcombine.high %v183_v42, %v187_v44 }
  0xca   :  { %v554_v52 = vld [vmem:[#allocation5 + $0xca0] sm:$0xff]  ;;  %3037 = vmatpush1.bf16.msra.mxu1 %v6600_v56  ;;  %v6226_v56 = vcombine.low %v183_v42, %v187_v44  ;;  %v323_v44 = vld [vmem:[#allocation5 + $0x568] sm:$0xff] }
  0xcb   :  { %v414_v60 = vld [vmem:[#allocation5 + $0x840] sm:$0xff]  ;;  %v6593_v63 = vcombine.high %v550_v50, %v554_v52  ;;  %2997 = vmatprep.subr.bf16.mxu0 %v6465_v57  ;;  %v6592_v2 = vcombine.low %v550_v50, %v554_v52  ;;  %v175_v50 = vld [vmem:[#allocation5 + $0xc8] sm:$0xff] }
  0xcc   :  { %v418_v61 = vld [vmem:[#allocation5 + $0x860] sm:$0xff]  ;;  %2998 = vmatpush1.bf16.msra.mxu0 %v6464_v1  ;;  %v179_v52 = vld [vmem:[#allocation5 + $0xe8] sm:$0xff] }
  0xcd   :  { %v542_v62 = vld [vmem:[#allocation5 + $0xc40] sm:$0xff]  ;;  %v6457_v3 = vcombine.high %v414_v60, %v418_v61  ;;  %3038 = vmatprep.subr.bf16.mxu1 %v6593_v63  ;;  %v6456_v9 = vcombine.low %v414_v60, %v418_v61  ;;  %v6219_v63 = vcombine.high %v175_v50, %v179_v52 }
  0xce   :  { %v546_v0 = vld [vmem:[#allocation5 + $0xc60] sm:$0xff]  ;;  %3039 = vmatpush1.bf16.msra.mxu1 %v6592_v2  ;;  %v6218_v2 = vcombine.low %v175_v50, %v179_v52 }
  0xcf   :  { %v406_v4 = vld [vmem:[#allocation5 + $0x800] sm:$0xff]  ;;  %v6585_v7 = vcombine.high %v542_v62, %v546_v0  ;;  %2999 = vmatprep.subr.bf16.mxu0 %v6457_v3  ;;  %v6584_v10 = vcombine.low %v542_v62, %v546_v0  ;;  %v167_v62 = vld [vmem:[#allocation5 + $0x88] sm:$0xff] }
  0xd0   :  { %v410_v5 = vld [vmem:[#allocation5 + $0x820] sm:$0xff]  ;;  %3000 = vmatpush1.bf16.msra.mxu0 %v6456_v9  ;;  %v171_v0 = vld [vmem:[#allocation5 + $0xa8] sm:$0xff] }
  0xd1   :  { %v534_v6 = vld [vmem:[#allocation5 + $0xc00] sm:$0xff]  ;;  %v6449_v11 = vcombine.high %v406_v4, %v410_v5  ;;  %3040 = vmatprep.subr.bf16.mxu1 %v6585_v7  ;;  %v6448_v18 = vcombine.low %v406_v4, %v410_v5  ;;  %v6211_v7 = vcombine.high %v167_v62, %v171_v0 }
  0xd2   :  { %v538_v8 = vld [vmem:[#allocation5 + $0xc20] sm:$0xff]  ;;  %3041 = vmatpush1.bf16.msra.mxu1 %v6584_v10  ;;  %v6210_v10 = vcombine.low %v167_v62, %v171_v0 }
  0xd3   :  { %v526_v12 = vld [vmem:[#allocation5 + $0xbc0] sm:$0xff]  ;;  %v6577_v15 = vcombine.high %v534_v6, %v538_v8  ;;  %3001 = vmatprep.subr.bf16.mxu0 %v6449_v11  ;;  %v6576_v20 = vcombine.low %v534_v6, %v538_v8  ;;  %v159_v6 = vld [vmem:[#allocation5 + $0x48] sm:$0xff] }
  0xd4   :  { %v530_v13 = vld [vmem:[#allocation5 + $0xbe0] sm:$0xff]  ;;  %3002 = vmatpush1.bf16.msra.mxu0 %v6448_v18  ;;  %v163_v8 = vld [vmem:[#allocation5 + $0x68] sm:$0xff] }
  0xd5   :  { %v6569_v22 = vcombine.high %v526_v12, %v530_v13  ;;  %v518_v23 = vld [vmem:[#allocation5 + $0xb80] sm:$0xff]  ;;  %3042 = vmatprep.subr.bf16.mxu1 %v6577_v15  ;;  %v6568_v54 = vcombine.low %v526_v12, %v530_v13  ;;  %v6203_v15 = vcombine.high %v159_v6, %v163_v8 }
  0xd6   :  { %v522_v24 = vld [vmem:[#allocation5 + $0xba0] sm:$0xff]  ;;  %3043 = vmatpush1.bf16.msra.mxu1 %v6576_v20  ;;  %v6202_v20 = vcombine.low %v159_v6, %v163_v8 }
  0xd7   :  { %3003 = vmatprep.subr.bf16.mxu0 %v6569_v22  ;;  %v6561_v30 = vcombine.high %v518_v23, %v522_v24  ;;  %v510_v31 = vld [vmem:[#allocation5 + $0xb40] sm:$0xff]  ;;  %3069 = vmatprep.subr.bf16.mxu1 %v6251_v53  ;;  %v6560_v37 = vcombine.low %v518_v23, %v522_v24  ;;  %v271_v23 = vld [vmem:[#allocation5 + $0x3c8] sm:$0xff] }
  0xd8   :  { %v514_v32 = vld [vmem:[#allocation5 + $0xb60] sm:$0xff]  ;;  %3004 = vmatpush2.bf16.msra.mxu0 %v6568_v54  ;;  %v275_v24 = vld [vmem:[#allocation5 + $0x3e8] sm:$0xff]  ;;  %v6194_v54 = vcombine.low %v151_v14, %v155_v17 }
  0xd9   :  { %3061 = vmatmul.mubr.bf16.vlgmr.msra.gmra.mxu1 %v7022_v26  ;;  %3005 = vmatprep.subr.bf16.mxu0 %v6561_v30  ;;  %v6553_v39 = vcombine.high %v510_v31, %v514_v32  ;;  %v502_v40 = vld [vmem:[#allocation5 + $0xb00] sm:$0xff]  ;;  %v6552_v45 = vcombine.low %v510_v31, %v514_v32  ;;  %v6195_v26 = vcombine.high %v151_v14, %v155_v17  ;;  %v339_v53 = vld [vmem:[#allocation5 + $0x5e8] sm:$0xff] }
  0xda   :  { %3070 = vmatpush1.bf16.msra.mxu1 %v6250_v29  ;;  %v506_v41 = vld [vmem:[#allocation5 + $0xb20] sm:$0xff]  ;;  %3101 = vmatprep.mubr.bf16.mxu1 %v7842_v58  ;;  %v6379_v29 = vcombine.high %v335_v25, %v339_v53  ;;  %v263_v30 = vld [vmem:[#allocation5 + $0x388] sm:$0xff]  ;;  %v6315_v33 = vcombine.high %v271_v23, %v275_v24 }
  0xdb   :  { %3071 = vmatprep.subr.bf16.mxu1 %v6243_v34  ;;  %v6545_v47 = vcombine.high %v502_v40, %v506_v41  ;;  %v494_v48 = vld [vmem:[#allocation5 + $0xac0] sm:$0xff]  ;;  %v6544_v55 = vcombine.low %v502_v40, %v506_v41  ;;  %v267_v31 = vld [vmem:[#allocation5 + $0x3a8] sm:$0xff] }
  0xdc   :  { %3006 = vmatpush2.bf16.msra.mxu0 %v6560_v37  ;;  %v498_v49 = vld [vmem:[#allocation5 + $0xae0] sm:$0xff]  ;;  %v327_v32 = vld [vmem:[#allocation5 + $0x588] sm:$0xff]  ;;  %v6378_v37 = vcombine.low %v335_v25, %v339_v53  ;;  %v6307_v42 = vcombine.high %v263_v30, %v267_v31  ;;  %v6306_v21 = vcombine.low %v263_v30, %v267_v31 }
  0xdd   :  { %3007 = vmatprep.subr.bf16.mxu0 %v6553_v39  ;;  %v6537_v57 = vcombine.high %v494_v48, %v498_v49  ;;  %v486_v60 = vld [vmem:[#allocation5 + $0xa80] sm:$0xff]  ;;  %v6536_v1 = vcombine.low %v494_v48, %v498_v49  ;;  %v331_v34 = vld [vmem:[#allocation5 + $0x5a8] sm:$0xff] }
  0xde   :  { %3072 = vmatpush1.bf16.msra.mxu1 %v6242_v38  ;;  %v490_v61 = vld [vmem:[#allocation5 + $0xaa0] sm:$0xff]  ;;  %v6314_v38 = vcombine.low %v271_v23, %v275_v24  ;;  %v6371_v39 = vcombine.high %v327_v32, %v331_v34  ;;  %v255_v40 = vld [vmem:[#allocation5 + $0x348] sm:$0xff] }
  0xdf   :  { %3073 = vmatprep.subr.bf16.mxu1 %v6235_v43  ;;  %v6529_v3 = vcombine.high %v486_v60, %v490_v61  ;;  %v478_v4 = vld [vmem:[#allocation5 + $0xa40] sm:$0xff]  ;;  %v6528_v9 = vcombine.low %v486_v60, %v490_v61  ;;  %v259_v41 = vld [vmem:[#allocation5 + $0x368] sm:$0xff] }
  0xe0   :  { %3008 = vmatpush2.bf16.msra.mxu0 %v6552_v45  ;;  %v482_v5 = vld [vmem:[#allocation5 + $0xa60] sm:$0xff]  ;;  %v319_v43 = vld [vmem:[#allocation5 + $0x548] sm:$0xff]  ;;  %v6370_v45 = vcombine.low %v327_v32, %v331_v34  ;;  %v6299_v50 = vcombine.high %v255_v40, %v259_v41 }
  0xe1   :  { %3009 = vmatprep.subr.bf16.mxu0 %v6545_v47  ;;  %v6521_v11 = vcombine.high %v478_v4, %v482_v5  ;;  %v470_v12 = vld [vmem:[#allocation5 + $0xa00] sm:$0xff]  ;;  %v6520_v18 = vcombine.low %v478_v4, %v482_v5  ;;  %v247_v47 = vld [vmem:[#allocation5 + $0x308] sm:$0xff]  ;;  %v6362_v52 = vcombine.low %v319_v43, %v323_v44 }
  0xe2   :  { %3074 = vmatpush1.bf16.msra.mxu1 %v6234_v46  ;;  %v474_v13 = vld [vmem:[#allocation5 + $0xa20] sm:$0xff]  ;;  %v6363_v46 = vcombine.high %v319_v43, %v323_v44  ;;  %v251_v48 = vld [vmem:[#allocation5 + $0x328] sm:$0xff] }
  0xe3   :  { %3075 = vmatprep.subr.bf16.mxu1 %v6227_v51  ;;  %v6513_v22 = vcombine.high %v470_v12, %v474_v13  ;;  %v6512_v27 = vcombine.low %v470_v12, %v474_v13  ;;  %v311_v49 = vld [vmem:[#allocation5 + $0x508] sm:$0xff]  ;;  %v6291_v62 = vcombine.high %v247_v47, %v251_v48 }
  0xe4   :  { %3010 = vmatpush2.bf16.msra.mxu0 %v6544_v55  ;;  %v315_v51 = vld [vmem:[#allocation5 + $0x528] sm:$0xff]  ;;  %v6298_v55 = vcombine.low %v255_v40, %v259_v41 }
  0xe5   :  { %3011 = vmatprep.subr.bf16.mxu0 %v6537_v57  ;;  %v239_v57 = vld [vmem:[#allocation5 + $0x2c8] sm:$0xff]  ;;  %v6354_v0 = vcombine.low %v311_v49, %v315_v51 }
  0xe6   :  { %3076 = vmatpush1.bf16.msra.mxu1 %v6226_v56  ;;  %v6355_v56 = vcombine.high %v311_v49, %v315_v51  ;;  %v243_v60 = vld [vmem:[#allocation5 + $0x2e8] sm:$0xff] }
  0xe7   :  { %3077 = vmatprep.subr.bf16.mxu1 %v6219_v63  ;;  %v303_v61 = vld [vmem:[#allocation5 + $0x4c8] sm:$0xff]  ;;  %v6283_v6 = vcombine.high %v239_v57, %v243_v60 }
  0xe8   :  { %3012 = vmatpush2.bf16.msra.mxu0 %v6536_v1  ;;  %v307_v63 = vld [vmem:[#allocation5 + $0x4e8] sm:$0xff]  ;;  %v6290_v1 = vcombine.low %v247_v47, %v251_v48 }
  0xe9   :  { %3013 = vmatprep.subr.bf16.mxu0 %v6529_v3  ;;  %v231_v3 = vld [vmem:[#allocation5 + $0x288] sm:$0xff]  ;;  %v6346_v8 = vcombine.low %v303_v61, %v307_v63 }
  0xea   :  { %3078 = vmatpush1.bf16.msra.mxu1 %v6218_v2  ;;  %v6347_v2 = vcombine.high %v303_v61, %v307_v63  ;;  %v235_v4 = vld [vmem:[#allocation5 + $0x2a8] sm:$0xff] }
  0xeb   :  { %3079 = vmatprep.subr.bf16.mxu1 %v6211_v7  ;;  %v295_v5 = vld [vmem:[#allocation5 + $0x488] sm:$0xff]  ;;  %v6275_v14 = vcombine.high %v231_v3, %v235_v4 }
  0xec   :  { %3014 = vmatpush2.bf16.msra.mxu0 %v6528_v9  ;;  %v299_v7 = vld [vmem:[#allocation5 + $0x4a8] sm:$0xff]  ;;  %v6282_v9 = vcombine.low %v239_v57, %v243_v60 }
  0xed   :  { %3015 = vmatprep.subr.bf16.mxu0 %v6521_v11  ;;  %v223_v11 = vld [vmem:[#allocation5 + $0x248] sm:$0xff]  ;;  %v6338_v17 = vcombine.low %v295_v5, %v299_v7 }
  0xee   :  { %3080 = vmatpush1.bf16.msra.mxu1 %v6210_v10  ;;  %v6339_v10 = vcombine.high %v295_v5, %v299_v7  ;;  %v227_v12 = vld [vmem:[#allocation5 + $0x268] sm:$0xff] }
  0xef   :  { %3081 = vmatprep.subr.bf16.mxu1 %v6203_v15  ;;  %v287_v13 = vld [vmem:[#allocation5 + $0x448] sm:$0xff]  ;;  %v6267_v25 = vcombine.high %v223_v11, %v227_v12 }
  0xf0   :  { %3016 = vmatpush2.bf16.msra.mxu0 %v6520_v18  ;;  %v291_v15 = vld [vmem:[#allocation5 + $0x468] sm:$0xff]  ;;  %v6274_v18 = vcombine.low %v231_v3, %v235_v4 }
  0xf1   :  { %3017 = vmatprep.subr.bf16.mxu0 %v6513_v22  ;;  %v215_v22 = vld [vmem:[#allocation5 + $0x208] sm:$0xff]  ;;  %v6330_v53 = vcombine.low %v287_v13, %v291_v15 }
  0xf2   :  { %3082 = vmatpush1.bf16.msra.mxu1 %v6202_v20  ;;  %v6331_v20 = vcombine.high %v287_v13, %v291_v15  ;;  %v219_v23 = vld [vmem:[#allocation5 + $0x228] sm:$0xff] }
  0xf3   :  { %3083 = vmatprep.subr.bf16.mxu1 %v6195_v26  ;;  %v279_v24 = vld [vmem:[#allocation5 + $0x408] sm:$0xff]  ;;  %v6259_v32 = vcombine.high %v215_v22, %v219_v23 }
  0xf4   :  { %3018 = vmatpush2.bf16.msra.mxu0 %v6512_v27  ;;  %v283_v26 = vld [vmem:[#allocation5 + $0x428] sm:$0xff]  ;;  %v6266_v27 = vcombine.low %v223_v11, %v227_v12 }
  0xf5   :  { %3110 = vmatprep.subr.bf16.mxu0 %v6379_v29  ;;  %v399_v29 = vld [vmem:[#allocation5 + $0x7c8] sm:$0xff]  ;;  %v6322_v34 = vcombine.low %v279_v24, %v283_v26 }
  0xf6   :  { %3084 = vmatpush1.bf16.msra.mxu1 %v6194_v54  ;;  %v6323_v54 = vcombine.high %v279_v24, %v283_v26  ;;  %v403_v30 = vld [vmem:[#allocation5 + $0x7e8] sm:$0xff] }
  0xf7   :  { %3085 = vmatprep.subr.bf16.mxu1 %v6315_v33  ;;  %3020 = vmatmul.mubr.bf16.vlgmr.msra.gmra.mxu0 %v7871_v35  ;;  %v463_v31 = vld [vmem:[#allocation5 + $0x9c8] sm:$0xff]  ;;  %v6442_v44 = vcombine.low %v399_v29, %v403_v30 }
  0xf8   :  { %3111 = vmatpush1.bf16.msra.mxu0 %v6378_v37  ;;  %3142 = vmatprep.mubr.bf16.mxu0 %v7846_v59  ;;  %v467_v33 = vld [vmem:[#allocation5 + $0x9e8] sm:$0xff]  ;;  %v6258_v37 = vcombine.low %v215_v22, %v219_v23 }
  0xf9   :  { %3112 = vmatprep.subr.bf16.mxu0 %v6371_v39  ;;  %v391_v39 = vld [vmem:[#allocation5 + $0x788] sm:$0xff] }
  0xfa   :  { %3086 = vmatpush2.bf16.msra.mxu1 %v6314_v38  ;;  %v6443_v38 = vcombine.high %v399_v29, %v403_v30  ;;  %v395_v40 = vld [vmem:[#allocation5 + $0x7a8] sm:$0xff] }
  0xfb   :  { %3087 = vmatprep.subr.bf16.mxu1 %v6307_v42  ;;  %v455_v41 = vld [vmem:[#allocation5 + $0x988] sm:$0xff]  ;;  %v6507_v42 = vcombine.high %v463_v31, %v467_v33  ;;  %v6434_v51 = vcombine.low %v391_v39, %v395_v40 }
  0xfc   :  { %3113 = vmatpush1.bf16.msra.mxu0 %v6370_v45  ;;  %v459_v43 = vld [vmem:[#allocation5 + $0x9a8] sm:$0xff]  ;;  %v6506_v45 = vcombine.low %v463_v31, %v467_v33 }
  0xfd   :  { %3114 = vmatprep.subr.bf16.mxu0 %v6363_v46  ;;  %v383_v46 = vld [vmem:[#allocation5 + $0x748] sm:$0xff]  ;;  %v6499_v49 = vcombine.high %v455_v41, %v459_v43 }
  0xfe   :  { %3088 = vmatpush2.bf16.msra.mxu1 %v6306_v21  ;;  %v6435_v21 = vcombine.high %v391_v39, %v395_v40  ;;  %v387_v47 = vld [vmem:[#allocation5 + $0x768] sm:$0xff] }
  0xff   :  { %3089 = vmatprep.subr.bf16.mxu1 %v6299_v50  ;;  %v447_v48 = vld [vmem:[#allocation5 + $0x948] sm:$0xff]  ;;  %v6426_v63 = vcombine.low %v383_v46, %v387_v47 }
 0x100   :  { %3115 = vmatpush1.bf16.msra.mxu0 %v6362_v52  ;;  %v451_v50 = vld [vmem:[#allocation5 + $0x968] sm:$0xff]  ;;  %v6498_v52 = vcombine.low %v455_v41, %v459_v43 }
 0x101   :  { %3116 = vmatprep.subr.bf16.mxu0 %v6355_v56  ;;  %v375_v56 = vld [vmem:[#allocation5 + $0x708] sm:$0xff]  ;;  %v6491_v61 = vcombine.high %v447_v48, %v451_v50 }
 0x102   :  { %3090 = vmatpush2.bf16.msra.mxu1 %v6298_v55  ;;  %v6427_v55 = vcombine.high %v383_v46, %v387_v47  ;;  %v379_v57 = vld [vmem:[#allocation5 + $0x728] sm:$0xff] }
 0x103   :  { %3091 = vmatprep.subr.bf16.mxu1 %v6291_v62  ;;  %v439_v60 = vld [vmem:[#allocation5 + $0x908] sm:$0xff]  ;;  %v6418_v7 = vcombine.low %v375_v56, %v379_v57 }
 0x104   :  { %3117 = vmatpush1.bf16.msra.mxu0 %v6354_v0  ;;  %v443_v62 = vld [vmem:[#allocation5 + $0x928] sm:$0xff]  ;;  %v6490_v0 = vcombine.low %v447_v48, %v451_v50 }
 0x105   :  { %3118 = vmatprep.subr.bf16.mxu0 %v6347_v2  ;;  %v367_v2 = vld [vmem:[#allocation5 + $0x6c8] sm:$0xff]  ;;  %v6483_v5 = vcombine.high %v439_v60, %v443_v62 }
 0x106   :  { %3092 = vmatpush2.bf16.msra.mxu1 %v6290_v1  ;;  %v6419_v1 = vcombine.high %v375_v56, %v379_v57  ;;  %v371_v3 = vld [vmem:[#allocation5 + $0x6e8] sm:$0xff] }
 0x107   :  { %3093 = vmatprep.subr.bf16.mxu1 %v6283_v6  ;;  %v431_v4 = vld [vmem:[#allocation5 + $0x8c8] sm:$0xff]  ;;  %v6410_v15 = vcombine.low %v367_v2, %v371_v3 }
 0x108   :  { %3119 = vmatpush1.bf16.msra.mxu0 %v6346_v8  ;;  %v435_v6 = vld [vmem:[#allocation5 + $0x8e8] sm:$0xff]  ;;  %v6482_v8 = vcombine.low %v439_v60, %v443_v62 }
 0x109   :  { %3120 = vmatprep.subr.bf16.mxu0 %v6339_v10  ;;  %v359_v10 = vld [vmem:[#allocation5 + $0x688] sm:$0xff]  ;;  %v6475_v13 = vcombine.high %v431_v4, %v435_v6 }
 0x10a   :  { %3094 = vmatpush2.bf16.msra.mxu1 %v6282_v9  ;;  %v6411_v9 = vcombine.high %v367_v2, %v371_v3  ;;  %v363_v11 = vld [vmem:[#allocation5 + $0x6a8] sm:$0xff] }
 0x10b   :  { %3095 = vmatprep.subr.bf16.mxu1 %v6275_v14  ;;  %v423_v12 = vld [vmem:[#allocation5 + $0x888] sm:$0xff]  ;;  %v6402_v26 = vcombine.low %v359_v10, %v363_v11 }
 0x10c   :  { %3121 = vmatpush1.bf16.msra.mxu0 %v6338_v17  ;;  %v427_v14 = vld [vmem:[#allocation5 + $0x8a8] sm:$0xff]  ;;  %v6474_v17 = vcombine.low %v431_v4, %v435_v6 }
 0x10d   :  { %3122 = vmatprep.subr.bf16.mxu0 %v6331_v20  ;;  %v351_v20 = vld [vmem:[#allocation5 + $0x648] sm:$0xff]  ;;  %v6467_v24 = vcombine.high %v423_v12, %v427_v14 }
 0x10e   :  { %3096 = vmatpush2.bf16.msra.mxu1 %v6274_v18  ;;  %v6403_v18 = vcombine.high %v359_v10, %v363_v11  ;;  %v355_v22 = vld [vmem:[#allocation5 + $0x668] sm:$0xff] }
 0x10f   :  { %3097 = vmatprep.subr.bf16.mxu1 %v6267_v25  ;;  %v415_v23 = vld [vmem:[#allocation5 + $0x848] sm:$0xff]  ;;  %v6394_v33 = vcombine.low %v351_v20, %v355_v22 }
 0x110   :  { %3123 = vmatpush1.bf16.msra.mxu0 %v6330_v53  ;;  %v419_v25 = vld [vmem:[#allocation5 + $0x868] sm:$0xff]  ;;  %v6466_v53 = vcombine.low %v423_v12, %v427_v14 }
 0x111   :  { %3124 = vmatprep.subr.bf16.mxu0 %v6323_v54  ;;  %v343_v54 = vld [vmem:[#allocation5 + $0x608] sm:$0xff]  ;;  %v6459_v31 = vcombine.high %v415_v23, %v419_v25 }
 0x112   :  { %3098 = vmatpush2.bf16.msra.mxu1 %v6266_v27  ;;  %v6395_v27 = vcombine.high %v351_v20, %v355_v22  ;;  %v347_v29 = vld [vmem:[#allocation5 + $0x628] sm:$0xff] }
 0x113   :  { %3099 = vmatprep.subr.bf16.mxu1 %v6259_v32  ;;  %v407_v30 = vld [vmem:[#allocation5 + $0x808] sm:$0xff]  ;;  %v6386_v43 = vcombine.low %v343_v54, %v347_v29 }
 0x114   :  { %3125 = vmatpush1.bf16.msra.mxu0 %v6322_v34  ;;  %v411_v32 = vld [vmem:[#allocation5 + $0x828] sm:$0xff]  ;;  %v6458_v34 = vcombine.low %v415_v23, %v419_v25 }
 0x115   :  { %3126 = vmatprep.subr.bf16.mxu0 %v6443_v38  ;;  %v527_v38 = vld [vmem:[#allocation5 + $0xbc8] sm:$0xff]  ;;  %v6451_v41 = vcombine.high %v407_v30, %v411_v32 }
 0x116   :  { %3100 = vmatpush2.bf16.msra.mxu1 %v6258_v37  ;;  %v6387_v37 = vcombine.high %v343_v54, %v347_v29  ;;  %v531_v39 = vld [vmem:[#allocation5 + $0xbe8] sm:$0xff] }
 0x117   :  { %3151 = vmatprep.subr.bf16.mxu1 %v6507_v42  ;;  %v591_v40 = vld [vmem:[#allocation5 + $0xdc8] sm:$0xff]  ;;  %v6571_v48 = vcombine.high %v527_v38, %v531_v39 }
 0x118   :  { %3127 = vmatpush2.bf16.msra.mxu0 %v6442_v44  ;;  %v595_v42 = vld [vmem:[#allocation5 + $0xde8] sm:$0xff]  ;;  %v6450_v44 = vcombine.low %v407_v30, %v411_v32 }
 0x119   :  { %3102 = vmatmul.mubr.bf16.vlgmr.msra.gmra.mxu1 %v7852_v16  ;;  %3128 = vmatprep.subr.bf16.mxu0 %v6435_v21  ;;  %v519_v21 = vld [vmem:[#allocation5 + $0xb88] sm:$0xff]  ;;  %v6634_v50 = vcombine.low %v591_v40, %v595_v42 }
 0x11a   :  { %3152 = vmatpush1.bf16.msra.mxu1 %v6506_v45  ;;  %3183 = vmatprep.mubr.bf16.mxu1 %v7863_v28  ;;  %v6635_v45 = vcombine.high %v591_v40, %v595_v42  ;;  %v523_v46 = vld [vmem:[#allocation5 + $0xba8] sm:$0xff] }
 0x11b   :  { %3153 = vmatprep.subr.bf16.mxu1 %v6499_v49  ;;  %v583_v47 = vld [vmem:[#allocation5 + $0xd88] sm:$0xff]  ;;  %v6563_v60 = vcombine.high %v519_v21, %v523_v46 }
 0x11c   :  { %3129 = vmatpush2.bf16.msra.mxu0 %v6434_v51  ;;  %v587_v49 = vld [vmem:[#allocation5 + $0xda8] sm:$0xff]  ;;  %v6570_v51 = vcombine.low %v527_v38, %v531_v39 }
 0x11d   :  { %3130 = vmatprep.subr.bf16.mxu0 %v6427_v55  ;;  %v511_v55 = vld [vmem:[#allocation5 + $0xb48] sm:$0xff]  ;;  %v6626_v62 = vcombine.low %v583_v47, %v587_v49 }
 0x11e   :  { %3154 = vmatpush1.bf16.msra.mxu1 %v6498_v52  ;;  %v6627_v52 = vcombine.high %v583_v47, %v587_v49  ;;  %v515_v56 = vld [vmem:[#allocation5 + $0xb68] sm:$0xff] }
 0x11f   :  { %3155 = vmatprep.subr.bf16.mxu1 %v6491_v61  ;;  %v575_v57 = vld [vmem:[#allocation5 + $0xd48] sm:$0xff]  ;;  %v6555_v4 = vcombine.high %v511_v55, %v515_v56 }
 0x120   :  { %3131 = vmatpush2.bf16.msra.mxu0 %v6426_v63  ;;  %v579_v61 = vld [vmem:[#allocation5 + $0xd68] sm:$0xff]  ;;  %v6562_v63 = vcombine.low %v519_v21, %v523_v46  ;;  %v212_v21 = vld [vmem:[#allocation5 + $0x1f0] sm:$0xff] }
 0x121   :  { %3132 = vmatprep.subr.bf16.mxu0 %v6419_v1  ;;  %v503_v1 = vld [vmem:[#allocation5 + $0xb08] sm:$0xff]  ;;  %v6618_v6 = vcombine.low %v575_v57, %v579_v61  ;;  %v336_v46 = vld [vmem:[#allocation5 + $0x5d0] sm:$0xff] }
 0x122   :  { %3156 = vmatpush1.bf16.msra.mxu1 %v6490_v0  ;;  %v6619_v0 = vcombine.high %v575_v57, %v579_v61  ;;  %v507_v2 = vld [vmem:[#allocation5 + $0xb28] sm:$0xff] }
 0x123   :  { %3157 = vmatprep.subr.bf16.mxu1 %v6483_v5  ;;  %v567_v3 = vld [vmem:[#allocation5 + $0xd08] sm:$0xff]  ;;  %v6547_v12 = vcombine.high %v503_v1, %v507_v2 }
 0x124   :  { %3133 = vmatpush2.bf16.msra.mxu0 %v6418_v7  ;;  %v571_v5 = vld [vmem:[#allocation5 + $0xd28] sm:$0xff]  ;;  %v6554_v7 = vcombine.low %v511_v55, %v515_v56  ;;  %v204_v55 = vld [vmem:[#allocation5 + $0x1b0] sm:$0xff] }
 0x125   :  { %3134 = vmatprep.subr.bf16.mxu0 %v6411_v9  ;;  %v495_v9 = vld [vmem:[#allocation5 + $0xac8] sm:$0xff]  ;;  %v6610_v14 = vcombine.low %v567_v3, %v571_v5  ;;  %v328_v56 = vld [vmem:[#allocation5 + $0x590] sm:$0xff] }
 0x126   :  { %3158 = vmatpush1.bf16.msra.mxu1 %v6482_v8  ;;  %v6611_v8 = vcombine.high %v567_v3, %v571_v5  ;;  %v499_v10 = vld [vmem:[#allocation5 + $0xae8] sm:$0xff]  ;;  %v7879_v5 = vld [vmem:[#allocation2 + $0x18] ss:$0 sps:$4 sm:$0xff]  }
 0x127   :  { %3159 = vmatprep.subr.bf16.mxu1 %v6475_v13  ;;  %v559_v11 = vld [vmem:[#allocation5 + $0xcc8] sm:$0xff]  ;;  %v6539_v23 = vcombine.high %v495_v9, %v499_v10 }
 0x128   :  { %3135 = vmatpush2.bf16.msra.mxu0 %v6410_v15  ;;  %v563_v13 = vld [vmem:[#allocation5 + $0xce8] sm:$0xff]  ;;  %v6546_v15 = vcombine.low %v503_v1, %v507_v2  ;;  %v196_v1 = vld [vmem:[#allocation5 + $0x170] sm:$0xff] }
 0x129   :  { %3136 = vmatprep.subr.bf16.mxu0 %v6403_v18  ;;  %v487_v18 = vld [vmem:[#allocation5 + $0xa88] sm:$0xff]  ;;  %v6602_v25 = vcombine.low %v559_v11, %v563_v13  ;;  %v320_v2 = vld [vmem:[#allocation5 + $0x550] sm:$0xff] }
 0x12a   :  { %3160 = vmatpush1.bf16.msra.mxu1 %v6474_v17  ;;  %v6603_v17 = vcombine.high %v559_v11, %v563_v13  ;;  %v491_v20 = vld [vmem:[#allocation5 + $0xaa8] sm:$0xff]  ;;  %v312_v11 = vld [vmem:[#allocation5 + $0x510] sm:$0xff] }
 0x12b   :  { %3161 = vmatprep.subr.bf16.mxu1 %v6467_v24  ;;  %v551_v22 = vld [vmem:[#allocation5 + $0xc88] sm:$0xff]  ;;  %v6531_v30 = vcombine.high %v487_v18, %v491_v20  ;;  %v316_v13 = vld [vmem:[#allocation5 + $0x530] sm:$0xff] }
 0x12c   :  { %3137 = vmatpush2.bf16.msra.mxu0 %v6402_v26  ;;  %v555_v24 = vld [vmem:[#allocation5 + $0xca8] sm:$0xff]  ;;  %v6538_v26 = vcombine.low %v495_v9, %v499_v10  ;;  %v184_v9 = vld [vmem:[#allocation5 + $0x110] sm:$0xff] }
 0x12d   :  { %3138 = vmatprep.subr.bf16.mxu0 %v6395_v27  ;;  %v479_v27 = vld [vmem:[#allocation5 + $0xa48] sm:$0xff]  ;;  %v6594_v32 = vcombine.low %v551_v22, %v555_v24  ;;  %v188_v10 = vld [vmem:[#allocation5 + $0x130] sm:$0xff] }
 0x12e   :  { %3162 = vmatpush1.bf16.msra.mxu1 %v6466_v53  ;;  %v6595_v53 = vcombine.high %v551_v22, %v555_v24  ;;  %v483_v54 = vld [vmem:[#allocation5 + $0xa68] sm:$0xff]  ;;  %v304_v22 = vld [vmem:[#allocation5 + $0x4d0] sm:$0xff] }
 0x12f   :  { %3163 = vmatprep.subr.bf16.mxu1 %v6459_v31  ;;  %v543_v29 = vld [vmem:[#allocation5 + $0xc48] sm:$0xff]  ;;  %v6523_v40 = vcombine.high %v479_v27, %v483_v54  ;;  %v308_v24 = vld [vmem:[#allocation5 + $0x4f0] sm:$0xff] }
 0x130   :  { %3139 = vmatpush2.bf16.msra.mxu0 %v6394_v33  ;;  %v547_v31 = vld [vmem:[#allocation5 + $0xc68] sm:$0xff]  ;;  %v6530_v33 = vcombine.low %v487_v18, %v491_v20  ;;  %v176_v18 = vld [vmem:[#allocation5 + $0xd0] sm:$0xff] }
 0x131   :  { %3140 = vmatprep.subr.bf16.mxu0 %v6387_v37  ;;  %v471_v37 = vld [vmem:[#allocation5 + $0xa08] sm:$0xff]  ;;  %v6586_v42 = vcombine.low %v543_v29, %v547_v31  ;;  %v180_v20 = vld [vmem:[#allocation5 + $0xf0] sm:$0xff] }
 0x132   :  { %3164 = vmatpush1.bf16.msra.mxu1 %v6458_v34  ;;  %v6587_v34 = vcombine.high %v543_v29, %v547_v31  ;;  %v475_v38 = vld [vmem:[#allocation5 + $0xa28] sm:$0xff]  ;;  %v296_v29 = vld [vmem:[#allocation5 + $0x490] sm:$0xff] }
 0x133   :  { %3165 = vmatprep.subr.bf16.mxu1 %v6451_v41  ;;  %v535_v39 = vld [vmem:[#allocation5 + $0xc08] sm:$0xff]  ;;  %v6515_v47 = vcombine.high %v471_v37, %v475_v38  ;;  %v300_v31 = vld [vmem:[#allocation5 + $0x4b0] sm:$0xff] }
 0x134   :  { %3141 = vmatpush2.bf16.msra.mxu0 %v6386_v43  ;;  %v539_v41 = vld [vmem:[#allocation5 + $0xc28] sm:$0xff]  ;;  %v6522_v43 = vcombine.low %v479_v27, %v483_v54  ;;  %v168_v27 = vld [vmem:[#allocation5 + $0x90] sm:$0xff] }
 0x135   :  { %3192 = vmatprep.subr.bf16.mxu0 %v6635_v45  ;;  %v208_v45 = vld [vmem:[#allocation5 + $0x1d0] sm:$0xff]  ;;  %v6578_v49 = vcombine.low %v535_v39, %v539_v41 }
 0x136   :  { %3166 = vmatpush1.bf16.msra.mxu1 %v6450_v44  ;;  %v6579_v44 = vcombine.high %v535_v39, %v539_v41  ;;  %v6252_v61 = vcombine.low %v208_v45, %v212_v21  ;;  %v172_v54 = vld [vmem:[#allocation5 + $0xb0] sm:$0xff]  ;;  %v6341_v39 = vcombine.high %v296_v29, %v300_v31 }
 0x137   :  { %3167 = vmatprep.subr.bf16.mxu1 %v6571_v48  ;;  %3143 = vmatmul.mubr.bf16.vlgmr.msra.gmra.mxu0 %v7856_v19  ;;  %v340_v48 = vld [vmem:[#allocation5 + $0x5f0] sm:$0xff] }
 0x138   :  { %3193 = vmatpush1.bf16.msra.mxu0 %v6634_v50  ;;  %3224 = vmatprep.mubr.bf16.mxu0 %v7757_v36  ;;  %v6514_v50 = vcombine.low %v471_v37, %v475_v38  ;;  %v6381_v57 = vcombine.high %v336_v46, %v340_v48  ;;  %v160_v37 = vld [vmem:[#allocation5 + $0x50] sm:$0xff] }
 0x139   :  { %3194 = vmatprep.subr.bf16.mxu0 %v6627_v52  ;;  %v200_v52 = vld [vmem:[#allocation5 + $0x190] sm:$0xff] }
 0x13a   :  { %3168 = vmatpush2.bf16.msra.mxu1 %v6570_v51  ;;  %v6253_v51 = vcombine.high %v208_v45, %v212_v21  ;;  %v164_v38 = vld [vmem:[#allocation5 + $0x70] sm:$0xff] }
 0x13b   :  { %3169 = vmatprep.subr.bf16.mxu1 %v6563_v60  ;;  %v332_v60 = vld [vmem:[#allocation5 + $0x5b0] sm:$0xff]  ;;  %v6205_v45 = vcombine.high %v160_v37, %v164_v38 }
 0x13c   :  { %3195 = vmatpush1.bf16.msra.mxu0 %v6626_v62  ;;  %v6380_v62 = vcombine.low %v336_v46, %v340_v48  ;;  %v6373_v3 = vcombine.high %v328_v56, %v332_v60  ;;  %v292_v41 = vld [vmem:[#allocation5 + $0x470] sm:$0xff] }
 0x13d   :  { %3196 = vmatprep.subr.bf16.mxu0 %v6619_v0  ;;  %v192_v0 = vld [vmem:[#allocation5 + $0x150] sm:$0xff] }
 0x13e   :  { %3170 = vmatpush2.bf16.msra.mxu1 %v6562_v63  ;;  %v6245_v63 = vcombine.high %v200_v52, %v204_v55  ;;  %v152_v46 = vld [vmem:[#allocation5 + $0x10] sm:$0xff] }
 0x13f   :  { %3171 = vmatprep.subr.bf16.mxu1 %v6555_v4  ;;  %v324_v4 = vld [vmem:[#allocation5 + $0x570] sm:$0xff] }
 0x140   :  { %3197 = vmatpush1.bf16.msra.mxu0 %v6618_v6  ;;  %v6244_v6 = vcombine.low %v200_v52, %v204_v55  ;;  %v280_v48 = vld [vmem:[#allocation5 + $0x410] sm:$0xff] }
 0x141   :  { %3198 = vmatprep.subr.bf16.mxu0 %v6611_v8  ;;  %v6237_v8 = vcombine.high %v192_v0, %v196_v1 }
 0x142   :  { %3172 = vmatpush2.bf16.msra.mxu1 %v6554_v7  ;;  %v6372_v7 = vcombine.low %v328_v56, %v332_v60  ;;  %v276_v60 = vld [vmem:[#allocation5 + $0x3f0] sm:$0xff] }
 0x143   :  { %3173 = vmatprep.subr.bf16.mxu1 %v6547_v12  ;;  %v6365_v12 = vcombine.high %v320_v2, %v324_v4 }
 0x144   :  { %3199 = vmatpush1.bf16.msra.mxu0 %v6610_v14  ;;  %v6236_v14 = vcombine.low %v192_v0, %v196_v1 }
 0x145   :  { %3200 = vmatprep.subr.bf16.mxu0 %v6603_v17  ;;  %v6229_v17 = vcombine.high %v184_v9, %v188_v10 }
 0x146   :  { %3174 = vmatpush2.bf16.msra.mxu1 %v6546_v15  ;;  %v6364_v15 = vcombine.low %v320_v2, %v324_v4  ;;  %v7890_v2 = vld [vmem:[#allocation7] sm:$0xff] }
 0x147   :  { %3175 = vmatprep.subr.bf16.mxu1 %v6539_v23  ;;  %v6357_v23 = vcombine.high %v312_v11, %v316_v13 }
 0x148   :  { %3201 = vmatpush1.bf16.msra.mxu0 %v6602_v25  ;;  %v6228_v25 = vcombine.low %v184_v9, %v188_v10  ;;  %v392_v9 = vld [vmem:[#allocation5 + $0x790] sm:$0xff] }
 0x149   :  { %3202 = vmatprep.subr.bf16.mxu0 %v6595_v53  ;;  %v6221_v53 = vcombine.high %v176_v18, %v180_v20  ;;  %v396_v10 = vld [vmem:[#allocation5 + $0x7b0] sm:$0xff] }
 0x14a   :  { %3176 = vmatpush2.bf16.msra.mxu1 %v6538_v26  ;;  %v6356_v26 = vcombine.low %v312_v11, %v316_v13 }
 0x14b   :  { %3177 = vmatprep.subr.bf16.mxu1 %v6531_v30  ;;  %v6349_v30 = vcombine.high %v304_v22, %v308_v24 }
 0x14c   :  { %3203 = vmatpush1.bf16.msra.mxu0 %v6594_v32  ;;  %v6220_v32 = vcombine.low %v176_v18, %v180_v20  ;;  %v256_v18 = vld [vmem:[#allocation5 + $0x350] sm:$0xff] }
 0x14d   :  { %3204 = vmatprep.subr.bf16.mxu0 %v6587_v34  ;;  %v6213_v34 = vcombine.high %v168_v27, %v172_v54  ;;  %v260_v20 = vld [vmem:[#allocation5 + $0x370] sm:$0xff] }
 0x14e   :  { %3178 = vmatpush2.bf16.msra.mxu1 %v6530_v33  ;;  %v6348_v33 = vcombine.low %v304_v22, %v308_v24  ;;  %v388_v24 = vld [vmem:[#allocation5 + $0x770] sm:$0xff] }
 0x14f   :  { %3179 = vmatprep.subr.bf16.mxu1 %v6523_v40  ;;  %v288_v40 = vld [vmem:[#allocation5 + $0x450] sm:$0xff] }
 0x150   :  { %3205 = vmatpush1.bf16.msra.mxu0 %v6586_v42  ;;  %v6212_v42 = vcombine.low %v168_v27, %v172_v54  ;;  %v6333_v21 = vcombine.high %v288_v40, %v292_v41  ;;  %v6332_v52 = vcombine.low %v288_v40, %v292_v41  ;;  %v6436_v54 = vcombine.low %v392_v9, %v396_v10  ;;  %v380_v40 = vld [vmem:[#allocation5 + $0x730] sm:$0xff] }
 0x151   :  { %3206 = vmatprep.subr.bf16.mxu0 %v6579_v44  ;;  %v6340_v44 = vcombine.low %v296_v29, %v300_v31  ;;  %v6301_v29 = vcombine.high %v256_v18, %v260_v20 }
 0x152   :  { %3180 = vmatpush2.bf16.msra.mxu1 %v6522_v43  ;;  %v600_v43 = vlaneseq }
 0x153   :  { %3181 = vmatprep.subr.bf16.mxu1 %v6515_v47  ;;  %v156_v47 = vld [vmem:[#allocation5 + $0x30] sm:$0xff] }
 0x154   :  { %3207 = vmatpush1.bf16.msra.mxu0 %v6578_v49  ;;  %v284_v49 = vld [vmem:[#allocation5 + $0x430] sm:$0xff]  ;;  %v6197_v55 = vcombine.high %v152_v46, %v156_v47 }
 0x155   :  { %3233 = vmatprep.subr.bf16.mxu0 %v6253_v51  ;;  %v7885_v51 = vshrl.u32 %v600_v43, 7  ;;  %v6325_v56 = vcombine.high %v280_v48, %v284_v49  ;;  %v6324_v1 = vcombine.low %v280_v48, %v284_v49  ;;  %v6300_v43 = vcombine.low %v256_v18, %v260_v20  ;;  %v240_v48 = vld [vmem:[#allocation5 + $0x2d0] sm:$0xff] }
 0x156   :  { %3182 = vmatpush2.bf16.msra.mxu1 %v6514_v50  ;;  %v6204_v50 = vcombine.low %v160_v37, %v164_v38  ;;  %v252_v37 = vld [vmem:[#allocation5 + $0x330] sm:$0xff] }
 0x157   :  { %3274 = vmatprep.subr.bf16.mxu1 %v6381_v57  ;;  %3225 = vmatmul.mubr.bf16.vlgmr.msra.gmra.mxu0 %v7879_v5  ;;  %v272_v57 = vld [vmem:[#allocation5 + $0x3d0] sm:$0xff]  ;;  %v7888_v0 = vsub.s32 0, %v7885_v51 }
 0x158   :  { %3234 = vmatpush1.bf16.msra.mxu0 %v6252_v61  ;;  %3265 = vmatprep.mubr.bf16.mxu0 %v7842_v58  ;;  %v400_v61 = vld [vmem:[#allocation5 + $0x7d0] sm:$0xff] }
 0x159   :  { %3184 = vmatmul.mubr.bf16.vlgmr.msra.gmra.mxu1 %v7871_v35  ;;  %3235 = vmatprep.subr.bf16.mxu0 %v6245_v63  ;;  %v6196_v63 = vcombine.low %v152_v46, %v156_v47  ;;  %v603_v11 = vrot.slane %v7890_v2, %v7888_v0  ;;  %v244_v49 = vld [vmem:[#allocation5 + $0x2f0] sm:$0xff] }
 0x15a   :  { %3275 = vmatpush1.bf16.msra.mxu1 %v6380_v62  ;;  %3306 = vmatprep.mubr.bf16.mxu1 %v7846_v59  ;;  %v404_v62 = vld [vmem:[#allocation5 + $0x7f0] sm:$0xff] }
 0x15b   :  { %3276 = vmatprep.subr.bf16.mxu1 %v6373_v3  ;;  %v6317_v3 = vcombine.high %v272_v57, %v276_v60  ;;  %v6445_v4 = vcombine.high %v400_v61, %v404_v62  ;;  %v6444_v13 = vcombine.low %v400_v61, %v404_v62  ;;  %v232_v61 = vld [vmem:[#allocation5 + $0x290] sm:$0xff] }
 0x15c   :  { %3236 = vmatpush1.bf16.msra.mxu0 %v6244_v6  ;;  %v7893_v6 = vsub.s32 1, %v7885_v51  ;;  %v236_v62 = vld [vmem:[#allocation5 + $0x2b0] sm:$0xff] }
 0x15d   :  { %3237 = vmatprep.subr.bf16.mxu0 %v6237_v8  ;;  %v268_v8 = vld [vmem:[#allocation5 + $0x3b0] sm:$0xff] }
 0x15e   :  { %3277 = vmatpush1.bf16.msra.mxu1 %v6372_v7  ;;  %v264_v7 = vld [vmem:[#allocation5 + $0x390] sm:$0xff] }
 0x15f   :  { %3278 = vmatprep.subr.bf16.mxu1 %v6365_v12  ;;  %v6316_v12 = vcombine.low %v272_v57, %v276_v60  ;;  %v6285_v57 = vcombine.high %v240_v48, %v244_v49  ;;  %v216_v18 = vld [vmem:[#allocation5 + $0x210] sm:$0xff] }
 0x160   :  { %3238 = vmatpush1.bf16.msra.mxu0 %v6236_v14  ;;  %v6309_v14 = vcombine.high %v264_v7, %v268_v8  ;;  %v220_v20 = vld [vmem:[#allocation5 + $0x230] sm:$0xff] }
 0x161   :  { %3239 = vmatprep.subr.bf16.mxu0 %v6229_v17  ;;  %v6437_v17 = vcombine.high %v392_v9, %v396_v10  ;;  %v224_v9 = vld [vmem:[#allocation5 + $0x250] sm:$0xff] }
 0x162   :  { %3279 = vmatpush1.bf16.msra.mxu1 %v6364_v15  ;;  %v607_v15 = vrot.slane %v7890_v2, %v7893_v6  ;;  %v228_v10 = vld [vmem:[#allocation5 + $0x270] sm:$0xff] }
 0x163   :  { %3280 = vmatprep.subr.bf16.mxu1 %v6357_v23  ;;  %v384_v23 = vld [vmem:[#allocation5 + $0x750] sm:$0xff] }
 0x164   :  { %3240 = vmatpush1.bf16.msra.mxu0 %v6228_v25 }
 0x165   :  { %3241 = vmatprep.subr.bf16.mxu0 %v6221_v53  ;;  %v6308_v53 = vcombine.low %v264_v7, %v268_v8  ;;  %v6277_v7 = vcombine.high %v232_v61, %v236_v62 }
 0x166   :  { %3281 = vmatpush1.bf16.msra.mxu1 %v6356_v26 }
 0x167   :  { %3282 = vmatprep.subr.bf16.mxu1 %v6349_v30 }
 0x168   :  { %3242 = vmatpush1.bf16.msra.mxu0 %v6220_v32 }
 0x169   :  { %3243 = vmatprep.subr.bf16.mxu0 %v6213_v34  ;;  %v248_v34 = vld [vmem:[#allocation5 + $0x310] sm:$0xff] }
 0x16a   :  { %3283 = vmatpush1.bf16.msra.mxu1 %v6348_v33  ;;  %v6429_v33 = vcombine.high %v384_v23, %v388_v24 }
 0x16b   :  { %3284 = vmatprep.subr.bf16.mxu1 %v6341_v39  ;;  %v376_v39 = vld [vmem:[#allocation5 + $0x710] sm:$0xff] }
 0x16c   :  { %3244 = vmatpush1.bf16.msra.mxu0 %v6212_v42  ;;  %v6421_v47 = vcombine.high %v376_v39, %v380_v40 }
 0x16d   :  { %3245 = vmatprep.subr.bf16.mxu0 %v6205_v45  ;;  %v6428_v45 = vcombine.low %v384_v23, %v388_v24  ;;  %v348_v23 = vld [vmem:[#allocation5 + $0x630] sm:$0xff]  ;;  %v6268_v24 = vcombine.low %v224_v9, %v228_v10 }
 0x16e   :  { %3285 = vmatpush1.bf16.msra.mxu1 %v6340_v44 }
 0x16f   :  { %3286 = vmatprep.subr.bf16.mxu1 %v6333_v21  ;;  %v6293_v21 = vcombine.high %v248_v34, %v252_v37 }
 0x170   :  { %3246 = vmatpush1.bf16.msra.mxu0 %v6204_v50  ;;  %v368_v50 = vld [vmem:[#allocation5 + $0x6d0] sm:$0xff] }
 0x171   :  { %3247 = vmatprep.subr.bf16.mxu0 %v6197_v55  ;;  %v6292_v55 = vcombine.low %v248_v34, %v252_v37 }
 0x172   :  { %3287 = vmatpush1.bf16.msra.mxu1 %v6332_v52  ;;  %v372_v52 = vld [vmem:[#allocation5 + $0x6f0] sm:$0xff] }
 0x173   :  { %3288 = vmatprep.subr.bf16.mxu1 %v6325_v56  ;;  %v6420_v56 = vcombine.low %v376_v39, %v380_v40  ;;  %v6413_v60 = vcombine.high %v368_v50, %v372_v52  ;;  %v460_v39 = vld [vmem:[#allocation5 + $0x9b0] sm:$0xff] }
 0x174   :  { %3248 = vmatpush1.bf16.msra.mxu0 %v6196_v63  ;;  %v360_v63 = vld [vmem:[#allocation5 + $0x690] sm:$0xff] }
 0x175   :  { %3249 = vmatprep.subr.bf16.mxu0 %v6317_v3  ;;  %v6284_v3 = vcombine.low %v240_v48, %v244_v49  ;;  %v584_v40 = vld [vmem:[#allocation5 + $0xd90] sm:$0xff] }
 0x176   :  { %3289 = vmatpush1.bf16.msra.mxu1 %v6324_v1  ;;  %v364_v1 = vld [vmem:[#allocation5 + $0x6b0] sm:$0xff] }
 0x177   :  { %3290 = vmatprep.subr.bf16.mxu1 %v6445_v4  ;;  %v2939_v22 = vpop.f32.mrf.mxu0  ;;  %v6412_v4 = vcombine.low %v368_v50, %v372_v52  ;;  %v6405_v8 = vcombine.high %v360_v63, %v364_v1  ;;  %v576_v48 = vld [vmem:[#allocation5 + $0xd50] sm:$0xff] }
 0x178   :  { %v2940_v25 = vadd.f32 %v2939_v22, %v603_v11  ;;  %3250 = vmatpush2.bf16.msra.mxu0 %v6316_v12  ;;  %v352_v11 = vld [vmem:[#allocation5 + $0x650] sm:$0xff] }
 0x179   :  { %v2980_v26 = vpop.f32.mrf.mxu1  ;;  %v2941_v27 = vpop.f32.mrf.mxu0  ;;  %3251 = vmatprep.subr.bf16.mxu0 %v6309_v14  ;;  %v356_v12 = vld [vmem:[#allocation5 + $0x670] sm:$0xff]  ;;  %v6404_v14 = vcombine.low %v360_v63, %v364_v1 }
 0x17a   :  { %3291 = vmatpush2.bf16.msra.mxu1 %v6444_v13  ;;  %v7899_v30 = vadd.f32 %v2980_v26, %v2940_v25  ;;  %v2942_v31 = vadd.f32 %v2941_v27, %v607_v15  ;;  %v6276_v13 = vcombine.low %v232_v61, %v236_v62  ;;  %v6269_v15 = vcombine.high %v224_v9, %v228_v10  ;;  %v344_v22 = vld [vmem:[#allocation5 + $0x610] sm:$0xff] }
 0x17b   :  { %v2982_v32 = vpop.f32.mrf.mxu1  ;;  %3292 = vmatprep.subr.bf16.mxu1 %v6437_v17  ;;  %v2943_v38 = vpop.f32.mrf.mxu0  ;;  %v6397_v17 = vcombine.high %v352_v11, %v356_v12  ;;  %v6396_v25 = vcombine.low %v352_v11, %v356_v12  ;;  %v6261_v26 = vcombine.high %v216_v18, %v220_v20  ;;  %v464_v27 = vld [vmem:[#allocation5 + $0x9d0] sm:$0xff] }
 0x17c   :  { %v7901_v41 = vadd.f32 %v2982_v32, %v2942_v31  ;;  %3252 = vmatpush2.bf16.msra.mxu0 %v6308_v53  ;;  %v6389_v53 = vcombine.high %v344_v22, %v348_v23  ;;  %v596_v31 = vld [vmem:[#allocation5 + $0xdf0] sm:$0xff]  ;;  %v6260_v32 = vcombine.low %v216_v18, %v220_v20 }
 0x17d   :  { %v2984_v42 = vpop.f32.mrf.mxu1  ;;  %v2944_v44 = vpop.f32.mrf.mxu0  ;;  %3253 = vmatprep.subr.bf16.mxu0 %v6301_v29  ;;  %v592_v29 = vld [vmem:[#allocation5 + $0xdd0] sm:$0xff] }
 0x17e   :  { %3293 = vmatpush2.bf16.msra.mxu1 %v6436_v54  ;;  %v468_v54 = vld [vmem:[#allocation5 + $0x9f0] sm:$0xff]  ;;  %v6637_v37 = vcombine.high %v592_v29, %v596_v31  ;;  %v6636_v44 = vcombine.low %v592_v29, %v596_v31 }
 0x17f   :  { %v2985_v46 = vpop.f32.mrf.mxu1  ;;  %3294 = vmatprep.subr.bf16.mxu1 %v6429_v33  ;;  %v6388_v33 = vcombine.low %v344_v22, %v348_v23  ;;  %v6509_v34 = vcombine.high %v464_v27, %v468_v54  ;;  %v456_v38 = vld [vmem:[#allocation5 + $0x990] sm:$0xff] }
 0x180   :  { %3254 = vmatpush2.bf16.msra.mxu0 %v6300_v43  ;;  %v588_v42 = vld [vmem:[#allocation5 + $0xdb0] sm:$0xff]  ;;  %v6508_v43 = vcombine.low %v464_v27, %v468_v54  ;;  %v6500_v52 = vcombine.low %v456_v38, %v460_v39 }
 0x181   :  { %3255 = vmatprep.subr.bf16.mxu0 %v6293_v21  ;;  %v6629_v21 = vcombine.high %v584_v40, %v588_v42  ;;  %v448_v46 = vld [vmem:[#allocation5 + $0x950] sm:$0xff] }
 0x182   :  { %3295 = vmatpush2.bf16.msra.mxu1 %v6428_v45  ;;  %v6501_v45 = vcombine.high %v456_v38, %v460_v39  ;;  %v580_v49 = vld [vmem:[#allocation5 + $0xd70] sm:$0xff] }
 0x183   :  { %3296 = vmatprep.subr.bf16.mxu1 %v6421_v47  ;;  %v452_v47 = vld [vmem:[#allocation5 + $0x970] sm:$0xff] }
 0x184   :  { %3256 = vmatpush2.bf16.msra.mxu0 %v6292_v55  ;;  %v6628_v55 = vcombine.low %v584_v40, %v588_v42  ;;  %v440_v61 = vld [vmem:[#allocation5 + $0x910] sm:$0xff] }
 0x185   :  { %3257 = vmatprep.subr.bf16.mxu0 %v6285_v57  ;;  %v444_v62 = vld [vmem:[#allocation5 + $0x930] sm:$0xff] }
 0x186   :  { %3297 = vmatpush2.bf16.msra.mxu1 %v6420_v56  ;;  %v6493_v56 = vcombine.high %v448_v46, %v452_v47  ;;  %v568_v63 = vld [vmem:[#allocation5 + $0xd10] sm:$0xff] }
 0x187   :  { %3298 = vmatprep.subr.bf16.mxu1 %v6413_v60  ;;  %v6621_v60 = vcombine.high %v576_v48, %v580_v49  ;;  %v572_v1 = vld [vmem:[#allocation5 + $0xd30] sm:$0xff] }
 0x188   :  { %3258 = vmatpush2.bf16.msra.mxu0 %v6284_v3  ;;  %v6613_v10 = vcombine.high %v568_v63, %v572_v1  ;;  %v432_v11 = vld [vmem:[#allocation5 + $0x8d0] sm:$0xff] }
 0x189   :  { %3259 = vmatprep.subr.bf16.mxu0 %v6277_v7  ;;  %v6620_v7 = vcombine.low %v576_v48, %v580_v49  ;;  %v436_v12 = vld [vmem:[#allocation5 + $0x8f0] sm:$0xff] }
 0x18a   :  { %3299 = vmatpush2.bf16.msra.mxu1 %v6412_v4  ;;  %v6492_v4 = vcombine.low %v448_v46, %v452_v47  ;;  %v6477_v18 = vcombine.high %v432_v11, %v436_v12  ;;  %v424_v22 = vld [vmem:[#allocation5 + $0x890] sm:$0xff] }
 0x18b   :  { %3300 = vmatprep.subr.bf16.mxu1 %v6405_v8  ;;  %v6485_v8 = vcombine.high %v440_v61, %v444_v62  ;;  %v428_v23 = vld [vmem:[#allocation5 + $0x8b0] sm:$0xff] }
 0x18c   :  { %3260 = vmatpush2.bf16.msra.mxu0 %v6276_v13  ;;  %v560_v13 = vld [vmem:[#allocation5 + $0xcd0] sm:$0xff]  ;;  %v6469_v27 = vcombine.high %v424_v22, %v428_v23 }
 0x18d   :  { %3261 = vmatprep.subr.bf16.mxu0 %v6269_v15  ;;  %v6484_v15 = vcombine.low %v440_v61, %v444_v62  ;;  %v416_v29 = vld [vmem:[#allocation5 + $0x850] sm:$0xff] }
 0x18e   :  { %3301 = vmatpush2.bf16.msra.mxu1 %v6404_v14  ;;  %v564_v14 = vld [vmem:[#allocation5 + $0xcf0] sm:$0xff] }
 0x18f   :  { %3302 = vmatprep.subr.bf16.mxu1 %v6397_v17  ;;  %v6612_v17 = vcombine.low %v568_v63, %v572_v1  ;;  %v6605_v20 = vcombine.high %v560_v13, %v564_v14  ;;  %v420_v31 = vld [vmem:[#allocation5 + $0x870] sm:$0xff] }
 0x190   :  { %3262 = vmatpush2.bf16.msra.mxu0 %v6268_v24  ;;  %v552_v24 = vld [vmem:[#allocation5 + $0xc90] sm:$0xff]  ;;  %v6461_v38 = vcombine.high %v416_v29, %v420_v31 }
 0x191   :  { %3263 = vmatprep.subr.bf16.mxu0 %v6261_v26  ;;  %v6476_v26 = vcombine.low %v432_v11, %v436_v12  ;;  %v408_v40 = vld [vmem:[#allocation5 + $0x810] sm:$0xff] }
 0x192   :  { %3303 = vmatpush2.bf16.msra.mxu1 %v6396_v25  ;;  %v556_v25 = vld [vmem:[#allocation5 + $0xcb0] sm:$0xff] }
 0x193   :  { %3304 = vmatprep.subr.bf16.mxu1 %v6389_v53  ;;  %v6604_v53 = vcombine.low %v560_v13, %v564_v14  ;;  %v6597_v54 = vcombine.high %v552_v24, %v556_v25  ;;  %v412_v42 = vld [vmem:[#allocation5 + $0x830] sm:$0xff]  ;;  %v193_v14 = vld [vmem:[#allocation5 + $0x158] sm:$0xff] }
 0x194   :  { %3264 = vmatpush2.bf16.msra.mxu0 %v6260_v32  ;;  %v544_v32 = vld [vmem:[#allocation5 + $0xc50] sm:$0xff]  ;;  %v6453_v46 = vcombine.high %v408_v40, %v412_v42 }
 0x195   :  { %3315 = vmatprep.subr.bf16.mxu0 %v6509_v34  ;;  %v6468_v34 = vcombine.low %v424_v22, %v428_v23  ;;  %v528_v48 = vld [vmem:[#allocation5 + $0xbd0] sm:$0xff] }
 0x196   :  { %3305 = vmatpush2.bf16.msra.mxu1 %v6388_v33  ;;  %v548_v33 = vld [vmem:[#allocation5 + $0xc70] sm:$0xff] }
 0x197   :  { %3356 = vmatprep.subr.bf16.mxu1 %v6637_v37  ;;  %3266 = vmatmul.mubr.bf16.vlgmr.msra.gmra.mxu0 %v7852_v16  ;;  %v6596_v37 = vcombine.low %v552_v24, %v556_v25  ;;  %v6589_v39 = vcombine.high %v544_v32, %v548_v33  ;;  %v532_v49 = vld [vmem:[#allocation5 + $0xbf0] sm:$0xff] }
 0x198   :  { %3316 = vmatpush1.bf16.msra.mxu0 %v6508_v43  ;;  %3347 = vmatprep.mubr.bf16.mxu0 %v7863_v28  ;;  %v536_v43 = vld [vmem:[#allocation5 + $0xc10] sm:$0xff]  ;;  %v6573_v61 = vcombine.high %v528_v48, %v532_v49 }
 0x199   :  { %v7904_v50 = vpop.f32.mrf.mxu1  ;;  %3307 = vmatmul.mubr.bf16.vlgmr.msra.gmra.mxu1 %v7856_v19  ;;  %3317 = vmatprep.subr.bf16.mxu0 %v6501_v45  ;;  %v6460_v45 = vcombine.low %v416_v29, %v420_v31  ;;  %v520_v63 = vld [vmem:[#allocation5 + $0xb90] sm:$0xff] }
 0x19a   :  { %3357 = vmatpush1.bf16.msra.mxu1 %v6636_v44  ;;  %3388 = vmatprep.mubr.bf16.mxu1 %v7757_v36  ;;  %v540_v44 = vld [vmem:[#allocation5 + $0xc30] sm:$0xff] }
 0x19b   :  { %v7907_v57 = vpop.f32.mrf.mxu1  ;;  %3358 = vmatprep.subr.bf16.mxu1 %v6629_v21  ;;  %v6588_v21 = vcombine.low %v544_v32, %v548_v33  ;;  %v6581_v47 = vcombine.high %v536_v43, %v540_v44  ;;  %v524_v1 = vld [vmem:[#allocation5 + $0xbb0] sm:$0xff] }
 0x19c   :  { %3318 = vmatpush1.bf16.msra.mxu0 %v6500_v52  ;;  %v209_v52 = vld [vmem:[#allocation5 + $0x1d8] sm:$0xff]  ;;  %v512_v11 = vld [vmem:[#allocation5 + $0xb50] sm:$0xff] }
 0x19d   :  { %v3066_v3 = vpop.f32.mrf.mxu1  ;;  %3319 = vmatprep.subr.bf16.mxu0 %v6493_v56  ;;  %v6452_v56 = vcombine.low %v408_v40, %v412_v42  ;;  %v516_v12 = vld [vmem:[#allocation5 + $0xb70] sm:$0xff] }
 0x19e   :  { %3359 = vmatpush1.bf16.msra.mxu1 %v6628_v55  ;;  %v213_v55 = vld [vmem:[#allocation5 + $0x1f8] sm:$0xff]  ;;  %v6557_v23 = vcombine.high %v512_v11, %v516_v12  ;;  %v6556_v31 = vcombine.low %v512_v11, %v516_v12 }
 0x19f   :  { %v3067_v9 = vpop.f32.mrf.mxu1  ;;  %3360 = vmatprep.subr.bf16.mxu1 %v6621_v60  ;;  %v6580_v60 = vcombine.low %v536_v43, %v540_v44  ;;  %v6255_v62 = vcombine.high %v209_v52, %v213_v55  ;;  %v201_v3 = vld [vmem:[#allocation5 + $0x198] sm:$0xff]  ;;  %v488_v43 = vld [vmem:[#allocation5 + $0xa90] sm:$0xff] }
 0x1a0   :  { %3320 = vmatpush1.bf16.msra.mxu0 %v6492_v4  ;;  %v205_v4 = vld [vmem:[#allocation5 + $0x1b8] sm:$0xff]  ;;  %v6565_v9 = vcombine.high %v520_v63, %v524_v1  ;;  %v492_v44 = vld [vmem:[#allocation5 + $0xab0] sm:$0xff] }
 0x1a1   :  { %3321 = vmatprep.subr.bf16.mxu0 %v6485_v8  ;;  %v6254_v8 = vcombine.low %v209_v52, %v213_v55  ;;  %v6246_v22 = vcombine.low %v201_v3, %v205_v4  ;;  %v480_v52 = vld [vmem:[#allocation5 + $0xa50] sm:$0xff] }
 0x1a2   :  { %3361 = vmatpush1.bf16.msra.mxu1 %v6620_v7  ;;  %v6572_v7 = vcombine.low %v528_v48, %v532_v49  ;;  %v6533_v48 = vcombine.high %v488_v43, %v492_v44  ;;  %v484_v55 = vld [vmem:[#allocation5 + $0xa70] sm:$0xff] }
 0x1a3   :  { %3362 = vmatprep.subr.bf16.mxu1 %v6613_v10  ;;  %v6247_v10 = vcombine.high %v201_v3, %v205_v4  ;;  %v472_v3 = vld [vmem:[#allocation5 + $0xa10] sm:$0xff] }
 0x1a4   :  { %3322 = vmatpush1.bf16.msra.mxu0 %v6484_v15  ;;  %v197_v15 = vld [vmem:[#allocation5 + $0x178] sm:$0xff]  ;;  %v476_v4 = vld [vmem:[#allocation5 + $0xa30] sm:$0xff] }
 0x1a5   :  { %3323 = vmatprep.subr.bf16.mxu0 %v6477_v18  ;;  %v6564_v18 = vcombine.low %v520_v63, %v524_v1  ;;  %v6525_v63 = vcombine.high %v480_v52, %v484_v55  ;;  %v6517_v11 = vcombine.high %v472_v3, %v476_v4 }
 0x1a6   :  { %3363 = vmatpush1.bf16.msra.mxu1 %v6612_v17 }
 0x1a7   :  { %3364 = vmatprep.subr.bf16.mxu1 %v6605_v20 }
 0x1a8   :  { %3324 = vmatpush1.bf16.msra.mxu0 %v6476_v26  ;;  %v6239_v26 = vcombine.high %v193_v14, %v197_v15 }
 0x1a9   :  { %3325 = vmatprep.subr.bf16.mxu0 %v6469_v27  ;;  %v508_v27 = vld [vmem:[#allocation5 + $0xb30] sm:$0xff] }
 0x1aa   :  { %3365 = vmatpush1.bf16.msra.mxu1 %v6604_v53  ;;  %v504_v53 = vld [vmem:[#allocation5 + $0xb10] sm:$0xff] }
 0x1ab   :  { %3366 = vmatprep.subr.bf16.mxu1 %v6597_v54  ;;  %v189_v54 = vld [vmem:[#allocation5 + $0x138] sm:$0xff]  ;;  %v6549_v33 = vcombine.high %v504_v53, %v508_v27 }
 0x1ac   :  { %3326 = vmatpush1.bf16.msra.mxu0 %v6468_v34  ;;  %v496_v34 = vld [vmem:[#allocation5 + $0xad0] sm:$0xff] }
 0x1ad   :  { %3327 = vmatprep.subr.bf16.mxu0 %v6461_v38  ;;  %v177_v38 = vld [vmem:[#allocation5 + $0xd8] sm:$0xff] }
 0x1ae   :  { %3367 = vmatpush1.bf16.msra.mxu1 %v6596_v37  ;;  %v500_v37 = vld [vmem:[#allocation5 + $0xaf0] sm:$0xff] }
 0x1af   :  { %3368 = vmatprep.subr.bf16.mxu1 %v6589_v39  ;;  %v181_v39 = vld [vmem:[#allocation5 + $0xf8] sm:$0xff] }
 0x1b0   :  { %3328 = vmatpush1.bf16.msra.mxu0 %v6460_v45  ;;  %v6223_v42 = vcombine.high %v177_v38, %v181_v39  ;;  %v169_v45 = vld [vmem:[#allocation5 + $0x98] sm:$0xff] }
 0x1b1   :  { %3329 = vmatprep.subr.bf16.mxu0 %v6453_v46  ;;  %v6540_v46 = vcombine.low %v496_v34, %v500_v37 }
 0x1b2   :  { %3369 = vmatpush1.bf16.msra.mxu1 %v6588_v21  ;;  %v173_v21 = vld [vmem:[#allocation5 + $0xb8] sm:$0xff] }
 0x1b3   :  { %3370 = vmatprep.subr.bf16.mxu1 %v6581_v47  ;;  %v6222_v47 = vcombine.low %v177_v38, %v181_v39  ;;  %v6215_v49 = vcombine.high %v169_v45, %v173_v21 }
 0x1b4   :  { %3330 = vmatpush1.bf16.msra.mxu0 %v6452_v56  ;;  %v161_v56 = vld [vmem:[#allocation5 + $0x58] sm:$0xff] }
 0x1b5   :  { %3331 = vmatprep.subr.bf16.mxu0 %v6573_v61  ;;  %v6532_v61 = vcombine.low %v488_v43, %v492_v44  ;;  %v249_v43 = vld [vmem:[#allocation5 + $0x318] sm:$0xff] }
 0x1b6   :  { %3371 = vmatpush1.bf16.msra.mxu1 %v6580_v60  ;;  %v165_v60 = vld [vmem:[#allocation5 + $0x78] sm:$0xff] }
 0x1b7   :  { %3397 = vmatprep.subr.bf16.mxu1 %v6255_v62  ;;  %v3021_v13 = vpop.f32.mrf.mxu0  ;;  %v6214_v62 = vcombine.low %v169_v45, %v173_v21  ;;  %v6207_v1 = vcombine.high %v161_v56, %v165_v60  ;;  %v253_v44 = vld [vmem:[#allocation5 + $0x338] sm:$0xff] }
 0x1b8   :  { %v3022_v17 = vadd.f32 %v3021_v13, %v7899_v30  ;;  %3332 = vmatpush2.bf16.msra.mxu0 %v6572_v7  ;;  %v153_v7 = vld [vmem:[#allocation5 + $0x18] sm:$0xff] }
 0x1b9   :  { %3389 = vmatmul.mubr.bf16.vlgmr.msra.gmra.mxu1 %v7879_v5  ;;  %v3023_v20 = vpop.f32.mrf.mxu0  ;;  %3333 = vmatprep.subr.bf16.mxu0 %v6565_v9  ;;  %v185_v5 = vld [vmem:[#allocation5 + $0x118] sm:$0xff]  ;;  %v6524_v9 = vcombine.low %v480_v52, %v484_v55 }
 0x1ba   :  { %3398 = vmatpush1.bf16.msra.mxu1 %v6254_v8  ;;  %v7914_v24 = vadd.f32 %v7904_v50, %v3022_v17  ;;  %v3024_v25 = vadd.f32 %v3023_v20, %v7901_v41  ;;  %3429 = vmatprep.mubr.bf16.mxu1 %v7842_v58  ;;  %v6238_v50 = vcombine.low %v193_v14, %v197_v15  ;;  %v157_v8 = vld [vmem:[#allocation5 + $0x38] sm:$0xff] }
 0x1bb   :  { %3399 = vmatprep.subr.bf16.mxu1 %v6247_v10  ;;  %v3025_v30 = vpop.f32.mrf.mxu0  ;;  %v6231_v41 = vcombine.high %v185_v5, %v189_v54  ;;  %v6548_v58 = vcombine.low %v504_v53, %v508_v27  ;;  %v6230_v40 = vcombine.low %v185_v5, %v189_v54  ;;  %v6206_v10 = vcombine.low %v161_v56, %v165_v60  ;;  %v337_v13 = vld [vmem:[#allocation5 + $0x5d8] sm:$0xff] }
 0x1bc   :  { %v7919_v29 = vadd.f32 %v7907_v57, %v3024_v25  ;;  %3334 = vmatpush2.bf16.msra.mxu0 %v6564_v18  ;;  %v6541_v57 = vcombine.high %v496_v34, %v500_v37  ;;  %v6199_v12 = vcombine.high %v153_v7, %v157_v8  ;;  %v341_v14 = vld [vmem:[#allocation5 + $0x5f8] sm:$0xff]  ;;  %v6516_v18 = vcombine.low %v472_v3, %v476_v4 }
 0x1bd   :  { %v3026_v32 = vpop.f32.mrf.mxu0  ;;  %3335 = vmatprep.subr.bf16.mxu0 %v6557_v23  ;;  %v273_v15 = vld [vmem:[#allocation5 + $0x3d8] sm:$0xff]  ;;  %v6198_v20 = vcombine.low %v153_v7, %v157_v8  ;;  %v6382_v30 = vcombine.low %v337_v13, %v341_v14  ;;  %vm3561_vm2 = vcmp.gt.f32.partialorder %v7914_v24, 0.0 }
 0x1be   :  { %3400 = vmatpush1.bf16.msra.mxu1 %v6246_v22  ;;  %v277_v17 = vld [vmem:[#allocation5 + $0x3f8] sm:$0xff]  ;;  %v6383_v22 = vcombine.high %v337_v13, %v341_v14  ;;  %vm3562_vm0 = vcmp.gt.f32.partialorder %v7919_v29, 0.0 }
 0x1bf   :  { %3401 = vmatprep.subr.bf16.mxu1 %v6239_v26  ;;  %v6319_v23 = vcombine.high %v273_v15, %v277_v17  ;;  %v329_v25 = vld [vmem:[#allocation5 + $0x598] sm:$0xff]  ;;  %v6318_v5 = vcombine.low %v273_v15, %v277_v17 }
 0x1c0   :  { %3336 = vmatpush2.bf16.msra.mxu0 %v6556_v31  ;;  %v333_v26 = vld [vmem:[#allocation5 + $0x5b8] sm:$0xff] }
 0x1c1   :  { %3337 = vmatprep.subr.bf16.mxu0 %v6549_v33  ;;  %v265_v53 = vld [vmem:[#allocation5 + $0x398] sm:$0xff]  ;;  %v6375_v54 = vcombine.high %v329_v25, %v333_v26  ;;  %v6374_v37 = vcombine.low %v329_v25, %v333_v26 }
 0x1c2   :  { %3402 = vmatpush1.bf16.msra.mxu1 %v6238_v50  ;;  %v269_v27 = vld [vmem:[#allocation5 + $0x3b8] sm:$0xff] }
 0x1c3   :  { %3403 = vmatprep.subr.bf16.mxu1 %v6231_v41  ;;  %v6311_v31 = vcombine.high %v265_v53, %v269_v27  ;;  %v321_v32 = vld [vmem:[#allocation5 + $0x558] sm:$0xff]  ;;  %v6310_v38 = vcombine.low %v265_v53, %v269_v27 }
 0x1c4   :  { %3338 = vmatpush2.bf16.msra.mxu0 %v6548_v58  ;;  %v325_v50 = vld [vmem:[#allocation5 + $0x578] sm:$0xff] }
 0x1c5   :  { %3339 = vmatprep.subr.bf16.mxu0 %v6541_v57  ;;  %v257_v33 = vld [vmem:[#allocation5 + $0x358] sm:$0xff]  ;;  %v6367_v39 = vcombine.high %v321_v32, %v325_v50  ;;  %v6366_v21 = vcombine.low %v321_v32, %v325_v50 }
 0x1c6   :  { %3404 = vmatpush1.bf16.msra.mxu1 %v6230_v40  ;;  %v261_v41 = vld [vmem:[#allocation5 + $0x378] sm:$0xff] }
 0x1c7   :  { %3405 = vmatprep.subr.bf16.mxu1 %v6223_v42  ;;  %v6303_v40 = vcombine.high %v257_v33, %v261_v41  ;;  %v313_v57 = vld [vmem:[#allocation5 + $0x518] sm:$0xff] }
 0x1c8   :  { %3340 = vmatpush2.bf16.msra.mxu0 %v6540_v46  ;;  %v317_v42 = vld [vmem:[#allocation5 + $0x538] sm:$0xff]  ;;  %v6302_v46 = vcombine.low %v257_v33, %v261_v41 }
 0x1c9   :  { %3341 = vmatprep.subr.bf16.mxu0 %v6533_v48  ;;  %v6295_v48 = vcombine.high %v249_v43, %v253_v44  ;;  %v309_v52 = vld [vmem:[#allocation5 + $0x4f8] sm:$0xff]  ;;  %v6358_v60 = vcombine.low %v313_v57, %v317_v42 }
 0x1ca   :  { %3406 = vmatpush1.bf16.msra.mxu1 %v6222_v47  ;;  %v6359_v47 = vcombine.high %v313_v57, %v317_v42  ;;  %v241_v55 = vld [vmem:[#allocation5 + $0x2d8] sm:$0xff] }
 0x1cb   :  { %3407 = vmatprep.subr.bf16.mxu1 %v6215_v49  ;;  %v305_v49 = vld [vmem:[#allocation5 + $0x4d8] sm:$0xff] }
 0x1cc   :  { %3342 = vmatpush2.bf16.msra.mxu0 %v6532_v61  ;;  %v245_v56 = vld [vmem:[#allocation5 + $0x2f8] sm:$0xff]  ;;  %v6294_v61 = vcombine.low %v249_v43, %v253_v44  ;;  %v6350_v8 = vcombine.low %v305_v49, %v309_v52 }
 0x1cd   :  { %3343 = vmatprep.subr.bf16.mxu0 %v6525_v63  ;;  %v6287_v63 = vcombine.high %v241_v55, %v245_v56  ;;  %v301_v3 = vld [vmem:[#allocation5 + $0x4b8] sm:$0xff] }
 0x1ce   :  { %3408 = vmatpush1.bf16.msra.mxu1 %v6214_v62  ;;  %v6351_v62 = vcombine.high %v305_v49, %v309_v52  ;;  %v233_v4 = vld [vmem:[#allocation5 + $0x298] sm:$0xff] }
 0x1cf   :  { %3409 = vmatprep.subr.bf16.mxu1 %v6207_v1  ;;  %v297_v1 = vld [vmem:[#allocation5 + $0x498] sm:$0xff] }
 0x1d0   :  { %3344 = vmatpush2.bf16.msra.mxu0 %v6524_v9  ;;  %v237_v7 = vld [vmem:[#allocation5 + $0x2b8] sm:$0xff]  ;;  %v6286_v9 = vcombine.low %v241_v55, %v245_v56  ;;  %v6342_v17 = vcombine.low %v297_v1, %v301_v3 }
 0x1d1   :  { %3345 = vmatprep.subr.bf16.mxu0 %v6517_v11  ;;  %v6279_v11 = vcombine.high %v233_v4, %v237_v7  ;;  %v293_v13 = vld [vmem:[#allocation5 + $0x478] sm:$0xff] }
 0x1d2   :  { %3410 = vmatpush1.bf16.msra.mxu1 %v6206_v10  ;;  %v6343_v10 = vcombine.high %v297_v1, %v301_v3  ;;  %v225_v14 = vld [vmem:[#allocation5 + $0x258] sm:$0xff] }
 0x1d3   :  { %3411 = vmatprep.subr.bf16.mxu1 %v6199_v12  ;;  %v289_v12 = vld [vmem:[#allocation5 + $0x458] sm:$0xff] }
 0x1d4   :  { %3346 = vmatpush2.bf16.msra.mxu0 %v6516_v18  ;;  %v229_v15 = vld [vmem:[#allocation5 + $0x278] sm:$0xff]  ;;  %v6278_v18 = vcombine.low %v233_v4, %v237_v7  ;;  %v6334_v27 = vcombine.low %v289_v12, %v293_v13 }
 0x1d5   :  { %3438 = vmatprep.subr.bf16.mxu0 %v6383_v22  ;;  %v6271_v22 = vcombine.high %v225_v14, %v229_v15  ;;  %v285_v25 = vld [vmem:[#allocation5 + $0x438] sm:$0xff] }
 0x1d6   :  { %3412 = vmatpush1.bf16.msra.mxu1 %v6198_v20  ;;  %v6335_v20 = vcombine.high %v289_v12, %v293_v13  ;;  %v217_v26 = vld [vmem:[#allocation5 + $0x218] sm:$0xff] }
 0x1d7   :  { %3413 = vmatprep.subr.bf16.mxu1 %v6319_v23  ;;  %3348 = vmatmul.mubr.bf16.vlgmr.msra.gmra.mxu0 %v7871_v35  ;;  %v281_v23 = vld [vmem:[#allocation5 + $0x418] sm:$0xff] }
 0x1d8   :  { %3439 = vmatpush1.bf16.msra.mxu0 %v6382_v30  ;;  %3470 = vmatprep.mubr.bf16.mxu0 %v7846_v59  ;;  %v221_v53 = vld [vmem:[#allocation5 + $0x238] sm:$0xff]  ;;  %v6270_v30 = vcombine.low %v225_v14, %v229_v15 }
 0x1d9   :  { %v7922_v34 = vpop.f32.mrf.mxu1  ;;  %3440 = vmatprep.subr.bf16.mxu0 %v6375_v54  ;;  %v610_v54 = vsub.s32 2, %v7885_v51  ;;  %v401_v32 = vld [vmem:[#allocation5 + $0x7d8] sm:$0xff] }
 0x1da   :  { %3414 = vmatpush2.bf16.msra.mxu1 %v6318_v5  ;;  %v6327_v5 = vcombine.high %v281_v23, %v285_v25  ;;  %v405_v50 = vld [vmem:[#allocation5 + $0x7f8] sm:$0xff] }
 0x1db   :  { %v7925_v58 = vpop.f32.mrf.mxu1  ;;  %3415 = vmatprep.subr.bf16.mxu1 %v6311_v31  ;;  %v6263_v31 = vcombine.high %v217_v26, %v221_v53  ;;  %v465_v33 = vld [vmem:[#allocation5 + $0x9d8] sm:$0xff] }
 0x1dc   :  { %3441 = vmatpush1.bf16.msra.mxu0 %v6374_v37  ;;  %v469_v41 = vld [vmem:[#allocation5 + $0x9f8] sm:$0xff]  ;;  %v6326_v37 = vcombine.low %v281_v23, %v285_v25 }
 0x1dd   :  { %v3107_v45 = vpop.f32.mrf.mxu1  ;;  %3442 = vmatprep.subr.bf16.mxu0 %v6367_v39  ;;  %v6447_v39 = vcombine.high %v401_v32, %v405_v50  ;;  %v6511_v57 = vcombine.high %v465_v33, %v469_v41  ;;  %v393_v42 = vld [vmem:[#allocation5 + $0x798] sm:$0xff] }
 0x1de   :  { %3416 = vmatpush2.bf16.msra.mxu1 %v6310_v38  ;;  %v6262_v38 = vcombine.low %v217_v26, %v221_v53  ;;  %v397_v43 = vld [vmem:[#allocation5 + $0x7b8] sm:$0xff] }
 0x1df   :  { %v3108_v59 = vpop.f32.mrf.mxu1  ;;  %3417 = vmatprep.subr.bf16.mxu1 %v6303_v40  ;;  %v611_v40 = vrot.slane %v7890_v2, %v610_v54  ;;  %v457_v44 = vld [vmem:[#allocation5 + $0x998] sm:$0xff] }
 0x1e0   :  { %3443 = vmatpush1.bf16.msra.mxu0 %v6366_v21  ;;  %v461_v45 = vld [vmem:[#allocation5 + $0x9b8] sm:$0xff]  ;;  %v6446_v21 = vcombine.low %v401_v32, %v405_v50 }
 0x1e1   :  { %3444 = vmatprep.subr.bf16.mxu0 %v6359_v47  ;;  %v6439_v47 = vcombine.high %v393_v42, %v397_v43  ;;  %v3104_v59 = vadd.f32 %v7922_v34, %v611_v40  ;;  %v385_v49 = vld [vmem:[#allocation5 + $0x758] sm:$0xff] }
 0x1e2   :  { %3418 = vmatpush2.bf16.msra.mxu1 %v6302_v46  ;;  %v6510_v46 = vcombine.low %v465_v33, %v469_v41  ;;  %v389_v52 = vld [vmem:[#allocation5 + $0x778] sm:$0xff] }
 0x1e3   :  { %3419 = vmatprep.subr.bf16.mxu1 %v6295_v48  ;;  %v6503_v48 = vcombine.high %v457_v44, %v461_v45  ;;  %v449_v2 = vld [vmem:[#allocation5 + $0x958] sm:$0xff]  ;;  %v6431_v1 = vcombine.high %v385_v49, %v389_v52 }
 0x1e4   :  { %3445 = vmatpush1.bf16.msra.mxu0 %v6358_v60  ;;  %v453_v56 = vld [vmem:[#allocation5 + $0x978] sm:$0xff] }
 0x1e5   :  { %3446 = vmatprep.subr.bf16.mxu0 %v6351_v62  ;;  %v6495_v34 = vcombine.high %v449_v2, %v453_v56  ;;  %v377_v3 = vld [vmem:[#allocation5 + $0x718] sm:$0xff] }
 0x1e6   :  { %3420 = vmatpush2.bf16.msra.mxu1 %v6294_v61  ;;  %v6438_v61 = vcombine.low %v393_v42, %v397_v43  ;;  %v381_v4 = vld [vmem:[#allocation5 + $0x738] sm:$0xff] }
 0x1e7   :  { %3421 = vmatprep.subr.bf16.mxu1 %v6287_v63  ;;  %v6502_v63 = vcombine.low %v457_v44, %v461_v45  ;;  %v6423_v12 = vcombine.high %v377_v3, %v381_v4  ;;  %v369_v14 = vld [vmem:[#allocation5 + $0x6d8] sm:$0xff] }
 0x1e8   :  { %3447 = vmatpush1.bf16.msra.mxu0 %v6350_v8  ;;  %v441_v8 = vld [vmem:[#allocation5 + $0x918] sm:$0xff] }
 0x1e9   :  { %3448 = vmatprep.subr.bf16.mxu0 %v6343_v10  ;;  %v6430_v10 = vcombine.low %v385_v49, %v389_v52  ;;  %v373_v15 = vld [vmem:[#allocation5 + $0x6f8] sm:$0xff] }
 0x1ea   :  { %3422 = vmatpush2.bf16.msra.mxu1 %v6286_v9  ;;  %v445_v9 = vld [vmem:[#allocation5 + $0x938] sm:$0xff] }
 0x1eb   :  { %3423 = vmatprep.subr.bf16.mxu1 %v6279_v11  ;;  %v6494_v11 = vcombine.low %v449_v2, %v453_v56  ;;  %v6487_v13 = vcombine.high %v441_v8, %v445_v9  ;;  %v361_v25 = vld [vmem:[#allocation5 + $0x698] sm:$0xff] }
 0x1ec   :  { %3449 = vmatpush1.bf16.msra.mxu0 %v6342_v17  ;;  %v433_v17 = vld [vmem:[#allocation5 + $0x8d8] sm:$0xff] }
 0x1ed   :  { %3450 = vmatprep.subr.bf16.mxu0 %v6335_v20  ;;  %v6422_v20 = vcombine.low %v377_v3, %v381_v4  ;;  %v365_v26 = vld [vmem:[#allocation5 + $0x6b8] sm:$0xff] }
 0x1ee   :  { %3424 = vmatpush2.bf16.msra.mxu1 %v6278_v18  ;;  %v437_v18 = vld [vmem:[#allocation5 + $0x8f8] sm:$0xff] }
 0x1ef   :  { %3425 = vmatprep.subr.bf16.mxu1 %v6271_v22  ;;  %v6415_v22 = vcombine.high %v369_v14, %v373_v15  ;;  %v6479_v23 = vcombine.high %v433_v17, %v437_v18  ;;  %v425_v53 = vld [vmem:[#allocation5 + $0x898] sm:$0xff] }
 0x1f0   :  { %3451 = vmatpush1.bf16.msra.mxu0 %v6334_v27  ;;  %v429_v27 = vld [vmem:[#allocation5 + $0x8b8] sm:$0xff] }
 0x1f1   :  { %3452 = vmatprep.subr.bf16.mxu0 %v6327_v5  ;;  %v6478_v5 = vcombine.low %v433_v17, %v437_v18  ;;  %v6471_v32 = vcombine.high %v425_v53, %v429_v27  ;;  %v353_v50 = vld [vmem:[#allocation5 + $0x658] sm:$0xff] }
 0x1f2   :  { %3426 = vmatpush2.bf16.msra.mxu1 %v6270_v30  ;;  %v6414_v30 = vcombine.low %v369_v14, %v373_v15  ;;  %v357_v33 = vld [vmem:[#allocation5 + $0x678] sm:$0xff] }
 0x1f3   :  { %3427 = vmatprep.subr.bf16.mxu1 %v6263_v31  ;;  %v6407_v31 = vcombine.high %v361_v25, %v365_v26  ;;  %v417_v41 = vld [vmem:[#allocation5 + $0x858] sm:$0xff]  ;;  %v6399_v40 = vcombine.high %v353_v50, %v357_v33 }
 0x1f4   :  { %3453 = vmatpush1.bf16.msra.mxu0 %v6326_v37  ;;  %v421_v37 = vld [vmem:[#allocation5 + $0x878] sm:$0xff] }
 0x1f5   :  { %3454 = vmatprep.subr.bf16.mxu0 %v6447_v39  ;;  %v6470_v39 = vcombine.low %v425_v53, %v429_v27  ;;  %v345_v42 = vld [vmem:[#allocation5 + $0x618] sm:$0xff] }
 0x1f6   :  { %3428 = vmatpush2.bf16.msra.mxu1 %v6262_v38  ;;  %v6406_v38 = vcombine.low %v361_v25, %v365_v26  ;;  %v349_v43 = vld [vmem:[#allocation5 + $0x638] sm:$0xff] }
 0x1f7   :  { %3479 = vmatprep.subr.bf16.mxu1 %v6511_v57  ;;  %v3144_v55 = vpop.f32.mrf.mxu0  ;;  %v6463_v57 = vcombine.high %v417_v41, %v421_v37  ;;  %v409_v44 = vld [vmem:[#allocation5 + $0x818] sm:$0xff]  ;;  %v6390_v2 = vcombine.low %v345_v42, %v349_v43 }
 0x1f8   :  { %v7932_v60 = vadd.f32 %v3144_v55, %v3104_v59  ;;  %3455 = vmatpush2.bf16.msra.mxu0 %v6446_v21  ;;  %v413_v45 = vld [vmem:[#allocation5 + $0x838] sm:$0xff]  ;;  %v6398_v21 = vcombine.low %v353_v50, %v357_v33 }
 0x1f9   :  { %3430 = vmatmul.mubr.bf16.vlgmr.msra.gmra.mxu1 %v7852_v16  ;;  %v7935_v62 = vpop.f32.mrf.mxu0  ;;  %3456 = vmatprep.subr.bf16.mxu0 %v6439_v47  ;;  %v6391_v47 = vcombine.high %v345_v42, %v349_v43  ;;  %v6455_v59 = vcombine.high %v409_v44, %v413_v45  ;;  %v597_v49 = vld [vmem:[#allocation5 + $0xdf8] sm:$0xff]  ;;  %v6454_v56 = vcombine.low %v409_v44, %v413_v45  ;;  %v7946_v43 = vld [vmem:[#allocation7] sm:$0xff] }
 0x1fa   :  { %3480 = vmatpush1.bf16.msra.mxu1 %v6510_v46  ;;  %3511 = vmatprep.mubr.bf16.mxu1 %v7863_v28  ;;  %v6486_v28 = vcombine.low %v441_v8, %v445_v9  ;;  %v6462_v46 = vcombine.low %v417_v41, %v421_v37  ;;  %v529_v52 = vld [vmem:[#allocation5 + $0xbd8] sm:$0xff] }
 0x1fb   :  { %3481 = vmatprep.subr.bf16.mxu1 %v6503_v48  ;;  %v3148_v7 = vpop.f32.mrf.mxu0  ;;  %v593_v48 = vld [vmem:[#allocation5 + $0xdd8] sm:$0xff] }
 0x1fc   :  { %3457 = vmatpush2.bf16.msra.mxu0 %v6438_v61  ;;  %v533_v55 = vld [vmem:[#allocation5 + $0xbf8] sm:$0xff]  ;;  %v6639_v61 = vcombine.high %v593_v48, %v597_v49  ;;  %v6638_v7 = vcombine.low %v593_v48, %v597_v49 }
 0x1fd   :  { %v3149_v16 = vpop.f32.mrf.mxu0  ;;  %3458 = vmatprep.subr.bf16.mxu0 %v6431_v1  ;;  %v585_v1 = vld [vmem:[#allocation5 + $0xd98] sm:$0xff]  ;;  %v6574_v8 = vcombine.low %v529_v52, %v533_v55 }
 0x1fe   :  { %3482 = vmatpush1.bf16.msra.mxu1 %v6502_v63  ;;  %v6575_v63 = vcombine.high %v529_v52, %v533_v55  ;;  %v521_v3 = vld [vmem:[#allocation5 + $0xb98] sm:$0xff] }
 0x1ff   :  { %3483 = vmatprep.subr.bf16.mxu1 %v6495_v34  ;;  %v589_v34 = vld [vmem:[#allocation5 + $0xdb8] sm:$0xff] }
 0x200   :  { %3459 = vmatpush2.bf16.msra.mxu0 %v6430_v10  ;;  %v525_v4 = vld [vmem:[#allocation5 + $0xbb8] sm:$0xff]  ;;  %v6631_v9 = vcombine.high %v585_v1, %v589_v34  ;;  %v6630_v17 = vcombine.low %v585_v1, %v589_v34 }
 0x201   :  { %3460 = vmatprep.subr.bf16.mxu0 %v6423_v12  ;;  %v6567_v10 = vcombine.high %v521_v3, %v525_v4  ;;  %v577_v16 = vld [vmem:[#allocation5 + $0xd58] sm:$0xff] }
 0x202   :  { %3484 = vmatpush1.bf16.msra.mxu1 %v6494_v11  ;;  %v581_v11 = vld [vmem:[#allocation5 + $0xd78] sm:$0xff] }
 0x203   :  { %3485 = vmatprep.subr.bf16.mxu1 %v6487_v13  ;;  %v513_v13 = vld [vmem:[#allocation5 + $0xb58] sm:$0xff] }
 0x204   :  { %3461 = vmatpush2.bf16.msra.mxu0 %v6422_v20  ;;  %v517_v14 = vld [vmem:[#allocation5 + $0xb78] sm:$0xff] }
 0x205   :  { %3462 = vmatprep.subr.bf16.mxu0 %v6415_v22  ;;  %v6623_v22 = vcombine.high %v577_v16, %v581_v11  ;;  %v6559_v25 = vcombine.high %v513_v13, %v517_v14  ;;  %v569_v26 = vld [vmem:[#allocation5 + $0xd18] sm:$0xff]  ;;  %v6558_v50 = vcombine.low %v513_v13, %v517_v14 }
 0x206   :  { %3486 = vmatpush1.bf16.msra.mxu1 %v6486_v28  ;;  %v6566_v28 = vcombine.low %v521_v3, %v525_v4  ;;  %v489_v48 = vld [vmem:[#allocation5 + $0xa98] sm:$0xff] }
 0x207   :  { %3487 = vmatprep.subr.bf16.mxu1 %v6479_v23  ;;  %v493_v49 = vld [vmem:[#allocation5 + $0xab8] sm:$0xff] }
 0x208   :  { %3463 = vmatpush2.bf16.msra.mxu0 %v6414_v30  ;;  %v505_v30 = vld [vmem:[#allocation5 + $0xb18] sm:$0xff] }
 0x209   :  { %3464 = vmatprep.subr.bf16.mxu0 %v6407_v31  ;;  %v549_v1 = vld [vmem:[#allocation5 + $0xc78] sm:$0xff] }
 0x20a   :  { %3488 = vmatpush1.bf16.msra.mxu1 %v6478_v5  ;;  %v509_v5 = vld [vmem:[#allocation5 + $0xb38] sm:$0xff] }
 0x20b   :  { %3489 = vmatprep.subr.bf16.mxu1 %v6471_v32  ;;  %v6551_v37 = vcombine.high %v505_v30, %v509_v5  ;;  %v6550_v45 = vcombine.low %v505_v30, %v509_v5  ;;  %v481_v3 = vld [vmem:[#allocation5 + $0xa58] sm:$0xff] }
 0x20c   :  { %3465 = vmatpush2.bf16.msra.mxu0 %v6406_v38  ;;  %v561_v38 = vld [vmem:[#allocation5 + $0xcd8] sm:$0xff] }
 0x20d   :  { %3466 = vmatprep.subr.bf16.mxu0 %v6399_v40  ;;  %v497_v40 = vld [vmem:[#allocation5 + $0xad8] sm:$0xff] }
 0x20e   :  { %3490 = vmatpush1.bf16.msra.mxu1 %v6470_v39  ;;  %v565_v39 = vld [vmem:[#allocation5 + $0xcf8] sm:$0xff] }
 0x20f   :  { %3491 = vmatprep.subr.bf16.mxu1 %v6463_v57  ;;  %v501_v57 = vld [vmem:[#allocation5 + $0xaf8] sm:$0xff]  ;;  %v6606_v52 = vcombine.low %v561_v38, %v565_v39 }
 0x210   :  { %3467 = vmatpush2.bf16.msra.mxu0 %v6398_v21  ;;  %v6607_v21 = vcombine.high %v561_v38, %v565_v39  ;;  %v485_v4 = vld [vmem:[#allocation5 + $0xa78] sm:$0xff] }
 0x211   :  { %3468 = vmatprep.subr.bf16.mxu0 %v6391_v47  ;;  %v553_v47 = vld [vmem:[#allocation5 + $0xc98] sm:$0xff] }
 0x212   :  { %3492 = vmatpush1.bf16.msra.mxu1 %v6462_v46  ;;  %v6543_v46 = vcombine.high %v497_v40, %v501_v57  ;;  %v477_v13 = vld [vmem:[#allocation5 + $0xa38] sm:$0xff] }
 0x213   :  { %3493 = vmatprep.subr.bf16.mxu1 %v6455_v59  ;;  %v557_v59 = vld [vmem:[#allocation5 + $0xcb8] sm:$0xff] }
 0x214   :  { %3469 = vmatpush2.bf16.msra.mxu0 %v6390_v2  ;;  %v6542_v2 = vcombine.low %v497_v40, %v501_v57  ;;  %v7028_v30 = vld [vmem:[#allocation8 + $0x2e0] ss:$16 sps:$4 sm:$0xff]   ;;  %v7042_v38 = vld [vmem:[#allocation8 + $0x2a4] ss:$16 sps:$4 sm:$0xff]  }
 0x215   :  { %3520 = vmatprep.subr.bf16.mxu0 %v6639_v61  ;;  %v6535_v61 = vcombine.high %v489_v48, %v493_v49  ;;  %v7037_v39 = vld [vmem:[#allocation8 + $0xa0] ss:$16 sps:$4 sm:$0xff]   ;;  %v7048_v57 = vld [vmem:[#allocation8 + $0x284] ss:$16 sps:$4 sm:$0xff]  }
 0x216   :  { %3494 = vmatpush1.bf16.msra.mxu1 %v6454_v56  ;;  %v6599_v56 = vcombine.high %v553_v47, %v557_v59  ;;  %v7040_v40 = vld [vmem:[#allocation8 + $0x2a0] ss:$16 sps:$4 sm:$0xff]  }
 0x217   :  { %3495 = vmatprep.subr.bf16.mxu1 %v6575_v63  ;;  %v3226_v12 = vpop.f32.mrf.mxu0  ;;  %3471 = vmatmul.mubr.bf16.vlgmr.msra.gmra.mxu0 %v7856_v19  ;;  %v573_v19 = vld [vmem:[#allocation5 + $0xd38] sm:$0xff] }
 0x218   :  { %3521 = vmatpush1.bf16.msra.mxu0 %v6638_v7  ;;  %3552 = vmatprep.mubr.bf16.mxu0 %v7757_v36  ;;  %v6622_v36 = vcombine.low %v577_v16, %v581_v11  ;;  %v6615_v33 = vcombine.high %v569_v26, %v573_v19  ;;  %v6614_v42 = vcombine.low %v569_v26, %v573_v19  ;;  %v545_v63 = vld [vmem:[#allocation5 + $0xc58] sm:$0xff] }
 0x219   :  { %v3185_v15 = vpop.f32.mrf.mxu1  ;;  %v7941_v20 = vpop.f32.mrf.mxu0  ;;  %3522 = vmatprep.subr.bf16.mxu0 %v6631_v9  ;;  %v6598_v7 = vcombine.low %v553_v47, %v557_v59  ;;  %v6534_v9 = vcombine.low %v489_v48, %v493_v49  ;;  %v537_v16 = vld [vmem:[#allocation5 + $0xc18] sm:$0xff]  ;;  %v6590_v14 = vcombine.low %v545_v63, %v549_v1 }
 0x21a   :  { %v3186_v18 = vadd.f32 %v3185_v15, %v7932_v60  ;;  %3496 = vmatpush2.bf16.msra.mxu1 %v6574_v8  ;;  %v614_v60 = vsub.s32 3, %v7885_v51  ;;  %v541_v11 = vld [vmem:[#allocation5 + $0xc38] sm:$0xff] }
 0x21b   :  { %v3187_v23 = vpop.f32.mrf.mxu1  ;;  %3497 = vmatprep.subr.bf16.mxu1 %v6567_v10  ;;  %v3230_v27 = vpop.f32.mrf.mxu0  ;;  %v6591_v10 = vcombine.high %v545_v63, %v549_v1  ;;  %v7027_v26 = vld [vmem:[#allocation8 + $0xe4] ss:$16 sps:$4 sm:$0xff]   ;;  %v7025_v19 = vld [vmem:[#allocation8 + $0xe0] ss:$16 sps:$4 sm:$0xff]  }
 0x21c   :  { %v7943_v53 = vadd.f32 %v3226_v12, %v3186_v18  ;;  %3523 = vmatpush1.bf16.msra.mxu0 %v6630_v17  ;;  %v615_v44 = vrot.slane %v7946_v43, %v614_v60  ;;  %v473_v12 = vld [vmem:[#allocation5 + $0xa18] sm:$0xff]  ;;  %v6583_v17 = vcombine.high %v537_v16, %v541_v11 }
 0x21d   :  { %v3189_v31 = vpop.f32.mrf.mxu1  ;;  %v3231_v32 = vpop.f32.mrf.mxu0  ;;  %3524 = vmatprep.subr.bf16.mxu0 %v6623_v22  ;;  %v6519_v18 = vcombine.high %v473_v12, %v477_v13  ;;  %v6582_v22 = vcombine.low %v537_v16, %v541_v11  ;;  %v7052_v47 = vld [vmem:[#allocation8 + $0x260] ss:$16 sps:$4 sm:$0xff]   ;;  %v7057_v59 = vld [vmem:[#allocation8 + $0x44] ss:$16 sps:$4 sm:$0xff]  }
 0x21e   :  { %3498 = vmatpush2.bf16.msra.mxu1 %v6566_v28  ;;  %v3106_v55 = vadd.f32 %v7925_v58, %v615_v44  ;;  %v6527_v58 = vcombine.high %v481_v3, %v485_v4  ;;  %v3570_v28 = vmul.f32 0.2, %v7919_v29  ;;  %v7033_v31 = vld [vmem:[#allocation8 + $0xc4] ss:$16 sps:$4 sm:$0xff]   ;;  %v7046_v44 = vld [vmem:[#allocation8 + $0x280] ss:$16 sps:$4 sm:$0xff]  }
 0x21f   :  { %v3190_v41 = vpop.f32.mrf.mxu1  ;;  %3499 = vmatprep.subr.bf16.mxu1 %v6559_v25  ;;  %v6518_v25 = vcombine.low %v473_v12, %v477_v13  ;;  %v7060_v48 = vld [vmem:[#allocation8 + $0x244] ss:$16 sps:$4 sm:$0xff]   ;;  %v7055_v49 = vld [vmem:[#allocation8 + $0x40] ss:$16 sps:$4 sm:$0xff]   ;;  %vm3563_vm3 = vcmp.gt.f32.partialorder %v7943_v53, 0.0 }
 0x220   :  { %3525 = vmatpush1.bf16.msra.mxu0 %v6622_v36  ;;  %v3147_v34 = vadd.f32 %v7935_v62, %v3106_v55  ;;  %v6526_v62 = vcombine.low %v481_v3, %v485_v4  ;;  %v3578_v27 = vsel %vm3562_vm0, %v7919_v29, %v3570_v28  ;;  %v7527_v36 = vld [vmem:[#allocation2 + $0x18] ss:$0 sps:$4 sm:$0xff]   ;;  %v7031_v41 = vld [vmem:[#allocation8 + $0xc0] ss:$16 sps:$4 sm:$0xff]   ;;  %v618_v3 = vsub.s32 4, %v7885_v51 }
 0x221   :  { %3526 = vmatprep.subr.bf16.mxu0 %v6615_v33  ;;  %v7957_v32 = vpack.c.bf16 %v3578_v27, %v3578_v27  ;;  %v7034_v29 = vld [vmem:[#allocation8 + $0x2c0] ss:$16 sps:$4 sm:$0xff]   ;;  %v7063_v55 = vld [vmem:[#allocation8 + $0x24] ss:$16 sps:$4 sm:$0xff]  }
 0x222   :  { %3500 = vmatpush2.bf16.msra.mxu1 %v6558_v50  ;;  %v3188_v8 = vadd.f32 %v3187_v23, %v3147_v34  ;;  %v7036_v50 = vld [vmem:[#allocation8 + $0x2c4] ss:$16 sps:$4 sm:$0xff]   ;;  %v7067_v34 = vld [vmem:[#allocation8] ss:$16 sps:$4 sm:$0xff]  }
 0x223   :  { %3501 = vmatprep.subr.bf16.mxu1 %v6551_v37  ;;  %v7039_v37 = vld [vmem:[#allocation8 + $0xa4] ss:$16 sps:$4 sm:$0xff]   ;;  %v7070_v4 = vld [vmem:[#allocation8 + $0x200] ss:$16 sps:$4 sm:$0xff]  }
 0x224   :  { %3527 = vmatpush1.bf16.msra.mxu0 %v6614_v42  ;;  %v3229_v15 = vadd.f32 %v7941_v20, %v3188_v8  ;;  %v7030_v20 = vld [vmem:[#allocation8 + $0x2e4] ss:$16 sps:$4 sm:$0xff]   ;;  %v7043_v42 = vld [vmem:[#allocation8 + $0x80] ss:$16 sps:$4 sm:$0xff]  }
 0x225   :  { %3528 = vmatprep.subr.bf16.mxu0 %v6607_v21  ;;  %v7054_v21 = vld [vmem:[#allocation8 + $0x264] ss:$16 sps:$4 sm:$0xff]   ;;  %v7088_v27 = vld [vmem:[#allocation8 + $0x3a0] ss:$16 sps:$4 sm:$0xff]  }
 0x226   :  { %3502 = vmatpush2.bf16.msra.mxu1 %v6550_v45  ;;  %v3572_v23 = vmul.f32 0.2, %v3229_v15  ;;  %vm3564_vm1 = vcmp.gt.f32.partialorder %v3229_v15, 0.0  ;;  %v7051_v45 = vld [vmem:[#allocation8 + $0x64] ss:$16 sps:$4 sm:$0xff]  }
 0x227   :  { %3503 = vmatprep.subr.bf16.mxu1 %v6543_v46  ;;  %v7049_v46 = vld [vmem:[#allocation8 + $0x60] ss:$16 sps:$4 sm:$0xff]   ;;  %v7069_v63 = vld [vmem:[#allocation8 + $0x4] ss:$16 sps:$4 sm:$0xff]  }
 0x228   :  { %3529 = vmatpush1.bf16.msra.mxu0 %v6606_v52  ;;  %v3580_v5 = vsel %vm3564_vm1, %v3229_v15, %v3572_v23  ;;  %v7058_v52 = vld [vmem:[#allocation8 + $0x240] ss:$16 sps:$4 sm:$0xff]   ;;  %v7072_v1 = vld [vmem:[#allocation8 + $0x204] ss:$16 sps:$4 sm:$0xff]  }
 0x229   :  { %3530 = vmatprep.subr.bf16.mxu0 %v6599_v56  ;;  %v7960_v33 = vpack.c.bf16 %v3580_v5, %v3580_v5  ;;  %v7061_v56 = vld [vmem:[#allocation8 + $0x20] ss:$16 sps:$4 sm:$0xff]   ;;  %v7078_v8 = vld [vmem:[#allocation8 + $0x3e4] ss:$16 sps:$4 sm:$0xff]  }
 0x22a   :  { %3504 = vmatpush2.bf16.msra.mxu1 %v6542_v2  ;;  %v7066_v2 = vld [vmem:[#allocation8 + $0x224] ss:$16 sps:$4 sm:$0xff]   ;;  %v7079_v15 = vld [vmem:[#allocation8 + $0x1c0] ss:$16 sps:$4 sm:$0xff]  }
 0x22b   :  { %3505 = vmatprep.subr.bf16.mxu1 %v6535_v61  ;;  %v7064_v61 = vld [vmem:[#allocation8 + $0x220] ss:$16 sps:$4 sm:$0xff]   ;;  %v7081_v16 = vld [vmem:[#allocation8 + $0x1c4] ss:$16 sps:$4 sm:$0xff]  }
 0x22c   :  { %3531 = vmatpush1.bf16.msra.mxu0 %v6598_v7  ;;  %v7075_v7 = vld [vmem:[#allocation8 + $0x1e4] ss:$16 sps:$4 sm:$0xff]  }
 0x22d   :  { %3532 = vmatprep.subr.bf16.mxu0 %v6591_v10  ;;  %v7073_v10 = vld [vmem:[#allocation8 + $0x1e0] ss:$16 sps:$4 sm:$0xff]   ;;  %v7084_v11 = vld [vmem:[#allocation8 + $0x3c4] ss:$16 sps:$4 sm:$0xff]  }
 0x22e   :  { %3506 = vmatpush2.bf16.msra.mxu1 %v6534_v9  ;;  %v619_v9 = vrot.slane %v7946_v43, %v618_v3  ;;  %v7090_v23 = vld [vmem:[#allocation8 + $0x3a4] ss:$16 sps:$4 sm:$0xff]   ;;  %v7178_v3 = vld [vmem:[#allocation8 + $0x6e0] ss:$16 sps:$4 sm:$0xff]  }
 0x22f   :  { %3507 = vmatprep.subr.bf16.mxu1 %v6527_v58  ;;  %v7076_v58 = vld [vmem:[#allocation8 + $0x3e0] ss:$16 sps:$4 sm:$0xff]  }
 0x230   :  { %3533 = vmatpush1.bf16.msra.mxu0 %v6590_v14 }
 0x231   :  { %3534 = vmatprep.subr.bf16.mxu0 %v6583_v17  ;;  %v7082_v17 = vld [vmem:[#allocation8 + $0x3c0] ss:$16 sps:$4 sm:$0xff]  }
 0x232   :  { %3508 = vmatpush2.bf16.msra.mxu1 %v6526_v62 }
 0x233   :  { %3509 = vmatprep.subr.bf16.mxu1 %v6519_v18  ;;  %v7087_v18 = vld [vmem:[#allocation8 + $0x1a4] ss:$16 sps:$4 sm:$0xff]  }
 0x234   :  { %3535 = vmatpush1.bf16.msra.mxu0 %v6582_v22 }
 0x235   :  { %5151 = vmatprep.subr.bf16.mxu0 %v7027_v26 }
 0x236   :  { %3510 = vmatpush2.bf16.msra.mxu1 %v6518_v25 }
 0x237   :  { %5192 = vmatprep.subr.bf16.mxu1 %v7030_v20  ;;  %3553 = vmatmul.mubr.bf16.vlgmr.msra.gmra.mxu0 %v7527_v36  ;;  %v7085_v20 = vld [vmem:[#allocation8 + $0x1a0] ss:$16 sps:$4 sm:$0xff]  }
 0x238   :  { %5152 = vmatpush1.bf16.msra.mxu0 %v7025_v19  ;;  %5183 = vmatprep.mubr.bf16.mxu0 %v7957_v32  ;;  %v7091_v36 = vld [vmem:[#allocation8 + $0x180] ss:$16 sps:$4 sm:$0xff]  }
 0x239   :  { %3512 = vmatmul.mubr.bf16.vlgmr.msra.gmra.mxu1 %v7871_v35  ;;  %5153 = vmatprep.subr.bf16.mxu0 %v7033_v31  ;;  %v7045_v35 = vld [vmem:[#allocation8 + $0x84] ss:$16 sps:$4 sm:$0xff]  }
 0x23a   :  { %5193 = vmatpush1.bf16.msra.mxu1 %v7028_v30  ;;  %5224 = vmatprep.mubr.bf16.mxu1 %v7960_v33  ;;  %v7093_v30 = vld [vmem:[#allocation8 + $0x184] ss:$16 sps:$4 sm:$0xff]  }
 0x23b   :  { %5194 = vmatprep.subr.bf16.mxu1 %v7036_v50  ;;  %v7096_v31 = vld [vmem:[#allocation8 + $0x384] ss:$16 sps:$4 sm:$0xff]   ;;  %v7094_v50 = vld [vmem:[#allocation8 + $0x380] ss:$16 sps:$4 sm:$0xff]  }
 0x23c   :  { %5154 = vmatpush1.bf16.msra.mxu0 %v7031_v41  ;;  %v7099_v41 = vld [vmem:[#allocation8 + $0x164] ss:$16 sps:$4 sm:$0xff]  }
 0x23d   :  { %5155 = vmatprep.subr.bf16.mxu0 %v7039_v37  ;;  %v7097_v37 = vld [vmem:[#allocation8 + $0x160] ss:$16 sps:$4 sm:$0xff]  }
 0x23e   :  { %5195 = vmatpush1.bf16.msra.mxu1 %v7034_v29  ;;  %v7102_v29 = vld [vmem:[#allocation8 + $0x364] ss:$16 sps:$4 sm:$0xff]  }
 0x23f   :  { %5196 = vmatprep.subr.bf16.mxu1 %v7042_v38  ;;  %v7100_v38 = vld [vmem:[#allocation8 + $0x360] ss:$16 sps:$4 sm:$0xff]  }
 0x240   :  { %5156 = vmatpush1.bf16.msra.mxu0 %v7037_v39  ;;  %v7105_v39 = vld [vmem:[#allocation8 + $0x144] ss:$16 sps:$4 sm:$0xff]  }
 0x241   :  { %5157 = vmatprep.subr.bf16.mxu0 %v7045_v35  ;;  %v7103_v35 = vld [vmem:[#allocation8 + $0x140] ss:$16 sps:$4 sm:$0xff]  }
 0x242   :  { %5197 = vmatpush1.bf16.msra.mxu1 %v7040_v40  ;;  %v7108_v40 = vld [vmem:[#allocation8 + $0x344] ss:$16 sps:$4 sm:$0xff]  }
 0x243   :  { %5198 = vmatprep.subr.bf16.mxu1 %v7048_v57  ;;  %v7106_v57 = vld [vmem:[#allocation8 + $0x340] ss:$16 sps:$4 sm:$0xff]  }
 0x244   :  { %5158 = vmatpush1.bf16.msra.mxu0 %v7043_v42  ;;  %v7111_v42 = vld [vmem:[#allocation8 + $0x124] ss:$16 sps:$4 sm:$0xff]  }
 0x245   :  { %5159 = vmatprep.subr.bf16.mxu0 %v7051_v45  ;;  %v7109_v45 = vld [vmem:[#allocation8 + $0x120] ss:$16 sps:$4 sm:$0xff]  }
 0x246   :  { %5199 = vmatpush1.bf16.msra.mxu1 %v7046_v44  ;;  %v7114_v44 = vld [vmem:[#allocation8 + $0x324] ss:$16 sps:$4 sm:$0xff]  }
 0x247   :  { %5200 = vmatprep.subr.bf16.mxu1 %v7054_v21  ;;  %v7112_v21 = vld [vmem:[#allocation8 + $0x320] ss:$16 sps:$4 sm:$0xff]  }
 0x248   :  { %5160 = vmatpush1.bf16.msra.mxu0 %v7049_v46  ;;  %v7117_v46 = vld [vmem:[#allocation8 + $0x104] ss:$16 sps:$4 sm:$0xff]  }
 0x249   :  { %5161 = vmatprep.subr.bf16.mxu0 %v7057_v59  ;;  %v7120_v59 = vld [vmem:[#allocation8 + $0x304] ss:$16 sps:$4 sm:$0xff]  }
 0x24a   :  { %5201 = vmatpush1.bf16.msra.mxu1 %v7052_v47  ;;  %v3569_v47 = vmul.f32 0.2, %v7914_v24 }
 0x24b   :  { %5202 = vmatprep.subr.bf16.mxu1 %v7060_v48  ;;  %v3571_v48 = vmul.f32 0.2, %v7943_v53 }
 0x24c   :  { %5162 = vmatpush1.bf16.msra.mxu0 %v7055_v49  ;;  %v7115_v49 = vld [vmem:[#allocation8 + $0x100] ss:$16 sps:$4 sm:$0xff]  }
 0x24d   :  { %5163 = vmatprep.subr.bf16.mxu0 %v7063_v55  ;;  %v7123_v55 = vld [vmem:[#allocation8 + $0x4e4] ss:$16 sps:$4 sm:$0xff]  }
 0x24e   :  { %5203 = vmatpush1.bf16.msra.mxu1 %v7058_v52  ;;  %v7118_v52 = vld [vmem:[#allocation8 + $0x300] ss:$16 sps:$4 sm:$0xff]  }
 0x24f   :  { %5204 = vmatprep.subr.bf16.mxu1 %v7066_v2  ;;  %v3577_v2 = vsel %vm3561_vm2, %v7914_v24, %v3569_v47  ;;  %v7124_v24 = vld [vmem:[#allocation8 + $0x4c0] ss:$16 sps:$4 sm:$0xff]   ;;  %v7234_v47 = vld [vmem:[#allocation8 + $0x7c4] ss:$16 sps:$4 sm:$0xff]  }
 0x250   :  { %5164 = vmatpush1.bf16.msra.mxu0 %v7061_v56  ;;  %v7180_v56 = vld [vmem:[#allocation8 + $0x6e4] ss:$16 sps:$4 sm:$0xff]  }
 0x251   :  { %5165 = vmatprep.subr.bf16.mxu0 %v7069_v63  ;;  %v7121_v63 = vld [vmem:[#allocation8 + $0x4e0] ss:$16 sps:$4 sm:$0xff]  }
 0x252   :  { %5205 = vmatpush1.bf16.msra.mxu1 %v7064_v61  ;;  %v3579_v61 = vsel %vm3563_vm3, %v7943_v53, %v3571_v48  ;;  %v7129_v53 = vld [vmem:[#allocation8 + $0x4a4] ss:$16 sps:$4 sm:$0xff]  }
 0x253   :  { %5206 = vmatprep.subr.bf16.mxu1 %v7072_v1  ;;  %v7978_v1 = vpack.c.bf16 %v3577_v2, %v3577_v2  ;;  %v7232_v2 = vld [vmem:[#allocation8 + $0x7c0] ss:$16 sps:$4 sm:$0xff]  }
 0x254   :  { %5166 = vmatpush1.bf16.msra.mxu0 %v7067_v34  ;;  %v7126_v34 = vld [vmem:[#allocation8 + $0x4c4] ss:$16 sps:$4 sm:$0xff]  }
 0x255   :  { %5167 = vmatprep.subr.bf16.mxu0 %v7075_v7  ;;  %v7186_v7 = vld [vmem:[#allocation8 + $0x6c4] ss:$16 sps:$4 sm:$0xff]  }
 0x256   :  { %5207 = vmatpush1.bf16.msra.mxu1 %v7070_v4  ;;  %v7980_v4 = vpack.c.bf16 %v3579_v61, %v3579_v61 }
 0x257   :  { %5208 = vmatprep.subr.bf16.mxu1 %v7078_v8  ;;  %v3267_v12 = vpop.f32.mrf.mxu0 }
 0x258   :  { %v3268_v13 = vadd.f32 %v3267_v12, %v619_v9  ;;  %5168 = vmatpush2.bf16.msra.mxu0 %v7073_v10  ;;  %v7184_v9 = vld [vmem:[#allocation8 + $0x6c0] ss:$16 sps:$4 sm:$0xff]   ;;  %v7132_v12 = vld [vmem:[#allocation8 + $0x484] ss:$16 sps:$4 sm:$0xff]  }
 0x259   :  { %v3308_v14 = vpop.f32.mrf.mxu1  ;;  %v7966_v62 = vpop.f32.mrf.mxu0  ;;  %5169 = vmatprep.subr.bf16.mxu0 %v7081_v16 }
 0x25a   :  { %5209 = vmatpush2.bf16.msra.mxu1 %v7076_v58  ;;  %v7968_v28 = vadd.f32 %v3308_v14, %v3268_v13  ;;  %v7192_v58 = vld [vmem:[#allocation8 + $0x6a4] ss:$16 sps:$4 sm:$0xff]   ;;  %v7190_v13 = vld [vmem:[#allocation8 + $0x6a0] ss:$16 sps:$4 sm:$0xff]  }
 0x25b   :  { %v7970_v22 = vpop.f32.mrf.mxu1  ;;  %5210 = vmatprep.subr.bf16.mxu1 %v7084_v11  ;;  %v3271_v25 = vpop.f32.mrf.mxu0  ;;  %v7127_v11 = vld [vmem:[#allocation8 + $0x4a0] ss:$16 sps:$4 sm:$0xff]  }
 0x25c   :  { %5170 = vmatpush2.bf16.msra.mxu0 %v7079_v15  ;;  %v7198_v15 = vld [vmem:[#allocation8 + $0x684] ss:$16 sps:$4 sm:$0xff]  }
 0x25d   :  { %v3312_v26 = vpop.f32.mrf.mxu1  ;;  %v3272_v19 = vpop.f32.mrf.mxu0  ;;  %5171 = vmatprep.subr.bf16.mxu0 %v7087_v18  ;;  %v7135_v18 = vld [vmem:[#allocation8 + $0x464] ss:$16 sps:$4 sm:$0xff]  }
 0x25e   :  { %5211 = vmatpush2.bf16.msra.mxu1 %v7082_v17  ;;  %v7130_v17 = vld [vmem:[#allocation8 + $0x480] ss:$16 sps:$4 sm:$0xff]   ;;  %v7204_v25 = vld [vmem:[#allocation8 + $0x664] ss:$16 sps:$4 sm:$0xff]  }
 0x25f   :  { %v3313_v5 = vpop.f32.mrf.mxu1  ;;  %5212 = vmatprep.subr.bf16.mxu1 %v7090_v23  ;;  %v7196_v23 = vld [vmem:[#allocation8 + $0x680] ss:$16 sps:$4 sm:$0xff]  }
 0x260   :  { %5172 = vmatpush2.bf16.msra.mxu0 %v7085_v20  ;;  %v7133_v26 = vld [vmem:[#allocation8 + $0x460] ss:$16 sps:$4 sm:$0xff]   ;;  %v7138_v20 = vld [vmem:[#allocation8 + $0x444] ss:$16 sps:$4 sm:$0xff]  }
 0x261   :  { %5173 = vmatprep.subr.bf16.mxu0 %v7093_v30  ;;  %v7202_v19 = vld [vmem:[#allocation8 + $0x660] ss:$16 sps:$4 sm:$0xff]   ;;  %v7141_v5 = vld [vmem:[#allocation8 + $0x424] ss:$16 sps:$4 sm:$0xff]  }
 0x262   :  { %5213 = vmatpush2.bf16.msra.mxu1 %v7088_v27  ;;  %v7210_v27 = vld [vmem:[#allocation8 + $0x644] ss:$16 sps:$4 sm:$0xff]   ;;  %v7136_v30 = vld [vmem:[#allocation8 + $0x440] ss:$16 sps:$4 sm:$0xff]  }
 0x263   :  { %5214 = vmatprep.subr.bf16.mxu1 %v7096_v31  ;;  %v7208_v31 = vld [vmem:[#allocation8 + $0x640] ss:$16 sps:$4 sm:$0xff]  }
 0x264   :  { %5174 = vmatpush2.bf16.msra.mxu0 %v7091_v36  ;;  %v7216_v36 = vld [vmem:[#allocation8 + $0x624] ss:$16 sps:$4 sm:$0xff]  }
 0x265   :  { %5175 = vmatprep.subr.bf16.mxu0 %v7099_v41  ;;  %v7139_v41 = vld [vmem:[#allocation8 + $0x420] ss:$16 sps:$4 sm:$0xff]  }
 0x266   :  { %5215 = vmatpush2.bf16.msra.mxu1 %v7094_v50  ;;  %v622_v50 = vsub.s32 5, %v7885_v51 }
 0x267   :  { %5216 = vmatprep.subr.bf16.mxu1 %v7102_v29  ;;  %v7144_v29 = vld [vmem:[#allocation8 + $0x404] ss:$16 sps:$4 sm:$0xff]  }
 0x268   :  { %5176 = vmatpush2.bf16.msra.mxu0 %v7097_v37  ;;  %v7214_v37 = vld [vmem:[#allocation8 + $0x620] ss:$16 sps:$4 sm:$0xff]  }
 0x269   :  { %5177 = vmatprep.subr.bf16.mxu0 %v7105_v39  ;;  %v623_v39 = vrot.slane %v7946_v43, %v622_v50  ;;  %v7171_v50 = vld [vmem:[#allocation8 + $0xec] ss:$16 sps:$4 sm:$0xff]  }
 0x26a   :  { %5217 = vmatpush2.bf16.msra.mxu1 %v7100_v38  ;;  %v7222_v38 = vld [vmem:[#allocation8 + $0x604] ss:$16 sps:$4 sm:$0xff]  }
 0x26b   :  { %5218 = vmatprep.subr.bf16.mxu1 %v7108_v40  ;;  %v7142_v40 = vld [vmem:[#allocation8 + $0x400] ss:$16 sps:$4 sm:$0xff]  }
 0x26c   :  { %5178 = vmatpush2.bf16.msra.mxu0 %v7103_v35  ;;  %v7147_v35 = vld [vmem:[#allocation8 + $0x5e4] ss:$16 sps:$4 sm:$0xff]  }
 0x26d   :  { %5179 = vmatprep.subr.bf16.mxu0 %v7111_v42  ;;  %v7228_v42 = vld [vmem:[#allocation8 + $0x7e4] ss:$16 sps:$4 sm:$0xff]  }
 0x26e   :  { %5219 = vmatpush2.bf16.msra.mxu1 %v7106_v57  ;;  %v7220_v57 = vld [vmem:[#allocation8 + $0x600] ss:$16 sps:$4 sm:$0xff]  }
 0x26f   :  { %5220 = vmatprep.subr.bf16.mxu1 %v7114_v44  ;;  %v3270_v44 = vadd.f32 %v7966_v62, %v623_v39  ;;  %v7240_v62 = vld [vmem:[#allocation8 + $0x7a4] ss:$16 sps:$4 sm:$0xff]   ;;  %v7174_v39 = vld [vmem:[#allocation8 + $0xcc] ss:$16 sps:$4 sm:$0xff]  }
 0x270   :  { %5180 = vmatpush2.bf16.msra.mxu0 %v7109_v45  ;;  %v7145_v45 = vld [vmem:[#allocation8 + $0x5e0] ss:$16 sps:$4 sm:$0xff]  }
 0x271   :  { %5181 = vmatprep.subr.bf16.mxu0 %v7117_v46  ;;  %v7226_v46 = vld [vmem:[#allocation8 + $0x7e0] ss:$16 sps:$4 sm:$0xff]   ;;  %v3311_v48 = vadd.f32 %v7970_v22, %v3270_v44 }
 0x272   :  { %5221 = vmatpush2.bf16.msra.mxu1 %v7112_v21  ;;  %v7150_v21 = vld [vmem:[#allocation8 + $0x5c4] ss:$16 sps:$4 sm:$0xff]   ;;  %v7238_v22 = vld [vmem:[#allocation8 + $0x7a0] ss:$16 sps:$4 sm:$0xff]  }
 0x273   :  { %5222 = vmatprep.subr.bf16.mxu1 %v7120_v59 }
 0x274   :  { %5182 = vmatpush2.bf16.msra.mxu0 %v7115_v49  ;;  %v7148_v49 = vld [vmem:[#allocation8 + $0x5c0] ss:$16 sps:$4 sm:$0xff]  }
 0x275   :  { %5233 = vmatprep.subr.bf16.mxu0 %v7123_v55  ;;  %v7153_v55 = vld [vmem:[#allocation8 + $0x5a4] ss:$16 sps:$4 sm:$0xff]  }
 0x276   :  { %5223 = vmatpush2.bf16.msra.mxu1 %v7118_v52 }
 0x277   :  { %5274 = vmatprep.subr.bf16.mxu1 %v7180_v56  ;;  %5184 = vmatmul.mubr.bf16.vlgmr.msra.gmra.mxu0 %v7978_v1 }
 0x278   :  { %5234 = vmatpush1.bf16.msra.mxu0 %v7121_v63 }
 0x279   :  { %v7983_v8 = vpop.f32.mrf.mxu1  ;;  %5225 = vmatmul.mubr.bf16.vlgmr.msra.gmra.mxu1 %v7980_v4  ;;  %5235 = vmatprep.subr.bf16.mxu0 %v7126_v34  ;;  %v7151_v34 = vld [vmem:[#allocation8 + $0x5a0] ss:$16 sps:$4 sm:$0xff]  }
 0x27a   :  { %5275 = vmatpush1.bf16.msra.mxu1 %v7178_v3 }
 0x27b   :  { %v7986_v10 = vpop.f32.mrf.mxu1  ;;  %5276 = vmatprep.subr.bf16.mxu1 %v7186_v7  ;;  %v7156_v7 = vld [vmem:[#allocation8 + $0x584] ss:$16 sps:$4 sm:$0xff]  }
 0x27c   :  { %5236 = vmatpush1.bf16.msra.mxu0 %v7124_v24 }
 0x27d   :  { %v3394_v16 = vpop.f32.mrf.mxu1  ;;  %5237 = vmatprep.subr.bf16.mxu0 %v7129_v53  ;;  %v7246_v53 = vld [vmem:[#allocation8 + $0x784] ss:$16 sps:$4 sm:$0xff]  }
 0x27e   :  { %5277 = vmatpush1.bf16.msra.mxu1 %v7184_v9  ;;  %v7154_v9 = vld [vmem:[#allocation8 + $0x580] ss:$16 sps:$4 sm:$0xff]  }
 0x27f   :  { %v3395_v14 = vpop.f32.mrf.mxu1  ;;  %5278 = vmatprep.subr.bf16.mxu1 %v7192_v58 }
 0x280   :  { %5238 = vmatpush1.bf16.msra.mxu0 %v7127_v11  ;;  %v7159_v11 = vld [vmem:[#allocation8 + $0x564] ss:$16 sps:$4 sm:$0xff]  }
 0x281   :  { %5239 = vmatprep.subr.bf16.mxu0 %v7132_v12  ;;  %v7252_v12 = vld [vmem:[#allocation8 + $0x764] ss:$16 sps:$4 sm:$0xff]  }
 0x282   :  { %5279 = vmatpush1.bf16.msra.mxu1 %v7190_v13  ;;  %v7157_v13 = vld [vmem:[#allocation8 + $0x560] ss:$16 sps:$4 sm:$0xff]   ;;  %v7162_v14 = vld [vmem:[#allocation8 + $0x544] ss:$16 sps:$4 sm:$0xff]  }
 0x283   :  { %5280 = vmatprep.subr.bf16.mxu1 %v7198_v15  ;;  %v7250_v15 = vld [vmem:[#allocation8 + $0x760] ss:$16 sps:$4 sm:$0xff]  }
 0x284   :  { %5240 = vmatpush1.bf16.msra.mxu0 %v7130_v17 }
 0x285   :  { %5241 = vmatprep.subr.bf16.mxu0 %v7135_v18  ;;  %v7258_v18 = vld [vmem:[#allocation8 + $0x744] ss:$16 sps:$4 sm:$0xff]  }
 0x286   :  { %5281 = vmatpush1.bf16.msra.mxu1 %v7196_v23  ;;  %v7160_v23 = vld [vmem:[#allocation8 + $0x540] ss:$16 sps:$4 sm:$0xff]  }
 0x287   :  { %5282 = vmatprep.subr.bf16.mxu1 %v7204_v25  ;;  %v7165_v25 = vld [vmem:[#allocation8 + $0x524] ss:$16 sps:$4 sm:$0xff]  }
 0x288   :  { %5242 = vmatpush1.bf16.msra.mxu0 %v7133_v26  ;;  %v7256_v26 = vld [vmem:[#allocation8 + $0x740] ss:$16 sps:$4 sm:$0xff]  }
 0x289   :  { %5243 = vmatprep.subr.bf16.mxu0 %v7138_v20 }
 0x28a   :  { %5283 = vmatpush1.bf16.msra.mxu1 %v7202_v19  ;;  %v7264_v19 = vld [vmem:[#allocation8 + $0x724] ss:$16 sps:$4 sm:$0xff]  }
 0x28b   :  { %5284 = vmatprep.subr.bf16.mxu1 %v7210_v27  ;;  %v7163_v27 = vld [vmem:[#allocation8 + $0x520] ss:$16 sps:$4 sm:$0xff]  }
 0x28c   :  { %5244 = vmatpush1.bf16.msra.mxu0 %v7136_v30  ;;  %v7168_v30 = vld [vmem:[#allocation8 + $0x504] ss:$16 sps:$4 sm:$0xff]  }
 0x28d   :  { %5245 = vmatprep.subr.bf16.mxu0 %v7141_v5  ;;  %v7262_v5 = vld [vmem:[#allocation8 + $0x720] ss:$16 sps:$4 sm:$0xff]  }
 0x28e   :  { %5285 = vmatpush1.bf16.msra.mxu1 %v7208_v31 }
 0x28f   :  { %5286 = vmatprep.subr.bf16.mxu1 %v7216_v36  ;;  %v7166_v36 = vld [vmem:[#allocation8 + $0x500] ss:$16 sps:$4 sm:$0xff]  }
 0x290   :  { %5246 = vmatpush1.bf16.msra.mxu0 %v7139_v41  ;;  %v7268_v41 = vld [vmem:[#allocation8 + $0x700] ss:$16 sps:$4 sm:$0xff]  }
 0x291   :  { %5247 = vmatprep.subr.bf16.mxu0 %v7144_v29 }
 0x292   :  { %5287 = vmatpush1.bf16.msra.mxu1 %v7214_v37  ;;  %v7169_v37 = vld [vmem:[#allocation8 + $0xe8] ss:$16 sps:$4 sm:$0xff]  }
 0x293   :  { %5288 = vmatprep.subr.bf16.mxu1 %v7222_v38 }
 0x294   :  { %5248 = vmatpush1.bf16.msra.mxu0 %v7142_v40 }
 0x295   :  { %5249 = vmatprep.subr.bf16.mxu0 %v7147_v35  ;;  %v7172_v35 = vld [vmem:[#allocation8 + $0xc8] ss:$16 sps:$4 sm:$0xff]  }
 0x296   :  { %5289 = vmatpush1.bf16.msra.mxu1 %v7220_v57  ;;  %v7177_v57 = vld [vmem:[#allocation8 + $0xac] ss:$16 sps:$4 sm:$0xff]  }
 0x297   :  { %5290 = vmatprep.subr.bf16.mxu1 %v7228_v42  ;;  %v3349_v59 = vpop.f32.mrf.mxu0 }
 0x298   :  { %5250 = vmatpush2.bf16.msra.mxu0 %v7145_v45  ;;  %v3350_v17 = vadd.f32 %v3349_v59, %v7968_v28  ;;  %v7270_v28 = vld [vmem:[#allocation8 + $0x704] ss:$16 sps:$4 sm:$0xff]   ;;  %v7175_v45 = vld [vmem:[#allocation8 + $0xa8] ss:$16 sps:$4 sm:$0xff]   ;;  %v7189_v59 = vld [vmem:[#allocation8 + $0x6c] ss:$16 sps:$4 sm:$0xff]  }
 0x299   :  { %v3351_v52 = vpop.f32.mrf.mxu0  ;;  %5251 = vmatprep.subr.bf16.mxu0 %v7150_v21  ;;  %v7183_v21 = vld [vmem:[#allocation8 + $0x8c] ss:$16 sps:$4 sm:$0xff]  }
 0x29a   :  { %5291 = vmatpush2.bf16.msra.mxu1 %v7226_v46  ;;  %v3352_v56 = vadd.f32 %v3351_v52, %v3311_v48  ;;  %v3391_v20 = vadd.f32 %v7983_v8, %v3350_v17  ;;  %v7276_v8 = vld [vmem:[#allocation8 + $0x2ec] ss:$16 sps:$4 sm:$0xff]   ;;  %v7187_v48 = vld [vmem:[#allocation8 + $0x68] ss:$16 sps:$4 sm:$0xff]  }
 0x29b   :  { %5292 = vmatprep.subr.bf16.mxu1 %v7234_v47  ;;  %v3353_v61 = vpop.f32.mrf.mxu0  ;;  %v7181_v47 = vld [vmem:[#allocation8 + $0x88] ss:$16 sps:$4 sm:$0xff]   ;;  %v7201_v52 = vld [vmem:[#allocation8 + $0x2c] ss:$16 sps:$4 sm:$0xff]  }
 0x29c   :  { %v3393_v63 = vadd.f32 %v7986_v10, %v3352_v56  ;;  %5252 = vmatpush2.bf16.msra.mxu0 %v7148_v49  ;;  %v7244_v10 = vld [vmem:[#allocation8 + $0x780] ss:$16 sps:$4 sm:$0xff]   ;;  %v3573_v31 = vmul.f32 0.2, %v3391_v20  ;;  %vm3565_vm5 = vcmp.gt.f32.partialorder %v3391_v20, 0.0 }
 0x29d   :  { %v3354_v3 = vpop.f32.mrf.mxu0  ;;  %5253 = vmatprep.subr.bf16.mxu0 %v7153_v55  ;;  %v7195_v49 = vld [vmem:[#allocation8 + $0x4c] ss:$16 sps:$4 sm:$0xff]   ;;  %v7199_v55 = vld [vmem:[#allocation8 + $0x28] ss:$16 sps:$4 sm:$0xff]  }
 0x29e   :  { %5293 = vmatpush2.bf16.msra.mxu1 %v7232_v2  ;;  %v3574_v24 = vmul.f32 0.2, %v3393_v63  ;;  %vm3566_vm4 = vcmp.gt.f32.partialorder %v3393_v63, 0.0  ;;  %v3581_v29 = vsel %vm3565_vm5, %v3391_v20, %v3573_v31  ;;  %v7207_v2 = vld [vmem:[#allocation8 + $0xc] ss:$16 sps:$4 sm:$0xff]  }
 0x29f   :  { %5294 = vmatprep.subr.bf16.mxu1 %v7240_v62  ;;  %v7998_v38 = vpack.c.bf16 %v3581_v29, %v3581_v29  ;;  %v7205_v56 = vld [vmem:[#allocation8 + $0x8] ss:$16 sps:$4 sm:$0xff]   ;;  %v7213_v62 = vld [vmem:[#allocation8 + $0x1ec] ss:$16 sps:$4 sm:$0xff]  }
 0x2a0   :  { %5254 = vmatpush2.bf16.msra.mxu0 %v7151_v34  ;;  %v3582_v58 = vsel %vm3566_vm4, %v3393_v63, %v3574_v24  ;;  %v7211_v61 = vld [vmem:[#allocation8 + $0x1e8] ss:$16 sps:$4 sm:$0xff]   ;;  %v7219_v63 = vld [vmem:[#allocation8 + $0x1cc] ss:$16 sps:$4 sm:$0xff]  }
 0x2a1   :  { %5255 = vmatprep.subr.bf16.mxu0 %v7156_v7  ;;  %v7993_v16 = vpack.c.bf16 %v3582_v58, %v3582_v58  ;;  %v7217_v3 = vld [vmem:[#allocation8 + $0x1c8] ss:$16 sps:$4 sm:$0xff]   ;;  %v7231_v58 = vld [vmem:[#allocation8 + $0x18c] ss:$16 sps:$4 sm:$0xff]  }
 0x2a2   :  { %5295 = vmatpush2.bf16.msra.mxu1 %v7238_v22  ;;  %v7225_v22 = vld [vmem:[#allocation8 + $0x1ac] ss:$16 sps:$4 sm:$0xff]   ;;  %v7247_v17 = vld [vmem:[#allocation8 + $0x128] ss:$16 sps:$4 sm:$0xff]  }
 0x2a3   :  { %5296 = vmatprep.subr.bf16.mxu1 %v7246_v53  ;;  %5265 = vmatprep.mubr.bf16.mxu0 %v7993_v16  ;;  %v7223_v53 = vld [vmem:[#allocation8 + $0x1a8] ss:$16 sps:$4 sm:$0xff]   ;;  %v7267_v31 = vld [vmem:[#allocation8 + $0x4cc] ss:$16 sps:$4 sm:$0xff]  }
 0x2a4   :  { %5256 = vmatpush2.bf16.msra.mxu0 %v7154_v9  ;;  %v7265_v29 = vld [vmem:[#allocation8 + $0x4c8] ss:$16 sps:$4 sm:$0xff]  }
 0x2a5   :  { %5257 = vmatprep.subr.bf16.mxu0 %v7159_v11  ;;  %v7229_v11 = vld [vmem:[#allocation8 + $0x188] ss:$16 sps:$4 sm:$0xff]  }
 0x2a6   :  { %5297 = vmatpush2.bf16.msra.mxu1 %v7244_v10  ;;  %v7237_v10 = vld [vmem:[#allocation8 + $0x16c] ss:$16 sps:$4 sm:$0xff]  }
 0x2a7   :  { %5298 = vmatprep.subr.bf16.mxu1 %v7252_v12  ;;  %v7235_v12 = vld [vmem:[#allocation8 + $0x168] ss:$16 sps:$4 sm:$0xff]  }
 0x2a8   :  { %5258 = vmatpush2.bf16.msra.mxu0 %v7157_v13  ;;  %v7243_v13 = vld [vmem:[#allocation8 + $0x14c] ss:$16 sps:$4 sm:$0xff]  }
 0x2a9   :  { %5259 = vmatprep.subr.bf16.mxu0 %v7162_v14  ;;  %v7241_v14 = vld [vmem:[#allocation8 + $0x148] ss:$16 sps:$4 sm:$0xff]  }
 0x2aa   :  { %5299 = vmatpush2.bf16.msra.mxu1 %v7250_v15  ;;  %v7249_v15 = vld [vmem:[#allocation8 + $0x12c] ss:$16 sps:$4 sm:$0xff]  }
 0x2ab   :  { %5300 = vmatprep.subr.bf16.mxu1 %v7258_v18  ;;  %v626_v18 = vsub.s32 6, %v7885_v51 }
 0x2ac   :  { %5260 = vmatpush2.bf16.msra.mxu0 %v7160_v23  ;;  %v7255_v23 = vld [vmem:[#allocation8 + $0x10c] ss:$16 sps:$4 sm:$0xff]  }
 0x2ad   :  { %5261 = vmatprep.subr.bf16.mxu0 %v7165_v25  ;;  %v630_v25 = vsub.s32 7, %v7885_v51  ;;  %v627_v20 = vrot.slane %v7946_v43, %v626_v18  ;;  %v7304_v18 = vld [vmem:[#allocation8 + $0x248] ss:$16 sps:$4 sm:$0xff]   ;;  %v7509_v51 = vld [vmem:[#allocation14 + $0x68] sm:$0xff]  }
 0x2ae   :  { %5301 = vmatpush2.bf16.msra.mxu1 %v7256_v26  ;;  %v7253_v26 = vld [vmem:[#allocation8 + $0x108] ss:$16 sps:$4 sm:$0xff]  }
 0x2af   :  { %5302 = vmatprep.subr.bf16.mxu1 %v7264_v19  ;;  %v7261_v19 = vld [vmem:[#allocation8 + $0x4ec] ss:$16 sps:$4 sm:$0xff]  }
 0x2b0   :  { %5262 = vmatpush2.bf16.msra.mxu0 %v7163_v27  ;;  %v631_v27 = vrot.slane %v7946_v43, %v630_v25  ;;  %v7313_v25 = vld [vmem:[#allocation8 + $0x5c8] ss:$16 sps:$4 sm:$0xff]  }
 0x2b1   :  { %5263 = vmatprep.subr.bf16.mxu0 %v7168_v30  ;;  %v7259_v30 = vld [vmem:[#allocation8 + $0x4e8] ss:$16 sps:$4 sm:$0xff]  }
 0x2b2   :  { %5303 = vmatpush2.bf16.msra.mxu1 %v7262_v5 }
 0x2b3   :  { %5304 = vmatprep.subr.bf16.mxu1 %v7270_v28 }
 0x2b4   :  { %5264 = vmatpush2.bf16.msra.mxu0 %v7166_v36 }
 0x2b5   :  { %5315 = vmatprep.subr.bf16.mxu0 %v7171_v50 }
 0x2b6   :  { %5305 = vmatpush2.bf16.msra.mxu1 %v7268_v41 }
 0x2b7   :  { %5356 = vmatprep.subr.bf16.mxu1 %v7276_v8  ;;  %5266 = vmatmul.mubr.bf16.vlgmr.msra.gmra.mxu0 %v7998_v38 }
 0x2b8   :  { %5316 = vmatpush1.bf16.msra.mxu0 %v7169_v37  ;;  %5347 = vmatprep.mubr.bf16.mxu0 %v7957_v32  ;;  %v7193_v32 = vld [vmem:[#allocation8 + $0x48] ss:$16 sps:$4 sm:$0xff]  }
 0x2b9   :  { %v8001_v40 = vpop.f32.mrf.mxu1  ;;  %5317 = vmatprep.subr.bf16.mxu0 %v7174_v39  ;;  %v7273_v39 = vld [vmem:[#allocation8 + $0x4ac] ss:$16 sps:$4 sm:$0xff]  }
 0x2ba   :  { %v3432_v5 = vadd.f32 %v8001_v40, %v627_v20  ;;  %v7310_v20 = vld [vmem:[#allocation8 + $0x228] ss:$16 sps:$4 sm:$0xff]  }
 0x2bb   :  { %v8004_v42 = vpop.f32.mrf.mxu1 }
 0x2bc   :  { %5318 = vmatpush1.bf16.msra.mxu0 %v7172_v35  ;;  %v3434_v28 = vadd.f32 %v8004_v42, %v631_v27  ;;  %v7271_v42 = vld [vmem:[#allocation8 + $0x4a8] ss:$16 sps:$4 sm:$0xff]  }
 0x2bd   :  { %v3435_v44 = vpop.f32.mrf.mxu1  ;;  %5319 = vmatprep.subr.bf16.mxu0 %v7177_v57  ;;  %v7319_v27 = vld [vmem:[#allocation8 + $0x5a8] ss:$16 sps:$4 sm:$0xff]  }
 0x2bf   :  { %v3436_v46 = vpop.f32.mrf.mxu1 }
 0x2c0   :  { %5320 = vmatpush1.bf16.msra.mxu0 %v7175_v45 }
 0x2c1   :  { %5321 = vmatprep.subr.bf16.mxu0 %v7183_v21 }
 0x2c4   :  { %5322 = vmatpush1.bf16.msra.mxu0 %v7181_v47  ;;  %v7279_v47 = vld [vmem:[#allocation8 + $0x48c] ss:$16 sps:$4 sm:$0xff]  }
 0x2c5   :  { %5323 = vmatprep.subr.bf16.mxu0 %v7189_v59 }
 0x2c8   :  { %5324 = vmatpush1.bf16.msra.mxu0 %v7187_v48 }
 0x2c9   :  { %5325 = vmatprep.subr.bf16.mxu0 %v7195_v49  ;;  %v7277_v49 = vld [vmem:[#allocation8 + $0x488] ss:$16 sps:$4 sm:$0xff]  }
 0x2cc   :  { %5326 = vmatpush1.bf16.msra.mxu0 %v7193_v32 }
 0x2cd   :  { %5327 = vmatprep.subr.bf16.mxu0 %v7201_v52  ;;  %v7285_v52 = vld [vmem:[#allocation8 + $0x46c] ss:$16 sps:$4 sm:$0xff]  }
 0x2d0   :  { %5328 = vmatpush1.bf16.msra.mxu0 %v7199_v55 }
 0x2d1   :  { %5329 = vmatprep.subr.bf16.mxu0 %v7207_v2  ;;  %v7274_v2 = vld [vmem:[#allocation8 + $0x2e8] ss:$16 sps:$4 sm:$0xff]  }
 0x2d4   :  { %5330 = vmatpush1.bf16.msra.mxu0 %v7205_v56 }
 0x2d5   :  { %5331 = vmatprep.subr.bf16.mxu0 %v7213_v62  ;;  %v7282_v62 = vld [vmem:[#allocation8 + $0x2cc] ss:$16 sps:$4 sm:$0xff]  }
 0x2d7   :  { %v3472_v34 = vpop.f32.mrf.mxu0 }
 0x2d8   :  { %5332 = vmatpush2.bf16.msra.mxu0 %v7211_v61  ;;  %v3473_v36 = vadd.f32 %v3472_v34, %v3432_v5  ;;  %v7283_v61 = vld [vmem:[#allocation8 + $0x468] ss:$16 sps:$4 sm:$0xff]  }
 0x2d9   :  { %v3474_v7 = vpop.f32.mrf.mxu0  ;;  %5333 = vmatprep.subr.bf16.mxu0 %v7219_v63  ;;  %v7291_v63 = vld [vmem:[#allocation8 + $0x44c] ss:$16 sps:$4 sm:$0xff]   ;;  %v7280_v34 = vld [vmem:[#allocation8 + $0x2c8] ss:$16 sps:$4 sm:$0xff]  }
 0x2da   :  { %v3475_v8 = vadd.f32 %v3474_v7, %v3434_v28  ;;  %v7289_v7 = vld [vmem:[#allocation8 + $0x448] ss:$16 sps:$4 sm:$0xff]  }
 0x2db   :  { %v3476_v24 = vpop.f32.mrf.mxu0  ;;  %v7316_v5 = vld [vmem:[#allocation8 + $0x208] ss:$16 sps:$4 sm:$0xff]  }
 0x2dc   :  { %5334 = vmatpush2.bf16.msra.mxu0 %v7217_v3  ;;  %v7288_v3 = vld [vmem:[#allocation8 + $0x2ac] ss:$16 sps:$4 sm:$0xff]   ;;  %v7286_v24 = vld [vmem:[#allocation8 + $0x2a8] ss:$16 sps:$4 sm:$0xff]  }
 0x2dd   :  { %v3477_v9 = vpop.f32.mrf.mxu0  ;;  %5335 = vmatprep.subr.bf16.mxu0 %v7225_v22  ;;  %v7297_v22 = vld [vmem:[#allocation8 + $0x42c] ss:$16 sps:$4 sm:$0xff]   ;;  %v7325_v28 = vld [vmem:[#allocation8 + $0x588] ss:$16 sps:$4 sm:$0xff]  }
 0x2de   :  { %v7295_v9 = vld [vmem:[#allocation8 + $0x428] ss:$16 sps:$4 sm:$0xff]  }
 0x2e0   :  { %5336 = vmatpush2.bf16.msra.mxu0 %v7223_v53  ;;  %v7294_v53 = vld [vmem:[#allocation8 + $0x28c] ss:$16 sps:$4 sm:$0xff]  }
 0x2e1   :  { %5337 = vmatprep.subr.bf16.mxu0 %v7231_v58  ;;  %v7303_v58 = vld [vmem:[#allocation8 + $0x40c] ss:$16 sps:$4 sm:$0xff]  }
 0x2e4   :  { %5338 = vmatpush2.bf16.msra.mxu0 %v7229_v11  ;;  %v7292_v11 = vld [vmem:[#allocation8 + $0x288] ss:$16 sps:$4 sm:$0xff]  }
 0x2e5   :  { %5339 = vmatprep.subr.bf16.mxu0 %v7237_v10  ;;  %v7300_v10 = vld [vmem:[#allocation8 + $0x26c] ss:$16 sps:$4 sm:$0xff]  }
 0x2e8   :  { %5340 = vmatpush2.bf16.msra.mxu0 %v7235_v12  ;;  %v7309_v12 = vld [vmem:[#allocation8 + $0x5ec] ss:$16 sps:$4 sm:$0xff]  }
 0x2e9   :  { %5341 = vmatprep.subr.bf16.mxu0 %v7243_v13  ;;  %v7298_v13 = vld [vmem:[#allocation8 + $0x268] ss:$16 sps:$4 sm:$0xff]  }
 0x2ec   :  { %5342 = vmatpush2.bf16.msra.mxu0 %v7241_v14  ;;  %v7306_v14 = vld [vmem:[#allocation8 + $0x24c] ss:$16 sps:$4 sm:$0xff]  }
 0x2ed   :  { %5343 = vmatprep.subr.bf16.mxu0 %v7249_v15  ;;  %v7307_v15 = vld [vmem:[#allocation8 + $0x5e8] ss:$16 sps:$4 sm:$0xff]  }
 0x2f0   :  { %5344 = vmatpush2.bf16.msra.mxu0 %v7247_v17  ;;  %v7315_v17 = vld [vmem:[#allocation8 + $0x5cc] ss:$16 sps:$4 sm:$0xff]  }
 0x2f1   :  { %5345 = vmatprep.subr.bf16.mxu0 %v7255_v23  ;;  %v7312_v23 = vld [vmem:[#allocation8 + $0x22c] ss:$16 sps:$4 sm:$0xff]  }
 0x2f4   :  { %5346 = vmatpush2.bf16.msra.mxu0 %v7253_v26  ;;  %v7321_v26 = vld [vmem:[#allocation8 + $0x5ac] ss:$16 sps:$4 sm:$0xff]  }
 0x2f5   :  { %5397 = vmatprep.subr.bf16.mxu0 %v7261_v19  ;;  %v7318_v19 = vld [vmem:[#allocation8 + $0x20c] ss:$16 sps:$4 sm:$0xff]  }
 0x2f7   :  { %v3554_v50 = vpop.f32.mrf.mxu0  ;;  %5348 = vmatmul.mubr.bf16.vlgmr.msra.gmra.mxu0 %v7978_v1 }
 0x2f8   :  { %5398 = vmatpush1.bf16.msra.mxu0 %v7259_v30  ;;  %5429 = vmatprep.mubr.bf16.mxu0 %v7993_v16  ;;  %v7327_v30 = vld [vmem:[#allocation8 + $0x58c] ss:$16 sps:$4 sm:$0xff]  }
 0x2f9   :  { %v3513_v41 = vpop.f32.mrf.mxu1  ;;  %v3556_v43 = vpop.f32.mrf.mxu0  ;;  %5399 = vmatprep.subr.bf16.mxu0 %v7267_v31  ;;  %v7324_v31 = vld [vmem:[#allocation8 + $0x3ec] ss:$16 sps:$4 sm:$0xff]  }
 0x2fa   :  { %v3514_v37 = vadd.f32 %v3513_v41, %v3473_v36  ;;  %v7333_v36 = vld [vmem:[#allocation8 + $0x56c] ss:$16 sps:$4 sm:$0xff]  }
 0x2fb   :  { %v3515_v35 = vpop.f32.mrf.mxu1  ;;  %v3558_v44 = vpop.f32.mrf.mxu0  ;;  %v7330_v41 = vld [vmem:[#allocation8 + $0x3cc] ss:$16 sps:$4 sm:$0xff]  }
 0x2fc   :  { %v3555_v40 = vadd.f32 %v3554_v50, %v3514_v37  ;;  %v3516_v57 = vadd.f32 %v3515_v35, %v3475_v8  ;;  %5400 = vmatpush1.bf16.msra.mxu0 %v7265_v29  ;;  %v7322_v50 = vld [vmem:[#allocation8 + $0x3e8] ss:$16 sps:$4 sm:$0xff]   ;;  %v7339_v8 = vld [vmem:[#allocation8 + $0x54c] ss:$16 sps:$4 sm:$0xff]  }
 0x2fd   :  { %v3517_v45 = vpop.f32.mrf.mxu1  ;;  %v3559_v46 = vpop.f32.mrf.mxu0  ;;  %5401 = vmatprep.subr.bf16.mxu0 %v7273_v39  ;;  %v7331_v29 = vld [vmem:[#allocation8 + $0x568] ss:$16 sps:$4 sm:$0xff]   ;;  %v7345_v35 = vld [vmem:[#allocation8 + $0x52c] ss:$16 sps:$4 sm:$0xff]  }
 0x2fe   :  { %vm3567_vm6 = vcmp.gt.f32.partialorder %v3555_v40, 0.0  ;;  %v3575_v21 = vmul.f32 0.2, %v3555_v40  ;;  %v3557_v1 = vadd.f32 %v3556_v43, %v3516_v57  ;;  %v7328_v37 = vld [vmem:[#allocation8 + $0x3c8] ss:$16 sps:$4 sm:$0xff]  }
 0x2ff   :  { %v3518_v16 = vpop.f32.mrf.mxu1  ;;  %v7336_v43 = vld [vmem:[#allocation8 + $0x3ac] ss:$16 sps:$4 sm:$0xff]   ;;  %v7337_v39 = vld [vmem:[#allocation8 + $0x548] ss:$16 sps:$4 sm:$0xff]   ;;  %v8021_v46 = vld [vmem:[#allocation10] sm:$0xf] }
 0x300   :  { %vm3568_vm7 = vcmp.gt.f32.partialorder %v3557_v1, 0.0  ;;  %v3576_v59 = vmul.f32 0.2, %v3557_v1  ;;  %v3583_v48 = vsel %vm3567_vm6, %v3555_v40, %v3575_v21  ;;  %5402 = vmatpush1.bf16.msra.mxu0 %v7271_v42  ;;  %v7334_v40 = vld [vmem:[#allocation8 + $0x3a8] ss:$16 sps:$4 sm:$0xff]  }
 0x301   :  { %5403 = vmatprep.subr.bf16.mxu0 %v7279_v47  ;;  %v8016_v56 = vpack.c.bf16 %v3583_v48, %v3583_v48  ;;  %v7342_v57 = vld [vmem:[#allocation8 + $0x38c] ss:$16 sps:$4 sm:$0xff]   ;;  %v7343_v44 = vld [vmem:[#allocation8 + $0x528] ss:$16 sps:$4 sm:$0xff]   ;;  %v3854_v48 = vrot.slane %v8021_v46, %v7888_v0 }
 0x302   :  { %v3584_v32 = vsel %vm3568_vm7, %v3557_v1, %v3576_v59  ;;  %v7351_v45 = vld [vmem:[#allocation8 + $0x50c] ss:$16 sps:$4 sm:$0xff]   ;;  %v7340_v42 = vld [vmem:[#allocation8 + $0x388] ss:$16 sps:$4 sm:$0xff]  }
 0x303   :  { %v8014_v55 = vpack.c.bf16 %v3584_v32, %v3584_v32  ;;  %v7348_v21 = vld [vmem:[#allocation8 + $0x36c] ss:$16 sps:$4 sm:$0xff]   ;;  %v7349_v1 = vld [vmem:[#allocation8 + $0x508] ss:$16 sps:$4 sm:$0xff]  }
 0x304   :  { %5404 = vmatpush1.bf16.msra.mxu0 %v7277_v49  ;;  %v7411_v47 = vld [vmem:[#allocation11 + $0x74] ss:$8 sps:$4 sm:$0xff]   ;;  %v7354_v59 = vld [vmem:[#allocation8 + $0x34c] ss:$16 sps:$4 sm:$0xff]   ;;  %v7414_v32 = vld [vmem:[#allocation11 + $0x64] ss:$8 sps:$4 sm:$0xff]  }
 0x305   :  { %5306 = vmatprep.mubr.bf16.mxu1 %v8014_v55  ;;  %5405 = vmatprep.subr.bf16.mxu0 %v7285_v52  ;;  %v7346_v16 = vld [vmem:[#allocation8 + $0x368] ss:$16 sps:$4 sm:$0xff]   ;;  %v7409_v49 = vld [vmem:[#allocation11 + $0x70] ss:$8 sps:$4 sm:$0xff]  }
 0x306   :  { %5307 = vmatmul.mubr.bf16.vlgmr.msra.gmra.mxu1 %v8016_v56  ;;  %v7352_v52 = vld [vmem:[#allocation8 + $0x348] ss:$16 sps:$4 sm:$0xff]  }
 0x307   :  { %5357 = vmatpush1.bf16.msra.mxu1 %v7274_v2  ;;  %5388 = vmatprep.mubr.bf16.mxu1 %v7960_v33  ;;  %v7301_v33 = vld [vmem:[#allocation8 + $0x408] ss:$16 sps:$4 sm:$0xff]   ;;  %v3858_v2 = vrot.slane %v8021_v46, %v7893_v6 }
 0x308   :  { %5358 = vmatprep.subr.bf16.mxu1 %v7282_v62  ;;  %5406 = vmatpush1.bf16.msra.mxu0 %v7283_v61  ;;  %v7357_v61 = vld [vmem:[#allocation8 + $0x32c] ss:$16 sps:$4 sm:$0xff]  }
 0x309   :  { %5407 = vmatprep.subr.bf16.mxu0 %v7291_v63 }
 0x30b   :  { %5359 = vmatpush1.bf16.msra.mxu1 %v7280_v34 }
 0x30c   :  { %5360 = vmatprep.subr.bf16.mxu1 %v7288_v3  ;;  %5408 = vmatpush1.bf16.msra.mxu0 %v7289_v7  ;;  %v7412_v3 = vld [vmem:[#allocation11 + $0x60] ss:$8 sps:$4 sm:$0xff]  }
 0x30d   :  { %5409 = vmatprep.subr.bf16.mxu0 %v7297_v22  ;;  %v7417_v22 = vld [vmem:[#allocation11 + $0x54] ss:$8 sps:$4 sm:$0xff]  }
 0x30f   :  { %5361 = vmatpush1.bf16.msra.mxu1 %v7286_v24 }
 0x310   :  { %5362 = vmatprep.subr.bf16.mxu1 %v7294_v53  ;;  %5410 = vmatpush1.bf16.msra.mxu0 %v7295_v9 }
 0x311   :  { %5411 = vmatprep.subr.bf16.mxu0 %v7303_v58  ;;  %v7355_v58 = vld [vmem:[#allocation8 + $0x328] ss:$16 sps:$4 sm:$0xff]  }
 0x313   :  { %5363 = vmatpush1.bf16.msra.mxu1 %v7292_v11 }
 0x314   :  { %5364 = vmatprep.subr.bf16.mxu1 %v7300_v10  ;;  %5412 = vmatpush1.bf16.msra.mxu0 %v7301_v33  ;;  %v7360_v10 = vld [vmem:[#allocation8 + $0x30c] ss:$16 sps:$4 sm:$0xff]  }
 0x315   :  { %5413 = vmatprep.subr.bf16.mxu0 %v7309_v12  ;;  %v7415_v12 = vld [vmem:[#allocation11 + $0x50] ss:$8 sps:$4 sm:$0xff]  }
 0x317   :  { %5365 = vmatpush1.bf16.msra.mxu1 %v7298_v13 }
 0x318   :  { %5366 = vmatprep.subr.bf16.mxu1 %v7306_v14  ;;  %5414 = vmatpush2.bf16.msra.mxu0 %v7307_v15  ;;  %v7420_v14 = vld [vmem:[#allocation11 + $0x44] ss:$8 sps:$4 sm:$0xff]  }
 0x319   :  { %5415 = vmatprep.subr.bf16.mxu0 %v7315_v17  ;;  %v7358_v17 = vld [vmem:[#allocation8 + $0x308] ss:$16 sps:$4 sm:$0xff]  }
 0x31b   :  { %5367 = vmatpush1.bf16.msra.mxu1 %v7304_v18  ;;  %v7363_v18 = vld [vmem:[#allocation8 + $0x6ec] ss:$16 sps:$4 sm:$0xff]  }
 0x31c   :  { %5368 = vmatprep.subr.bf16.mxu1 %v7312_v23  ;;  %5416 = vmatpush2.bf16.msra.mxu0 %v7313_v25  ;;  %v7418_v23 = vld [vmem:[#allocation11 + $0x40] ss:$8 sps:$4 sm:$0xff]   ;;  %v7423_v25 = vld [vmem:[#allocation11 + $0x34] ss:$8 sps:$4 sm:$0xff]  }
 0x31d   :  { %5417 = vmatprep.subr.bf16.mxu0 %v7321_v26  ;;  %v7361_v26 = vld [vmem:[#allocation8 + $0x6e8] ss:$16 sps:$4 sm:$0xff]  }
 0x31f   :  { %5369 = vmatpush1.bf16.msra.mxu1 %v7310_v20  ;;  %v7366_v20 = vld [vmem:[#allocation8 + $0x6cc] ss:$16 sps:$4 sm:$0xff]  }
 0x320   :  { %5370 = vmatprep.subr.bf16.mxu1 %v7318_v19  ;;  %5418 = vmatpush2.bf16.msra.mxu0 %v7319_v27  ;;  %v7421_v19 = vld [vmem:[#allocation11 + $0x30] ss:$8 sps:$4 sm:$0xff]   ;;  %v7426_v27 = vld [vmem:[#allocation11 + $0x24] ss:$8 sps:$4 sm:$0xff]  }
 0x321   :  { %5419 = vmatprep.subr.bf16.mxu0 %v7327_v30  ;;  %v7364_v30 = vld [vmem:[#allocation8 + $0x6c8] ss:$16 sps:$4 sm:$0xff]  }
 0x323   :  { %5371 = vmatpush1.bf16.msra.mxu1 %v7316_v5  ;;  %v7369_v5 = vld [vmem:[#allocation8 + $0x6ac] ss:$16 sps:$4 sm:$0xff]  }
 0x324   :  { %5372 = vmatprep.subr.bf16.mxu1 %v7324_v31  ;;  %5420 = vmatpush2.bf16.msra.mxu0 %v7325_v28  ;;  %v7424_v31 = vld [vmem:[#allocation11 + $0x20] ss:$8 sps:$4 sm:$0xff]   ;;  %v7429_v28 = vld [vmem:[#allocation11 + $0x14] ss:$8 sps:$4 sm:$0xff]  }
 0x325   :  { %5421 = vmatprep.subr.bf16.mxu0 %v7333_v36  ;;  %v7367_v36 = vld [vmem:[#allocation8 + $0x6a8] ss:$16 sps:$4 sm:$0xff]  }
 0x327   :  { %5373 = vmatpush2.bf16.msra.mxu1 %v7322_v50  ;;  %v7372_v50 = vld [vmem:[#allocation8 + $0x68c] ss:$16 sps:$4 sm:$0xff]  }
 0x328   :  { %5374 = vmatprep.subr.bf16.mxu1 %v7330_v41  ;;  %5422 = vmatpush2.bf16.msra.mxu0 %v7331_v29  ;;  %v7427_v41 = vld [vmem:[#allocation11 + $0x10] ss:$8 sps:$4 sm:$0xff]   ;;  %v7370_v29 = vld [vmem:[#allocation8 + $0x688] ss:$16 sps:$4 sm:$0xff]  }
 0x329   :  { %5423 = vmatprep.subr.bf16.mxu0 %v7339_v8  ;;  %v7375_v8 = vld [vmem:[#allocation8 + $0x66c] ss:$16 sps:$4 sm:$0xff]  }
 0x32b   :  { %5375 = vmatpush2.bf16.msra.mxu1 %v7328_v37  ;;  %v7435_v37 = vld [vmem:[#allocation11 + $0xf4] ss:$8 sps:$4 sm:$0xff]  }
 0x32c   :  { %5376 = vmatprep.subr.bf16.mxu1 %v7336_v43  ;;  %5424 = vmatpush2.bf16.msra.mxu0 %v7337_v39  ;;  %v7373_v43 = vld [vmem:[#allocation8 + $0x668] ss:$16 sps:$4 sm:$0xff]   ;;  %v7378_v39 = vld [vmem:[#allocation8 + $0x64c] ss:$16 sps:$4 sm:$0xff]  }
 0x32d   :  { %5425 = vmatprep.subr.bf16.mxu0 %v7345_v35  ;;  %v7433_v35 = vld [vmem:[#allocation11 + $0xf0] ss:$8 sps:$4 sm:$0xff]  }
 0x32f   :  { %5377 = vmatpush2.bf16.msra.mxu1 %v7334_v40  ;;  %v7438_v40 = vld [vmem:[#allocation11 + $0xe4] ss:$8 sps:$4 sm:$0xff]  }
 0x330   :  { %5378 = vmatprep.subr.bf16.mxu1 %v7342_v57  ;;  %5426 = vmatpush2.bf16.msra.mxu0 %v7343_v44  ;;  %v7376_v57 = vld [vmem:[#allocation8 + $0x648] ss:$16 sps:$4 sm:$0xff]   ;;  %v7381_v44 = vld [vmem:[#allocation8 + $0x62c] ss:$16 sps:$4 sm:$0xff]  }
 0x331   :  { %5427 = vmatprep.subr.bf16.mxu0 %v7351_v45  ;;  %v7436_v45 = vld [vmem:[#allocation11 + $0xe0] ss:$8 sps:$4 sm:$0xff]  }
 0x333   :  { %5379 = vmatpush2.bf16.msra.mxu1 %v7340_v42  ;;  %v7441_v42 = vld [vmem:[#allocation11 + $0xd4] ss:$8 sps:$4 sm:$0xff]  }
 0x334   :  { %5380 = vmatprep.subr.bf16.mxu1 %v7348_v21  ;;  %5428 = vmatpush2.bf16.msra.mxu0 %v7349_v1  ;;  %v7379_v21 = vld [vmem:[#allocation8 + $0x628] ss:$16 sps:$4 sm:$0xff]   ;;  %v7384_v1 = vld [vmem:[#allocation8 + $0x60c] ss:$16 sps:$4 sm:$0xff]  }
 0x335   :  { %5891 = vmatprep.subr.bf16.mxu0 %v7411_v47  ;;  %v7439_v47 = vld [vmem:[#allocation11 + $0xd0] ss:$8 sps:$4 sm:$0xff]  }
 0x337   :  { %5381 = vmatpush2.bf16.msra.mxu1 %v7346_v16  ;;  %v5185_v62 = vpop.f32.mrf.mxu0  ;;  %5430 = vmatmul.mubr.bf16.vlgmr.msra.gmra.mxu0 %v7998_v38  ;;  %v7444_v16 = vld [vmem:[#allocation11 + $0xc4] ss:$8 sps:$4 sm:$0xff]  }
 0x338   :  { %5382 = vmatprep.subr.bf16.mxu1 %v7354_v59  ;;  %v5186_v63 = vadd.f32 %v5185_v62, %v3854_v48  ;;  %5892 = vmatpush1.bf16.msra.mxu0 %v7409_v49  ;;  %v7382_v59 = vld [vmem:[#allocation8 + $0x608] ss:$16 sps:$4 sm:$0xff]   ;;  %v7387_v48 = vld [vmem:[#allocation8 + $0x7ec] ss:$16 sps:$4 sm:$0xff]  }
 0x339   :  { %v5226_v34 = vpop.f32.mrf.mxu1  ;;  %v5187_v7 = vpop.f32.mrf.mxu0  ;;  %5893 = vmatprep.subr.bf16.mxu0 %v7414_v32  ;;  %v7442_v49 = vld [vmem:[#allocation11 + $0xc0] ss:$8 sps:$4 sm:$0xff]   ;;  %v7447_v32 = vld [vmem:[#allocation11 + $0xb4] ss:$8 sps:$4 sm:$0xff]   ;;  %v7445_v62 = vld [vmem:[#allocation11 + $0xb0] ss:$8 sps:$4 sm:$0xff]  }
 0x33a   :  { %v8028_v24 = vadd.f32 %v5226_v34, %v5186_v63  ;;  %v5188_v53 = vadd.f32 %v5187_v7, %v3858_v2  ;;  %v7390_v2 = vld [vmem:[#allocation8 + $0x7cc] ss:$16 sps:$4 sm:$0xff]   ;;  %v7388_v63 = vld [vmem:[#allocation8 + $0x7c8] ss:$16 sps:$4 sm:$0xff]  }
 0x33b   :  { %5383 = vmatpush2.bf16.msra.mxu1 %v7352_v52  ;;  %v5228_v9 = vpop.f32.mrf.mxu1  ;;  %v5189_v11 = vpop.f32.mrf.mxu0  ;;  %v7385_v52 = vld [vmem:[#allocation8 + $0x7e8] ss:$16 sps:$4 sm:$0xff]   ;;  %v7393_v34 = vld [vmem:[#allocation8 + $0x7ac] ss:$16 sps:$4 sm:$0xff]  }
 0x33c   :  { %5384 = vmatprep.subr.bf16.mxu1 %v7357_v61  ;;  %v8030_v33 = vadd.f32 %v5228_v9, %v5188_v53  ;;  %5894 = vmatpush1.bf16.msra.mxu0 %v7412_v3  ;;  %v7450_v61 = vld [vmem:[#allocation11 + $0xa4] ss:$8 sps:$4 sm:$0xff]   ;;  %v7448_v3 = vld [vmem:[#allocation11 + $0xa0] ss:$8 sps:$4 sm:$0xff]   ;;  %v7453_v7 = vld [vmem:[#allocation11 + $0x94] ss:$8 sps:$4 sm:$0xff]  }
 0x33d   :  { %v5230_v38 = vpop.f32.mrf.mxu1  ;;  %v5190_v13 = vpop.f32.mrf.mxu0  ;;  %5895 = vmatprep.subr.bf16.mxu0 %v7417_v22  ;;  %v7391_v22 = vld [vmem:[#allocation8 + $0x7a8] ss:$16 sps:$4 sm:$0xff]   ;;  %v7396_v53 = vld [vmem:[#allocation8 + $0x78c] ss:$16 sps:$4 sm:$0xff]  }
 0x33e   :  { %v7451_v9 = vld [vmem:[#allocation11 + $0x90] ss:$8 sps:$4 sm:$0xff]   ;;  %v7394_v11 = vld [vmem:[#allocation8 + $0x788] ss:$16 sps:$4 sm:$0xff]   ;;  %v7454_v38 = vld [vmem:[#allocation11 + $0x80] ss:$8 sps:$4 sm:$0xff]  }
 0x33f   :  { %5385 = vmatpush2.bf16.msra.mxu1 %v7355_v58  ;;  %v5231_v15 = vpop.f32.mrf.mxu1  ;;  %v7456_v58 = vld [vmem:[#allocation11 + $0x84] ss:$8 sps:$4 sm:$0xff]   ;;  %v7402_v13 = vld [vmem:[#allocation8 + $0x74c] ss:$16 sps:$4 sm:$0xff]  }
 0x340   :  { %5386 = vmatprep.subr.bf16.mxu1 %v7360_v10  ;;  %5896 = vmatpush1.bf16.msra.mxu0 %v7415_v12  ;;  %v7399_v10 = vld [vmem:[#allocation8 + $0x76c] ss:$16 sps:$4 sm:$0xff]   ;;  %v7397_v12 = vld [vmem:[#allocation8 + $0x768] ss:$16 sps:$4 sm:$0xff]  }
 0x341   :  { %5897 = vmatprep.subr.bf16.mxu0 %v7420_v14  ;;  %v7400_v14 = vld [vmem:[#allocation8 + $0x748] ss:$16 sps:$4 sm:$0xff]  }
 0x343   :  { %5387 = vmatpush2.bf16.msra.mxu1 %v7358_v17  ;;  %v7405_v17 = vld [vmem:[#allocation8 + $0x72c] ss:$16 sps:$4 sm:$0xff]  }
 0x344   :  { %5438 = vmatprep.subr.bf16.mxu1 %v7363_v18  ;;  %5898 = vmatpush1.bf16.msra.mxu0 %v7418_v23 }
 0x345   :  { %5899 = vmatprep.subr.bf16.mxu0 %v7423_v25 }
 0x346   :  { %5389 = vmatmul.mubr.bf16.vlgmr.msra.gmra.mxu1 %v7980_v4  ;;  %v7432_v4 = vld [vmem:[#allocation11 + $0x4] ss:$8 sps:$4 sm:$0xff]  }
 0x347   :  { %5439 = vmatpush1.bf16.msra.mxu1 %v7361_v26  ;;  %5470 = vmatprep.mubr.bf16.mxu1 %v8014_v55  ;;  %v7430_v55 = vld [vmem:[#allocation11] ss:$8 sps:$4 sm:$0xff]   ;;  %v7403_v26 = vld [vmem:[#allocation8 + $0x728] ss:$16 sps:$4 sm:$0xff]  }
 0x348   :  { %5440 = vmatprep.subr.bf16.mxu1 %v7366_v20  ;;  %5900 = vmatpush1.bf16.msra.mxu0 %v7421_v19  ;;  %v7408_v19 = vld [vmem:[#allocation8 + $0x70c] ss:$16 sps:$4 sm:$0xff]  }
 0x349   :  { %5901 = vmatprep.subr.bf16.mxu0 %v7426_v27 }
 0x34b   :  { %5441 = vmatpush1.bf16.msra.mxu1 %v7364_v30  ;;  %v7406_v30 = vld [vmem:[#allocation8 + $0x708] ss:$16 sps:$4 sm:$0xff]  }
 0x34c   :  { %5442 = vmatprep.subr.bf16.mxu1 %v7369_v5  ;;  %5902 = vmatpush1.bf16.msra.mxu0 %v7424_v31  ;;  %v7457_v5 = vld [vmem:[#allocation11 + $0x170] ss:$8 sps:$4 sm:$0xff]   ;;  %v7459_v31 = vld [vmem:[#allocation11 + $0x174] ss:$8 sps:$4 sm:$0xff]  }
 0x34d   :  { %5903 = vmatprep.subr.bf16.mxu0 %v7429_v28  ;;  %v7460_v28 = vld [vmem:[#allocation11 + $0x160] ss:$8 sps:$4 sm:$0xff]  }
 0x34f   :  { %5443 = vmatpush1.bf16.msra.mxu1 %v7367_v36  ;;  %v7463_v36 = vld [vmem:[#allocation11 + $0x150] ss:$8 sps:$4 sm:$0xff]  }
 0x350   :  { %5444 = vmatprep.subr.bf16.mxu1 %v7372_v50  ;;  %5904 = vmatpush1.bf16.msra.mxu0 %v7427_v41  ;;  %v7468_v50 = vld [vmem:[#allocation11 + $0x144] ss:$8 sps:$4 sm:$0xff]   ;;  %v7466_v41 = vld [vmem:[#allocation11 + $0x140] ss:$8 sps:$4 sm:$0xff]  }
 0x351   :  { %5905 = vmatprep.subr.bf16.mxu0 %v7432_v4  ;;  %v7471_v4 = vld [vmem:[#allocation11 + $0x134] ss:$8 sps:$4 sm:$0xff]  }
 0x353   :  { %5445 = vmatpush1.bf16.msra.mxu1 %v7370_v29  ;;  %v7469_v29 = vld [vmem:[#allocation11 + $0x130] ss:$8 sps:$4 sm:$0xff]  }
 0x354   :  { %5446 = vmatprep.subr.bf16.mxu1 %v7375_v8  ;;  %5906 = vmatpush1.bf16.msra.mxu0 %v7430_v55  ;;  %v7472_v8 = vld [vmem:[#allocation11 + $0x120] ss:$8 sps:$4 sm:$0xff]   ;;  %v7477_v55 = vld [vmem:[#allocation11 + $0x114] ss:$8 sps:$4 sm:$0xff]  }
 0x355   :  { %5907 = vmatprep.subr.bf16.mxu0 %v7435_v37  ;;  %v7475_v37 = vld [vmem:[#allocation11 + $0x110] ss:$8 sps:$4 sm:$0xff]  }
 0x357   :  { %5447 = vmatpush1.bf16.msra.mxu1 %v7373_v43  ;;  %v7480_v43 = vld [vmem:[#allocation11 + $0x104] ss:$8 sps:$4 sm:$0xff]  }
 0x358   :  { %5448 = vmatprep.subr.bf16.mxu1 %v7378_v39  ;;  %5908 = vmatpush2.bf16.msra.mxu0 %v7433_v35  ;;  %v7478_v39 = vld [vmem:[#allocation11 + $0x100] ss:$8 sps:$4 sm:$0xff]   ;;  %v7483_v35 = vld [vmem:[#allocation11 + $0x1f4] ss:$8 sps:$4 sm:$0xff]  }
 0x359   :  { %5909 = vmatprep.subr.bf16.mxu0 %v7438_v40  ;;  %v7481_v40 = vld [vmem:[#allocation11 + $0x1f0] ss:$8 sps:$4 sm:$0xff]  }
 0x35b   :  { %5449 = vmatpush1.bf16.msra.mxu1 %v7376_v57  ;;  %v7486_v57 = vld [vmem:[#allocation11 + $0x1e4] ss:$8 sps:$4 sm:$0xff]  }
 0x35c   :  { %5450 = vmatprep.subr.bf16.mxu1 %v7381_v44  ;;  %5910 = vmatpush2.bf16.msra.mxu0 %v7436_v45  ;;  %v7484_v44 = vld [vmem:[#allocation11 + $0x1e0] ss:$8 sps:$4 sm:$0xff]   ;;  %v7489_v45 = vld [vmem:[#allocation11 + $0x1d4] ss:$8 sps:$4 sm:$0xff]  }
 0x35d   :  { %5911 = vmatprep.subr.bf16.mxu0 %v7441_v42  ;;  %v7487_v42 = vld [vmem:[#allocation11 + $0x1d0] ss:$8 sps:$4 sm:$0xff]  }
 0x35f   :  { %5451 = vmatpush1.bf16.msra.mxu1 %v7379_v21  ;;  %v7492_v21 = vld [vmem:[#allocation11 + $0x1c4] ss:$8 sps:$4 sm:$0xff]  }
 0x360   :  { %5452 = vmatprep.subr.bf16.mxu1 %v7384_v1  ;;  %5912 = vmatpush2.bf16.msra.mxu0 %v7439_v47  ;;  %v7490_v1 = vld [vmem:[#allocation11 + $0x1c0] ss:$8 sps:$4 sm:$0xff]  }
 0x361   :  { %5913 = vmatprep.subr.bf16.mxu0 %v7444_v16  ;;  %v7495_v16 = vld [vmem:[#allocation11 + $0x1b4] ss:$8 sps:$4 sm:$0xff]  }
 0x363   :  { %5453 = vmatpush1.bf16.msra.mxu1 %v7382_v59 }
 0x364   :  { %5454 = vmatprep.subr.bf16.mxu1 %v7387_v48  ;;  %5914 = vmatpush2.bf16.msra.mxu0 %v7442_v49  ;;  %v7493_v48 = vld [vmem:[#allocation11 + $0x1b0] ss:$8 sps:$4 sm:$0xff]  }
 0x365   :  { %5915 = vmatprep.subr.bf16.mxu0 %v7447_v32  ;;  %v7498_v32 = vld [vmem:[#allocation11 + $0x1a4] ss:$8 sps:$4 sm:$0xff]  }
 0x367   :  { %5455 = vmatpush2.bf16.msra.mxu1 %v7385_v52 }
 0x368   :  { %5456 = vmatprep.subr.bf16.mxu1 %v7390_v2  ;;  %5916 = vmatpush2.bf16.msra.mxu0 %v7445_v62  ;;  %v7496_v2 = vld [vmem:[#allocation11 + $0x1a0] ss:$8 sps:$4 sm:$0xff]  }
 0x369   :  { %5917 = vmatprep.subr.bf16.mxu0 %v7450_v61 }
 0x36b   :  { %5457 = vmatpush2.bf16.msra.mxu1 %v7388_v63  ;;  %v7501_v63 = vld [vmem:[#allocation11 + $0x194] ss:$8 sps:$4 sm:$0xff]  }
 0x36c   :  { %5458 = vmatprep.subr.bf16.mxu1 %v7393_v34  ;;  %5918 = vmatpush2.bf16.msra.mxu0 %v7448_v3  ;;  %v7499_v3 = vld [vmem:[#allocation11 + $0x190] ss:$8 sps:$4 sm:$0xff]  }
 0x36d   :  { %5919 = vmatprep.subr.bf16.mxu0 %v7453_v7 }
 0x36f   :  { %5459 = vmatpush2.bf16.msra.mxu1 %v7391_v22 }
 0x370   :  { %5460 = vmatprep.subr.bf16.mxu1 %v7396_v53  ;;  %5920 = vmatpush2.bf16.msra.mxu0 %v7451_v9 }
 0x371   :  { %5921 = vmatprep.subr.bf16.mxu0 %v7456_v58  ;;  %v7504_v58 = vld [vmem:[#allocation11 + $0x184] ss:$8 sps:$4 sm:$0xff]  }
 0x373   :  { %5461 = vmatpush2.bf16.msra.mxu1 %v7394_v11 }
 0x374   :  { %5462 = vmatprep.subr.bf16.mxu1 %v7399_v10  ;;  %5922 = vmatpush2.bf16.msra.mxu0 %v7454_v38  ;;  %v7502_v38 = vld [vmem:[#allocation11 + $0x180] ss:$8 sps:$4 sm:$0xff]  }
 0x377   :  { %5463 = vmatpush2.bf16.msra.mxu1 %v7397_v12  ;;  %v5267_v15 = vpop.f32.mrf.mxu0 }
 0x378   :  { %5464 = vmatprep.subr.bf16.mxu1 %v7402_v13  ;;  %v8035_v18 = vadd.f32 %v5267_v15, %v8028_v24  ;;  %v7462_v24 = vld [vmem:[#allocation11 + $0x164] ss:$8 sps:$4 sm:$0xff]  }
 0x379   :  { %v5269_v23 = vpop.f32.mrf.mxu0 }
 0x37a   :  { %v8038_v25 = vadd.f32 %v5269_v23, %v8030_v33  ;;  %v7465_v33 = vld [vmem:[#allocation11 + $0x154] ss:$8 sps:$4 sm:$0xff]  }
 0x37b   :  { %5465 = vmatpush2.bf16.msra.mxu1 %v7400_v14  ;;  %v5271_v20 = vpop.f32.mrf.mxu0 }
 0x37c   :  { %5466 = vmatprep.subr.bf16.mxu1 %v7405_v17 }
 0x37d   :  { %v5272_v27 = vpop.f32.mrf.mxu0 }
 0x37f   :  { %5467 = vmatpush2.bf16.msra.mxu1 %v7403_v26  ;;  %v3866_v26 = vrot.slane %v8021_v46, %v614_v60  ;;  %v7510_v60 = vld [vmem:[#allocation14 + $0x28] sm:$0xff]  }
 0x380   :  { %5468 = vmatprep.subr.bf16.mxu1 %v7408_v19 }
 0x383   :  { %5469 = vmatpush2.bf16.msra.mxu1 %v7406_v30 }
 0x384   :  { %5932 = vmatprep.subr.bf16.mxu1 %v7459_v31 }
 0x386   :  { %5471 = vmatmul.mubr.bf16.vlgmr.msra.gmra.mxu1 %v8016_v56  ;;  %v7474_v56 = vld [vmem:[#allocation11 + $0x124] ss:$8 sps:$4 sm:$0xff]  }
 0x387   :  { %5933 = vmatpush1.bf16.msra.mxu1 %v7457_v5 }
 0x388   :  { %5934 = vmatprep.subr.bf16.mxu1 %v7462_v24 }
 0x38b   :  { %5935 = vmatpush1.bf16.msra.mxu1 %v7460_v28 }
 0x38c   :  { %5936 = vmatprep.subr.bf16.mxu1 %v7465_v33 }
 0x38f   :  { %5937 = vmatpush1.bf16.msra.mxu1 %v7463_v36 }
 0x390   :  { %5938 = vmatprep.subr.bf16.mxu1 %v7468_v50  ;;  %v7505_v50 = vld [vmem:[#allocation14 + $0x78] sm:$0xff]  }
 0x391   :  { %6977 = vmatprep.subr.bf16.mxu0 %v7505_v50 }
 0x393   :  { %5939 = vmatpush1.bf16.msra.mxu1 %v7466_v41  ;;  %v7506_v41 = vld [vmem:[#allocation14 + $0x38] sm:$0xff]  }
 0x394   :  { %5940 = vmatprep.subr.bf16.mxu1 %v7471_v4  ;;  %v7507_v4 = vld [vmem:[#allocation14 + $0x70] sm:$0xff]  }
 0x397   :  { %5941 = vmatpush1.bf16.msra.mxu1 %v7469_v29  ;;  %v7512_v29 = vld [vmem:[#allocation14 + $0x20] sm:$0xff]  }
 0x398   :  { %5942 = vmatprep.subr.bf16.mxu1 %v7474_v56  ;;  %v7513_v56 = vld [vmem:[#allocation14 + $0x58] sm:$0xff]  }
 0x39b   :  { %5943 = vmatpush1.bf16.msra.mxu1 %v7472_v8  ;;  %v7514_v8 = vld [vmem:[#allocation14 + $0x18] sm:$0xff]  }
 0x39c   :  { %5944 = vmatprep.subr.bf16.mxu1 %v7477_v55  ;;  %v7515_v55 = vld [vmem:[#allocation14 + $0x50] sm:$0xff]  }
 0x39f   :  { %5945 = vmatpush1.bf16.msra.mxu1 %v7475_v37 }
 0x3a0   :  { %5946 = vmatprep.subr.bf16.mxu1 %v7480_v43 }
 0x3a3   :  { %5947 = vmatpush1.bf16.msra.mxu1 %v7478_v39 }
 0x3a4   :  { %5948 = vmatprep.subr.bf16.mxu1 %v7483_v35 }
 0x3a7   :  { %5949 = vmatpush2.bf16.msra.mxu1 %v7481_v40 }
 0x3a8   :  { %5950 = vmatprep.subr.bf16.mxu1 %v7486_v57 }
 0x3ab   :  { %5951 = vmatpush2.bf16.msra.mxu1 %v7484_v44 }
 0x3ac   :  { %5952 = vmatprep.subr.bf16.mxu1 %v7489_v45 }
 0x3af   :  { %5953 = vmatpush2.bf16.msra.mxu1 %v7487_v42 }
 0x3b0   :  { %5954 = vmatprep.subr.bf16.mxu1 %v7492_v21 }
 0x3b3   :  { %5955 = vmatpush2.bf16.msra.mxu1 %v7490_v1 }
 0x3b4   :  { %5956 = vmatprep.subr.bf16.mxu1 %v7495_v16  ;;  %v7516_v16 = vld [vmem:[#allocation14 + $0x10] sm:$0xff]  }
 0x3b7   :  { %v5349_v47 = vpop.f32.mrf.mxu0  ;;  %5957 = vmatpush2.bf16.msra.mxu1 %v7493_v48  ;;  %v7517_v48 = vld [vmem:[#allocation14 + $0x48] sm:$0xff]  }
 0x3b8   :  { %5958 = vmatprep.subr.bf16.mxu1 %v7498_v32  ;;  %v7518_v32 = vld [vmem:[#allocation14 + $0x8] sm:$0xff]  }
 0x3b9   :  { %v5351_v59 = vpop.f32.mrf.mxu0 }
 0x3ba   :  { %v5352_v27 = vadd.f32 %v5351_v59, %v3866_v26 }
 0x3bb   :  { %v5353_v49 = vpop.f32.mrf.mxu0  ;;  %5959 = vmatpush2.bf16.msra.mxu1 %v7496_v2  ;;  %v7519_v2 = vld [vmem:[#allocation14 + $0x40] sm:$0xff]  }
 0x3bc   :  { %5960 = vmatprep.subr.bf16.mxu1 %v7501_v63  ;;  %v5559_v63 = vld [vmem:[#allocation13] sm:$0x3] }
 0x3bd   :  { %v5354_v52 = vpop.f32.mrf.mxu0 }
 0x3bf   :  { %5961 = vmatpush2.bf16.msra.mxu1 %v7499_v3  ;;  %v5568_v3 = vrot.slane %v5559_v63, %v7893_v6  ;;  %v6960_v6 = vld [vmem:[#allocation16] ss:$0 sm:$0xff] }
 0x3c0   :  { %5962 = vmatprep.subr.bf16.mxu1 %v7504_v58 }
 0x3c3   :  { %5963 = vmatpush2.bf16.msra.mxu1 %v7502_v38 }
 0x3c6   :  { %v5308_v62 = vpop.f32.mrf.mxu1 }
 0x3c7   :  { %v5309_v61 = vadd.f32 %v5308_v62, %v8035_v18 }
 0x3c8   :  { %v5310_v34 = vpop.f32.mrf.mxu1 }
 0x3c9   :  { %vm5479_vm8 = vcmp.gt.f32.partialorder %v5309_v61, 0.0  ;;  %v5483_v7 = vmul.f32 0.2, %v5309_v61  ;;  %v5311_v22 = vadd.f32 %v5310_v34, %v8038_v25  ;;  %v3862_v25 = vrot.slane %v8021_v46, %v610_v54  ;;  %v7508_v54 = vld [vmem:[#allocation14 + $0x30] sm:$0xff]   ;;  %v7511_v46 = vld [vmem:[#allocation14 + $0x60] sm:$0xff]  }
 0x3ca   :  { %v5312_v53 = vpop.f32.mrf.mxu1  ;;  %v5564_v34 = vrot.slane %v5559_v63, %v7888_v0 }
 0x3cb   :  { %vm5480_vm9 = vcmp.gt.f32.partialorder %v5311_v22, 0.0  ;;  %v5484_v9 = vmul.f32 0.2, %v5311_v22  ;;  %v5487_v11 = vsel %vm5479_vm8, %v5309_v61, %v5483_v7  ;;  %v5350_v20 = vadd.f32 %v5349_v47, %v3862_v25  ;;  %v7520_v61 = vld [vmem:[#allocation14] sm:$0xff]  }
 0x3cc   :  { %v5313_v10 = vpop.f32.mrf.mxu1  ;;  %v5491_v14 = vpack.c.bf16 %v5487_v11, %v5487_v11 }
 0x3cd   :  { %v5488_v12 = vsel %vm5480_vm9, %v5311_v22, %v5484_v9 }
 0x3ce   :  { %v5492_v13 = vpack.c.bf16 %v5488_v12, %v5488_v12 }
 0x3d0   :  { %5923 = vmatprep.mubr.bf16.mxu0 %v5492_v13 }
 0x3d1   :  { %5924 = vmatmul.mubr.bf16.vlgmr.msra.gmra.mxu0 %v5491_v14 }
 0x3d2   :  { %6978 = vmatpush3.bf16.msra.mxu0 %v7506_v41 }
 0x3d3   :  { %6979 = vmatprep.subr.bf16.mxu0 %v7507_v4 }
 0x3d6   :  { %6980 = vmatpush3.bf16.msra.mxu0 %v7508_v54 }
 0x3d7   :  { %6981 = vmatprep.subr.bf16.mxu0 %v7509_v51 }
 0x3da   :  { %6982 = vmatpush3.bf16.msra.mxu0 %v7510_v60 }
 0x3db   :  { %6983 = vmatprep.subr.bf16.mxu0 %v7511_v46 }
 0x3de   :  { %6984 = vmatpush3.bf16.msra.mxu0 %v7512_v29 }
 0x3df   :  { %6985 = vmatprep.subr.bf16.mxu0 %v7513_v56 }
 0x3e2   :  { %6986 = vmatpush3.bf16.msra.mxu0 %v7514_v8 }
 0x3e3   :  { %6987 = vmatprep.subr.bf16.mxu0 %v7515_v55 }
 0x3e6   :  { %6988 = vmatpush3.bf16.msra.mxu0 %v7516_v16 }
 0x3e7   :  { %6989 = vmatprep.subr.bf16.mxu0 %v7517_v48 }
 0x3ea   :  { %6990 = vmatpush3.bf16.msra.mxu0 %v7518_v32 }
 0x3eb   :  { %6991 = vmatprep.subr.bf16.mxu0 %v7519_v2 }
 0x3ee   :  { %6992 = vmatpush3.bf16.msra.mxu0 %v7520_v61 }
 0x3f7   :  { %v5431_v15 = vpop.f32.mrf.mxu0 }
 0x3f9   :  { %v5433_v17 = vpop.f32.mrf.mxu0 }
 0x3fb   :  { %v5435_v18 = vpop.f32.mrf.mxu0 }
 0x3fd   :  { %v5436_v23 = vpop.f32.mrf.mxu0 }
 0x406   :  { %v5390_v19 = vpop.f32.mrf.mxu1 }
 0x407   :  { %v5391_v30 = vadd.f32 %v5390_v19, %v5350_v20 }
 0x408   :  { %v5392_v5 = vpop.f32.mrf.mxu1 }
 0x409   :  { %v5393_v31 = vadd.f32 %v5392_v5, %v5352_v27  ;;  %v5432_v24 = vadd.f32 %v5431_v15, %v5391_v30 }
 0x40a   :  { %v5394_v28 = vpop.f32.mrf.mxu1 }
 0x40b   :  { %v5434_v33 = vadd.f32 %v5433_v17, %v5393_v31 }
 0x40c   :  { %v5395_v36 = vpop.f32.mrf.mxu1 }
 0x446   :  { %v5472_v37 = vpop.f32.mrf.mxu1 }
 0x447   :  { %v5473_v43 = vadd.f32 %v5472_v37, %v5432_v24 }
 0x448   :  { %v5474_v39 = vpop.f32.mrf.mxu1 }
 0x449   :  { %vm5481_vm10 = vcmp.gt.f32.partialorder %v5473_v43, 0.0  ;;  %v5485_v35 = vmul.f32 0.2, %v5473_v43  ;;  %v5475_v40 = vadd.f32 %v5474_v39, %v5434_v33 }
 0x44a   :  { %v5476_v57 = vpop.f32.mrf.mxu1 }
 0x44b   :  { %vm5482_vm11 = vcmp.gt.f32.partialorder %v5475_v40, 0.0  ;;  %v5486_v44 = vmul.f32 0.2, %v5475_v40  ;;  %v5489_v45 = vsel %vm5481_vm10, %v5473_v43, %v5485_v35 }
 0x44c   :  { %v5477_v42 = vpop.f32.mrf.mxu1  ;;  %v5493_v47 = vpack.c.bf16 %v5489_v45, %v5489_v45 }
 0x44d   :  { %v5490_v21 = vsel %vm5482_vm11, %v5475_v40, %v5486_v44 }
 0x44e   :  { %v5494_v1 = vpack.c.bf16 %v5490_v21, %v5490_v21 }
 0x450   :  { %5964 = vmatprep.mubr.bf16.mxu1 %v5494_v1 }
 0x451   :  { %5965 = vmatmul.mubr.bf16.vlgmr.msra.gmra.mxu1 %v5493_v47 }
 0x491   :  { %v5925_v59 = vpop.f32.mrf.mxu0 }
 0x492   :  { %v5926_v7 = vadd.f32 %v5925_v59, %v5564_v34 }
 0x493   :  { %v5927_v49 = vpop.f32.mrf.mxu0 }
 0x494   :  { %v5928_v53 = vadd.f32 %v5927_v49, %v5568_v3 }
 0x495   :  { %v5929_v52 = vpop.f32.mrf.mxu0 }
 0x497   :  { %v5930_v62 = vpop.f32.mrf.mxu0 }
 0x511   :  { %v5966_v22 = vpop.f32.mrf.mxu1 }
 0x512   :  { %v5967_v9 = vadd.f32 %v5966_v22, %v5926_v7 }
 0x513   :  { %v5968_v58 = vpop.f32.mrf.mxu1 }
 0x514   :  { %vm5973_vm12 = vcmp.gt.f32.partialorder %v5967_v9, 0.0  ;;  %v5975_v11 = vmul.f32 0.2, %v5967_v9  ;;  %v5969_v10 = vadd.f32 %v5968_v58, %v5928_v53 }
 0x515   :  { %v5970_v38 = vpop.f32.mrf.mxu1 }
 0x516   :  { %vm5974_vm13 = vcmp.gt.f32.partialorder %v5969_v10, 0.0  ;;  %v5976_v12 = vmul.f32 0.2, %v5969_v10  ;;  %v5977_v13 = vsel %vm5973_vm12, %v5967_v9, %v5975_v11 }
 0x517   :  { %v5971_v14 = vpop.f32.mrf.mxu1  ;;  %v5979_v18 = vpack.c.bf16 %v5977_v13, %v5977_v13 }
 0x518   :  { %v5978_v15 = vsel %vm5974_vm13, %v5969_v10, %v5976_v12 }
 0x519   :  { %v5980_v17 = vpack.c.bf16 %v5978_v15, %v5978_v15 }
 0x51b   :  { %6148 = vmatprep.mubr.bf16.mxu0 %v5980_v17 }
 0x51c   :  { %6149 = vmatmul.mubr.bf16.vlgmr.msra.gmra.mxu0 %v5979_v18 }
 0x5dc   :  { %v6993_v0 = vpop.f32.mrf.mxu0 }
 0x5de   :  { %v6994_v23 = vpop.f32.mrf.mxu0 }
 0x5df   :  { %v6995_v25 = vadd.f32 %v6994_v23, %v6993_v0 }
 0x5e0   :  { %v6996_v26 = vpop.f32.mrf.mxu0 }
 0x5e1   :  { %v6151_v20 = vadd.f32 %v6995_v25, %v6960_v6 }
 0x5e2   :  { %v6997_v19 = vpop.f32.mrf.mxu0 }
 0x5e3   :  { %v6156_v27 = vand.u32 2147483647, %v6151_v20  ;;  %vm6162_vm14 = vcmp.ge.f32.partialorder %v6151_v20, 0.0 }
 0x5e5   :  { %v6157_v30 = vsub.f32 0.0, %v6156_v27 }
 0x5e7   :  { %v6158_v5 = vmul.f32 1.442695, %v6157_v30 }
 0x5e9   :  { %7521 = vpow2.f32 %v6158_v5 }
 0x5f6   :  { %v7522_v31 = vpop.eup %7521 }
 0x5f7   :  { %v6160_v24 = vadd.f32 1.0, %v7522_v31 }
 0x5f9   :  { %7523 = vrcp.f32 %v6160_v24 }
 0x606   :  { %v7524_v28 = vpop.eup %7523 }
 0x607   :  { %v6163_v33 = vmul.f32 %v7524_v28, %v7522_v31 }
 0x609   :  { %v6164_v36 = vsel %vm6162_vm14, %v7524_v28, %v6163_v33 }
 0x60a   :  { %6165 = vst [vmem:[#allocation17] sm:$0xff] %v6164_v36 }
 0x60b   :  { %7719 = shalt.err (!%p7716_p7)
}
 0x60c   :  { %6175 = dma.vmem_to_hbm [thread:$0]  %s6173_s8, 128, %s8063_s9, [#allocation4]  }
 0x60d   :  { %7738 = dma.done.wait [#allocation4], 128  }
 0x60e   :  { %7739 = vsyncadd [#allocation4], 4294967168 }
 0x60f   :  { %6179 = vsyncpa [#allocation3], 1 }
 0x610   :  { %6180 = vsyncpa [#allocation6], 1 }
 0x611   :  { %6181 = vsyncpa [#allocation9], 1 }
 0x612   :  { %6182 = vsyncpa [#allocation12], 1 }
 0x613   :  { %6183 = vsyncpa [#allocation15], 1 }
 0x614   :  { %6184 = vsyncpa [#allocation4], 1 }

// kernel: tpu_custom_call.1
= control target key start
LH: loop header
LB: loop body
LE: loop exit
PB: predicated region body
PF: predicated region fallthrough
CT: control target
= control target key end

     0   :  { %14 = vsyncpa [#allocation3], 0  ;;  %s8054_s0 = inlined_call_operand.hbm [shape: bf16[8,896], index: 0, kind: input, shape index: {}]   ;;  %s8055_s1 = inlined_call_operand.hbm [shape: bf16[896,1024], index: 1, kind: input, shape index: {}]   ;;  %s8056_s2 = inlined_call_operand.hbm [shape: f32[1,1024], index: 2, kind: input, shape index: {}]   ;;  %s8057_s3 = inlined_call_operand.hbm [shape: bf16[1024,512], index: 3, kind: input, shape index: {}]   ;;  %s8058_s4 = inlined_call_operand.hbm [shape: f32[1,512], index: 4, kind: input, shape index: {}]   ;;  %s8059_s5 = inlined_call_operand.hbm [shape: bf16[512,256], index: 5, kind: input, shape index: {}]   ;;  %s8060_s6 = inlined_call_operand.hbm [shape: f32[1,256], index: 6, kind: input, shape index: {}]   ;;  %s8061_s7 = inlined_call_operand.hbm [shape: bf16[256,128], index: 7, kind: input, shape index: {}]   ;;  %s8062_s8 = inlined_call_operand.hbm [shape: f32[1,128], index: 8, kind: input, shape index: {}]   ;;  %s8063_s9 = inlined_call_operand.hbm [shape: f32[8,128], index: 9, kind: output, shape index: {}]  }
   0x1   :  { %15 = vsyncpa [#allocation6], 0 }
   0x2   :  { %16 = vsyncpa [#allocation9], 0 }
   0x3   :  { %17 = vsyncpa [#allocation12], 0 }
   0x4   :  { %18 = vsyncpa [#allocation15], 0 }
   0x5   :  { %19 = vsyncpa [#allocation4], 0  ;;  %s7740_s30 = smov [#allocation5]  }
   0x6   :  { %s35_s10 = sshll.u32 %s7740_s30, 4  ;;  %s36_s10 = int_to_ptr.vmem [resolvable:$true] %s35_s10 }
   0x7   :  { %s7536_s11 = scalar_lea.vmem %s36_s10, 57344  ;;  %p7541_p1 = scmp.lt.s32.totalorder %s36_s10, %s36_s10 }
   0x8   :  { %p7537_p0 = scmp.ne.s32.totalorder %s36_s10, %s7536_s11  ;;  %p7542_p2 = scmp.lt.s32.totalorder %s7536_s11, %s7536_s11 }
   0xa   :  { %p7543_p3 = por %p7542_p2, %p7541_p1 }
   0xc   :  { %p7544_p4 = pnand %p7543_p3, %p7537_p0 }
   0xe   :  { %7547 = shalt.err (!%p7544_p4)
}
   0xf   :  { %s7741_s12 = smov 512   ;;  %s7742_s13 = smov 32  }
  0x10   :  { %41 = dma.hbm_to_vmem [thread:$0]  %s8055_s1, 57344, %s36_s10, [#allocation6], %s7741_s12, %s7741_s12, %s7742_s13  }
  0x11   :  { %s7743_s16 = smov [#allocation8]  }
  0x12   :  { %s57_s17 = sshll.u32 %s7743_s16, 4  ;;  %s58_s17 = int_to_ptr.vmem [resolvable:$true] %s57_s17 }
  0x13   :  { %s7556_s18 = scalar_lea.vmem %s58_s17, 32768  ;;  %p7561_p6 = scmp.lt.s32.totalorder %s58_s17, %s58_s17 }
  0x14   :  { %p7557_p5 = scmp.ne.s32.totalorder %s58_s17, %s7556_s18  ;;  %p7562_p7 = scmp.lt.s32.totalorder %s7556_s18, %s7556_s18 }
  0x16   :  { %p7563_p8 = por %p7562_p7, %p7561_p6 }
  0x18   :  { %p7564_p9 = pnand %p7563_p8, %p7557_p5 }
  0x1a   :  { %7567 = shalt.err (!%p7564_p9)
}
  0x1b   :  { %s7744_s19 = smov 256   ;;  %s7745_s20 = smov 16  }
  0x1c   :  { %63 = dma.hbm_to_vmem [thread:$0]  %s8057_s3, 32768, %s58_s17, [#allocation9], %s7744_s19, %s7744_s19, %s7745_s20  }
  0x1d   :  { %s7746_s23 = smov [#allocation11]  }
  0x1e   :  { %s79_s24 = sshll.u32 %s7746_s23, 4  ;;  %s80_s24 = int_to_ptr.vmem [resolvable:$true] %s79_s24 }
  0x1f   :  { %s7576_s1 = scalar_lea.vmem %s80_s24, 8192  ;;  %p7581_p11 = scmp.lt.s32.totalorder %s80_s24, %s80_s24 }
  0x20   :  { %p7577_p10 = scmp.ne.s32.totalorder %s80_s24, %s7576_s1  ;;  %p7582_p12 = scmp.lt.s32.totalorder %s7576_s1, %s7576_s1 }
  0x22   :  { %p7583_p13 = por %p7582_p12, %p7581_p11 }
  0x24   :  { %p7584_p0 = pnand %p7583_p13, %p7577_p10 }
  0x26   :  { %7587 = shalt.err (!%p7584_p0)
}
  0x27   :  { %s7747_s25 = smov 128   ;;  %s7748_s26 = smov 8  }
  0x28   :  { %85 = dma.hbm_to_vmem [thread:$0]  %s8059_s5, 8192, %s80_s24, [#allocation12], %s7747_s25, %s7747_s25, %s7748_s26  }
  0x29   :  { %s7749_s29 = smov [#allocation14]  }
  0x2a   :  { %s101_s30 = sshll.u32 %s7749_s29, 4  ;;  %s102_s30 = int_to_ptr.vmem [resolvable:$true] %s101_s30 }
  0x2b   :  { %s7596_s3 = scalar_lea.vmem %s102_s30, 2048  ;;  %p7601_p2 = scmp.lt.s32.totalorder %s102_s30, %s102_s30 }
  0x2c   :  { %p7597_p1 = scmp.ne.s32.totalorder %s102_s30, %s7596_s3  ;;  %p7602_p3 = scmp.lt.s32.totalorder %s7596_s3, %s7596_s3 }
  0x2e   :  { %p7603_p4 = por %p7602_p3, %p7601_p2 }
  0x30   :  { %p7604_p5 = pnand %p7603_p4, %p7597_p1 }
  0x32   :  { %7607 = shalt.err (!%p7604_p5)
}
  0x33   :  { %s7750_s10 = smov 64   ;;  %s7751_s11 = smov 4  }
  0x34   :  { %107 = dma.hbm_to_vmem [thread:$0]  %s8061_s7, 2048, %s102_s30, [#allocation15], %s7750_s10, %s7750_s10, %s7751_s11  }
  0x35   :  { %s7752_s14 = smov [#allocation2]   ;;  %s7753_s16 = smov [#allocation7]  }
  0x36   :  { %s26_s15 = sshll.u32 %s7752_s14, 4  ;;  %s48_s5 = sshll.u32 %s7753_s16, 4  ;;  %s27_s15 = int_to_ptr.vmem [resolvable:$true] %s26_s15  ;;  %s49_s5 = int_to_ptr.vmem [resolvable:$true] %s48_s5 }
  0x37   :  { %s7616_s17 = scalar_lea.vmem %s27_s15, 448  ;;  %p7621_p7 = scmp.lt.s32.totalorder %s27_s15, %s27_s15 }
  0x38   :  { %p7617_p6 = scmp.ne.s32.totalorder %s27_s15, %s7616_s17  ;;  %p7622_p8 = scmp.lt.s32.totalorder %s7616_s17, %s7616_s17 }
  0x3a   :  { %p7623_p9 = por %p7622_p8, %p7621_p7 }
  0x3c   :  { %p7624_p10 = pnand %p7623_p9, %p7617_p6 }
  0x3e   :  { %7627 = shalt.err (!%p7624_p10)
}
  0x3f   :  { %29 = dma.hbm_to_vmem [thread:$0]  %s8054_s0, 448, %s27_s15, [#allocation3]  }
  0x40   :  { %s7636_s20 = scalar_lea.vmem %s49_s5, 128  ;;  %p7641_p12 = scmp.lt.s32.totalorder %s49_s5, %s49_s5 }
  0x41   :  { %p7637_p11 = scmp.ne.s32.totalorder %s49_s5, %s7636_s20  ;;  %p7642_p13 = scmp.lt.s32.totalorder %s7636_s20, %s7636_s20 }
  0x43   :  { %p7643_p0 = por %p7642_p13, %p7641_p12 }
  0x45   :  { %p7644_p1 = pnand %p7643_p0, %p7637_p11 }
  0x47   :  { %7647 = shalt.err (!%p7644_p1)
}
  0x48   :  { %51 = dma.hbm_to_vmem [thread:$0]  %s8056_s2, 128, %s49_s5, [#allocation6]  }
  0x49   :  { %s7754_s22 = smov [#allocation10]   ;;  %s7755_s24 = smov [#allocation13]  }
  0x4a   :  { %s70_s23 = sshll.u32 %s7754_s22, 4  ;;  %s92_s1 = sshll.u32 %s7755_s24, 4  ;;  %s71_s23 = int_to_ptr.vmem [resolvable:$true] %s70_s23  ;;  %s93_s1 = int_to_ptr.vmem [resolvable:$true] %s92_s1 }
  0x4b   :  { %s7656_s25 = scalar_lea.vmem %s71_s23, 64  ;;  %p7661_p3 = scmp.lt.s32.totalorder %s71_s23, %s71_s23 }
  0x4c   :  { %p7657_p2 = scmp.ne.s32.totalorder %s71_s23, %s7656_s25  ;;  %p7662_p4 = scmp.lt.s32.totalorder %s7656_s25, %s7656_s25 }
  0x4e   :  { %p7663_p5 = por %p7662_p4, %p7661_p3 }
  0x50   :  { %p7664_p6 = pnand %p7663_p5, %p7657_p2 }
  0x52   :  { %7667 = shalt.err (!%p7664_p6)
}
  0x53   :  { %73 = dma.hbm_to_vmem [thread:$0]  %s8058_s4, 64, %s71_s23, [#allocation9]  }
  0x54   :  { %s7676_s27 = scalar_lea.vmem %s93_s1, 32  ;;  %p7681_p8 = scmp.lt.s32.totalorder %s93_s1, %s93_s1 }
  0x55   :  { %p7677_p7 = scmp.ne.s32.totalorder %s93_s1, %s7676_s27  ;;  %p7682_p9 = scmp.lt.s32.totalorder %s7676_s27, %s7676_s27 }
  0x57   :  { %p7683_p10 = por %p7682_p9, %p7681_p8 }
  0x59   :  { %p7684_p11 = pnand %p7683_p10, %p7677_p7 }
  0x5b   :  { %7687 = shalt.err (!%p7684_p11)
}
  0x5c   :  { %95 = dma.hbm_to_vmem [thread:$0]  %s8060_s6, 32, %s93_s1, [#allocation12]  }
  0x5d   :  { %s7756_s29 = smov [#allocation16]  }
  0x5e   :  { %s114_s30 = sshll.u32 %s7756_s29, 4  ;;  %s115_s30 = int_to_ptr.vmem [resolvable:$true] %s114_s30 }
  0x5f   :  { %s7696_s3 = scalar_lea.vmem %s115_s30, 16  ;;  %s7700_s10 = scalar_lea.vmem %s115_s30, 32 }
  0x60   :  { %p7697_p12 = scmp.ne.s32.totalorder %s115_s30, %s7696_s3  ;;  %p7701_p13 = scmp.lt.s32.totalorder %s115_s30, %s115_s30 }
  0x61   :  { %p7702_p0 = scmp.lt.s32.totalorder %s7700_s10, %s7696_s3 }
  0x63   :  { %p7703_p1 = por %p7702_p0, %p7701_p13 }
  0x65   :  { %p7704_p2 = pnand %p7703_p1, %p7697_p12 }
  0x67   :  { %7707 = shalt.err (!%p7704_p2)
}
  0x68   :  { %117 = dma.hbm_to_vmem [thread:$0]  %s8062_s8, 16, %s115_s30, [#allocation15]  }
  0x69   :  { %7728 = dma.done.wait [#allocation3], 448  }
  0x6a   :  { %7729 = vsyncadd [#allocation3], 4294966848 }
  0x6b   :  { %7730 = dma.done.wait [#allocation6], 57472  }
  0x6c   :  { %7731 = vsyncadd [#allocation6], 4294909824 }
  0x6d   :  { %7732 = dma.done.wait [#allocation9], 32832  }
  0x6e   :  { %7733 = vsyncadd [#allocation9], 4294934464 }
  0x6f   :  { %7734 = dma.done.wait [#allocation12], 8224  }
  0x70   :  { %7735 = vsyncadd [#allocation12], 4294959072 }
  0x71   :  { %7736 = dma.done.wait [#allocation15], 2064  }
  0x72   :  { %7737 = vsyncadd [#allocation15], 4294965232  ;;  %v206_v0 = vld [vmem:[#allocation5 + $0x1c0] sm:$0xff]  ;;  %v7838_v54 = vld [vmem:[#allocation2 + $0x8] sm:$0xff]  ;;  %s7758_s6 = smov [#allocation17]  }
  0x73   :  { %v210_v1 = vld [vmem:[#allocation5 + $0x1e0] sm:$0xff]  ;;  %v7846_v59 = vcombine.high %v7838_v54, %v7838_v54  ;;  %s6172_s8 = sshll.u32 %s7758_s6, 4  ;;  %s6173_s8 = int_to_ptr.vmem [resolvable:$true] %s6172_s8 }
  0x74   :  { %v334_v2 = vld [vmem:[#allocation5 + $0x5c0] sm:$0xff]  ;;  %v6249_v3 = vcombine.high %v206_v0, %v210_v1  ;;  %v6248_v5 = vcombine.low %v206_v0, %v210_v1  ;;  %s7708_s12 = scalar_lea.vmem %s6173_s8, 128  ;;  %p7713_p4 = scmp.lt.s32.totalorder %s6173_s8, %s6173_s8 }
  0x75   :  { %v338_v4 = vld [vmem:[#allocation5 + $0x5e0] sm:$0xff]  ;;  %2978 = vmatprep.mubr.bf16.mxu1 %v7846_v59  ;;  %p7709_p3 = scmp.ne.s32.totalorder %s6173_s8, %s7708_s12  ;;  %p7714_p5 = scmp.lt.s32.totalorder %s7708_s12, %s7708_s12 }
  0x76   :  { %v198_v6 = vld [vmem:[#allocation5 + $0x180] sm:$0xff]  ;;  %v6377_v8 = vcombine.high %v334_v2, %v338_v4  ;;  %v6376_v9 = vcombine.low %v334_v2, %v338_v4  ;;  %2905 = vmatprep.subr.bf16.mxu0 %v6249_v3 }
  0x77   :  { %v202_v7 = vld [vmem:[#allocation5 + $0x1a0] sm:$0xff]  ;;  %2906 = vmatpush1.bf16.msra.mxu0 %v6248_v5  ;;  %p7715_p6 = por %p7714_p5, %p7713_p4 }
  0x78   :  { %v6241_v10 = vcombine.high %v198_v6, %v202_v7  ;;  %v326_v11 = vld [vmem:[#allocation5 + $0x580] sm:$0xff]  ;;  %2946 = vmatprep.subr.bf16.mxu1 %v6377_v8  ;;  %v6240_v18 = vcombine.low %v198_v6, %v202_v7 }
  0x79   :  { %v330_v12 = vld [vmem:[#allocation5 + $0x5a0] sm:$0xff]  ;;  %2947 = vmatpush1.bf16.msra.mxu1 %v6376_v9  ;;  %p7716_p7 = pnand %p7715_p6, %p7709_p3 }
  0x7a   :  { %v190_v13 = vld [vmem:[#allocation5 + $0x140] sm:$0xff]  ;;  %v6369_v14 = vcombine.high %v326_v11, %v330_v12  ;;  %2907 = vmatprep.subr.bf16.mxu0 %v6241_v10  ;;  %v6368_v19 = vcombine.low %v326_v11, %v330_v12 }
  0x7b   :  { %v194_v15 = vld [vmem:[#allocation5 + $0x160] sm:$0xff]  ;;  %2908 = vmatpush1.bf16.msra.mxu0 %v6240_v18 }
  0x7c   :  { %v318_v16 = vld [vmem:[#allocation5 + $0x540] sm:$0xff]  ;;  %v6233_v20 = vcombine.high %v190_v13, %v194_v15  ;;  %2948 = vmatprep.subr.bf16.mxu1 %v6369_v14  ;;  %v6232_v26 = vcombine.low %v190_v13, %v194_v15 }
  0x7d   :  { %v322_v17 = vld [vmem:[#allocation5 + $0x560] sm:$0xff]  ;;  %2949 = vmatpush1.bf16.msra.mxu1 %v6368_v19 }
  0x7e   :  { %v6361_v21 = vcombine.high %v318_v16, %v322_v17  ;;  %v182_v22 = vld [vmem:[#allocation5 + $0x100] sm:$0xff]  ;;  %2909 = vmatprep.subr.bf16.mxu0 %v6233_v20  ;;  %v6360_v27 = vcombine.low %v318_v16, %v322_v17 }
  0x7f   :  { %v186_v23 = vld [vmem:[#allocation5 + $0x120] sm:$0xff]  ;;  %2910 = vmatpush1.bf16.msra.mxu0 %v6232_v26 }
  0x80   :  { %v310_v24 = vld [vmem:[#allocation5 + $0x500] sm:$0xff]  ;;  %v6225_v28 = vcombine.high %v182_v22, %v186_v23  ;;  %2950 = vmatprep.subr.bf16.mxu1 %v6361_v21  ;;  %v6224_v34 = vcombine.low %v182_v22, %v186_v23 }
  0x81   :  { %v314_v25 = vld [vmem:[#allocation5 + $0x520] sm:$0xff]  ;;  %2951 = vmatpush1.bf16.msra.mxu1 %v6360_v27 }
  0x82   :  { %v6353_v29 = vcombine.high %v310_v24, %v314_v25  ;;  %v174_v30 = vld [vmem:[#allocation5 + $0xc0] sm:$0xff]  ;;  %2911 = vmatprep.subr.bf16.mxu0 %v6225_v28  ;;  %v6352_v35 = vcombine.low %v310_v24, %v314_v25 }
  0x83   :  { %v178_v31 = vld [vmem:[#allocation5 + $0xe0] sm:$0xff]  ;;  %2912 = vmatpush1.bf16.msra.mxu0 %v6224_v34 }
  0x84   :  { %v302_v32 = vld [vmem:[#allocation5 + $0x4c0] sm:$0xff]  ;;  %v6217_v36 = vcombine.high %v174_v30, %v178_v31  ;;  %2952 = vmatprep.subr.bf16.mxu1 %v6353_v29  ;;  %v6216_v42 = vcombine.low %v174_v30, %v178_v31 }
  0x85   :  { %v306_v33 = vld [vmem:[#allocation5 + $0x4e0] sm:$0xff]  ;;  %2953 = vmatpush1.bf16.msra.mxu1 %v6352_v35 }
  0x86   :  { %v6345_v37 = vcombine.high %v302_v32, %v306_v33  ;;  %v166_v38 = vld [vmem:[#allocation5 + $0x80] sm:$0xff]  ;;  %2913 = vmatprep.subr.bf16.mxu0 %v6217_v36  ;;  %v6344_v43 = vcombine.low %v302_v32, %v306_v33 }
  0x87   :  { %v170_v39 = vld [vmem:[#allocation5 + $0xa0] sm:$0xff]  ;;  %2914 = vmatpush1.bf16.msra.mxu0 %v6216_v42 }
  0x88   :  { %v294_v40 = vld [vmem:[#allocation5 + $0x480] sm:$0xff]  ;;  %v6209_v44 = vcombine.high %v166_v38, %v170_v39  ;;  %2954 = vmatprep.subr.bf16.mxu1 %v6345_v37  ;;  %v6208_v50 = vcombine.low %v166_v38, %v170_v39 }
  0x89   :  { %v298_v41 = vld [vmem:[#allocation5 + $0x4a0] sm:$0xff]  ;;  %2955 = vmatpush1.bf16.msra.mxu1 %v6344_v43 }
  0x8a   :  { %v6337_v45 = vcombine.high %v294_v40, %v298_v41  ;;  %v158_v46 = vld [vmem:[#allocation5 + $0x40] sm:$0xff]  ;;  %2915 = vmatprep.subr.bf16.mxu0 %v6209_v44  ;;  %v6336_v51 = vcombine.low %v294_v40, %v298_v41 }
  0x8b   :  { %v162_v47 = vld [vmem:[#allocation5 + $0x60] sm:$0xff]  ;;  %2916 = vmatpush1.bf16.msra.mxu0 %v6208_v50 }
  0x8c   :  { %v286_v48 = vld [vmem:[#allocation5 + $0x440] sm:$0xff]  ;;  %v6201_v52 = vcombine.high %v158_v46, %v162_v47  ;;  %2956 = vmatprep.subr.bf16.mxu1 %v6337_v45  ;;  %v6200_v62 = vcombine.low %v158_v46, %v162_v47 }
  0x8d   :  { %v290_v49 = vld [vmem:[#allocation5 + $0x460] sm:$0xff]  ;;  %2957 = vmatpush1.bf16.msra.mxu1 %v6336_v51 }
  0x8e   :  { %v7836_v53 = vld [vmem:[#allocation2] sm:$0xff]  ;;  %v6329_v55 = vcombine.high %v286_v48, %v290_v49  ;;  %2917 = vmatprep.subr.bf16.mxu0 %v6201_v52  ;;  %v6328_v63 = vcombine.low %v286_v48, %v290_v49 }
  0x8f   :  { %v150_v56 = vld [vmem:[#allocation5] sm:$0xff]  ;;  %v7842_v58 = vcombine.high %v7836_v53, %v7836_v53  ;;  %2918 = vmatpush1.bf16.msra.mxu0 %v6200_v62 }
  0x90   :  { %v154_v57 = vld [vmem:[#allocation5 + $0x20] sm:$0xff]  ;;  %2958 = vmatprep.subr.bf16.mxu1 %v6329_v55 }
  0x91   :  { %v278_v60 = vld [vmem:[#allocation5 + $0x400] sm:$0xff]  ;;  %2937 = vmatprep.mubr.bf16.mxu0 %v7842_v58  ;;  %v6193_v0 = vcombine.high %v150_v56, %v154_v57  ;;  %v6192_v6 = vcombine.low %v150_v56, %v154_v57  ;;  %2959 = vmatpush1.bf16.msra.mxu1 %v6328_v63 }
  0x92   :  { %v282_v61 = vld [vmem:[#allocation5 + $0x420] sm:$0xff] }
  0x93   :  { %v6321_v1 = vcombine.high %v278_v60, %v282_v61  ;;  %v270_v2 = vld [vmem:[#allocation5 + $0x3c0] sm:$0xff]  ;;  %2919 = vmatprep.subr.bf16.mxu0 %v6193_v0  ;;  %v6320_v7 = vcombine.low %v278_v60, %v282_v61 }
  0x94   :  { %v274_v3 = vld [vmem:[#allocation5 + $0x3e0] sm:$0xff]  ;;  %2920 = vmatpush1.bf16.msra.mxu0 %v6192_v6 }
  0x95   :  { %v398_v4 = vld [vmem:[#allocation5 + $0x7c0] sm:$0xff]  ;;  %v6313_v8 = vcombine.high %v270_v2, %v274_v3  ;;  %2960 = vmatprep.subr.bf16.mxu1 %v6321_v1  ;;  %v6312_v14 = vcombine.low %v270_v2, %v274_v3 }
  0x96   :  { %v402_v5 = vld [vmem:[#allocation5 + $0x7e0] sm:$0xff]  ;;  %2961 = vmatpush1.bf16.msra.mxu1 %v6320_v7 }
  0x97   :  { %v6441_v9 = vcombine.high %v398_v4, %v402_v5  ;;  %v262_v10 = vld [vmem:[#allocation5 + $0x380] sm:$0xff]  ;;  %2921 = vmatprep.subr.bf16.mxu0 %v6313_v8  ;;  %v6440_v15 = vcombine.low %v398_v4, %v402_v5 }
  0x98   :  { %v266_v11 = vld [vmem:[#allocation5 + $0x3a0] sm:$0xff]  ;;  %2922 = vmatpush2.bf16.msra.mxu0 %v6312_v14 }
  0x99   :  { %v390_v12 = vld [vmem:[#allocation5 + $0x780] sm:$0xff]  ;;  %v6305_v16 = vcombine.high %v262_v10, %v266_v11  ;;  %2962 = vmatprep.subr.bf16.mxu1 %v6441_v9  ;;  %v6304_v22 = vcombine.low %v262_v10, %v266_v11 }
  0x9a   :  { %v394_v13 = vld [vmem:[#allocation5 + $0x7a0] sm:$0xff]  ;;  %2963 = vmatpush2.bf16.msra.mxu1 %v6440_v15 }
  0x9b   :  { %v6433_v17 = vcombine.high %v390_v12, %v394_v13  ;;  %v254_v18 = vld [vmem:[#allocation5 + $0x340] sm:$0xff]  ;;  %2923 = vmatprep.subr.bf16.mxu0 %v6305_v16  ;;  %v6432_v23 = vcombine.low %v390_v12, %v394_v13  ;;  %v7852_v16 = vcombine.low %v7836_v53, %v7836_v53 }
  0x9c   :  { %v258_v19 = vld [vmem:[#allocation5 + $0x360] sm:$0xff]  ;;  %2924 = vmatpush2.bf16.msra.mxu0 %v6304_v22 }
  0x9d   :  { %v382_v20 = vld [vmem:[#allocation5 + $0x740] sm:$0xff]  ;;  %v6297_v24 = vcombine.high %v254_v18, %v258_v19  ;;  %2964 = vmatprep.subr.bf16.mxu1 %v6433_v17  ;;  %v6296_v30 = vcombine.low %v254_v18, %v258_v19  ;;  %v7856_v19 = vcombine.low %v7838_v54, %v7838_v54 }
  0x9e   :  { %v386_v21 = vld [vmem:[#allocation5 + $0x760] sm:$0xff]  ;;  %2965 = vmatpush2.bf16.msra.mxu1 %v6432_v23 }
  0x9f   :  { %v6425_v25 = vcombine.high %v382_v20, %v386_v21  ;;  %v246_v26 = vld [vmem:[#allocation5 + $0x300] sm:$0xff]  ;;  %2925 = vmatprep.subr.bf16.mxu0 %v6297_v24  ;;  %v6424_v31 = vcombine.low %v382_v20, %v386_v21  ;;  %v7858_v21 = vld [vmem:[#allocation2 + $0x10] sm:$0xff] }
  0xa0   :  { %v250_v27 = vld [vmem:[#allocation5 + $0x320] sm:$0xff]  ;;  %2926 = vmatpush2.bf16.msra.mxu0 %v6296_v30 }
  0xa1   :  { %v374_v28 = vld [vmem:[#allocation5 + $0x700] sm:$0xff]  ;;  %v6289_v32 = vcombine.high %v246_v26, %v250_v27  ;;  %2966 = vmatprep.subr.bf16.mxu1 %v6425_v25  ;;  %v6288_v38 = vcombine.low %v246_v26, %v250_v27 }
  0xa2   :  { %v378_v29 = vld [vmem:[#allocation5 + $0x720] sm:$0xff]  ;;  %2967 = vmatpush2.bf16.msra.mxu1 %v6424_v31 }
  0xa3   :  { %v6417_v33 = vcombine.high %v374_v28, %v378_v29  ;;  %v238_v34 = vld [vmem:[#allocation5 + $0x2c0] sm:$0xff]  ;;  %2927 = vmatprep.subr.bf16.mxu0 %v6289_v32  ;;  %v6416_v39 = vcombine.low %v374_v28, %v378_v29  ;;  %v7863_v28 = vcombine.high %v7858_v21, %v7858_v21 }
  0xa4   :  { %v242_v35 = vld [vmem:[#allocation5 + $0x2e0] sm:$0xff]  ;;  %2928 = vmatpush2.bf16.msra.mxu0 %v6288_v38 }
  0xa5   :  { %v366_v36 = vld [vmem:[#allocation5 + $0x6c0] sm:$0xff]  ;;  %v6281_v40 = vcombine.high %v238_v34, %v242_v35  ;;  %2968 = vmatprep.subr.bf16.mxu1 %v6417_v33  ;;  %v6280_v46 = vcombine.low %v238_v34, %v242_v35 }
  0xa6   :  { %v370_v37 = vld [vmem:[#allocation5 + $0x6e0] sm:$0xff]  ;;  %2969 = vmatpush2.bf16.msra.mxu1 %v6416_v39 }
  0xa7   :  { %v6409_v41 = vcombine.high %v366_v36, %v370_v37  ;;  %v230_v42 = vld [vmem:[#allocation5 + $0x280] sm:$0xff]  ;;  %2929 = vmatprep.subr.bf16.mxu0 %v6281_v40  ;;  %v6408_v47 = vcombine.low %v366_v36, %v370_v37  ;;  %v7757_v36 = vmov 0  }
  0xa8   :  { %v234_v43 = vld [vmem:[#allocation5 + $0x2a0] sm:$0xff]  ;;  %2930 = vmatpush2.bf16.msra.mxu0 %v6280_v46 }
  0xa9   :  { %v358_v44 = vld [vmem:[#allocation5 + $0x680] sm:$0xff]  ;;  %v6273_v48 = vcombine.high %v230_v42, %v234_v43  ;;  %2970 = vmatprep.subr.bf16.mxu1 %v6409_v41  ;;  %v6272_v56 = vcombine.low %v230_v42, %v234_v43 }
  0xaa   :  { %v362_v45 = vld [vmem:[#allocation5 + $0x6a0] sm:$0xff]  ;;  %2971 = vmatpush2.bf16.msra.mxu1 %v6408_v47 }
  0xab   :  { %v6401_v49 = vcombine.high %v358_v44, %v362_v45  ;;  %v222_v50 = vld [vmem:[#allocation5 + $0x240] sm:$0xff]  ;;  %2931 = vmatprep.subr.bf16.mxu0 %v6273_v48  ;;  %v6400_v57 = vcombine.low %v358_v44, %v362_v45 }
  0xac   :  { %v226_v51 = vld [vmem:[#allocation5 + $0x260] sm:$0xff]  ;;  %2932 = vmatpush2.bf16.msra.mxu0 %v6272_v56 }
  0xad   :  { %v350_v52 = vld [vmem:[#allocation5 + $0x640] sm:$0xff]  ;;  %v6265_v60 = vcombine.high %v222_v50, %v226_v51  ;;  %2972 = vmatprep.subr.bf16.mxu1 %v6401_v49  ;;  %v6264_v2 = vcombine.low %v222_v50, %v226_v51 }
  0xae   :  { %v354_v55 = vld [vmem:[#allocation5 + $0x660] sm:$0xff]  ;;  %2973 = vmatpush2.bf16.msra.mxu1 %v6400_v57 }
  0xaf   :  { %v6393_v61 = vcombine.high %v350_v52, %v354_v55  ;;  %v214_v62 = vld [vmem:[#allocation5 + $0x200] sm:$0xff]  ;;  %2933 = vmatprep.subr.bf16.mxu0 %v6265_v60  ;;  %v6392_v3 = vcombine.low %v350_v52, %v354_v55 }
  0xb0   :  { %v218_v63 = vld [vmem:[#allocation5 + $0x220] sm:$0xff]  ;;  %2934 = vmatpush2.bf16.msra.mxu0 %v6264_v2 }
  0xb1   :  { %v342_v0 = vld [vmem:[#allocation5 + $0x600] sm:$0xff]  ;;  %v6257_v4 = vcombine.high %v214_v62, %v218_v63  ;;  %2974 = vmatprep.subr.bf16.mxu1 %v6393_v61  ;;  %v6256_v10 = vcombine.low %v214_v62, %v218_v63 }
  0xb2   :  { %v346_v1 = vld [vmem:[#allocation5 + $0x620] sm:$0xff]  ;;  %2975 = vmatpush2.bf16.msra.mxu1 %v6392_v3 }
  0xb3   :  { %v6385_v5 = vcombine.high %v342_v0, %v346_v1  ;;  %v462_v6 = vld [vmem:[#allocation5 + $0x9c0] sm:$0xff]  ;;  %2935 = vmatprep.subr.bf16.mxu0 %v6257_v4  ;;  %v6384_v11 = vcombine.low %v342_v0, %v346_v1 }
  0xb4   :  { %v466_v7 = vld [vmem:[#allocation5 + $0x9e0] sm:$0xff]  ;;  %2936 = vmatpush2.bf16.msra.mxu0 %v6256_v10 }
  0xb5   :  { %v590_v8 = vld [vmem:[#allocation5 + $0xdc0] sm:$0xff]  ;;  %v6505_v12 = vcombine.high %v462_v6, %v466_v7  ;;  %2976 = vmatprep.subr.bf16.mxu1 %v6385_v5  ;;  %v6504_v20 = vcombine.low %v462_v6, %v466_v7 }
  0xb6   :  { %v594_v9 = vld [vmem:[#allocation5 + $0xde0] sm:$0xff]  ;;  %2977 = vmatpush2.bf16.msra.mxu1 %v6384_v11 }
  0xb7   :  { %v6633_v13 = vcombine.high %v590_v8, %v594_v9  ;;  %v454_v14 = vld [vmem:[#allocation5 + $0x980] sm:$0xff]  ;;  %2987 = vmatprep.subr.bf16.mxu0 %v6505_v12  ;;  %v6632_v22 = vcombine.low %v590_v8, %v594_v9  ;;  %2938 = vmatmul.mubr.bf16.vlgmr.msra.gmra.mxu0 %v7852_v16 }
  0xb8   :  { %v458_v15 = vld [vmem:[#allocation5 + $0x9a0] sm:$0xff]  ;;  %2988 = vmatpush1.bf16.msra.mxu0 %v6504_v20  ;;  %3019 = vmatprep.mubr.bf16.mxu0 %v7863_v28 }
  0xb9   :  { %v582_v17 = vld [vmem:[#allocation5 + $0xd80] sm:$0xff]  ;;  %v6497_v23 = vcombine.high %v454_v14, %v458_v15  ;;  %3028 = vmatprep.subr.bf16.mxu1 %v6633_v13  ;;  %2979 = vmatmul.mubr.bf16.vlgmr.msra.gmra.mxu1 %v7856_v19  ;;  %v6496_v54 = vcombine.low %v454_v14, %v458_v15  ;;  %v207_v14 = vld [vmem:[#allocation5 + $0x1c8] sm:$0xff] }
  0xba   :  { %v586_v18 = vld [vmem:[#allocation5 + $0xda0] sm:$0xff]  ;;  %3029 = vmatpush1.bf16.msra.mxu1 %v6632_v22  ;;  %3060 = vmatprep.mubr.bf16.mxu1 %v7757_v36 }
  0xbb   :  { %v446_v24 = vld [vmem:[#allocation5 + $0x940] sm:$0xff]  ;;  %v6625_v25 = vcombine.high %v582_v17, %v586_v18  ;;  %2989 = vmatprep.subr.bf16.mxu0 %v6497_v23  ;;  %v6624_v29 = vcombine.low %v582_v17, %v586_v18  ;;  %v211_v17 = vld [vmem:[#allocation5 + $0x1e8] sm:$0xff] }
  0xbc   :  { %v450_v26 = vld [vmem:[#allocation5 + $0x960] sm:$0xff]  ;;  %2990 = vmatpush1.bf16.msra.mxu0 %v6496_v54 }
  0xbd   :  { %v574_v53 = vld [vmem:[#allocation5 + $0xd40] sm:$0xff]  ;;  %v6489_v30 = vcombine.high %v446_v24, %v450_v26  ;;  %3030 = vmatprep.subr.bf16.mxu1 %v6625_v25  ;;  %v6488_v37 = vcombine.low %v446_v24, %v450_v26  ;;  %v199_v25 = vld [vmem:[#allocation5 + $0x188] sm:$0xff]  ;;  %v7022_v26 = vld [vmem:[#allocation2 + $0x18] ss:$0 sps:$4 sm:$0xff]  }
  0xbe   :  { %v578_v27 = vld [vmem:[#allocation5 + $0xd60] sm:$0xff]  ;;  %3031 = vmatpush1.bf16.msra.mxu1 %v6624_v29  ;;  %v6250_v29 = vcombine.low %v207_v14, %v211_v17 }
  0xbf   :  { %v438_v31 = vld [vmem:[#allocation5 + $0x900] sm:$0xff]  ;;  %v6617_v34 = vcombine.high %v574_v53, %v578_v27  ;;  %2991 = vmatprep.subr.bf16.mxu0 %v6489_v30  ;;  %v6616_v38 = vcombine.low %v574_v53, %v578_v27  ;;  %v6251_v53 = vcombine.high %v207_v14, %v211_v17  ;;  %v203_v27 = vld [vmem:[#allocation5 + $0x1a8] sm:$0xff] }
  0xc0   :  { %v442_v32 = vld [vmem:[#allocation5 + $0x920] sm:$0xff]  ;;  %2992 = vmatpush1.bf16.msra.mxu0 %v6488_v37  ;;  %v151_v14 = vld [vmem:[#allocation5 + $0x8] sm:$0xff] }
  0xc1   :  { %v566_v33 = vld [vmem:[#allocation5 + $0xd00] sm:$0xff]  ;;  %v6481_v39 = vcombine.high %v438_v31, %v442_v32  ;;  %3032 = vmatprep.subr.bf16.mxu1 %v6617_v34  ;;  %v6480_v45 = vcombine.low %v438_v31, %v442_v32  ;;  %v6243_v34 = vcombine.high %v199_v25, %v203_v27  ;;  %v155_v17 = vld [vmem:[#allocation5 + $0x28] sm:$0xff] }
  0xc2   :  { %v570_v35 = vld [vmem:[#allocation5 + $0xd20] sm:$0xff]  ;;  %3033 = vmatpush1.bf16.msra.mxu1 %v6616_v38  ;;  %v6242_v38 = vcombine.low %v199_v25, %v203_v27  ;;  %v335_v25 = vld [vmem:[#allocation5 + $0x5c8] sm:$0xff] }
  0xc3   :  { %v430_v40 = vld [vmem:[#allocation5 + $0x8c0] sm:$0xff]  ;;  %v6609_v43 = vcombine.high %v566_v33, %v570_v35  ;;  %2993 = vmatprep.subr.bf16.mxu0 %v6481_v39  ;;  %v6608_v46 = vcombine.low %v566_v33, %v570_v35  ;;  %v191_v33 = vld [vmem:[#allocation5 + $0x148] sm:$0xff] }
  0xc4   :  { %v434_v41 = vld [vmem:[#allocation5 + $0x8e0] sm:$0xff]  ;;  %2994 = vmatpush1.bf16.msra.mxu0 %v6480_v45  ;;  %v195_v35 = vld [vmem:[#allocation5 + $0x168] sm:$0xff] }
  0xc5   :  { %v558_v42 = vld [vmem:[#allocation5 + $0xcc0] sm:$0xff]  ;;  %v6473_v47 = vcombine.high %v430_v40, %v434_v41  ;;  %3034 = vmatprep.subr.bf16.mxu1 %v6609_v43  ;;  %v6472_v55 = vcombine.low %v430_v40, %v434_v41  ;;  %v6235_v43 = vcombine.high %v191_v33, %v195_v35 }
  0xc6   :  { %v562_v44 = vld [vmem:[#allocation5 + $0xce0] sm:$0xff]  ;;  %3035 = vmatpush1.bf16.msra.mxu1 %v6608_v46  ;;  %v6234_v46 = vcombine.low %v191_v33, %v195_v35  ;;  %v7871_v35 = vcombine.low %v7858_v21, %v7858_v21 }
  0xc7   :  { %v422_v48 = vld [vmem:[#allocation5 + $0x880] sm:$0xff]  ;;  %v6601_v51 = vcombine.high %v558_v42, %v562_v44  ;;  %2995 = vmatprep.subr.bf16.mxu0 %v6473_v47  ;;  %v6600_v56 = vcombine.low %v558_v42, %v562_v44  ;;  %v183_v42 = vld [vmem:[#allocation5 + $0x108] sm:$0xff] }
  0xc8   :  { %v426_v49 = vld [vmem:[#allocation5 + $0x8a0] sm:$0xff]  ;;  %2996 = vmatpush1.bf16.msra.mxu0 %v6472_v55  ;;  %v187_v44 = vld [vmem:[#allocation5 + $0x128] sm:$0xff] }
  0xc9   :  { %v550_v50 = vld [vmem:[#allocation5 + $0xc80] sm:$0xff]  ;;  %v6465_v57 = vcombine.high %v422_v48, %v426_v49  ;;  %3036 = vmatprep.subr.bf16.mxu1 %v6601_v51  ;;  %v6464_v1 = vcombine.low %v422_v48, %v426_v49  ;;  %v6227_v51 = vcombine.high %v183_v42, %v187_v44 }
  0xca   :  { %v554_v52 = vld [vmem:[#allocation5 + $0xca0] sm:$0xff]  ;;  %3037 = vmatpush1.bf16.msra.mxu1 %v6600_v56  ;;  %v6226_v56 = vcombine.low %v183_v42, %v187_v44  ;;  %v323_v44 = vld [vmem:[#allocation5 + $0x568] sm:$0xff] }
  0xcb   :  { %v414_v60 = vld [vmem:[#allocation5 + $0x840] sm:$0xff]  ;;  %v6593_v63 = vcombine.high %v550_v50, %v554_v52  ;;  %2997 = vmatprep.subr.bf16.mxu0 %v6465_v57  ;;  %v6592_v2 = vcombine.low %v550_v50, %v554_v52  ;;  %v175_v50 = vld [vmem:[#allocation5 + $0xc8] sm:$0xff] }
  0xcc   :  { %v418_v61 = vld [vmem:[#allocation5 + $0x860] sm:$0xff]  ;;  %2998 = vmatpush1.bf16.msra.mxu0 %v6464_v1  ;;  %v179_v52 = vld [vmem:[#allocation5 + $0xe8] sm:$0xff] }
  0xcd   :  { %v542_v62 = vld [vmem:[#allocation5 + $0xc40] sm:$0xff]  ;;  %v6457_v3 = vcombine.high %v414_v60, %v418_v61  ;;  %3038 = vmatprep.subr.bf16.mxu1 %v6593_v63  ;;  %v6456_v9 = vcombine.low %v414_v60, %v418_v61  ;;  %v6219_v63 = vcombine.high %v175_v50, %v179_v52 }
  0xce   :  { %v546_v0 = vld [vmem:[#allocation5 + $0xc60] sm:$0xff]  ;;  %3039 = vmatpush1.bf16.msra.mxu1 %v6592_v2  ;;  %v6218_v2 = vcombine.low %v175_v50, %v179_v52 }
  0xcf   :  { %v406_v4 = vld [vmem:[#allocation5 + $0x800] sm:$0xff]  ;;  %v6585_v7 = vcombine.high %v542_v62, %v546_v0  ;;  %2999 = vmatprep.subr.bf16.mxu0 %v6457_v3  ;;  %v6584_v10 = vcombine.low %v542_v62, %v546_v0  ;;  %v167_v62 = vld [vmem:[#allocation5 + $0x88] sm:$0xff] }
  0xd0   :  { %v410_v5 = vld [vmem:[#allocation5 + $0x820] sm:$0xff]  ;;  %3000 = vmatpush1.bf16.msra.mxu0 %v6456_v9  ;;  %v171_v0 = vld [vmem:[#allocation5 + $0xa8] sm:$0xff] }
  0xd1   :  { %v534_v6 = vld [vmem:[#allocation5 + $0xc00] sm:$0xff]  ;;  %v6449_v11 = vcombine.high %v406_v4, %v410_v5  ;;  %3040 = vmatprep.subr.bf16.mxu1 %v6585_v7  ;;  %v6448_v18 = vcombine.low %v406_v4, %v410_v5  ;;  %v6211_v7 = vcombine.high %v167_v62, %v171_v0 }
  0xd2   :  { %v538_v8 = vld [vmem:[#allocation5 + $0xc20] sm:$0xff]  ;;  %3041 = vmatpush1.bf16.msra.mxu1 %v6584_v10  ;;  %v6210_v10 = vcombine.low %v167_v62, %v171_v0 }
  0xd3   :  { %v526_v12 = vld [vmem:[#allocation5 + $0xbc0] sm:$0xff]  ;;  %v6577_v15 = vcombine.high %v534_v6, %v538_v8  ;;  %3001 = vmatprep.subr.bf16.mxu0 %v6449_v11  ;;  %v6576_v20 = vcombine.low %v534_v6, %v538_v8  ;;  %v159_v6 = vld [vmem:[#allocation5 + $0x48] sm:$0xff] }
  0xd4   :  { %v530_v13 = vld [vmem:[#allocation5 + $0xbe0] sm:$0xff]  ;;  %3002 = vmatpush1.bf16.msra.mxu0 %v6448_v18  ;;  %v163_v8 = vld [vmem:[#allocation5 + $0x68] sm:$0xff] }
  0xd5   :  { %v6569_v22 = vcombine.high %v526_v12, %v530_v13  ;;  %v518_v23 = vld [vmem:[#allocation5 + $0xb80] sm:$0xff]  ;;  %3042 = vmatprep.subr.bf16.mxu1 %v6577_v15  ;;  %v6568_v54 = vcombine.low %v526_v12, %v530_v13  ;;  %v6203_v15 = vcombine.high %v159_v6, %v163_v8 }
  0xd6   :  { %v522_v24 = vld [vmem:[#allocation5 + $0xba0] sm:$0xff]  ;;  %3043 = vmatpush1.bf16.msra.mxu1 %v6576_v20  ;;  %v6202_v20 = vcombine.low %v159_v6, %v163_v8 }
  0xd7   :  { %3003 = vmatprep.subr.bf16.mxu0 %v6569_v22  ;;  %v6561_v30 = vcombine.high %v518_v23, %v522_v24  ;;  %v510_v31 = vld [vmem:[#allocation5 + $0xb40] sm:$0xff]  ;;  %3069 = vmatprep.subr.bf16.mxu1 %v6251_v53  ;;  %v6560_v37 = vcombine.low %v518_v23, %v522_v24  ;;  %v271_v23 = vld [vmem:[#allocation5 + $0x3c8] sm:$0xff] }
  0xd8   :  { %v514_v32 = vld [vmem:[#allocation5 + $0xb60] sm:$0xff]  ;;  %3004 = vmatpush2.bf16.msra.mxu0 %v6568_v54  ;;  %v275_v24 = vld [vmem:[#allocation5 + $0x3e8] sm:$0xff]  ;;  %v6194_v54 = vcombine.low %v151_v14, %v155_v17 }
  0xd9   :  { %3061 = vmatmul.mubr.bf16.vlgmr.msra.gmra.mxu1 %v7022_v26  ;;  %3005 = vmatprep.subr.bf16.mxu0 %v6561_v30  ;;  %v6553_v39 = vcombine.high %v510_v31, %v514_v32  ;;  %v502_v40 = vld [vmem:[#allocation5 + $0xb00] sm:$0xff]  ;;  %v6552_v45 = vcombine.low %v510_v31, %v514_v32  ;;  %v6195_v26 = vcombine.high %v151_v14, %v155_v17  ;;  %v339_v53 = vld [vmem:[#allocation5 + $0x5e8] sm:$0xff] }
  0xda   :  { %3070 = vmatpush1.bf16.msra.mxu1 %v6250_v29  ;;  %v506_v41 = vld [vmem:[#allocation5 + $0xb20] sm:$0xff]  ;;  %3101 = vmatprep.mubr.bf16.mxu1 %v7842_v58  ;;  %v6379_v29 = vcombine.high %v335_v25, %v339_v53  ;;  %v263_v30 = vld [vmem:[#allocation5 + $0x388] sm:$0xff]  ;;  %v6315_v33 = vcombine.high %v271_v23, %v275_v24 }
  0xdb   :  { %3071 = vmatprep.subr.bf16.mxu1 %v6243_v34  ;;  %v6545_v47 = vcombine.high %v502_v40, %v506_v41  ;;  %v494_v48 = vld [vmem:[#allocation5 + $0xac0] sm:$0xff]  ;;  %v6544_v55 = vcombine.low %v502_v40, %v506_v41  ;;  %v267_v31 = vld [vmem:[#allocation5 + $0x3a8] sm:$0xff] }
  0xdc   :  { %3006 = vmatpush2.bf16.msra.mxu0 %v6560_v37  ;;  %v498_v49 = vld [vmem:[#allocation5 + $0xae0] sm:$0xff]  ;;  %v327_v32 = vld [vmem:[#allocation5 + $0x588] sm:$0xff]  ;;  %v6378_v37 = vcombine.low %v335_v25, %v339_v53  ;;  %v6307_v42 = vcombine.high %v263_v30, %v267_v31  ;;  %v6306_v21 = vcombine.low %v263_v30, %v267_v31 }
  0xdd   :  { %3007 = vmatprep.subr.bf16.mxu0 %v6553_v39  ;;  %v6537_v57 = vcombine.high %v494_v48, %v498_v49  ;;  %v486_v60 = vld [vmem:[#allocation5 + $0xa80] sm:$0xff]  ;;  %v6536_v1 = vcombine.low %v494_v48, %v498_v49  ;;  %v331_v34 = vld [vmem:[#allocation5 + $0x5a8] sm:$0xff] }
  0xde   :  { %3072 = vmatpush1.bf16.msra.mxu1 %v6242_v38  ;;  %v490_v61 = vld [vmem:[#allocation5 + $0xaa0] sm:$0xff]  ;;  %v6314_v38 = vcombine.low %v271_v23, %v275_v24  ;;  %v6371_v39 = vcombine.high %v327_v32, %v331_v34  ;;  %v255_v40 = vld [vmem:[#allocation5 + $0x348] sm:$0xff] }
  0xdf   :  { %3073 = vmatprep.subr.bf16.mxu1 %v6235_v43  ;;  %v6529_v3 = vcombine.high %v486_v60, %v490_v61  ;;  %v478_v4 = vld [vmem:[#allocation5 + $0xa40] sm:$0xff]  ;;  %v6528_v9 = vcombine.low %v486_v60, %v490_v61  ;;  %v259_v41 = vld [vmem:[#allocation5 + $0x368] sm:$0xff] }
  0xe0   :  { %3008 = vmatpush2.bf16.msra.mxu0 %v6552_v45  ;;  %v482_v5 = vld [vmem:[#allocation5 + $0xa60] sm:$0xff]  ;;  %v319_v43 = vld [vmem:[#allocation5 + $0x548] sm:$0xff]  ;;  %v6370_v45 = vcombine.low %v327_v32, %v331_v34  ;;  %v6299_v50 = vcombine.high %v255_v40, %v259_v41 }
  0xe1   :  { %3009 = vmatprep.subr.bf16.mxu0 %v6545_v47  ;;  %v6521_v11 = vcombine.high %v478_v4, %v482_v5  ;;  %v470_v12 = vld [vmem:[#allocation5 + $0xa00] sm:$0xff]  ;;  %v6520_v18 = vcombine.low %v478_v4, %v482_v5  ;;  %v247_v47 = vld [vmem:[#allocation5 + $0x308] sm:$0xff]  ;;  %v6362_v52 = vcombine.low %v319_v43, %v323_v44 }
  0xe2   :  { %3074 = vmatpush1.bf16.msra.mxu1 %v6234_v46  ;;  %v474_v13 = vld [vmem:[#allocation5 + $0xa20] sm:$0xff]  ;;  %v6363_v46 = vcombine.high %v319_v43, %v323_v44  ;;  %v251_v48 = vld [vmem:[#allocation5 + $0x328] sm:$0xff] }
  0xe3   :  { %3075 = vmatprep.subr.bf16.mxu1 %v6227_v51  ;;  %v6513_v22 = vcombine.high %v470_v12, %v474_v13  ;;  %v6512_v27 = vcombine.low %v470_v12, %v474_v13  ;;  %v311_v49 = vld [vmem:[#allocation5 + $0x508] sm:$0xff]  ;;  %v6291_v62 = vcombine.high %v247_v47, %v251_v48 }
  0xe4   :  { %3010 = vmatpush2.bf16.msra.mxu0 %v6544_v55  ;;  %v315_v51 = vld [vmem:[#allocation5 + $0x528] sm:$0xff]  ;;  %v6298_v55 = vcombine.low %v255_v40, %v259_v41 }
  0xe5   :  { %3011 = vmatprep.subr.bf16.mxu0 %v6537_v57  ;;  %v239_v57 = vld [vmem:[#allocation5 + $0x2c8] sm:$0xff]  ;;  %v6354_v0 = vcombine.low %v311_v49, %v315_v51 }
  0xe6   :  { %3076 = vmatpush1.bf16.msra.mxu1 %v6226_v56  ;;  %v6355_v56 = vcombine.high %v311_v49, %v315_v51  ;;  %v243_v60 = vld [vmem:[#allocation5 + $0x2e8] sm:$0xff] }
  0xe7   :  { %3077 = vmatprep.subr.bf16.mxu1 %v6219_v63  ;;  %v303_v61 = vld [vmem:[#allocation5 + $0x4c8] sm:$0xff]  ;;  %v6283_v6 = vcombine.high %v239_v57, %v243_v60 }
  0xe8   :  { %3012 = vmatpush2.bf16.msra.mxu0 %v6536_v1  ;;  %v307_v63 = vld [vmem:[#allocation5 + $0x4e8] sm:$0xff]  ;;  %v6290_v1 = vcombine.low %v247_v47, %v251_v48 }
  0xe9   :  { %3013 = vmatprep.subr.bf16.mxu0 %v6529_v3  ;;  %v231_v3 = vld [vmem:[#allocation5 + $0x288] sm:$0xff]  ;;  %v6346_v8 = vcombine.low %v303_v61, %v307_v63 }
  0xea   :  { %3078 = vmatpush1.bf16.msra.mxu1 %v6218_v2  ;;  %v6347_v2 = vcombine.high %v303_v61, %v307_v63  ;;  %v235_v4 = vld [vmem:[#allocation5 + $0x2a8] sm:$0xff] }
  0xeb   :  { %3079 = vmatprep.subr.bf16.mxu1 %v6211_v7  ;;  %v295_v5 = vld [vmem:[#allocation5 + $0x488] sm:$0xff]  ;;  %v6275_v14 = vcombine.high %v231_v3, %v235_v4 }
  0xec   :  { %3014 = vmatpush2.bf16.msra.mxu0 %v6528_v9  ;;  %v299_v7 = vld [vmem:[#allocation5 + $0x4a8] sm:$0xff]  ;;  %v6282_v9 = vcombine.low %v239_v57, %v243_v60 }
  0xed   :  { %3015 = vmatprep.subr.bf16.mxu0 %v6521_v11  ;;  %v223_v11 = vld [vmem:[#allocation5 + $0x248] sm:$0xff]  ;;  %v6338_v17 = vcombine.low %v295_v5, %v299_v7 }
  0xee   :  { %3080 = vmatpush1.bf16.msra.mxu1 %v6210_v10  ;;  %v6339_v10 = vcombine.high %v295_v5, %v299_v7  ;;  %v227_v12 = vld [vmem:[#allocation5 + $0x268] sm:$0xff] }
  0xef   :  { %3081 = vmatprep.subr.bf16.mxu1 %v6203_v15  ;;  %v287_v13 = vld [vmem:[#allocation5 + $0x448] sm:$0xff]  ;;  %v6267_v25 = vcombine.high %v223_v11, %v227_v12 }
  0xf0   :  { %3016 = vmatpush2.bf16.msra.mxu0 %v6520_v18  ;;  %v291_v15 = vld [vmem:[#allocation5 + $0x468] sm:$0xff]  ;;  %v6274_v18 = vcombine.low %v231_v3, %v235_v4 }
  0xf1   :  { %3017 = vmatprep.subr.bf16.mxu0 %v6513_v22  ;;  %v215_v22 = vld [vmem:[#allocation5 + $0x208] sm:$0xff]  ;;  %v6330_v53 = vcombine.low %v287_v13, %v291_v15 }
  0xf2   :  { %3082 = vmatpush1.bf16.msra.mxu1 %v6202_v20  ;;  %v6331_v20 = vcombine.high %v287_v13, %v291_v15  ;;  %v219_v23 = vld [vmem:[#allocation5 + $0x228] sm:$0xff] }
  0xf3   :  { %3083 = vmatprep.subr.bf16.mxu1 %v6195_v26  ;;  %v279_v24 = vld [vmem:[#allocation5 + $0x408] sm:$0xff]  ;;  %v6259_v32 = vcombine.high %v215_v22, %v219_v23 }
  0xf4   :  { %3018 = vmatpush2.bf16.msra.mxu0 %v6512_v27  ;;  %v283_v26 = vld [vmem:[#allocation5 + $0x428] sm:$0xff]  ;;  %v6266_v27 = vcombine.low %v223_v11, %v227_v12 }
  0xf5   :  { %3110 = vmatprep.subr.bf16.mxu0 %v6379_v29  ;;  %v399_v29 = vld [vmem:[#allocation5 + $0x7c8] sm:$0xff]  ;;  %v6322_v34 = vcombine.low %v279_v24, %v283_v26 }
  0xf6   :  { %3084 = vmatpush1.bf16.msra.mxu1 %v6194_v54  ;;  %v6323_v54 = vcombine.high %v279_v24, %v283_v26  ;;  %v403_v30 = vld [vmem:[#allocation5 + $0x7e8] sm:$0xff] }
  0xf7   :  { %3085 = vmatprep.subr.bf16.mxu1 %v6315_v33  ;;  %3020 = vmatmul.mubr.bf16.vlgmr.msra.gmra.mxu0 %v7871_v35  ;;  %v463_v31 = vld [vmem:[#allocation5 + $0x9c8] sm:$0xff]  ;;  %v6442_v44 = vcombine.low %v399_v29, %v403_v30 }
  0xf8   :  { %3111 = vmatpush1.bf16.msra.mxu0 %v6378_v37  ;;  %3142 = vmatprep.mubr.bf16.mxu0 %v7846_v59  ;;  %v467_v33 = vld [vmem:[#allocation5 + $0x9e8] sm:$0xff]  ;;  %v6258_v37 = vcombine.low %v215_v22, %v219_v23 }
  0xf9   :  { %3112 = vmatprep.subr.bf16.mxu0 %v6371_v39  ;;  %v391_v39 = vld [vmem:[#allocation5 + $0x788] sm:$0xff] }
  0xfa   :  { %3086 = vmatpush2.bf16.msra.mxu1 %v6314_v38  ;;  %v6443_v38 = vcombine.high %v399_v29, %v403_v30  ;;  %v395_v40 = vld [vmem:[#allocation5 + $0x7a8] sm:$0xff] }
  0xfb   :  { %3087 = vmatprep.subr.bf16.mxu1 %v6307_v42  ;;  %v455_v41 = vld [vmem:[#allocation5 + $0x988] sm:$0xff]  ;;  %v6507_v42 = vcombine.high %v463_v31, %v467_v33  ;;  %v6434_v51 = vcombine.low %v391_v39, %v395_v40 }
  0xfc   :  { %3113 = vmatpush1.bf16.msra.mxu0 %v6370_v45  ;;  %v459_v43 = vld [vmem:[#allocation5 + $0x9a8] sm:$0xff]  ;;  %v6506_v45 = vcombine.low %v463_v31, %v467_v33 }
  0xfd   :  { %3114 = vmatprep.subr.bf16.mxu0 %v6363_v46  ;;  %v383_v46 = vld [vmem:[#allocation5 + $0x748] sm:$0xff]  ;;  %v6499_v49 = vcombine.high %v455_v41, %v459_v43 }
  0xfe   :  { %3088 = vmatpush2.bf16.msra.mxu1 %v6306_v21  ;;  %v6435_v21 = vcombine.high %v391_v39, %v395_v40  ;;  %v387_v47 = vld [vmem:[#allocation5 + $0x768] sm:$0xff] }
  0xff   :  { %3089 = vmatprep.subr.bf16.mxu1 %v6299_v50  ;;  %v447_v48 = vld [vmem:[#allocation5 + $0x948] sm:$0xff]  ;;  %v6426_v63 = vcombine.low %v383_v46, %v387_v47 }
 0x100   :  { %3115 = vmatpush1.bf16.msra.mxu0 %v6362_v52  ;;  %v451_v50 = vld [vmem:[#allocation5 + $0x968] sm:$0xff]  ;;  %v6498_v52 = vcombine.low %v455_v41, %v459_v43 }
 0x101   :  { %3116 = vmatprep.subr.bf16.mxu0 %v6355_v56  ;;  %v375_v56 = vld [vmem:[#allocation5 + $0x708] sm:$0xff]  ;;  %v6491_v61 = vcombine.high %v447_v48, %v451_v50 }
 0x102   :  { %3090 = vmatpush2.bf16.msra.mxu1 %v6298_v55  ;;  %v6427_v55 = vcombine.high %v383_v46, %v387_v47  ;;  %v379_v57 = vld [vmem:[#allocation5 + $0x728] sm:$0xff] }
 0x103   :  { %3091 = vmatprep.subr.bf16.mxu1 %v6291_v62  ;;  %v439_v60 = vld [vmem:[#allocation5 + $0x908] sm:$0xff]  ;;  %v6418_v7 = vcombine.low %v375_v56, %v379_v57 }
 0x104   :  { %3117 = vmatpush1.bf16.msra.mxu0 %v6354_v0  ;;  %v443_v62 = vld [vmem:[#allocation5 + $0x928] sm:$0xff]  ;;  %v6490_v0 = vcombine.low %v447_v48, %v451_v50 }
 0x105   :  { %3118 = vmatprep.subr.bf16.mxu0 %v6347_v2  ;;  %v367_v2 = vld [vmem:[#allocation5 + $0x6c8] sm:$0xff]  ;;  %v6483_v5 = vcombine.high %v439_v60, %v443_v62 }
 0x106   :  { %3092 = vmatpush2.bf16.msra.mxu1 %v6290_v1  ;;  %v6419_v1 = vcombine.high %v375_v56, %v379_v57  ;;  %v371_v3 = vld [vmem:[#allocation5 + $0x6e8] sm:$0xff] }
 0x107   :  { %3093 = vmatprep.subr.bf16.mxu1 %v6283_v6  ;;  %v431_v4 = vld [vmem:[#allocation5 + $0x8c8] sm:$0xff]  ;;  %v6410_v15 = vcombine.low %v367_v2, %v371_v3 }
 0x108   :  { %3119 = vmatpush1.bf16.msra.mxu0 %v6346_v8  ;;  %v435_v6 = vld [vmem:[#allocation5 + $0x8e8] sm:$0xff]  ;;  %v6482_v8 = vcombine.low %v439_v60, %v443_v62 }
 0x109   :  { %3120 = vmatprep.subr.bf16.mxu0 %v6339_v10  ;;  %v359_v10 = vld [vmem:[#allocation5 + $0x688] sm:$0xff]  ;;  %v6475_v13 = vcombine.high %v431_v4, %v435_v6 }
 0x10a   :  { %3094 = vmatpush2.bf16.msra.mxu1 %v6282_v9  ;;  %v6411_v9 = vcombine.high %v367_v2, %v371_v3  ;;  %v363_v11 = vld [vmem:[#allocation5 + $0x6a8] sm:$0xff] }
 0x10b   :  { %3095 = vmatprep.subr.bf16.mxu1 %v6275_v14  ;;  %v423_v12 = vld [vmem:[#allocation5 + $0x888] sm:$0xff]  ;;  %v6402_v26 = vcombine.low %v359_v10, %v363_v11 }
 0x10c   :  { %3121 = vmatpush1.bf16.msra.mxu0 %v6338_v17  ;;  %v427_v14 = vld [vmem:[#allocation5 + $0x8a8] sm:$0xff]  ;;  %v6474_v17 = vcombine.low %v431_v4, %v435_v6 }
 0x10d   :  { %3122 = vmatprep.subr.bf16.mxu0 %v6331_v20  ;;  %v351_v20 = vld [vmem:[#allocation5 + $0x648] sm:$0xff]  ;;  %v6467_v24 = vcombine.high %v423_v12, %v427_v14 }
 0x10e   :  { %3096 = vmatpush2.bf16.msra.mxu1 %v6274_v18  ;;  %v6403_v18 = vcombine.high %v359_v10, %v363_v11  ;;  %v355_v22 = vld [vmem:[#allocation5 + $0x668] sm:$0xff] }
 0x10f   :  { %3097 = vmatprep.subr.bf16.mxu1 %v6267_v25  ;;  %v415_v23 = vld [vmem:[#allocation5 + $0x848] sm:$0xff]  ;;  %v6394_v33 = vcombine.low %v351_v20, %v355_v22 }
 0x110   :  { %3123 = vmatpush1.bf16.msra.mxu0 %v6330_v53  ;;  %v419_v25 = vld [vmem:[#allocation5 + $0x868] sm:$0xff]  ;;  %v6466_v53 = vcombine.low %v423_v12, %v427_v14 }
 0x111   :  { %3124 = vmatprep.subr.bf16.mxu0 %v6323_v54  ;;  %v343_v54 = vld [vmem:[#allocation5 + $0x608] sm:$0xff]  ;;  %v6459_v31 = vcombine.high %v415_v23, %v419_v25 }
 0x112   :  { %3098 = vmatpush2.bf16.msra.mxu1 %v6266_v27  ;;  %v6395_v27 = vcombine.high %v351_v20, %v355_v22  ;;  %v347_v29 = vld [vmem:[#allocation5 + $0x628] sm:$0xff] }
 0x113   :  { %3099 = vmatprep.subr.bf16.mxu1 %v6259_v32  ;;  %v407_v30 = vld [vmem:[#allocation5 + $0x808] sm:$0xff]  ;;  %v6386_v43 = vcombine.low %v343_v54, %v347_v29 }
 0x114   :  { %3125 = vmatpush1.bf16.msra.mxu0 %v6322_v34  ;;  %v411_v32 = vld [vmem:[#allocation5 + $0x828] sm:$0xff]  ;;  %v6458_v34 = vcombine.low %v415_v23, %v419_v25 }
 0x115   :  { %3126 = vmatprep.subr.bf16.mxu0 %v6443_v38  ;;  %v527_v38 = vld [vmem:[#allocation5 + $0xbc8] sm:$0xff]  ;;  %v6451_v41 = vcombine.high %v407_v30, %v411_v32 }
 0x116   :  { %3100 = vmatpush2.bf16.msra.mxu1 %v6258_v37  ;;  %v6387_v37 = vcombine.high %v343_v54, %v347_v29  ;;  %v531_v39 = vld [vmem:[#allocation5 + $0xbe8] sm:$0xff] }
 0x117   :  { %3151 = vmatprep.subr.bf16.mxu1 %v6507_v42  ;;  %v591_v40 = vld [vmem:[#allocation5 + $0xdc8] sm:$0xff]  ;;  %v6571_v48 = vcombine.high %v527_v38, %v531_v39 }
 0x118   :  { %3127 = vmatpush2.bf16.msra.mxu0 %v6442_v44  ;;  %v595_v42 = vld [vmem:[#allocation5 + $0xde8] sm:$0xff]  ;;  %v6450_v44 = vcombine.low %v407_v30, %v411_v32 }
 0x119   :  { %3102 = vmatmul.mubr.bf16.vlgmr.msra.gmra.mxu1 %v7852_v16  ;;  %3128 = vmatprep.subr.bf16.mxu0 %v6435_v21  ;;  %v519_v21 = vld [vmem:[#allocation5 + $0xb88] sm:$0xff]  ;;  %v6634_v50 = vcombine.low %v591_v40, %v595_v42 }
 0x11a   :  { %3152 = vmatpush1.bf16.msra.mxu1 %v6506_v45  ;;  %3183 = vmatprep.mubr.bf16.mxu1 %v7863_v28  ;;  %v6635_v45 = vcombine.high %v591_v40, %v595_v42  ;;  %v523_v46 = vld [vmem:[#allocation5 + $0xba8] sm:$0xff] }
 0x11b   :  { %3153 = vmatprep.subr.bf16.mxu1 %v6499_v49  ;;  %v583_v47 = vld [vmem:[#allocation5 + $0xd88] sm:$0xff]  ;;  %v6563_v60 = vcombine.high %v519_v21, %v523_v46 }
 0x11c   :  { %3129 = vmatpush2.bf16.msra.mxu0 %v6434_v51  ;;  %v587_v49 = vld [vmem:[#allocation5 + $0xda8] sm:$0xff]  ;;  %v6570_v51 = vcombine.low %v527_v38, %v531_v39 }
 0x11d   :  { %3130 = vmatprep.subr.bf16.mxu0 %v6427_v55  ;;  %v511_v55 = vld [vmem:[#allocation5 + $0xb48] sm:$0xff]  ;;  %v6626_v62 = vcombine.low %v583_v47, %v587_v49 }
 0x11e   :  { %3154 = vmatpush1.bf16.msra.mxu1 %v6498_v52  ;;  %v6627_v52 = vcombine.high %v583_v47, %v587_v49  ;;  %v515_v56 = vld [vmem:[#allocation5 + $0xb68] sm:$0xff] }
 0x11f   :  { %3155 = vmatprep.subr.bf16.mxu1 %v6491_v61  ;;  %v575_v57 = vld [vmem:[#allocation5 + $0xd48] sm:$0xff]  ;;  %v6555_v4 = vcombine.high %v511_v55, %v515_v56 }
 0x120   :  { %3131 = vmatpush2.bf16.msra.mxu0 %v6426_v63  ;;  %v579_v61 = vld [vmem:[#allocation5 + $0xd68] sm:$0xff]  ;;  %v6562_v63 = vcombine.low %v519_v21, %v523_v46  ;;  %v212_v21 = vld [vmem:[#allocation5 + $0x1f0] sm:$0xff] }
 0x121   :  { %3132 = vmatprep.subr.bf16.mxu0 %v6419_v1  ;;  %v503_v1 = vld [vmem:[#allocation5 + $0xb08] sm:$0xff]  ;;  %v6618_v6 = vcombine.low %v575_v57, %v579_v61  ;;  %v336_v46 = vld [vmem:[#allocation5 + $0x5d0] sm:$0xff] }
 0x122   :  { %3156 = vmatpush1.bf16.msra.mxu1 %v6490_v0  ;;  %v6619_v0 = vcombine.high %v575_v57, %v579_v61  ;;  %v507_v2 = vld [vmem:[#allocation5 + $0xb28] sm:$0xff] }
 0x123   :  { %3157 = vmatprep.subr.bf16.mxu1 %v6483_v5  ;;  %v567_v3 = vld [vmem:[#allocation5 + $0xd08] sm:$0xff]  ;;  %v6547_v12 = vcombine.high %v503_v1, %v507_v2 }
 0x124   :  { %3133 = vmatpush2.bf16.msra.mxu0 %v6418_v7  ;;  %v571_v5 = vld [vmem:[#allocation5 + $0xd28] sm:$0xff]  ;;  %v6554_v7 = vcombine.low %v511_v55, %v515_v56  ;;  %v204_v55 = vld [vmem:[#allocation5 + $0x1b0] sm:$0xff] }
 0x125   :  { %3134 = vmatprep.subr.bf16.mxu0 %v6411_v9  ;;  %v495_v9 = vld [vmem:[#allocation5 + $0xac8] sm:$0xff]  ;;  %v6610_v14 = vcombine.low %v567_v3, %v571_v5  ;;  %v328_v56 = vld [vmem:[#allocation5 + $0x590] sm:$0xff] }
 0x126   :  { %3158 = vmatpush1.bf16.msra.mxu1 %v6482_v8  ;;  %v6611_v8 = vcombine.high %v567_v3, %v571_v5  ;;  %v499_v10 = vld [vmem:[#allocation5 + $0xae8] sm:$0xff]  ;;  %v7879_v5 = vld [vmem:[#allocation2 + $0x18] ss:$0 sps:$4 sm:$0xff]  }
 0x127   :  { %3159 = vmatprep.subr.bf16.mxu1 %v6475_v13  ;;  %v559_v11 = vld [vmem:[#allocation5 + $0xcc8] sm:$0xff]  ;;  %v6539_v23 = vcombine.high %v495_v9, %v499_v10 }
 0x128   :  { %3135 = vmatpush2.bf16.msra.mxu0 %v6410_v15  ;;  %v563_v13 = vld [vmem:[#allocation5 + $0xce8] sm:$0xff]  ;;  %v6546_v15 = vcombine.low %v503_v1, %v507_v2  ;;  %v196_v1 = vld [vmem:[#allocation5 + $0x170] sm:$0xff] }
 0x129   :  { %3136 = vmatprep.subr.bf16.mxu0 %v6403_v18  ;;  %v487_v18 = vld [vmem:[#allocation5 + $0xa88] sm:$0xff]  ;;  %v6602_v25 = vcombine.low %v559_v11, %v563_v13  ;;  %v320_v2 = vld [vmem:[#allocation5 + $0x550] sm:$0xff] }
 0x12a   :  { %3160 = vmatpush1.bf16.msra.mxu1 %v6474_v17  ;;  %v6603_v17 = vcombine.high %v559_v11, %v563_v13  ;;  %v491_v20 = vld [vmem:[#allocation5 + $0xaa8] sm:$0xff]  ;;  %v312_v11 = vld [vmem:[#allocation5 + $0x510] sm:$0xff] }
 0x12b   :  { %3161 = vmatprep.subr.bf16.mxu1 %v6467_v24  ;;  %v551_v22 = vld [vmem:[#allocation5 + $0xc88] sm:$0xff]  ;;  %v6531_v30 = vcombine.high %v487_v18, %v491_v20  ;;  %v316_v13 = vld [vmem:[#allocation5 + $0x530] sm:$0xff] }
 0x12c   :  { %3137 = vmatpush2.bf16.msra.mxu0 %v6402_v26  ;;  %v555_v24 = vld [vmem:[#allocation5 + $0xca8] sm:$0xff]  ;;  %v6538_v26 = vcombine.low %v495_v9, %v499_v10  ;;  %v184_v9 = vld [vmem:[#allocation5 + $0x110] sm:$0xff] }
 0x12d   :  { %3138 = vmatprep.subr.bf16.mxu0 %v6395_v27  ;;  %v479_v27 = vld [vmem:[#allocation5 + $0xa48] sm:$0xff]  ;;  %v6594_v32 = vcombine.low %v551_v22, %v555_v24  ;;  %v188_v10 = vld [vmem:[#allocation5 + $0x130] sm:$0xff] }
 0x12e   :  { %3162 = vmatpush1.bf16.msra.mxu1 %v6466_v53  ;;  %v6595_v53 = vcombine.high %v551_v22, %v555_v24  ;;  %v483_v54 = vld [vmem:[#allocation5 + $0xa68] sm:$0xff]  ;;  %v304_v22 = vld [vmem:[#allocation5 + $0x4d0] sm:$0xff] }
 0x12f   :  { %3163 = vmatprep.subr.bf16.mxu1 %v6459_v31  ;;  %v543_v29 = vld [vmem:[#allocation5 + $0xc48] sm:$0xff]  ;;  %v6523_v40 = vcombine.high %v479_v27, %v483_v54  ;;  %v308_v24 = vld [vmem:[#allocation5 + $0x4f0] sm:$0xff] }
 0x130   :  { %3139 = vmatpush2.bf16.msra.mxu0 %v6394_v33  ;;  %v547_v31 = vld [vmem:[#allocation5 + $0xc68] sm:$0xff]  ;;  %v6530_v33 = vcombine.low %v487_v18, %v491_v20  ;;  %v176_v18 = vld [vmem:[#allocation5 + $0xd0] sm:$0xff] }
 0x131   :  { %3140 = vmatprep.subr.bf16.mxu0 %v6387_v37  ;;  %v471_v37 = vld [vmem:[#allocation5 + $0xa08] sm:$0xff]  ;;  %v6586_v42 = vcombine.low %v543_v29, %v547_v31  ;;  %v180_v20 = vld [vmem:[#allocation5 + $0xf0] sm:$0xff] }
 0x132   :  { %3164 = vmatpush1.bf16.msra.mxu1 %v6458_v34  ;;  %v6587_v34 = vcombine.high %v543_v29, %v547_v31  ;;  %v475_v38 = vld [vmem:[#allocation5 + $0xa28] sm:$0xff]  ;;  %v296_v29 = vld [vmem:[#allocation5 + $0x490] sm:$0xff] }
 0x133   :  { %3165 = vmatprep.subr.bf16.mxu1 %v6451_v41  ;;  %v535_v39 = vld [vmem:[#allocation5 + $0xc08] sm:$0xff]  ;;  %v6515_v47 = vcombine.high %v471_v37, %v475_v38  ;;  %v300_v31 = vld [vmem:[#allocation5 + $0x4b0] sm:$0xff] }
 0x134   :  { %3141 = vmatpush2.bf16.msra.mxu0 %v6386_v43  ;;  %v539_v41 = vld [vmem:[#allocation5 + $0xc28] sm:$0xff]  ;;  %v6522_v43 = vcombine.low %v479_v27, %v483_v54  ;;  %v168_v27 = vld [vmem:[#allocation5 + $0x90] sm:$0xff] }
 0x135   :  { %3192 = vmatprep.subr.bf16.mxu0 %v6635_v45  ;;  %v208_v45 = vld [vmem:[#allocation5 + $0x1d0] sm:$0xff]  ;;  %v6578_v49 = vcombine.low %v535_v39, %v539_v41 }
 0x136   :  { %3166 = vmatpush1.bf16.msra.mxu1 %v6450_v44  ;;  %v6579_v44 = vcombine.high %v535_v39, %v539_v41  ;;  %v6252_v61 = vcombine.low %v208_v45, %v212_v21  ;;  %v172_v54 = vld [vmem:[#allocation5 + $0xb0] sm:$0xff]  ;;  %v6341_v39 = vcombine.high %v296_v29, %v300_v31 }
 0x137   :  { %3167 = vmatprep.subr.bf16.mxu1 %v6571_v48  ;;  %3143 = vmatmul.mubr.bf16.vlgmr.msra.gmra.mxu0 %v7856_v19  ;;  %v340_v48 = vld [vmem:[#allocation5 + $0x5f0] sm:$0xff] }
 0x138   :  { %3193 = vmatpush1.bf16.msra.mxu0 %v6634_v50  ;;  %3224 = vmatprep.mubr.bf16.mxu0 %v7757_v36  ;;  %v6514_v50 = vcombine.low %v471_v37, %v475_v38  ;;  %v6381_v57 = vcombine.high %v336_v46, %v340_v48  ;;  %v160_v37 = vld [vmem:[#allocation5 + $0x50] sm:$0xff] }
 0x139   :  { %3194 = vmatprep.subr.bf16.mxu0 %v6627_v52  ;;  %v200_v52 = vld [vmem:[#allocation5 + $0x190] sm:$0xff] }
 0x13a   :  { %3168 = vmatpush2.bf16.msra.mxu1 %v6570_v51  ;;  %v6253_v51 = vcombine.high %v208_v45, %v212_v21  ;;  %v164_v38 = vld [vmem:[#allocation5 + $0x70] sm:$0xff] }
 0x13b   :  { %3169 = vmatprep.subr.bf16.mxu1 %v6563_v60  ;;  %v332_v60 = vld [vmem:[#allocation5 + $0x5b0] sm:$0xff]  ;;  %v6205_v45 = vcombine.high %v160_v37, %v164_v38 }
 0x13c   :  { %3195 = vmatpush1.bf16.msra.mxu0 %v6626_v62  ;;  %v6380_v62 = vcombine.low %v336_v46, %v340_v48  ;;  %v6373_v3 = vcombine.high %v328_v56, %v332_v60  ;;  %v292_v41 = vld [vmem:[#allocation5 + $0x470] sm:$0xff] }
 0x13d   :  { %3196 = vmatprep.subr.bf16.mxu0 %v6619_v0  ;;  %v192_v0 = vld [vmem:[#allocation5 + $0x150] sm:$0xff] }
 0x13e   :  { %3170 = vmatpush2.bf16.msra.mxu1 %v6562_v63  ;;  %v6245_v63 = vcombine.high %v200_v52, %v204_v55  ;;  %v152_v46 = vld [vmem:[#allocation5 + $0x10] sm:$0xff] }
 0x13f   :  { %3171 = vmatprep.subr.bf16.mxu1 %v6555_v4  ;;  %v324_v4 = vld [vmem:[#allocation5 + $0x570] sm:$0xff] }
 0x140   :  { %3197 = vmatpush1.bf16.msra.mxu0 %v6618_v6  ;;  %v6244_v6 = vcombine.low %v200_v52, %v204_v55  ;;  %v280_v48 = vld [vmem:[#allocation5 + $0x410] sm:$0xff] }
 0x141   :  { %3198 = vmatprep.subr.bf16.mxu0 %v6611_v8  ;;  %v6237_v8 = vcombine.high %v192_v0, %v196_v1 }
 0x142   :  { %3172 = vmatpush2.bf16.msra.mxu1 %v6554_v7  ;;  %v6372_v7 = vcombine.low %v328_v56, %v332_v60  ;;  %v276_v60 = vld [vmem:[#allocation5 + $0x3f0] sm:$0xff] }
 0x143   :  { %3173 = vmatprep.subr.bf16.mxu1 %v6547_v12  ;;  %v6365_v12 = vcombine.high %v320_v2, %v324_v4 }
 0x144   :  { %3199 = vmatpush1.bf16.msra.mxu0 %v6610_v14  ;;  %v6236_v14 = vcombine.low %v192_v0, %v196_v1 }
 0x145   :  { %3200 = vmatprep.subr.bf16.mxu0 %v6603_v17  ;;  %v6229_v17 = vcombine.high %v184_v9, %v188_v10 }
 0x146   :  { %3174 = vmatpush2.bf16.msra.mxu1 %v6546_v15  ;;  %v6364_v15 = vcombine.low %v320_v2, %v324_v4  ;;  %v7890_v2 = vld [vmem:[#allocation7] sm:$0xff] }
 0x147   :  { %3175 = vmatprep.subr.bf16.mxu1 %v6539_v23  ;;  %v6357_v23 = vcombine.high %v312_v11, %v316_v13 }
 0x148   :  { %3201 = vmatpush1.bf16.msra.mxu0 %v6602_v25  ;;  %v6228_v25 = vcombine.low %v184_v9, %v188_v10  ;;  %v392_v9 = vld [vmem:[#allocation5 + $0x790] sm:$0xff] }
 0x149   :  { %3202 = vmatprep.subr.bf16.mxu0 %v6595_v53  ;;  %v6221_v53 = vcombine.high %v176_v18, %v180_v20  ;;  %v396_v10 = vld [vmem:[#allocation5 + $0x7b0] sm:$0xff] }
 0x14a   :  { %3176 = vmatpush2.bf16.msra.mxu1 %v6538_v26  ;;  %v6356_v26 = vcombine.low %v312_v11, %v316_v13 }
 0x14b   :  { %3177 = vmatprep.subr.bf16.mxu1 %v6531_v30  ;;  %v6349_v30 = vcombine.high %v304_v22, %v308_v24 }
 0x14c   :  { %3203 = vmatpush1.bf16.msra.mxu0 %v6594_v32  ;;  %v6220_v32 = vcombine.low %v176_v18, %v180_v20  ;;  %v256_v18 = vld [vmem:[#allocation5 + $0x350] sm:$0xff] }
 0x14d   :  { %3204 = vmatprep.subr.bf16.mxu0 %v6587_v34  ;;  %v6213_v34 = vcombine.high %v168_v27, %v172_v54  ;;  %v260_v20 = vld [vmem:[#allocation5 + $0x370] sm:$0xff] }
 0x14e   :  { %3178 = vmatpush2.bf16.msra.mxu1 %v6530_v33  ;;  %v6348_v33 = vcombine.low %v304_v22, %v308_v24  ;;  %v388_v24 = vld [vmem:[#allocation5 + $0x770] sm:$0xff] }
 0x14f   :  { %3179 = vmatprep.subr.bf16.mxu1 %v6523_v40  ;;  %v288_v40 = vld [vmem:[#allocation5 + $0x450] sm:$0xff] }
 0x150   :  { %3205 = vmatpush1.bf16.msra.mxu0 %v6586_v42  ;;  %v6212_v42 = vcombine.low %v168_v27, %v172_v54  ;;  %v6333_v21 = vcombine.high %v288_v40, %v292_v41  ;;  %v6332_v52 = vcombine.low %v288_v40, %v292_v41  ;;  %v6436_v54 = vcombine.low %v392_v9, %v396_v10  ;;  %v380_v40 = vld [vmem:[#allocation5 + $0x730] sm:$0xff] }
 0x151   :  { %3206 = vmatprep.subr.bf16.mxu0 %v6579_v44  ;;  %v6340_v44 = vcombine.low %v296_v29, %v300_v31  ;;  %v6301_v29 = vcombine.high %v256_v18, %v260_v20 }
 0x152   :  { %3180 = vmatpush2.bf16.msra.mxu1 %v6522_v43  ;;  %v600_v43 = vlaneseq }
 0x153   :  { %3181 = vmatprep.subr.bf16.mxu1 %v6515_v47  ;;  %v156_v47 = vld [vmem:[#allocation5 + $0x30] sm:$0xff] }
 0x154   :  { %3207 = vmatpush1.bf16.msra.mxu0 %v6578_v49  ;;  %v284_v49 = vld [vmem:[#allocation5 + $0x430] sm:$0xff]  ;;  %v6197_v55 = vcombine.high %v152_v46, %v156_v47 }
 0x155   :  { %3233 = vmatprep.subr.bf16.mxu0 %v6253_v51  ;;  %v7885_v51 = vshrl.u32 %v600_v43, 7  ;;  %v6325_v56 = vcombine.high %v280_v48, %v284_v49  ;;  %v6324_v1 = vcombine.low %v280_v48, %v284_v49  ;;  %v6300_v43 = vcombine.low %v256_v18, %v260_v20  ;;  %v240_v48 = vld [vmem:[#allocation5 + $0x2d0] sm:$0xff] }
 0x156   :  { %3182 = vmatpush2.bf16.msra.mxu1 %v6514_v50  ;;  %v6204_v50 = vcombine.low %v160_v37, %v164_v38  ;;  %v252_v37 = vld [vmem:[#allocation5 + $0x330] sm:$0xff] }
 0x157   :  { %3274 = vmatprep.subr.bf16.mxu1 %v6381_v57  ;;  %3225 = vmatmul.mubr.bf16.vlgmr.msra.gmra.mxu0 %v7879_v5  ;;  %v272_v57 = vld [vmem:[#allocation5 + $0x3d0] sm:$0xff]  ;;  %v7888_v0 = vsub.s32 0, %v7885_v51 }
 0x158   :  { %3234 = vmatpush1.bf16.msra.mxu0 %v6252_v61  ;;  %3265 = vmatprep.mubr.bf16.mxu0 %v7842_v58  ;;  %v400_v61 = vld [vmem:[#allocation5 + $0x7d0] sm:$0xff] }
 0x159   :  { %3184 = vmatmul.mubr.bf16.vlgmr.msra.gmra.mxu1 %v7871_v35  ;;  %3235 = vmatprep.subr.bf16.mxu0 %v6245_v63  ;;  %v6196_v63 = vcombine.low %v152_v46, %v156_v47  ;;  %v603_v11 = vrot.slane %v7890_v2, %v7888_v0  ;;  %v244_v49 = vld [vmem:[#allocation5 + $0x2f0] sm:$0xff] }
 0x15a   :  { %3275 = vmatpush1.bf16.msra.mxu1 %v6380_v62  ;;  %3306 = vmatprep.mubr.bf16.mxu1 %v7846_v59  ;;  %v404_v62 = vld [vmem:[#allocation5 + $0x7f0] sm:$0xff] }
 0x15b   :  { %3276 = vmatprep.subr.bf16.mxu1 %v6373_v3  ;;  %v6317_v3 = vcombine.high %v272_v57, %v276_v60  ;;  %v6445_v4 = vcombine.high %v400_v61, %v404_v62  ;;  %v6444_v13 = vcombine.low %v400_v61, %v404_v62  ;;  %v232_v61 = vld [vmem:[#allocation5 + $0x290] sm:$0xff] }
 0x15c   :  { %3236 = vmatpush1.bf16.msra.mxu0 %v6244_v6  ;;  %v7893_v6 = vsub.s32 1, %v7885_v51  ;;  %v236_v62 = vld [vmem:[#allocation5 + $0x2b0] sm:$0xff] }
 0x15d   :  { %3237 = vmatprep.subr.bf16.mxu0 %v6237_v8  ;;  %v268_v8 = vld [vmem:[#allocation5 + $0x3b0] sm:$0xff] }
 0x15e   :  { %3277 = vmatpush1.bf16.msra.mxu1 %v6372_v7  ;;  %v264_v7 = vld [vmem:[#allocation5 + $0x390] sm:$0xff] }
 0x15f   :  { %3278 = vmatprep.subr.bf16.mxu1 %v6365_v12  ;;  %v6316_v12 = vcombine.low %v272_v57, %v276_v60  ;;  %v6285_v57 = vcombine.high %v240_v48, %v244_v49  ;;  %v216_v18 = vld [vmem:[#allocation5 + $0x210] sm:$0xff] }
 0x160   :  { %3238 = vmatpush1.bf16.msra.mxu0 %v6236_v14  ;;  %v6309_v14 = vcombine.high %v264_v7, %v268_v8  ;;  %v220_v20 = vld [vmem:[#allocation5 + $0x230] sm:$0xff] }
 0x161   :  { %3239 = vmatprep.subr.bf16.mxu0 %v6229_v17  ;;  %v6437_v17 = vcombine.high %v392_v9, %v396_v10  ;;  %v224_v9 = vld [vmem:[#allocation5 + $0x250] sm:$0xff] }
 0x162   :  { %3279 = vmatpush1.bf16.msra.mxu1 %v6364_v15  ;;  %v607_v15 = vrot.slane %v7890_v2, %v7893_v6  ;;  %v228_v10 = vld [vmem:[#allocation5 + $0x270] sm:$0xff] }
 0x163   :  { %3280 = vmatprep.subr.bf16.mxu1 %v6357_v23  ;;  %v384_v23 = vld [vmem:[#allocation5 + $0x750] sm:$0xff] }
 0x164   :  { %3240 = vmatpush1.bf16.msra.mxu0 %v6228_v25 }
 0x165   :  { %3241 = vmatprep.subr.bf16.mxu0 %v6221_v53  ;;  %v6308_v53 = vcombine.low %v264_v7, %v268_v8  ;;  %v6277_v7 = vcombine.high %v232_v61, %v236_v62 }
 0x166   :  { %3281 = vmatpush1.bf16.msra.mxu1 %v6356_v26 }
 0x167   :  { %3282 = vmatprep.subr.bf16.mxu1 %v6349_v30 }
 0x168   :  { %3242 = vmatpush1.bf16.msra.mxu0 %v6220_v32 }
 0x169   :  { %3243 = vmatprep.subr.bf16.mxu0 %v6213_v34  ;;  %v248_v34 = vld [vmem:[#allocation5 + $0x310] sm:$0xff] }
 0x16a   :  { %3283 = vmatpush1.bf16.msra.mxu1 %v6348_v33  ;;  %v6429_v33 = vcombine.high %v384_v23, %v388_v24 }
 0x16b   :  { %3284 = vmatprep.subr.bf16.mxu1 %v6341_v39  ;;  %v376_v39 = vld [vmem:[#allocation5 + $0x710] sm:$0xff] }
 0x16c   :  { %3244 = vmatpush1.bf16.msra.mxu0 %v6212_v42  ;;  %v6421_v47 = vcombine.high %v376_v39, %v380_v40 }
 0x16d   :  { %3245 = vmatprep.subr.bf16.mxu0 %v6205_v45  ;;  %v6428_v45 = vcombine.low %v384_v23, %v388_v24  ;;  %v348_v23 = vld [vmem:[#allocation5 + $0x630] sm:$0xff]  ;;  %v6268_v24 = vcombine.low %v224_v9, %v228_v10 }
 0x16e   :  { %3285 = vmatpush1.bf16.msra.mxu1 %v6340_v44 }
 0x16f   :  { %3286 = vmatprep.subr.bf16.mxu1 %v6333_v21  ;;  %v6293_v21 = vcombine.high %v248_v34, %v252_v37 }
 0x170   :  { %3246 = vmatpush1.bf16.msra.mxu0 %v6204_v50  ;;  %v368_v50 = vld [vmem:[#allocation5 + $0x6d0] sm:$0xff] }
 0x171   :  { %3247 = vmatprep.subr.bf16.mxu0 %v6197_v55  ;;  %v6292_v55 = vcombine.low %v248_v34, %v252_v37 }
 0x172   :  { %3287 = vmatpush1.bf16.msra.mxu1 %v6332_v52  ;;  %v372_v52 = vld [vmem:[#allocation5 + $0x6f0] sm:$0xff] }
 0x173   :  { %3288 = vmatprep.subr.bf16.mxu1 %v6325_v56  ;;  %v6420_v56 = vcombine.low %v376_v39, %v380_v40  ;;  %v6413_v60 = vcombine.high %v368_v50, %v372_v52  ;;  %v460_v39 = vld [vmem:[#allocation5 + $0x9b0] sm:$0xff] }
 0x174   :  { %3248 = vmatpush1.bf16.msra.mxu0 %v6196_v63  ;;  %v360_v63 = vld [vmem:[#allocation5 + $0x690] sm:$0xff] }
 0x175   :  { %3249 = vmatprep.subr.bf16.mxu0 %v6317_v3  ;;  %v6284_v3 = vcombine.low %v240_v48, %v244_v49  ;;  %v584_v40 = vld [vmem:[#allocation5 + $0xd90] sm:$0xff] }
 0x176   :  { %3289 = vmatpush1.bf16.msra.mxu1 %v6324_v1  ;;  %v364_v1 = vld [vmem:[#allocation5 + $0x6b0] sm:$0xff] }
 0x177   :  { %3290 = vmatprep.subr.bf16.mxu1 %v6445_v4  ;;  %v2939_v22 = vpop.f32.mrf.mxu0  ;;  %v6412_v4 = vcombine.low %v368_v50, %v372_v52  ;;  %v6405_v8 = vcombine.high %v360_v63, %v364_v1  ;;  %v576_v48 = vld [vmem:[#allocation5 + $0xd50] sm:$0xff] }
 0x178   :  { %v2940_v25 = vadd.f32 %v2939_v22, %v603_v11  ;;  %3250 = vmatpush2.bf16.msra.mxu0 %v6316_v12  ;;  %v352_v11 = vld [vmem:[#allocation5 + $0x650] sm:$0xff] }
 0x179   :  { %v2980_v26 = vpop.f32.mrf.mxu1  ;;  %v2941_v27 = vpop.f32.mrf.mxu0  ;;  %3251 = vmatprep.subr.bf16.mxu0 %v6309_v14  ;;  %v356_v12 = vld [vmem:[#allocation5 + $0x670] sm:$0xff]  ;;  %v6404_v14 = vcombine.low %v360_v63, %v364_v1 }
 0x17a   :  { %3291 = vmatpush2.bf16.msra.mxu1 %v6444_v13  ;;  %v7899_v30 = vadd.f32 %v2980_v26, %v2940_v25  ;;  %v2942_v31 = vadd.f32 %v2941_v27, %v607_v15  ;;  %v6276_v13 = vcombine.low %v232_v61, %v236_v62  ;;  %v6269_v15 = vcombine.high %v224_v9, %v228_v10  ;;  %v344_v22 = vld [vmem:[#allocation5 + $0x610] sm:$0xff] }
 0x17b   :  { %v2982_v32 = vpop.f32.mrf.mxu1  ;;  %3292 = vmatprep.subr.bf16.mxu1 %v6437_v17  ;;  %v2943_v38 = vpop.f32.mrf.mxu0  ;;  %v6397_v17 = vcombine.high %v352_v11, %v356_v12  ;;  %v6396_v25 = vcombine.low %v352_v11, %v356_v12  ;;  %v6261_v26 = vcombine.high %v216_v18, %v220_v20  ;;  %v464_v27 = vld [vmem:[#allocation5 + $0x9d0] sm:$0xff] }
 0x17c   :  { %v7901_v41 = vadd.f32 %v2982_v32, %v2942_v31  ;;  %3252 = vmatpush2.bf16.msra.mxu0 %v6308_v53  ;;  %v6389_v53 = vcombine.high %v344_v22, %v348_v23  ;;  %v596_v31 = vld [vmem:[#allocation5 + $0xdf0] sm:$0xff]  ;;  %v6260_v32 = vcombine.low %v216_v18, %v220_v20 }
 0x17d   :  { %v2984_v42 = vpop.f32.mrf.mxu1  ;;  %v2944_v44 = vpop.f32.mrf.mxu0  ;;  %3253 = vmatprep.subr.bf16.mxu0 %v6301_v29  ;;  %v592_v29 = vld [vmem:[#allocation5 + $0xdd0] sm:$0xff] }
 0x17e   :  { %3293 = vmatpush2.bf16.msra.mxu1 %v6436_v54  ;;  %v468_v54 = vld [vmem:[#allocation5 + $0x9f0] sm:$0xff]  ;;  %v6637_v37 = vcombine.high %v592_v29, %v596_v31  ;;  %v6636_v44 = vcombine.low %v592_v29, %v596_v31 }
 0x17f   :  { %v2985_v46 = vpop.f32.mrf.mxu1  ;;  %3294 = vmatprep.subr.bf16.mxu1 %v6429_v33  ;;  %v6388_v33 = vcombine.low %v344_v22, %v348_v23  ;;  %v6509_v34 = vcombine.high %v464_v27, %v468_v54  ;;  %v456_v38 = vld [vmem:[#allocation5 + $0x990] sm:$0xff] }
 0x180   :  { %3254 = vmatpush2.bf16.msra.mxu0 %v6300_v43  ;;  %v588_v42 = vld [vmem:[#allocation5 + $0xdb0] sm:$0xff]  ;;  %v6508_v43 = vcombine.low %v464_v27, %v468_v54  ;;  %v6500_v52 = vcombine.low %v456_v38, %v460_v39 }
 0x181   :  { %3255 = vmatprep.subr.bf16.mxu0 %v6293_v21  ;;  %v6629_v21 = vcombine.high %v584_v40, %v588_v42  ;;  %v448_v46 = vld [vmem:[#allocation5 + $0x950] sm:$0xff] }
 0x182   :  { %3295 = vmatpush2.bf16.msra.mxu1 %v6428_v45  ;;  %v6501_v45 = vcombine.high %v456_v38, %v460_v39  ;;  %v580_v49 = vld [vmem:[#allocation5 + $0xd70] sm:$0xff] }
 0x183   :  { %3296 = vmatprep.subr.bf16.mxu1 %v6421_v47  ;;  %v452_v47 = vld [vmem:[#allocation5 + $0x970] sm:$0xff] }
 0x184   :  { %3256 = vmatpush2.bf16.msra.mxu0 %v6292_v55  ;;  %v6628_v55 = vcombine.low %v584_v40, %v588_v42  ;;  %v440_v61 = vld [vmem:[#allocation5 + $0x910] sm:$0xff] }
 0x185   :  { %3257 = vmatprep.subr.bf16.mxu0 %v6285_v57  ;;  %v444_v62 = vld [vmem:[#allocation5 + $0x930] sm:$0xff] }
 0x186   :  { %3297 = vmatpush2.bf16.msra.mxu1 %v6420_v56  ;;  %v6493_v56 = vcombine.high %v448_v46, %v452_v47  ;;  %v568_v63 = vld [vmem:[#allocation5 + $0xd10] sm:$0xff] }
 0x187   :  { %3298 = vmatprep.subr.bf16.mxu1 %v6413_v60  ;;  %v6621_v60 = vcombine.high %v576_v48, %v580_v49  ;;  %v572_v1 = vld [vmem:[#allocation5 + $0xd30] sm:$0xff] }
 0x188   :  { %3258 = vmatpush2.bf16.msra.mxu0 %v6284_v3  ;;  %v6613_v10 = vcombine.high %v568_v63, %v572_v1  ;;  %v432_v11 = vld [vmem:[#allocation5 + $0x8d0] sm:$0xff] }
 0x189   :  { %3259 = vmatprep.subr.bf16.mxu0 %v6277_v7  ;;  %v6620_v7 = vcombine.low %v576_v48, %v580_v49  ;;  %v436_v12 = vld [vmem:[#allocation5 + $0x8f0] sm:$0xff] }
 0x18a   :  { %3299 = vmatpush2.bf16.msra.mxu1 %v6412_v4  ;;  %v6492_v4 = vcombine.low %v448_v46, %v452_v47  ;;  %v6477_v18 = vcombine.high %v432_v11, %v436_v12  ;;  %v424_v22 = vld [vmem:[#allocation5 + $0x890] sm:$0xff] }
 0x18b   :  { %3300 = vmatprep.subr.bf16.mxu1 %v6405_v8  ;;  %v6485_v8 = vcombine.high %v440_v61, %v444_v62  ;;  %v428_v23 = vld [vmem:[#allocation5 + $0x8b0] sm:$0xff] }
 0x18c   :  { %3260 = vmatpush2.bf16.msra.mxu0 %v6276_v13  ;;  %v560_v13 = vld [vmem:[#allocation5 + $0xcd0] sm:$0xff]  ;;  %v6469_v27 = vcombine.high %v424_v22, %v428_v23 }
 0x18d   :  { %3261 = vmatprep.subr.bf16.mxu0 %v6269_v15  ;;  %v6484_v15 = vcombine.low %v440_v61, %v444_v62  ;;  %v416_v29 = vld [vmem:[#allocation5 + $0x850] sm:$0xff] }
 0x18e   :  { %3301 = vmatpush2.bf16.msra.mxu1 %v6404_v14  ;;  %v564_v14 = vld [vmem:[#allocation5 + $0xcf0] sm:$0xff] }
 0x18f   :  { %3302 = vmatprep.subr.bf16.mxu1 %v6397_v17  ;;  %v6612_v17 = vcombine.low %v568_v63, %v572_v1  ;;  %v6605_v20 = vcombine.high %v560_v13, %v564_v14  ;;  %v420_v31 = vld [vmem:[#allocation5 + $0x870] sm:$0xff] }
 0x190   :  { %3262 = vmatpush2.bf16.msra.mxu0 %v6268_v24  ;;  %v552_v24 = vld [vmem:[#allocation5 + $0xc90] sm:$0xff]  ;;  %v6461_v38 = vcombine.high %v416_v29, %v420_v31 }
 0x191   :  { %3263 = vmatprep.subr.bf16.mxu0 %v6261_v26  ;;  %v6476_v26 = vcombine.low %v432_v11, %v436_v12  ;;  %v408_v40 = vld [vmem:[#allocation5 + $0x810] sm:$0xff] }
 0x192   :  { %3303 = vmatpush2.bf16.msra.mxu1 %v6396_v25  ;;  %v556_v25 = vld [vmem:[#allocation5 + $0xcb0] sm:$0xff] }
 0x193   :  { %3304 = vmatprep.subr.bf16.mxu1 %v6389_v53  ;;  %v6604_v53 = vcombine.low %v560_v13, %v564_v14  ;;  %v6597_v54 = vcombine.high %v552_v24, %v556_v25  ;;  %v412_v42 = vld [vmem:[#allocation5 + $0x830] sm:$0xff]  ;;  %v193_v14 = vld [vmem:[#allocation5 + $0x158] sm:$0xff] }
 0x194   :  { %3264 = vmatpush2.bf16.msra.mxu0 %v6260_v32  ;;  %v544_v32 = vld [vmem:[#allocation5 + $0xc50] sm:$0xff]  ;;  %v6453_v46 = vcombine.high %v408_v40, %v412_v42 }
 0x195   :  { %3315 = vmatprep.subr.bf16.mxu0 %v6509_v34  ;;  %v6468_v34 = vcombine.low %v424_v22, %v428_v23  ;;  %v528_v48 = vld [vmem:[#allocation5 + $0xbd0] sm:$0xff] }
 0x196   :  { %3305 = vmatpush2.bf16.msra.mxu1 %v6388_v33  ;;  %v548_v33 = vld [vmem:[#allocation5 + $0xc70] sm:$0xff] }
 0x197   :  { %3356 = vmatprep.subr.bf16.mxu1 %v6637_v37  ;;  %3266 = vmatmul.mubr.bf16.vlgmr.msra.gmra.mxu0 %v7852_v16  ;;  %v6596_v37 = vcombine.low %v552_v24, %v556_v25  ;;  %v6589_v39 = vcombine.high %v544_v32, %v548_v33  ;;  %v532_v49 = vld [vmem:[#allocation5 + $0xbf0] sm:$0xff] }
 0x198   :  { %3316 = vmatpush1.bf16.msra.mxu0 %v6508_v43  ;;  %3347 = vmatprep.mubr.bf16.mxu0 %v7863_v28  ;;  %v536_v43 = vld [vmem:[#allocation5 + $0xc10] sm:$0xff]  ;;  %v6573_v61 = vcombine.high %v528_v48, %v532_v49 }
 0x199   :  { %v7904_v50 = vpop.f32.mrf.mxu1  ;;  %3307 = vmatmul.mubr.bf16.vlgmr.msra.gmra.mxu1 %v7856_v19  ;;  %3317 = vmatprep.subr.bf16.mxu0 %v6501_v45  ;;  %v6460_v45 = vcombine.low %v416_v29, %v420_v31  ;;  %v520_v63 = vld [vmem:[#allocation5 + $0xb90] sm:$0xff] }
 0x19a   :  { %3357 = vmatpush1.bf16.msra.mxu1 %v6636_v44  ;;  %3388 = vmatprep.mubr.bf16.mxu1 %v7757_v36  ;;  %v540_v44 = vld [vmem:[#allocation5 + $0xc30] sm:$0xff] }
 0x19b   :  { %v7907_v57 = vpop.f32.mrf.mxu1  ;;  %3358 = vmatprep.subr.bf16.mxu1 %v6629_v21  ;;  %v6588_v21 = vcombine.low %v544_v32, %v548_v33  ;;  %v6581_v47 = vcombine.high %v536_v43, %v540_v44  ;;  %v524_v1 = vld [vmem:[#allocation5 + $0xbb0] sm:$0xff] }
 0x19c   :  { %3318 = vmatpush1.bf16.msra.mxu0 %v6500_v52  ;;  %v209_v52 = vld [vmem:[#allocation5 + $0x1d8] sm:$0xff]  ;;  %v512_v11 = vld [vmem:[#allocation5 + $0xb50] sm:$0xff] }
 0x19d   :  { %v3066_v3 = vpop.f32.mrf.mxu1  ;;  %3319 = vmatprep.subr.bf16.mxu0 %v6493_v56  ;;  %v6452_v56 = vcombine.low %v408_v40, %v412_v42  ;;  %v516_v12 = vld [vmem:[#allocation5 + $0xb70] sm:$0xff] }
 0x19e   :  { %3359 = vmatpush1.bf16.msra.mxu1 %v6628_v55  ;;  %v213_v55 = vld [vmem:[#allocation5 + $0x1f8] sm:$0xff]  ;;  %v6557_v23 = vcombine.high %v512_v11, %v516_v12  ;;  %v6556_v31 = vcombine.low %v512_v11, %v516_v12 }
 0x19f   :  { %v3067_v9 = vpop.f32.mrf.mxu1  ;;  %3360 = vmatprep.subr.bf16.mxu1 %v6621_v60  ;;  %v6580_v60 = vcombine.low %v536_v43, %v540_v44  ;;  %v6255_v62 = vcombine.high %v209_v52, %v213_v55  ;;  %v201_v3 = vld [vmem:[#allocation5 + $0x198] sm:$0xff]  ;;  %v488_v43 = vld [vmem:[#allocation5 + $0xa90] sm:$0xff] }
 0x1a0   :  { %3320 = vmatpush1.bf16.msra.mxu0 %v6492_v4  ;;  %v205_v4 = vld [vmem:[#allocation5 + $0x1b8] sm:$0xff]  ;;  %v6565_v9 = vcombine.high %v520_v63, %v524_v1  ;;  %v492_v44 = vld [vmem:[#allocation5 + $0xab0] sm:$0xff] }
 0x1a1   :  { %3321 = vmatprep.subr.bf16.mxu0 %v6485_v8  ;;  %v6254_v8 = vcombine.low %v209_v52, %v213_v55  ;;  %v6246_v22 = vcombine.low %v201_v3, %v205_v4  ;;  %v480_v52 = vld [vmem:[#allocation5 + $0xa50] sm:$0xff] }
 0x1a2   :  { %3361 = vmatpush1.bf16.msra.mxu1 %v6620_v7  ;;  %v6572_v7 = vcombine.low %v528_v48, %v532_v49  ;;  %v6533_v48 = vcombine.high %v488_v43, %v492_v44  ;;  %v484_v55 = vld [vmem:[#allocation5 + $0xa70] sm:$0xff] }
 0x1a3   :  { %3362 = vmatprep.subr.bf16.mxu1 %v6613_v10  ;;  %v6247_v10 = vcombine.high %v201_v3, %v205_v4  ;;  %v472_v3 = vld [vmem:[#allocation5 + $0xa10] sm:$0xff] }
 0x1a4   :  { %3322 = vmatpush1.bf16.msra.mxu0 %v6484_v15  ;;  %v197_v15 = vld [vmem:[#allocation5 + $0x178] sm:$0xff]  ;;  %v476_v4 = vld [vmem:[#allocation5 + $0xa30] sm:$0xff] }
 0x1a5   :  { %3323 = vmatprep.subr.bf16.mxu0 %v6477_v18  ;;  %v6564_v18 = vcombine.low %v520_v63, %v524_v1  ;;  %v6525_v63 = vcombine.high %v480_v52, %v484_v55  ;;  %v6517_v11 = vcombine.high %v472_v3, %v476_v4 }
 0x1a6   :  { %3363 = vmatpush1.bf16.msra.mxu1 %v6612_v17 }
 0x1a7   :  { %3364 = vmatprep.subr.bf16.mxu1 %v6605_v20 }
 0x1a8   :  { %3324 = vmatpush1.bf16.msra.mxu0 %v6476_v26  ;;  %v6239_v26 = vcombine.high %v193_v14, %v197_v15 }
 0x1a9   :  { %3325 = vmatprep.subr.bf16.mxu0 %v6469_v27  ;;  %v508_v27 = vld [vmem:[#allocation5 + $0xb30] sm:$0xff] }
 0x1aa   :  { %3365 = vmatpush1.bf16.msra.mxu1 %v6604_v53  ;;  %v504_v53 = vld [vmem:[#allocation5 + $0xb10] sm:$0xff] }
 0x1ab   :  { %3366 = vmatprep.subr.bf16.mxu1 %v6597_v54  ;;  %v189_v54 = vld [vmem:[#allocation5 + $0x138] sm:$0xff]  ;;  %v6549_v33 = vcombine.high %v504_v53, %v508_v27 }
 0x1ac   :  { %3326 = vmatpush1.bf16.msra.mxu0 %v6468_v34  ;;  %v496_v34 = vld [vmem:[#allocation5 + $0xad0] sm:$0xff] }
 0x1ad   :  { %3327 = vmatprep.subr.bf16.mxu0 %v6461_v38  ;;  %v177_v38 = vld [vmem:[#allocation5 + $0xd8] sm:$0xff] }
 0x1ae   :  { %3367 = vmatpush1.bf16.msra.mxu1 %v6596_v37  ;;  %v500_v37 = vld [vmem:[#allocation5 + $0xaf0] sm:$0xff] }
 0x1af   :  { %3368 = vmatprep.subr.bf16.mxu1 %v6589_v39  ;;  %v181_v39 = vld [vmem:[#allocation5 + $0xf8] sm:$0xff] }
 0x1b0   :  { %3328 = vmatpush1.bf16.msra.mxu0 %v6460_v45  ;;  %v6223_v42 = vcombine.high %v177_v38, %v181_v39  ;;  %v169_v45 = vld [vmem:[#allocation5 + $0x98] sm:$0xff] }
 0x1b1   :  { %3329 = vmatprep.subr.bf16.mxu0 %v6453_v46  ;;  %v6540_v46 = vcombine.low %v496_v34, %v500_v37 }
 0x1b2   :  { %3369 = vmatpush1.bf16.msra.mxu1 %v6588_v21  ;;  %v173_v21 = vld [vmem:[#allocation5 + $0xb8] sm:$0xff] }
 0x1b3   :  { %3370 = vmatprep.subr.bf16.mxu1 %v6581_v47  ;;  %v6222_v47 = vcombine.low %v177_v38, %v181_v39  ;;  %v6215_v49 = vcombine.high %v169_v45, %v173_v21 }
 0x1b4   :  { %3330 = vmatpush1.bf16.msra.mxu0 %v6452_v56  ;;  %v161_v56 = vld [vmem:[#allocation5 + $0x58] sm:$0xff] }
 0x1b5   :  { %3331 = vmatprep.subr.bf16.mxu0 %v6573_v61  ;;  %v6532_v61 = vcombine.low %v488_v43, %v492_v44  ;;  %v249_v43 = vld [vmem:[#allocation5 + $0x318] sm:$0xff] }
 0x1b6   :  { %3371 = vmatpush1.bf16.msra.mxu1 %v6580_v60  ;;  %v165_v60 = vld [vmem:[#allocation5 + $0x78] sm:$0xff] }
 0x1b7   :  { %3397 = vmatprep.subr.bf16.mxu1 %v6255_v62  ;;  %v3021_v13 = vpop.f32.mrf.mxu0  ;;  %v6214_v62 = vcombine.low %v169_v45, %v173_v21  ;;  %v6207_v1 = vcombine.high %v161_v56, %v165_v60  ;;  %v253_v44 = vld [vmem:[#allocation5 + $0x338] sm:$0xff] }
 0x1b8   :  { %v3022_v17 = vadd.f32 %v3021_v13, %v7899_v30  ;;  %3332 = vmatpush2.bf16.msra.mxu0 %v6572_v7  ;;  %v153_v7 = vld [vmem:[#allocation5 + $0x18] sm:$0xff] }
 0x1b9   :  { %3389 = vmatmul.mubr.bf16.vlgmr.msra.gmra.mxu1 %v7879_v5  ;;  %v3023_v20 = vpop.f32.mrf.mxu0  ;;  %3333 = vmatprep.subr.bf16.mxu0 %v6565_v9  ;;  %v185_v5 = vld [vmem:[#allocation5 + $0x118] sm:$0xff]  ;;  %v6524_v9 = vcombine.low %v480_v52, %v484_v55 }
 0x1ba   :  { %3398 = vmatpush1.bf16.msra.mxu1 %v6254_v8  ;;  %v7914_v24 = vadd.f32 %v7904_v50, %v3022_v17  ;;  %v3024_v25 = vadd.f32 %v3023_v20, %v7901_v41  ;;  %3429 = vmatprep.mubr.bf16.mxu1 %v7842_v58  ;;  %v6238_v50 = vcombine.low %v193_v14, %v197_v15  ;;  %v157_v8 = vld [vmem:[#allocation5 + $0x38] sm:$0xff] }
 0x1bb   :  { %3399 = vmatprep.subr.bf16.mxu1 %v6247_v10  ;;  %v3025_v30 = vpop.f32.mrf.mxu0  ;;  %v6231_v41 = vcombine.high %v185_v5, %v189_v54  ;;  %v6548_v58 = vcombine.low %v504_v53, %v508_v27  ;;  %v6230_v40 = vcombine.low %v185_v5, %v189_v54  ;;  %v6206_v10 = vcombine.low %v161_v56, %v165_v60  ;;  %v337_v13 = vld [vmem:[#allocation5 + $0x5d8] sm:$0xff] }
 0x1bc   :  { %v7919_v29 = vadd.f32 %v7907_v57, %v3024_v25  ;;  %3334 = vmatpush2.bf16.msra.mxu0 %v6564_v18  ;;  %v6541_v57 = vcombine.high %v496_v34, %v500_v37  ;;  %v6199_v12 = vcombine.high %v153_v7, %v157_v8  ;;  %v341_v14 = vld [vmem:[#allocation5 + $0x5f8] sm:$0xff]  ;;  %v6516_v18 = vcombine.low %v472_v3, %v476_v4 }
 0x1bd   :  { %v3026_v32 = vpop.f32.mrf.mxu0  ;;  %3335 = vmatprep.subr.bf16.mxu0 %v6557_v23  ;;  %v273_v15 = vld [vmem:[#allocation5 + $0x3d8] sm:$0xff]  ;;  %v6198_v20 = vcombine.low %v153_v7, %v157_v8  ;;  %v6382_v30 = vcombine.low %v337_v13, %v341_v14  ;;  %vm3561_vm2 = vcmp.gt.f32.partialorder %v7914_v24, 0.0 }
 0x1be   :  { %3400 = vmatpush1.bf16.msra.mxu1 %v6246_v22  ;;  %v277_v17 = vld [vmem:[#allocation5 + $0x3f8] sm:$0xff]  ;;  %v6383_v22 = vcombine.high %v337_v13, %v341_v14  ;;  %vm3562_vm0 = vcmp.gt.f32.partialorder %v7919_v29, 0.0 }
 0x1bf   :  { %3401 = vmatprep.subr.bf16.mxu1 %v6239_v26  ;;  %v6319_v23 = vcombine.high %v273_v15, %v277_v17  ;;  %v329_v25 = vld [vmem:[#allocation5 + $0x598] sm:$0xff]  ;;  %v6318_v5 = vcombine.low %v273_v15, %v277_v17 }
 0x1c0   :  { %3336 = vmatpush2.bf16.msra.mxu0 %v6556_v31  ;;  %v333_v26 = vld [vmem:[#allocation5 + $0x5b8] sm:$0xff] }
 0x1c1   :  { %3337 = vmatprep.subr.bf16.mxu0 %v6549_v33  ;;  %v265_v53 = vld [vmem:[#allocation5 + $0x398] sm:$0xff]  ;;  %v6375_v54 = vcombine.high %v329_v25, %v333_v26  ;;  %v6374_v37 = vcombine.low %v329_v25, %v333_v26 }
 0x1c2   :  { %3402 = vmatpush1.bf16.msra.mxu1 %v6238_v50  ;;  %v269_v27 = vld [vmem:[#allocation5 + $0x3b8] sm:$0xff] }
 0x1c3   :  { %3403 = vmatprep.subr.bf16.mxu1 %v6231_v41  ;;  %v6311_v31 = vcombine.high %v265_v53, %v269_v27  ;;  %v321_v32 = vld [vmem:[#allocation5 + $0x558] sm:$0xff]  ;;  %v6310_v38 = vcombine.low %v265_v53, %v269_v27 }
 0x1c4   :  { %3338 = vmatpush2.bf16.msra.mxu0 %v6548_v58  ;;  %v325_v50 = vld [vmem:[#allocation5 + $0x578] sm:$0xff] }
 0x1c5   :  { %3339 = vmatprep.subr.bf16.mxu0 %v6541_v57  ;;  %v257_v33 = vld [vmem:[#allocation5 + $0x358] sm:$0xff]  ;;  %v6367_v39 = vcombine.high %v321_v32, %v325_v50  ;;  %v6366_v21 = vcombine.low %v321_v32, %v325_v50 }
 0x1c6   :  { %3404 = vmatpush1.bf16.msra.mxu1 %v6230_v40  ;;  %v261_v41 = vld [vmem:[#allocation5 + $0x378] sm:$0xff] }
 0x1c7   :  { %3405 = vmatprep.subr.bf16.mxu1 %v6223_v42  ;;  %v6303_v40 = vcombine.high %v257_v33, %v261_v41  ;;  %v313_v57 = vld [vmem:[#allocation5 + $0x518] sm:$0xff] }
 0x1c8   :  { %3340 = vmatpush2.bf16.msra.mxu0 %v6540_v46  ;;  %v317_v42 = vld [vmem:[#allocation5 + $0x538] sm:$0xff]  ;;  %v6302_v46 = vcombine.low %v257_v33, %v261_v41 }
 0x1c9   :  { %3341 = vmatprep.subr.bf16.mxu0 %v6533_v48  ;;  %v6295_v48 = vcombine.high %v249_v43, %v253_v44  ;;  %v309_v52 = vld [vmem:[#allocation5 + $0x4f8] sm:$0xff]  ;;  %v6358_v60 = vcombine.low %v313_v57, %v317_v42 }
 0x1ca   :  { %3406 = vmatpush1.bf16.msra.mxu1 %v6222_v47  ;;  %v6359_v47 = vcombine.high %v313_v57, %v317_v42  ;;  %v241_v55 = vld [vmem:[#allocation5 + $0x2d8] sm:$0xff] }
 0x1cb   :  { %3407 = vmatprep.subr.bf16.mxu1 %v6215_v49  ;;  %v305_v49 = vld [vmem:[#allocation5 + $0x4d8] sm:$0xff] }
 0x1cc   :  { %3342 = vmatpush2.bf16.msra.mxu0 %v6532_v61  ;;  %v245_v56 = vld [vmem:[#allocation5 + $0x2f8] sm:$0xff]  ;;  %v6294_v61 = vcombine.low %v249_v43, %v253_v44  ;;  %v6350_v8 = vcombine.low %v305_v49, %v309_v52 }
 0x1cd   :  { %3343 = vmatprep.subr.bf16.mxu0 %v6525_v63  ;;  %v6287_v63 = vcombine.high %v241_v55, %v245_v56  ;;  %v301_v3 = vld [vmem:[#allocation5 + $0x4b8] sm:$0xff] }
 0x1ce   :  { %3408 = vmatpush1.bf16.msra.mxu1 %v6214_v62  ;;  %v6351_v62 = vcombine.high %v305_v49, %v309_v52  ;;  %v233_v4 = vld [vmem:[#allocation5 + $0x298] sm:$0xff] }
 0x1cf   :  { %3409 = vmatprep.subr.bf16.mxu1 %v6207_v1  ;;  %v297_v1 = vld [vmem:[#allocation5 + $0x498] sm:$0xff] }
 0x1d0   :  { %3344 = vmatpush2.bf16.msra.mxu0 %v6524_v9  ;;  %v237_v7 = vld [vmem:[#allocation5 + $0x2b8] sm:$0xff]  ;;  %v6286_v9 = vcombine.low %v241_v55, %v245_v56  ;;  %v6342_v17 = vcombine.low %v297_v1, %v301_v3 }
 0x1d1   :  { %3345 = vmatprep.subr.bf16.mxu0 %v6517_v11  ;;  %v6279_v11 = vcombine.high %v233_v4, %v237_v7  ;;  %v293_v13 = vld [vmem:[#allocation5 + $0x478] sm:$0xff] }
 0x1d2   :  { %3410 = vmatpush1.bf16.msra.mxu1 %v6206_v10  ;;  %v6343_v10 = vcombine.high %v297_v1, %v301_v3  ;;  %v225_v14 = vld [vmem:[#allocation5 + $0x258] sm:$0xff] }
 0x1d3   :  { %3411 = vmatprep.subr.bf16.mxu1 %v6199_v12  ;;  %v289_v12 = vld [vmem:[#allocation5 + $0x458] sm:$0xff] }
 0x1d4   :  { %3346 = vmatpush2.bf16.msra.mxu0 %v6516_v18  ;;  %v229_v15 = vld [vmem:[#allocation5 + $0x278] sm:$0xff]  ;;  %v6278_v18 = vcombine.low %v233_v4, %v237_v7  ;;  %v6334_v27 = vcombine.low %v289_v12, %v293_v13 }
 0x1d5   :  { %3438 = vmatprep.subr.bf16.mxu0 %v6383_v22  ;;  %v6271_v22 = vcombine.high %v225_v14, %v229_v15  ;;  %v285_v25 = vld [vmem:[#allocation5 + $0x438] sm:$0xff] }
 0x1d6   :  { %3412 = vmatpush1.bf16.msra.mxu1 %v6198_v20  ;;  %v6335_v20 = vcombine.high %v289_v12, %v293_v13  ;;  %v217_v26 = vld [vmem:[#allocation5 + $0x218] sm:$0xff] }
 0x1d7   :  { %3413 = vmatprep.subr.bf16.mxu1 %v6319_v23  ;;  %3348 = vmatmul.mubr.bf16.vlgmr.msra.gmra.mxu0 %v7871_v35  ;;  %v281_v23 = vld [vmem:[#allocation5 + $0x418] sm:$0xff] }
 0x1d8   :  { %3439 = vmatpush1.bf16.msra.mxu0 %v6382_v30  ;;  %3470 = vmatprep.mubr.bf16.mxu0 %v7846_v59  ;;  %v221_v53 = vld [vmem:[#allocation5 + $0x238] sm:$0xff]  ;;  %v6270_v30 = vcombine.low %v225_v14, %v229_v15 }
 0x1d9   :  { %v7922_v34 = vpop.f32.mrf.mxu1  ;;  %3440 = vmatprep.subr.bf16.mxu0 %v6375_v54  ;;  %v610_v54 = vsub.s32 2, %v7885_v51  ;;  %v401_v32 = vld [vmem:[#allocation5 + $0x7d8] sm:$0xff] }
 0x1da   :  { %3414 = vmatpush2.bf16.msra.mxu1 %v6318_v5  ;;  %v6327_v5 = vcombine.high %v281_v23, %v285_v25  ;;  %v405_v50 = vld [vmem:[#allocation5 + $0x7f8] sm:$0xff] }
 0x1db   :  { %v7925_v58 = vpop.f32.mrf.mxu1  ;;  %3415 = vmatprep.subr.bf16.mxu1 %v6311_v31  ;;  %v6263_v31 = vcombine.high %v217_v26, %v221_v53  ;;  %v465_v33 = vld [vmem:[#allocation5 + $0x9d8] sm:$0xff] }
 0x1dc   :  { %3441 = vmatpush1.bf16.msra.mxu0 %v6374_v37  ;;  %v469_v41 = vld [vmem:[#allocation5 + $0x9f8] sm:$0xff]  ;;  %v6326_v37 = vcombine.low %v281_v23, %v285_v25 }
 0x1dd   :  { %v3107_v45 = vpop.f32.mrf.mxu1  ;;  %3442 = vmatprep.subr.bf16.mxu0 %v6367_v39  ;;  %v6447_v39 = vcombine.high %v401_v32, %v405_v50  ;;  %v6511_v57 = vcombine.high %v465_v33, %v469_v41  ;;  %v393_v42 = vld [vmem:[#allocation5 + $0x798] sm:$0xff] }
 0x1de   :  { %3416 = vmatpush2.bf16.msra.mxu1 %v6310_v38  ;;  %v6262_v38 = vcombine.low %v217_v26, %v221_v53  ;;  %v397_v43 = vld [vmem:[#allocation5 + $0x7b8] sm:$0xff] }
 0x1df   :  { %v3108_v59 = vpop.f32.mrf.mxu1  ;;  %3417 = vmatprep.subr.bf16.mxu1 %v6303_v40  ;;  %v611_v40 = vrot.slane %v7890_v2, %v610_v54  ;;  %v457_v44 = vld [vmem:[#allocation5 + $0x998] sm:$0xff] }
 0x1e0   :  { %3443 = vmatpush1.bf16.msra.mxu0 %v6366_v21  ;;  %v461_v45 = vld [vmem:[#allocation5 + $0x9b8] sm:$0xff]  ;;  %v6446_v21 = vcombine.low %v401_v32, %v405_v50 }
 0x1e1   :  { %3444 = vmatprep.subr.bf16.mxu0 %v6359_v47  ;;  %v6439_v47 = vcombine.high %v393_v42, %v397_v43  ;;  %v3104_v59 = vadd.f32 %v7922_v34, %v611_v40  ;;  %v385_v49 = vld [vmem:[#allocation5 + $0x758] sm:$0xff] }
 0x1e2   :  { %3418 = vmatpush2.bf16.msra.mxu1 %v6302_v46  ;;  %v6510_v46 = vcombine.low %v465_v33, %v469_v41  ;;  %v389_v52 = vld [vmem:[#allocation5 + $0x778] sm:$0xff] }
 0x1e3   :  { %3419 = vmatprep.subr.bf16.mxu1 %v6295_v48  ;;  %v6503_v48 = vcombine.high %v457_v44, %v461_v45  ;;  %v449_v2 = vld [vmem:[#allocation5 + $0x958] sm:$0xff]  ;;  %v6431_v1 = vcombine.high %v385_v49, %v389_v52 }
 0x1e4   :  { %3445 = vmatpush1.bf16.msra.mxu0 %v6358_v60  ;;  %v453_v56 = vld [vmem:[#allocation5 + $0x978] sm:$0xff] }
 0x1e5   :  { %3446 = vmatprep.subr.bf16.mxu0 %v6351_v62  ;;  %v6495_v34 = vcombine.high %v449_v2, %v453_v56  ;;  %v377_v3 = vld [vmem:[#allocation5 + $0x718] sm:$0xff] }
 0x1e6   :  { %3420 = vmatpush2.bf16.msra.mxu1 %v6294_v61  ;;  %v6438_v61 = vcombine.low %v393_v42, %v397_v43  ;;  %v381_v4 = vld [vmem:[#allocation5 + $0x738] sm:$0xff] }
 0x1e7   :  { %3421 = vmatprep.subr.bf16.mxu1 %v6287_v63  ;;  %v6502_v63 = vcombine.low %v457_v44, %v461_v45  ;;  %v6423_v12 = vcombine.high %v377_v3, %v381_v4  ;;  %v369_v14 = vld [vmem:[#allocation5 + $0x6d8] sm:$0xff] }
 0x1e8   :  { %3447 = vmatpush1.bf16.msra.mxu0 %v6350_v8  ;;  %v441_v8 = vld [vmem:[#allocation5 + $0x918] sm:$0xff] }
 0x1e9   :  { %3448 = vmatprep.subr.bf16.mxu0 %v6343_v10  ;;  %v6430_v10 = vcombine.low %v385_v49, %v389_v52  ;;  %v373_v15 = vld [vmem:[#allocation5 + $0x6f8] sm:$0xff] }
 0x1ea   :  { %3422 = vmatpush2.bf16.msra.mxu1 %v6286_v9  ;;  %v445_v9 = vld [vmem:[#allocation5 + $0x938] sm:$0xff] }
 0x1eb   :  { %3423 = vmatprep.subr.bf16.mxu1 %v6279_v11  ;;  %v6494_v11 = vcombine.low %v449_v2, %v453_v56  ;;  %v6487_v13 = vcombine.high %v441_v8, %v445_v9  ;;  %v361_v25 = vld [vmem:[#allocation5 + $0x698] sm:$0xff] }
 0x1ec   :  { %3449 = vmatpush1.bf16.msra.mxu0 %v6342_v17  ;;  %v433_v17 = vld [vmem:[#allocation5 + $0x8d8] sm:$0xff] }
 0x1ed   :  { %3450 = vmatprep.subr.bf16.mxu0 %v6335_v20  ;;  %v6422_v20 = vcombine.low %v377_v3, %v381_v4  ;;  %v365_v26 = vld [vmem:[#allocation5 + $0x6b8] sm:$0xff] }
 0x1ee   :  { %3424 = vmatpush2.bf16.msra.mxu1 %v6278_v18  ;;  %v437_v18 = vld [vmem:[#allocation5 + $0x8f8] sm:$0xff] }
 0x1ef   :  { %3425 = vmatprep.subr.bf16.mxu1 %v6271_v22  ;;  %v6415_v22 = vcombine.high %v369_v14, %v373_v15  ;;  %v6479_v23 = vcombine.high %v433_v17, %v437_v18  ;;  %v425_v53 = vld [vmem:[#allocation5 + $0x898] sm:$0xff] }
 0x1f0   :  { %3451 = vmatpush1.bf16.msra.mxu0 %v6334_v27  ;;  %v429_v27 = vld [vmem:[#allocation5 + $0x8b8] sm:$0xff] }
 0x1f1   :  { %3452 = vmatprep.subr.bf16.mxu0 %v6327_v5  ;;  %v6478_v5 = vcombine.low %v433_v17, %v437_v18  ;;  %v6471_v32 = vcombine.high %v425_v53, %v429_v27  ;;  %v353_v50 = vld [vmem:[#allocation5 + $0x658] sm:$0xff] }
 0x1f2   :  { %3426 = vmatpush2.bf16.msra.mxu1 %v6270_v30  ;;  %v6414_v30 = vcombine.low %v369_v14, %v373_v15  ;;  %v357_v33 = vld [vmem:[#allocation5 + $0x678] sm:$0xff] }
 0x1f3   :  { %3427 = vmatprep.subr.bf16.mxu1 %v6263_v31  ;;  %v6407_v31 = vcombine.high %v361_v25, %v365_v26  ;;  %v417_v41 = vld [vmem:[#allocation5 + $0x858] sm:$0xff]  ;;  %v6399_v40 = vcombine.high %v353_v50, %v357_v33 }
 0x1f4   :  { %3453 = vmatpush1.bf16.msra.mxu0 %v6326_v37  ;;  %v421_v37 = vld [vmem:[#allocation5 + $0x878] sm:$0xff] }
 0x1f5   :  { %3454 = vmatprep.subr.bf16.mxu0 %v6447_v39  ;;  %v6470_v39 = vcombine.low %v425_v53, %v429_v27  ;;  %v345_v42 = vld [vmem:[#allocation5 + $0x618] sm:$0xff] }
 0x1f6   :  { %3428 = vmatpush2.bf16.msra.mxu1 %v6262_v38  ;;  %v6406_v38 = vcombine.low %v361_v25, %v365_v26  ;;  %v349_v43 = vld [vmem:[#allocation5 + $0x638] sm:$0xff] }
 0x1f7   :  { %3479 = vmatprep.subr.bf16.mxu1 %v6511_v57  ;;  %v3144_v55 = vpop.f32.mrf.mxu0  ;;  %v6463_v57 = vcombine.high %v417_v41, %v421_v37  ;;  %v409_v44 = vld [vmem:[#allocation5 + $0x818] sm:$0xff]  ;;  %v6390_v2 = vcombine.low %v345_v42, %v349_v43 }
 0x1f8   :  { %v7932_v60 = vadd.f32 %v3144_v55, %v3104_v59  ;;  %3455 = vmatpush2.bf16.msra.mxu0 %v6446_v21  ;;  %v413_v45 = vld [vmem:[#allocation5 + $0x838] sm:$0xff]  ;;  %v6398_v21 = vcombine.low %v353_v50, %v357_v33 }
 0x1f9   :  { %3430 = vmatmul.mubr.bf16.vlgmr.msra.gmra.mxu1 %v7852_v16  ;;  %v7935_v62 = vpop.f32.mrf.mxu0  ;;  %3456 = vmatprep.subr.bf16.mxu0 %v6439_v47  ;;  %v6391_v47 = vcombine.high %v345_v42, %v349_v43  ;;  %v6455_v59 = vcombine.high %v409_v44, %v413_v45  ;;  %v597_v49 = vld [vmem:[#allocation5 + $0xdf8] sm:$0xff]  ;;  %v6454_v56 = vcombine.low %v409_v44, %v413_v45  ;;  %v7946_v43 = vld [vmem:[#allocation7] sm:$0xff] }
 0x1fa   :  { %3480 = vmatpush1.bf16.msra.mxu1 %v6510_v46  ;;  %3511 = vmatprep.mubr.bf16.mxu1 %v7863_v28  ;;  %v6486_v28 = vcombine.low %v441_v8, %v445_v9  ;;  %v6462_v46 = vcombine.low %v417_v41, %v421_v37  ;;  %v529_v52 = vld [vmem:[#allocation5 + $0xbd8] sm:$0xff] }
 0x1fb   :  { %3481 = vmatprep.subr.bf16.mxu1 %v6503_v48  ;;  %v3148_v7 = vpop.f32.mrf.mxu0  ;;  %v593_v48 = vld [vmem:[#allocation5 + $0xdd8] sm:$0xff] }
 0x1fc   :  { %3457 = vmatpush2.bf16.msra.mxu0 %v6438_v61  ;;  %v533_v55 = vld [vmem:[#allocation5 + $0xbf8] sm:$0xff]  ;;  %v6639_v61 = vcombine.high %v593_v48, %v597_v49  ;;  %v6638_v7 = vcombine.low %v593_v48, %v597_v49 }
 0x1fd   :  { %v3149_v16 = vpop.f32.mrf.mxu0  ;;  %3458 = vmatprep.subr.bf16.mxu0 %v6431_v1  ;;  %v585_v1 = vld [vmem:[#allocation5 + $0xd98] sm:$0xff]  ;;  %v6574_v8 = vcombine.low %v529_v52, %v533_v55 }
 0x1fe   :  { %3482 = vmatpush1.bf16.msra.mxu1 %v6502_v63  ;;  %v6575_v63 = vcombine.high %v529_v52, %v533_v55  ;;  %v521_v3 = vld [vmem:[#allocation5 + $0xb98] sm:$0xff] }
 0x1ff   :  { %3483 = vmatprep.subr.bf16.mxu1 %v6495_v34  ;;  %v589_v34 = vld [vmem:[#allocation5 + $0xdb8] sm:$0xff] }
 0x200   :  { %3459 = vmatpush2.bf16.msra.mxu0 %v6430_v10  ;;  %v525_v4 = vld [vmem:[#allocation5 + $0xbb8] sm:$0xff]  ;;  %v6631_v9 = vcombine.high %v585_v1, %v589_v34  ;;  %v6630_v17 = vcombine.low %v585_v1, %v589_v34 }
 0x201   :  { %3460 = vmatprep.subr.bf16.mxu0 %v6423_v12  ;;  %v6567_v10 = vcombine.high %v521_v3, %v525_v4  ;;  %v577_v16 = vld [vmem:[#allocation5 + $0xd58] sm:$0xff] }
 0x202   :  { %3484 = vmatpush1.bf16.msra.mxu1 %v6494_v11  ;;  %v581_v11 = vld [vmem:[#allocation5 + $0xd78] sm:$0xff] }
 0x203   :  { %3485 = vmatprep.subr.bf16.mxu1 %v6487_v13  ;;  %v513_v13 = vld [vmem:[#allocation5 + $0xb58] sm:$0xff] }
 0x204   :  { %3461 = vmatpush2.bf16.msra.mxu0 %v6422_v20  ;;  %v517_v14 = vld [vmem:[#allocation5 + $0xb78] sm:$0xff] }
 0x205   :  { %3462 = vmatprep.subr.bf16.mxu0 %v6415_v22  ;;  %v6623_v22 = vcombine.high %v577_v16, %v581_v11  ;;  %v6559_v25 = vcombine.high %v513_v13, %v517_v14  ;;  %v569_v26 = vld [vmem:[#allocation5 + $0xd18] sm:$0xff]  ;;  %v6558_v50 = vcombine.low %v513_v13, %v517_v14 }
 0x206   :  { %3486 = vmatpush1.bf16.msra.mxu1 %v6486_v28  ;;  %v6566_v28 = vcombine.low %v521_v3, %v525_v4  ;;  %v489_v48 = vld [vmem:[#allocation5 + $0xa98] sm:$0xff] }
 0x207   :  { %3487 = vmatprep.subr.bf16.mxu1 %v6479_v23  ;;  %v493_v49 = vld [vmem:[#allocation5 + $0xab8] sm:$0xff] }
 0x208   :  { %3463 = vmatpush2.bf16.msra.mxu0 %v6414_v30  ;;  %v505_v30 = vld [vmem:[#allocation5 + $0xb18] sm:$0xff] }
 0x209   :  { %3464 = vmatprep.subr.bf16.mxu0 %v6407_v31  ;;  %v549_v1 = vld [vmem:[#allocation5 + $0xc78] sm:$0xff] }
 0x20a   :  { %3488 = vmatpush1.bf16.msra.mxu1 %v6478_v5  ;;  %v509_v5 = vld [vmem:[#allocation5 + $0xb38] sm:$0xff] }
 0x20b   :  { %3489 = vmatprep.subr.bf16.mxu1 %v6471_v32  ;;  %v6551_v37 = vcombine.high %v505_v30, %v509_v5  ;;  %v6550_v45 = vcombine.low %v505_v30, %v509_v5  ;;  %v481_v3 = vld [vmem:[#allocation5 + $0xa58] sm:$0xff] }
 0x20c   :  { %3465 = vmatpush2.bf16.msra.mxu0 %v6406_v38  ;;  %v561_v38 = vld [vmem:[#allocation5 + $0xcd8] sm:$0xff] }
 0x20d   :  { %3466 = vmatprep.subr.bf16.mxu0 %v6399_v40  ;;  %v497_v40 = vld [vmem:[#allocation5 + $0xad8] sm:$0xff] }
 0x20e   :  { %3490 = vmatpush1.bf16.msra.mxu1 %v6470_v39  ;;  %v565_v39 = vld [vmem:[#allocation5 + $0xcf8] sm:$0xff] }
 0x20f   :  { %3491 = vmatprep.subr.bf16.mxu1 %v6463_v57  ;;  %v501_v57 = vld [vmem:[#allocation5 + $0xaf8] sm:$0xff]  ;;  %v6606_v52 = vcombine.low %v561_v38, %v565_v39 }
 0x210   :  { %3467 = vmatpush2.bf16.msra.mxu0 %v6398_v21  ;;  %v6607_v21 = vcombine.high %v561_v38, %v565_v39  ;;  %v485_v4 = vld [vmem:[#allocation5 + $0xa78] sm:$0xff] }
 0x211   :  { %3468 = vmatprep.subr.bf16.mxu0 %v6391_v47  ;;  %v553_v47 = vld [vmem:[#allocation5 + $0xc98] sm:$0xff] }
 0x212   :  { %3492 = vmatpush1.bf16.msra.mxu1 %v6462_v46  ;;  %v6543_v46 = vcombine.high %v497_v40, %v501_v57  ;;  %v477_v13 = vld [vmem:[#allocation5 + $0xa38] sm:$0xff] }
 0x213   :  { %3493 = vmatprep.subr.bf16.mxu1 %v6455_v59  ;;  %v557_v59 = vld [vmem:[#allocation5 + $0xcb8] sm:$0xff] }
 0x214   :  { %3469 = vmatpush2.bf16.msra.mxu0 %v6390_v2  ;;  %v6542_v2 = vcombine.low %v497_v40, %v501_v57  ;;  %v7028_v30 = vld [vmem:[#allocation8 + $0x2e0] ss:$16 sps:$4 sm:$0xff]   ;;  %v7042_v38 = vld [vmem:[#allocation8 + $0x2a4] ss:$16 sps:$4 sm:$0xff]  }
 0x215   :  { %3520 = vmatprep.subr.bf16.mxu0 %v6639_v61  ;;  %v6535_v61 = vcombine.high %v489_v48, %v493_v49  ;;  %v7037_v39 = vld [vmem:[#allocation8 + $0xa0] ss:$16 sps:$4 sm:$0xff]   ;;  %v7048_v57 = vld [vmem:[#allocation8 + $0x284] ss:$16 sps:$4 sm:$0xff]  }
 0x216   :  { %3494 = vmatpush1.bf16.msra.mxu1 %v6454_v56  ;;  %v6599_v56 = vcombine.high %v553_v47, %v557_v59  ;;  %v7040_v40 = vld [vmem:[#allocation8 + $0x2a0] ss:$16 sps:$4 sm:$0xff]  }
 0x217   :  { %3495 = vmatprep.subr.bf16.mxu1 %v6575_v63  ;;  %v3226_v12 = vpop.f32.mrf.mxu0  ;;  %3471 = vmatmul.mubr.bf16.vlgmr.msra.gmra.mxu0 %v7856_v19  ;;  %v573_v19 = vld [vmem:[#allocation5 + $0xd38] sm:$0xff] }
 0x218   :  { %3521 = vmatpush1.bf16.msra.mxu0 %v6638_v7  ;;  %3552 = vmatprep.mubr.bf16.mxu0 %v7757_v36  ;;  %v6622_v36 = vcombine.low %v577_v16, %v581_v11  ;;  %v6615_v33 = vcombine.high %v569_v26, %v573_v19  ;;  %v6614_v42 = vcombine.low %v569_v26, %v573_v19  ;;  %v545_v63 = vld [vmem:[#allocation5 + $0xc58] sm:$0xff] }
 0x219   :  { %v3185_v15 = vpop.f32.mrf.mxu1  ;;  %v7941_v20 = vpop.f32.mrf.mxu0  ;;  %3522 = vmatprep.subr.bf16.mxu0 %v6631_v9  ;;  %v6598_v7 = vcombine.low %v553_v47, %v557_v59  ;;  %v6534_v9 = vcombine.low %v489_v48, %v493_v49  ;;  %v537_v16 = vld [vmem:[#allocation5 + $0xc18] sm:$0xff]  ;;  %v6590_v14 = vcombine.low %v545_v63, %v549_v1 }
 0x21a   :  { %v3186_v18 = vadd.f32 %v3185_v15, %v7932_v60  ;;  %3496 = vmatpush2.bf16.msra.mxu1 %v6574_v8  ;;  %v614_v60 = vsub.s32 3, %v7885_v51  ;;  %v541_v11 = vld [vmem:[#allocation5 + $0xc38] sm:$0xff] }
 0x21b   :  { %v3187_v23 = vpop.f32.mrf.mxu1  ;;  %3497 = vmatprep.subr.bf16.mxu1 %v6567_v10  ;;  %v3230_v27 = vpop.f32.mrf.mxu0  ;;  %v6591_v10 = vcombine.high %v545_v63, %v549_v1  ;;  %v7027_v26 = vld [vmem:[#allocation8 + $0xe4] ss:$16 sps:$4 sm:$0xff]   ;;  %v7025_v19 = vld [vmem:[#allocation8 + $0xe0] ss:$16 sps:$4 sm:$0xff]  }
 0x21c   :  { %v7943_v53 = vadd.f32 %v3226_v12, %v3186_v18  ;;  %3523 = vmatpush1.bf16.msra.mxu0 %v6630_v17  ;;  %v615_v44 = vrot.slane %v7946_v43, %v614_v60  ;;  %v473_v12 = vld [vmem:[#allocation5 + $0xa18] sm:$0xff]  ;;  %v6583_v17 = vcombine.high %v537_v16, %v541_v11 }
 0x21d   :  { %v3189_v31 = vpop.f32.mrf.mxu1  ;;  %v3231_v32 = vpop.f32.mrf.mxu0  ;;  %3524 = vmatprep.subr.bf16.mxu0 %v6623_v22  ;;  %v6519_v18 = vcombine.high %v473_v12, %v477_v13  ;;  %v6582_v22 = vcombine.low %v537_v16, %v541_v11  ;;  %v7052_v47 = vld [vmem:[#allocation8 + $0x260] ss:$16 sps:$4 sm:$0xff]   ;;  %v7057_v59 = vld [vmem:[#allocation8 + $0x44] ss:$16 sps:$4 sm:$0xff]  }
 0x21e   :  { %3498 = vmatpush2.bf16.msra.mxu1 %v6566_v28  ;;  %v3106_v55 = vadd.f32 %v7925_v58, %v615_v44  ;;  %v6527_v58 = vcombine.high %v481_v3, %v485_v4  ;;  %v3570_v28 = vmul.f32 0.2, %v7919_v29  ;;  %v7033_v31 = vld [vmem:[#allocation8 + $0xc4] ss:$16 sps:$4 sm:$0xff]   ;;  %v7046_v44 = vld [vmem:[#allocation8 + $0x280] ss:$16 sps:$4 sm:$0xff]  }
 0x21f   :  { %v3190_v41 = vpop.f32.mrf.mxu1  ;;  %3499 = vmatprep.subr.bf16.mxu1 %v6559_v25  ;;  %v6518_v25 = vcombine.low %v473_v12, %v477_v13  ;;  %v7060_v48 = vld [vmem:[#allocation8 + $0x244] ss:$16 sps:$4 sm:$0xff]   ;;  %v7055_v49 = vld [vmem:[#allocation8 + $0x40] ss:$16 sps:$4 sm:$0xff]   ;;  %vm3563_vm3 = vcmp.gt.f32.partialorder %v7943_v53, 0.0 }
 0x220   :  { %3525 = vmatpush1.bf16.msra.mxu0 %v6622_v36  ;;  %v3147_v34 = vadd.f32 %v7935_v62, %v3106_v55  ;;  %v6526_v62 = vcombine.low %v481_v3, %v485_v4  ;;  %v3578_v27 = vsel %vm3562_vm0, %v7919_v29, %v3570_v28  ;;  %v7527_v36 = vld [vmem:[#allocation2 + $0x18] ss:$0 sps:$4 sm:$0xff]   ;;  %v7031_v41 = vld [vmem:[#allocation8 + $0xc0] ss:$16 sps:$4 sm:$0xff]   ;;  %v618_v3 = vsub.s32 4, %v7885_v51 }
 0x221   :  { %3526 = vmatprep.subr.bf16.mxu0 %v6615_v33  ;;  %v7957_v32 = vpack.c.bf16 %v3578_v27, %v3578_v27  ;;  %v7034_v29 = vld [vmem:[#allocation8 + $0x2c0] ss:$16 sps:$4 sm:$0xff]   ;;  %v7063_v55 = vld [vmem:[#allocation8 + $0x24] ss:$16 sps:$4 sm:$0xff]  }
 0x222   :  { %3500 = vmatpush2.bf16.msra.mxu1 %v6558_v50  ;;  %v3188_v8 = vadd.f32 %v3187_v23, %v3147_v34  ;;  %v7036_v50 = vld [vmem:[#allocation8 + $0x2c4] ss:$16 sps:$4 sm:$0xff]   ;;  %v7067_v34 = vld [vmem:[#allocation8] ss:$16 sps:$4 sm:$0xff]  }
 0x223   :  { %3501 = vmatprep.subr.bf16.mxu1 %v6551_v37  ;;  %v7039_v37 = vld [vmem:[#allocation8 + $0xa4] ss:$16 sps:$4 sm:$0xff]   ;;  %v7070_v4 = vld [vmem:[#allocation8 + $0x200] ss:$16 sps:$4 sm:$0xff]  }
 0x224   :  { %3527 = vmatpush1.bf16.msra.mxu0 %v6614_v42  ;;  %v3229_v15 = vadd.f32 %v7941_v20, %v3188_v8  ;;  %v7030_v20 = vld [vmem:[#allocation8 + $0x2e4] ss:$16 sps:$4 sm:$0xff]   ;;  %v7043_v42 = vld [vmem:[#allocation8 + $0x80] ss:$16 sps:$4 sm:$0xff]  }
 0x225   :  { %3528 = vmatprep.subr.bf16.mxu0 %v6607_v21  ;;  %v7054_v21 = vld [vmem:[#allocation8 + $0x264] ss:$16 sps:$4 sm:$0xff]   ;;  %v7088_v27 = vld [vmem:[#allocation8 + $0x3a0] ss:$16 sps:$4 sm:$0xff]  }
 0x226   :  { %3502 = vmatpush2.bf16.msra.mxu1 %v6550_v45  ;;  %v3572_v23 = vmul.f32 0.2, %v3229_v15  ;;  %vm3564_vm1 = vcmp.gt.f32.partialorder %v3229_v15, 0.0  ;;  %v7051_v45 = vld [vmem:[#allocation8 + $0x64] ss:$16 sps:$4 sm:$0xff]  }
 0x227   :  { %3503 = vmatprep.subr.bf16.mxu1 %v6543_v46  ;;  %v7049_v46 = vld [vmem:[#allocation8 + $0x60] ss:$16 sps:$4 sm:$0xff]   ;;  %v7069_v63 = vld [vmem:[#allocation8 + $0x4] ss:$16 sps:$4 sm:$0xff]  }
 0x228   :  { %3529 = vmatpush1.bf16.msra.mxu0 %v6606_v52  ;;  %v3580_v5 = vsel %vm3564_vm1, %v3229_v15, %v3572_v23  ;;  %v7058_v52 = vld [vmem:[#allocation8 + $0x240] ss:$16 sps:$4 sm:$0xff]   ;;  %v7072_v1 = vld [vmem:[#allocation8 + $0x204] ss:$16 sps:$4 sm:$0xff]  }
 0x229   :  { %3530 = vmatprep.subr.bf16.mxu0 %v6599_v56  ;;  %v7960_v33 = vpack.c.bf16 %v3580_v5, %v3580_v5  ;;  %v7061_v56 = vld [vmem:[#allocation8 + $0x20] ss:$16 sps:$4 sm:$0xff]   ;;  %v7078_v8 = vld [vmem:[#allocation8 + $0x3e4] ss:$16 sps:$4 sm:$0xff]  }
 0x22a   :  { %3504 = vmatpush2.bf16.msra.mxu1 %v6542_v2  ;;  %v7066_v2 = vld [vmem:[#allocation8 + $0x224] ss:$16 sps:$4 sm:$0xff]   ;;  %v7079_v15 = vld [vmem:[#allocation8 + $0x1c0] ss:$16 sps:$4 sm:$0xff]  }
 0x22b   :  { %3505 = vmatprep.subr.bf16.mxu1 %v6535_v61  ;;  %v7064_v61 = vld [vmem:[#allocation8 + $0x220] ss:$16 sps:$4 sm:$0xff]   ;;  %v7081_v16 = vld [vmem:[#allocation8 + $0x1c4] ss:$16 sps:$4 sm:$0xff]  }
 0x22c   :  { %3531 = vmatpush1.bf16.msra.mxu0 %v6598_v7  ;;  %v7075_v7 = vld [vmem:[#allocation8 + $0x1e4] ss:$16 sps:$4 sm:$0xff]  }
 0x22d   :  { %3532 = vmatprep.subr.bf16.mxu0 %v6591_v10  ;;  %v7073_v10 = vld [vmem:[#allocation8 + $0x1e0] ss:$16 sps:$4 sm:$0xff]   ;;  %v7084_v11 = vld [vmem:[#allocation8 + $0x3c4] ss:$16 sps:$4 sm:$0xff]  }
 0x22e   :  { %3506 = vmatpush2.bf16.msra.mxu1 %v6534_v9  ;;  %v619_v9 = vrot.slane %v7946_v43, %v618_v3  ;;  %v7090_v23 = vld [vmem:[#allocation8 + $0x3a4] ss:$16 sps:$4 sm:$0xff]   ;;  %v7178_v3 = vld [vmem:[#allocation8 + $0x6e0] ss:$16 sps:$4 sm:$0xff]  }
 0x22f   :  { %3507 = vmatprep.subr.bf16.mxu1 %v6527_v58  ;;  %v7076_v58 = vld [vmem:[#allocation8 + $0x3e0] ss:$16 sps:$4 sm:$0xff]  }
 0x230   :  { %3533 = vmatpush1.bf16.msra.mxu0 %v6590_v14 }
 0x231   :  { %3534 = vmatprep.subr.bf16.mxu0 %v6583_v17  ;;  %v7082_v17 = vld [vmem:[#allocation8 + $0x3c0] ss:$16 sps:$4 sm:$0xff]  }
 0x232   :  { %3508 = vmatpush2.bf16.msra.mxu1 %v6526_v62 }
 0x233   :  { %3509 = vmatprep.subr.bf16.mxu1 %v6519_v18  ;;  %v7087_v18 = vld [vmem:[#allocation8 + $0x1a4] ss:$16 sps:$4 sm:$0xff]  }
 0x234   :  { %3535 = vmatpush1.bf16.msra.mxu0 %v6582_v22 }
 0x235   :  { %5151 = vmatprep.subr.bf16.mxu0 %v7027_v26 }
 0x236   :  { %3510 = vmatpush2.bf16.msra.mxu1 %v6518_v25 }
 0x237   :  { %5192 = vmatprep.subr.bf16.mxu1 %v7030_v20  ;;  %3553 = vmatmul.mubr.bf16.vlgmr.msra.gmra.mxu0 %v7527_v36  ;;  %v7085_v20 = vld [vmem:[#allocation8 + $0x1a0] ss:$16 sps:$4 sm:$0xff]  }
 0x238   :  { %5152 = vmatpush1.bf16.msra.mxu0 %v7025_v19  ;;  %5183 = vmatprep.mubr.bf16.mxu0 %v7957_v32  ;;  %v7091_v36 = vld [vmem:[#allocation8 + $0x180] ss:$16 sps:$4 sm:$0xff]  }
 0x239   :  { %3512 = vmatmul.mubr.bf16.vlgmr.msra.gmra.mxu1 %v7871_v35  ;;  %5153 = vmatprep.subr.bf16.mxu0 %v7033_v31  ;;  %v7045_v35 = vld [vmem:[#allocation8 + $0x84] ss:$16 sps:$4 sm:$0xff]  }
 0x23a   :  { %5193 = vmatpush1.bf16.msra.mxu1 %v7028_v30  ;;  %5224 = vmatprep.mubr.bf16.mxu1 %v7960_v33  ;;  %v7093_v30 = vld [vmem:[#allocation8 + $0x184] ss:$16 sps:$4 sm:$0xff]  }
 0x23b   :  { %5194 = vmatprep.subr.bf16.mxu1 %v7036_v50  ;;  %v7096_v31 = vld [vmem:[#allocation8 + $0x384] ss:$16 sps:$4 sm:$0xff]   ;;  %v7094_v50 = vld [vmem:[#allocation8 + $0x380] ss:$16 sps:$4 sm:$0xff]  }
 0x23c   :  { %5154 = vmatpush1.bf16.msra.mxu0 %v7031_v41  ;;  %v7099_v41 = vld [vmem:[#allocation8 + $0x164] ss:$16 sps:$4 sm:$0xff]  }
 0x23d   :  { %5155 = vmatprep.subr.bf16.mxu0 %v7039_v37  ;;  %v7097_v37 = vld [vmem:[#allocation8 + $0x160] ss:$16 sps:$4 sm:$0xff]  }
 0x23e   :  { %5195 = vmatpush1.bf16.msra.mxu1 %v7034_v29  ;;  %v7102_v29 = vld [vmem:[#allocation8 + $0x364] ss:$16 sps:$4 sm:$0xff]  }
 0x23f   :  { %5196 = vmatprep.subr.bf16.mxu1 %v7042_v38  ;;  %v7100_v38 = vld [vmem:[#allocation8 + $0x360] ss:$16 sps:$4 sm:$0xff]  }
 0x240   :  { %5156 = vmatpush1.bf16.msra.mxu0 %v7037_v39  ;;  %v7105_v39 = vld [vmem:[#allocation8 + $0x144] ss:$16 sps:$4 sm:$0xff]  }
 0x241   :  { %5157 = vmatprep.subr.bf16.mxu0 %v7045_v35  ;;  %v7103_v35 = vld [vmem:[#allocation8 + $0x140] ss:$16 sps:$4 sm:$0xff]  }
 0x242   :  { %5197 = vmatpush1.bf16.msra.mxu1 %v7040_v40  ;;  %v7108_v40 = vld [vmem:[#allocation8 + $0x344] ss:$16 sps:$4 sm:$0xff]  }
 0x243   :  { %5198 = vmatprep.subr.bf16.mxu1 %v7048_v57  ;;  %v7106_v57 = vld [vmem:[#allocation8 + $0x340] ss:$16 sps:$4 sm:$0xff]  }
 0x244   :  { %5158 = vmatpush1.bf16.msra.mxu0 %v7043_v42  ;;  %v7111_v42 = vld [vmem:[#allocation8 + $0x124] ss:$16 sps:$4 sm:$0xff]  }
 0x245   :  { %5159 = vmatprep.subr.bf16.mxu0 %v7051_v45  ;;  %v7109_v45 = vld [vmem:[#allocation8 + $0x120] ss:$16 sps:$4 sm:$0xff]  }
 0x246   :  { %5199 = vmatpush1.bf16.msra.mxu1 %v7046_v44  ;;  %v7114_v44 = vld [vmem:[#allocation8 + $0x324] ss:$16 sps:$4 sm:$0xff]  }
 0x247   :  { %5200 = vmatprep.subr.bf16.mxu1 %v7054_v21  ;;  %v7112_v21 = vld [vmem:[#allocation8 + $0x320] ss:$16 sps:$4 sm:$0xff]  }
 0x248   :  { %5160 = vmatpush1.bf16.msra.mxu0 %v7049_v46  ;;  %v7117_v46 = vld [vmem:[#allocation8 + $0x104] ss:$16 sps:$4 sm:$0xff]  }
 0x249   :  { %5161 = vmatprep.subr.bf16.mxu0 %v7057_v59  ;;  %v7120_v59 = vld [vmem:[#allocation8 + $0x304] ss:$16 sps:$4 sm:$0xff]  }
 0x24a   :  { %5201 = vmatpush1.bf16.msra.mxu1 %v7052_v47  ;;  %v3569_v47 = vmul.f32 0.2, %v7914_v24 }
 0x24b   :  { %5202 = vmatprep.subr.bf16.mxu1 %v7060_v48  ;;  %v3571_v48 = vmul.f32 0.2, %v7943_v53 }
 0x24c   :  { %5162 = vmatpush1.bf16.msra.mxu0 %v7055_v49  ;;  %v7115_v49 = vld [vmem:[#allocation8 + $0x100] ss:$16 sps:$4 sm:$0xff]  }
 0x24d   :  { %5163 = vmatprep.subr.bf16.mxu0 %v7063_v55  ;;  %v7123_v55 = vld [vmem:[#allocation8 + $0x4e4] ss:$16 sps:$4 sm:$0xff]  }
 0x24e   :  { %5203 = vmatpush1.bf16.msra.mxu1 %v7058_v52  ;;  %v7118_v52 = vld [vmem:[#allocation8 + $0x300] ss:$16 sps:$4 sm:$0xff]  }
 0x24f   :  { %5204 = vmatprep.subr.bf16.mxu1 %v7066_v2  ;;  %v3577_v2 = vsel %vm3561_vm2, %v7914_v24, %v3569_v47  ;;  %v7124_v24 = vld [vmem:[#allocation8 + $0x4c0] ss:$16 sps:$4 sm:$0xff]   ;;  %v7234_v47 = vld [vmem:[#allocation8 + $0x7c4] ss:$16 sps:$4 sm:$0xff]  }
 0x250   :  { %5164 = vmatpush1.bf16.msra.mxu0 %v7061_v56  ;;  %v7180_v56 = vld [vmem:[#allocation8 + $0x6e4] ss:$16 sps:$4 sm:$0xff]  }
 0x251   :  { %5165 = vmatprep.subr.bf16.mxu0 %v7069_v63  ;;  %v7121_v63 = vld [vmem:[#allocation8 + $0x4e0] ss:$16 sps:$4 sm:$0xff]  }
 0x252   :  { %5205 = vmatpush1.bf16.msra.mxu1 %v7064_v61  ;;  %v3579_v61 = vsel %vm3563_vm3, %v7943_v53, %v3571_v48  ;;  %v7129_v53 = vld [vmem:[#allocation8 + $0x4a4] ss:$16 sps:$4 sm:$0xff]  }
 0x253   :  { %5206 = vmatprep.subr.bf16.mxu1 %v7072_v1  ;;  %v7978_v1 = vpack.c.bf16 %v3577_v2, %v3577_v2  ;;  %v7232_v2 = vld [vmem:[#allocation8 + $0x7c0] ss:$16 sps:$4 sm:$0xff]  }
 0x254   :  { %5166 = vmatpush1.bf16.msra.mxu0 %v7067_v34  ;;  %v7126_v34 = vld [vmem:[#allocation8 + $0x4c4] ss:$16 sps:$4 sm:$0xff]  }
 0x255   :  { %5167 = vmatprep.subr.bf16.mxu0 %v7075_v7  ;;  %v7186_v7 = vld [vmem:[#allocation8 + $0x6c4] ss:$16 sps:$4 sm:$0xff]  }
 0x256   :  { %5207 = vmatpush1.bf16.msra.mxu1 %v7070_v4  ;;  %v7980_v4 = vpack.c.bf16 %v3579_v61, %v3579_v61 }
 0x257   :  { %5208 = vmatprep.subr.bf16.mxu1 %v7078_v8  ;;  %v3267_v12 = vpop.f32.mrf.mxu0 }
 0x258   :  { %v3268_v13 = vadd.f32 %v3267_v12, %v619_v9  ;;  %5168 = vmatpush2.bf16.msra.mxu0 %v7073_v10  ;;  %v7184_v9 = vld [vmem:[#allocation8 + $0x6c0] ss:$16 sps:$4 sm:$0xff]   ;;  %v7132_v12 = vld [vmem:[#allocation8 + $0x484] ss:$16 sps:$4 sm:$0xff]  }
 0x259   :  { %v3308_v14 = vpop.f32.mrf.mxu1  ;;  %v7966_v62 = vpop.f32.mrf.mxu0  ;;  %5169 = vmatprep.subr.bf16.mxu0 %v7081_v16 }
 0x25a   :  { %5209 = vmatpush2.bf16.msra.mxu1 %v7076_v58  ;;  %v7968_v28 = vadd.f32 %v3308_v14, %v3268_v13  ;;  %v7192_v58 = vld [vmem:[#allocation8 + $0x6a4] ss:$16 sps:$4 sm:$0xff]   ;;  %v7190_v13 = vld [vmem:[#allocation8 + $0x6a0] ss:$16 sps:$4 sm:$0xff]  }
 0x25b   :  { %v7970_v22 = vpop.f32.mrf.mxu1  ;;  %5210 = vmatprep.subr.bf16.mxu1 %v7084_v11  ;;  %v3271_v25 = vpop.f32.mrf.mxu0  ;;  %v7127_v11 = vld [vmem:[#allocation8 + $0x4a0] ss:$16 sps:$4 sm:$0xff]  }
 0x25c   :  { %5170 = vmatpush2.bf16.msra.mxu0 %v7079_v15  ;;  %v7198_v15 = vld [vmem:[#allocation8 + $0x684] ss:$16 sps:$4 sm:$0xff]  }
 0x25d   :  { %v3312_v26 = vpop.f32.mrf.mxu1  ;;  %v3272_v19 = vpop.f32.mrf.mxu0  ;;  %5171 = vmatprep.subr.bf16.mxu0 %v7087_v18  ;;  %v7135_v18 = vld [vmem:[#allocation8 + $0x464] ss:$16 sps:$4 sm:$0xff]  }
 0x25e   :  { %5211 = vmatpush2.bf16.msra.mxu1 %v7082_v17  ;;  %v7130_v17 = vld [vmem:[#allocation8 + $0x480] ss:$16 sps:$4 sm:$0xff]   ;;  %v7204_v25 = vld [vmem:[#allocation8 + $0x664] ss:$16 sps:$4 sm:$0xff]  }
 0x25f   :  { %v3313_v5 = vpop.f32.mrf.mxu1  ;;  %5212 = vmatprep.subr.bf16.mxu1 %v7090_v23  ;;  %v7196_v23 = vld [vmem:[#allocation8 + $0x680] ss:$16 sps:$4 sm:$0xff]  }
 0x260   :  { %5172 = vmatpush2.bf16.msra.mxu0 %v7085_v20  ;;  %v7133_v26 = vld [vmem:[#allocation8 + $0x460] ss:$16 sps:$4 sm:$0xff]   ;;  %v7138_v20 = vld [vmem:[#allocation8 + $0x444] ss:$16 sps:$4 sm:$0xff]  }
 0x261   :  { %5173 = vmatprep.subr.bf16.mxu0 %v7093_v30  ;;  %v7202_v19 = vld [vmem:[#allocation8 + $0x660] ss:$16 sps:$4 sm:$0xff]   ;;  %v7141_v5 = vld [vmem:[#allocation8 + $0x424] ss:$16 sps:$4 sm:$0xff]  }
 0x262   :  { %5213 = vmatpush2.bf16.msra.mxu1 %v7088_v27  ;;  %v7210_v27 = vld [vmem:[#allocation8 + $0x644] ss:$16 sps:$4 sm:$0xff]   ;;  %v7136_v30 = vld [vmem:[#allocation8 + $0x440] ss:$16 sps:$4 sm:$0xff]  }
 0x263   :  { %5214 = vmatprep.subr.bf16.mxu1 %v7096_v31  ;;  %v7208_v31 = vld [vmem:[#allocation8 + $0x640] ss:$16 sps:$4 sm:$0xff]  }
 0x264   :  { %5174 = vmatpush2.bf16.msra.mxu0 %v7091_v36  ;;  %v7216_v36 = vld [vmem:[#allocation8 + $0x624] ss:$16 sps:$4 sm:$0xff]  }
 0x265   :  { %5175 = vmatprep.subr.bf16.mxu0 %v7099_v41  ;;  %v7139_v41 = vld [vmem:[#allocation8 + $0x420] ss:$16 sps:$4 sm:$0xff]  }
 0x266   :  { %5215 = vmatpush2.bf16.msra.mxu1 %v7094_v50  ;;  %v622_v50 = vsub.s32 5, %v7885_v51 }
 0x267   :  { %5216 = vmatprep.subr.bf16.mxu1 %v7102_v29  ;;  %v7144_v29 = vld [vmem:[#allocation8 + $0x404] ss:$16 sps:$4 sm:$0xff]  }
 0x268   :  { %5176 = vmatpush2.bf16.msra.mxu0 %v7097_v37  ;;  %v7214_v37 = vld [vmem:[#allocation8 + $0x620] ss:$16 sps:$4 sm:$0xff]  }
 0x269   :  { %5177 = vmatprep.subr.bf16.mxu0 %v7105_v39  ;;  %v623_v39 = vrot.slane %v7946_v43, %v622_v50  ;;  %v7171_v50 = vld [vmem:[#allocation8 + $0xec] ss:$16 sps:$4 sm:$0xff]  }
 0x26a   :  { %5217 = vmatpush2.bf16.msra.mxu1 %v7100_v38  ;;  %v7222_v38 = vld [vmem:[#allocation8 + $0x604] ss:$16 sps:$4 sm:$0xff]  }
 0x26b   :  { %5218 = vmatprep.subr.bf16.mxu1 %v7108_v40  ;;  %v7142_v40 = vld [vmem:[#allocation8 + $0x400] ss:$16 sps:$4 sm:$0xff]  }
 0x26c   :  { %5178 = vmatpush2.bf16.msra.mxu0 %v7103_v35  ;;  %v7147_v35 = vld [vmem:[#allocation8 + $0x5e4] ss:$16 sps:$4 sm:$0xff]  }
 0x26d   :  { %5179 = vmatprep.subr.bf16.mxu0 %v7111_v42  ;;  %v7228_v42 = vld [vmem:[#allocation8 + $0x7e4] ss:$16 sps:$4 sm:$0xff]  }
 0x26e   :  { %5219 = vmatpush2.bf16.msra.mxu1 %v7106_v57  ;;  %v7220_v57 = vld [vmem:[#allocation8 + $0x600] ss:$16 sps:$4 sm:$0xff]  }
 0x26f   :  { %5220 = vmatprep.subr.bf16.mxu1 %v7114_v44  ;;  %v3270_v44 = vadd.f32 %v7966_v62, %v623_v39  ;;  %v7240_v62 = vld [vmem:[#allocation8 + $0x7a4] ss:$16 sps:$4 sm:$0xff]   ;;  %v7174_v39 = vld [vmem:[#allocation8 + $0xcc] ss:$16 sps:$4 sm:$0xff]  }
 0x270   :  { %5180 = vmatpush2.bf16.msra.mxu0 %v7109_v45  ;;  %v7145_v45 = vld [vmem:[#allocation8 + $0x5e0] ss:$16 sps:$4 sm:$0xff]  }
 0x271   :  { %5181 = vmatprep.subr.bf16.mxu0 %v7117_v46  ;;  %v7226_v46 = vld [vmem:[#allocation8 + $0x7e0] ss:$16 sps:$4 sm:$0xff]   ;;  %v3311_v48 = vadd.f32 %v7970_v22, %v3270_v44 }
 0x272   :  { %5221 = vmatpush2.bf16.msra.mxu1 %v7112_v21  ;;  %v7150_v21 = vld [vmem:[#allocation8 + $0x5c4] ss:$16 sps:$4 sm:$0xff]   ;;  %v7238_v22 = vld [vmem:[#allocation8 + $0x7a0] ss:$16 sps:$4 sm:$0xff]  }
 0x273   :  { %5222 = vmatprep.subr.bf16.mxu1 %v7120_v59 }
 0x274   :  { %5182 = vmatpush2.bf16.msra.mxu0 %v7115_v49  ;;  %v7148_v49 = vld [vmem:[#allocation8 + $0x5c0] ss:$16 sps:$4 sm:$0xff]  }
 0x275   :  { %5233 = vmatprep.subr.bf16.mxu0 %v7123_v55  ;;  %v7153_v55 = vld [vmem:[#allocation8 + $0x5a4] ss:$16 sps:$4 sm:$0xff]  }
 0x276   :  { %5223 = vmatpush2.bf16.msra.mxu1 %v7118_v52 }
 0x277   :  { %5274 = vmatprep.subr.bf16.mxu1 %v7180_v56  ;;  %5184 = vmatmul.mubr.bf16.vlgmr.msra.gmra.mxu0 %v7978_v1 }
 0x278   :  { %5234 = vmatpush1.bf16.msra.mxu0 %v7121_v63 }
 0x279   :  { %v7983_v8 = vpop.f32.mrf.mxu1  ;;  %5225 = vmatmul.mubr.bf16.vlgmr.msra.gmra.mxu1 %v7980_v4  ;;  %5235 = vmatprep.subr.bf16.mxu0 %v7126_v34  ;;  %v7151_v34 = vld [vmem:[#allocation8 + $0x5a0] ss:$16 sps:$4 sm:$0xff]  }
 0x27a   :  { %5275 = vmatpush1.bf16.msra.mxu1 %v7178_v3 }
 0x27b   :  { %v7986_v10 = vpop.f32.mrf.mxu1  ;;  %5276 = vmatprep.subr.bf16.mxu1 %v7186_v7  ;;  %v7156_v7 = vld [vmem:[#allocation8 + $0x584] ss:$16 sps:$4 sm:$0xff]  }
 0x27c   :  { %5236 = vmatpush1.bf16.msra.mxu0 %v7124_v24 }
 0x27d   :  { %v3394_v16 = vpop.f32.mrf.mxu1  ;;  %5237 = vmatprep.subr.bf16.mxu0 %v7129_v53  ;;  %v7246_v53 = vld [vmem:[#allocation8 + $0x784] ss:$16 sps:$4 sm:$0xff]  }
 0x27e   :  { %5277 = vmatpush1.bf16.msra.mxu1 %v7184_v9  ;;  %v7154_v9 = vld [vmem:[#allocation8 + $0x580] ss:$16 sps:$4 sm:$0xff]  }
 0x27f   :  { %v3395_v14 = vpop.f32.mrf.mxu1  ;;  %5278 = vmatprep.subr.bf16.mxu1 %v7192_v58 }
 0x280   :  { %5238 = vmatpush1.bf16.msra.mxu0 %v7127_v11  ;;  %v7159_v11 = vld [vmem:[#allocation8 + $0x564] ss:$16 sps:$4 sm:$0xff]  }
 0x281   :  { %5239 = vmatprep.subr.bf16.mxu0 %v7132_v12  ;;  %v7252_v12 = vld [vmem:[#allocation8 + $0x764] ss:$16 sps:$4 sm:$0xff]  }
 0x282   :  { %5279 = vmatpush1.bf16.msra.mxu1 %v7190_v13  ;;  %v7157_v13 = vld [vmem:[#allocation8 + $0x560] ss:$16 sps:$4 sm:$0xff]   ;;  %v7162_v14 = vld [vmem:[#allocation8 + $0x544] ss:$16 sps:$4 sm:$0xff]  }
 0x283   :  { %5280 = vmatprep.subr.bf16.mxu1 %v7198_v15  ;;  %v7250_v15 = vld [vmem:[#allocation8 + $0x760] ss:$16 sps:$4 sm:$0xff]  }
 0x284   :  { %5240 = vmatpush1.bf16.msra.mxu0 %v7130_v17 }
 0x285   :  { %5241 = vmatprep.subr.bf16.mxu0 %v7135_v18  ;;  %v7258_v18 = vld [vmem:[#allocation8 + $0x744] ss:$16 sps:$4 sm:$0xff]  }
 0x286   :  { %5281 = vmatpush1.bf16.msra.mxu1 %v7196_v23  ;;  %v7160_v23 = vld [vmem:[#allocation8 + $0x540] ss:$16 sps:$4 sm:$0xff]  }
 0x287   :  { %5282 = vmatprep.subr.bf16.mxu1 %v7204_v25  ;;  %v7165_v25 = vld [vmem:[#allocation8 + $0x524] ss:$16 sps:$4 sm:$0xff]  }
 0x288   :  { %5242 = vmatpush1.bf16.msra.mxu0 %v7133_v26  ;;  %v7256_v26 = vld [vmem:[#allocation8 + $0x740] ss:$16 sps:$4 sm:$0xff]  }
 0x289   :  { %5243 = vmatprep.subr.bf16.mxu0 %v7138_v20 }
 0x28a   :  { %5283 = vmatpush1.bf16.msra.mxu1 %v7202_v19  ;;  %v7264_v19 = vld [vmem:[#allocation8 + $0x724] ss:$16 sps:$4 sm:$0xff]  }
 0x28b   :  { %5284 = vmatprep.subr.bf16.mxu1 %v7210_v27  ;;  %v7163_v27 = vld [vmem:[#allocation8 + $0x520] ss:$16 sps:$4 sm:$0xff]  }
 0x28c   :  { %5244 = vmatpush1.bf16.msra.mxu0 %v7136_v30  ;;  %v7168_v30 = vld [vmem:[#allocation8 + $0x504] ss:$16 sps:$4 sm:$0xff]  }
 0x28d   :  { %5245 = vmatprep.subr.bf16.mxu0 %v7141_v5  ;;  %v7262_v5 = vld [vmem:[#allocation8 + $0x720] ss:$16 sps:$4 sm:$0xff]  }
 0x28e   :  { %5285 = vmatpush1.bf16.msra.mxu1 %v7208_v31 }
 0x28f   :  { %5286 = vmatprep.subr.bf16.mxu1 %v7216_v36  ;;  %v7166_v36 = vld [vmem:[#allocation8 + $0x500] ss:$16 sps:$4 sm:$0xff]  }
 0x290   :  { %5246 = vmatpush1.bf16.msra.mxu0 %v7139_v41  ;;  %v7268_v41 = vld [vmem:[#allocation8 + $0x700] ss:$16 sps:$4 sm:$0xff]  }
 0x291   :  { %5247 = vmatprep.subr.bf16.mxu0 %v7144_v29 }
 0x292   :  { %5287 = vmatpush1.bf16.msra.mxu1 %v7214_v37  ;;  %v7169_v37 = vld [vmem:[#allocation8 + $0xe8] ss:$16 sps:$4 sm:$0xff]  }
 0x293   :  { %5288 = vmatprep.subr.bf16.mxu1 %v7222_v38 }
 0x294   :  { %5248 = vmatpush1.bf16.msra.mxu0 %v7142_v40 }
 0x295   :  { %5249 = vmatprep.subr.bf16.mxu0 %v7147_v35  ;;  %v7172_v35 = vld [vmem:[#allocation8 + $0xc8] ss:$16 sps:$4 sm:$0xff]  }
 0x296   :  { %5289 = vmatpush1.bf16.msra.mxu1 %v7220_v57  ;;  %v7177_v57 = vld [vmem:[#allocation8 + $0xac] ss:$16 sps:$4 sm:$0xff]  }
 0x297   :  { %5290 = vmatprep.subr.bf16.mxu1 %v7228_v42  ;;  %v3349_v59 = vpop.f32.mrf.mxu0 }
 0x298   :  { %5250 = vmatpush2.bf16.msra.mxu0 %v7145_v45  ;;  %v3350_v17 = vadd.f32 %v3349_v59, %v7968_v28  ;;  %v7270_v28 = vld [vmem:[#allocation8 + $0x704] ss:$16 sps:$4 sm:$0xff]   ;;  %v7175_v45 = vld [vmem:[#allocation8 + $0xa8] ss:$16 sps:$4 sm:$0xff]   ;;  %v7189_v59 = vld [vmem:[#allocation8 + $0x6c] ss:$16 sps:$4 sm:$0xff]  }
 0x299   :  { %v3351_v52 = vpop.f32.mrf.mxu0  ;;  %5251 = vmatprep.subr.bf16.mxu0 %v7150_v21  ;;  %v7183_v21 = vld [vmem:[#allocation8 + $0x8c] ss:$16 sps:$4 sm:$0xff]  }
 0x29a   :  { %5291 = vmatpush2.bf16.msra.mxu1 %v7226_v46  ;;  %v3352_v56 = vadd.f32 %v3351_v52, %v3311_v48  ;;  %v3391_v20 = vadd.f32 %v7983_v8, %v3350_v17  ;;  %v7276_v8 = vld [vmem:[#allocation8 + $0x2ec] ss:$16 sps:$4 sm:$0xff]   ;;  %v7187_v48 = vld [vmem:[#allocation8 + $0x68] ss:$16 sps:$4 sm:$0xff]  }
 0x29b   :  { %5292 = vmatprep.subr.bf16.mxu1 %v7234_v47  ;;  %v3353_v61 = vpop.f32.mrf.mxu0  ;;  %v7181_v47 = vld [vmem:[#allocation8 + $0x88] ss:$16 sps:$4 sm:$0xff]   ;;  %v7201_v52 = vld [vmem:[#allocation8 + $0x2c] ss:$16 sps:$4 sm:$0xff]  }
 0x29c   :  { %v3393_v63 = vadd.f32 %v7986_v10, %v3352_v56  ;;  %5252 = vmatpush2.bf16.msra.mxu0 %v7148_v49  ;;  %v7244_v10 = vld [vmem:[#allocation8 + $0x780] ss:$16 sps:$4 sm:$0xff]   ;;  %v3573_v31 = vmul.f32 0.2, %v3391_v20  ;;  %vm3565_vm5 = vcmp.gt.f32.partialorder %v3391_v20, 0.0 }
 0x29d   :  { %v3354_v3 = vpop.f32.mrf.mxu0  ;;  %5253 = vmatprep.subr.bf16.mxu0 %v7153_v55  ;;  %v7195_v49 = vld [vmem:[#allocation8 + $0x4c] ss:$16 sps:$4 sm:$0xff]   ;;  %v7199_v55 = vld [vmem:[#allocation8 + $0x28] ss:$16 sps:$4 sm:$0xff]  }
 0x29e   :  { %5293 = vmatpush2.bf16.msra.mxu1 %v7232_v2  ;;  %v3574_v24 = vmul.f32 0.2, %v3393_v63  ;;  %vm3566_vm4 = vcmp.gt.f32.partialorder %v3393_v63, 0.0  ;;  %v3581_v29 = vsel %vm3565_vm5, %v3391_v20, %v3573_v31  ;;  %v7207_v2 = vld [vmem:[#allocation8 + $0xc] ss:$16 sps:$4 sm:$0xff]  }
 0x29f   :  { %5294 = vmatprep.subr.bf16.mxu1 %v7240_v62  ;;  %v7998_v38 = vpack.c.bf16 %v3581_v29, %v3581_v29  ;;  %v7205_v56 = vld [vmem:[#allocation8 + $0x8] ss:$16 sps:$4 sm:$0xff]   ;;  %v7213_v62 = vld [vmem:[#allocation8 + $0x1ec] ss:$16 sps:$4 sm:$0xff]  }
 0x2a0   :  { %5254 = vmatpush2.bf16.msra.mxu0 %v7151_v34  ;;  %v3582_v58 = vsel %vm3566_vm4, %v3393_v63, %v3574_v24  ;;  %v7211_v61 = vld [vmem:[#allocation8 + $0x1e8] ss:$16 sps:$4 sm:$0xff]   ;;  %v7219_v63 = vld [vmem:[#allocation8 + $0x1cc] ss:$16 sps:$4 sm:$0xff]  }
 0x2a1   :  { %5255 = vmatprep.subr.bf16.mxu0 %v7156_v7  ;;  %v7993_v16 = vpack.c.bf16 %v3582_v58, %v3582_v58  ;;  %v7217_v3 = vld [vmem:[#allocation8 + $0x1c8] ss:$16 sps:$4 sm:$0xff]   ;;  %v7231_v58 = vld [vmem:[#allocation8 + $0x18c] ss:$16 sps:$4 sm:$0xff]  }
 0x2a2   :  { %5295 = vmatpush2.bf16.msra.mxu1 %v7238_v22  ;;  %v7225_v22 = vld [vmem:[#allocation8 + $0x1ac] ss:$16 sps:$4 sm:$0xff]   ;;  %v7247_v17 = vld [vmem:[#allocation8 + $0x128] ss:$16 sps:$4 sm:$0xff]  }
 0x2a3   :  { %5296 = vmatprep.subr.bf16.mxu1 %v7246_v53  ;;  %5265 = vmatprep.mubr.bf16.mxu0 %v7993_v16  ;;  %v7223_v53 = vld [vmem:[#allocation8 + $0x1a8] ss:$16 sps:$4 sm:$0xff]   ;;  %v7267_v31 = vld [vmem:[#allocation8 + $0x4cc] ss:$16 sps:$4 sm:$0xff]  }
 0x2a4   :  { %5256 = vmatpush2.bf16.msra.mxu0 %v7154_v9  ;;  %v7265_v29 = vld [vmem:[#allocation8 + $0x4c8] ss:$16 sps:$4 sm:$0xff]  }
 0x2a5   :  { %5257 = vmatprep.subr.bf16.mxu0 %v7159_v11  ;;  %v7229_v11 = vld [vmem:[#allocation8 + $0x188] ss:$16 sps:$4 sm:$0xff]  }
 0x2a6   :  { %5297 = vmatpush2.bf16.msra.mxu1 %v7244_v10  ;;  %v7237_v10 = vld [vmem:[#allocation8 + $0x16c] ss:$16 sps:$4 sm:$0xff]  }
 0x2a7   :  { %5298 = vmatprep.subr.bf16.mxu1 %v7252_v12  ;;  %v7235_v12 = vld [vmem:[#allocation8 + $0x168] ss:$16 sps:$4 sm:$0xff]  }
 0x2a8   :  { %5258 = vmatpush2.bf16.msra.mxu0 %v7157_v13  ;;  %v7243_v13 = vld [vmem:[#allocation8 + $0x14c] ss:$16 sps:$4 sm:$0xff]  }
 0x2a9   :  { %5259 = vmatprep.subr.bf16.mxu0 %v7162_v14  ;;  %v7241_v14 = vld [vmem:[#allocation8 + $0x148] ss:$16 sps:$4 sm:$0xff]  }
 0x2aa   :  { %5299 = vmatpush2.bf16.msra.mxu1 %v7250_v15  ;;  %v7249_v15 = vld [vmem:[#allocation8 + $0x12c] ss:$16 sps:$4 sm:$0xff]  }
 0x2ab   :  { %5300 = vmatprep.subr.bf16.mxu1 %v7258_v18  ;;  %v626_v18 = vsub.s32 6, %v7885_v51 }
 0x2ac   :  { %5260 = vmatpush2.bf16.msra.mxu0 %v7160_v23  ;;  %v7255_v23 = vld [vmem:[#allocation8 + $0x10c] ss:$16 sps:$4 sm:$0xff]  }
 0x2ad   :  { %5261 = vmatprep.subr.bf16.mxu0 %v7165_v25  ;;  %v630_v25 = vsub.s32 7, %v7885_v51  ;;  %v627_v20 = vrot.slane %v7946_v43, %v626_v18  ;;  %v7304_v18 = vld [vmem:[#allocation8 + $0x248] ss:$16 sps:$4 sm:$0xff]   ;;  %v7509_v51 = vld [vmem:[#allocation14 + $0x68] sm:$0xff]  }
 0x2ae   :  { %5301 = vmatpush2.bf16.msra.mxu1 %v7256_v26  ;;  %v7253_v26 = vld [vmem:[#allocation8 + $0x108] ss:$16 sps:$4 sm:$0xff]  }
 0x2af   :  { %5302 = vmatprep.subr.bf16.mxu1 %v7264_v19  ;;  %v7261_v19 = vld [vmem:[#allocation8 + $0x4ec] ss:$16 sps:$4 sm:$0xff]  }
 0x2b0   :  { %5262 = vmatpush2.bf16.msra.mxu0 %v7163_v27  ;;  %v631_v27 = vrot.slane %v7946_v43, %v630_v25  ;;  %v7313_v25 = vld [vmem:[#allocation8 + $0x5c8] ss:$16 sps:$4 sm:$0xff]  }
 0x2b1   :  { %5263 = vmatprep.subr.bf16.mxu0 %v7168_v30  ;;  %v7259_v30 = vld [vmem:[#allocation8 + $0x4e8] ss:$16 sps:$4 sm:$0xff]  }
 0x2b2   :  { %5303 = vmatpush2.bf16.msra.mxu1 %v7262_v5 }
 0x2b3   :  { %5304 = vmatprep.subr.bf16.mxu1 %v7270_v28 }
 0x2b4   :  { %5264 = vmatpush2.bf16.msra.mxu0 %v7166_v36 }
 0x2b5   :  { %5315 = vmatprep.subr.bf16.mxu0 %v7171_v50 }
 0x2b6   :  { %5305 = vmatpush2.bf16.msra.mxu1 %v7268_v41 }
 0x2b7   :  { %5356 = vmatprep.subr.bf16.mxu1 %v7276_v8  ;;  %5266 = vmatmul.mubr.bf16.vlgmr.msra.gmra.mxu0 %v7998_v38 }
 0x2b8   :  { %5316 = vmatpush1.bf16.msra.mxu0 %v7169_v37  ;;  %5347 = vmatprep.mubr.bf16.mxu0 %v7957_v32  ;;  %v7193_v32 = vld [vmem:[#allocation8 + $0x48] ss:$16 sps:$4 sm:$0xff]  }
 0x2b9   :  { %v8001_v40 = vpop.f32.mrf.mxu1  ;;  %5317 = vmatprep.subr.bf16.mxu0 %v7174_v39  ;;  %v7273_v39 = vld [vmem:[#allocation8 + $0x4ac] ss:$16 sps:$4 sm:$0xff]  }
 0x2ba   :  { %v3432_v5 = vadd.f32 %v8001_v40, %v627_v20  ;;  %v7310_v20 = vld [vmem:[#allocation8 + $0x228] ss:$16 sps:$4 sm:$0xff]  }
 0x2bb   :  { %v8004_v42 = vpop.f32.mrf.mxu1 }
 0x2bc   :  { %5318 = vmatpush1.bf16.msra.mxu0 %v7172_v35  ;;  %v3434_v28 = vadd.f32 %v8004_v42, %v631_v27  ;;  %v7271_v42 = vld [vmem:[#allocation8 + $0x4a8] ss:$16 sps:$4 sm:$0xff]  }
 0x2bd   :  { %v3435_v44 = vpop.f32.mrf.mxu1  ;;  %5319 = vmatprep.subr.bf16.mxu0 %v7177_v57  ;;  %v7319_v27 = vld [vmem:[#allocation8 + $0x5a8] ss:$16 sps:$4 sm:$0xff]  }
 0x2bf   :  { %v3436_v46 = vpop.f32.mrf.mxu1 }
 0x2c0   :  { %5320 = vmatpush1.bf16.msra.mxu0 %v7175_v45 }
 0x2c1   :  { %5321 = vmatprep.subr.bf16.mxu0 %v7183_v21 }
 0x2c4   :  { %5322 = vmatpush1.bf16.msra.mxu0 %v7181_v47  ;;  %v7279_v47 = vld [vmem:[#allocation8 + $0x48c] ss:$16 sps:$4 sm:$0xff]  }
 0x2c5   :  { %5323 = vmatprep.subr.bf16.mxu0 %v7189_v59 }
 0x2c8   :  { %5324 = vmatpush1.bf16.msra.mxu0 %v7187_v48 }
 0x2c9   :  { %5325 = vmatprep.subr.bf16.mxu0 %v7195_v49  ;;  %v7277_v49 = vld [vmem:[#allocation8 + $0x488] ss:$16 sps:$4 sm:$0xff]  }
 0x2cc   :  { %5326 = vmatpush1.bf16.msra.mxu0 %v7193_v32 }
 0x2cd   :  { %5327 = vmatprep.subr.bf16.mxu0 %v7201_v52  ;;  %v7285_v52 = vld [vmem:[#allocation8 + $0x46c] ss:$16 sps:$4 sm:$0xff]  }
 0x2d0   :  { %5328 = vmatpush1.bf16.msra.mxu0 %v7199_v55 }
 0x2d1   :  { %5329 = vmatprep.subr.bf16.mxu0 %v7207_v2  ;;  %v7274_v2 = vld [vmem:[#allocation8 + $0x2e8] ss:$16 sps:$4 sm:$0xff]  }
 0x2d4   :  { %5330 = vmatpush1.bf16.msra.mxu0 %v7205_v56 }
 0x2d5   :  { %5331 = vmatprep.subr.bf16.mxu0 %v7213_v62  ;;  %v7282_v62 = vld [vmem:[#allocation8 + $0x2cc] ss:$16 sps:$4 sm:$0xff]  }
 0x2d7   :  { %v3472_v34 = vpop.f32.mrf.mxu0 }
 0x2d8   :  { %5332 = vmatpush2.bf16.msra.mxu0 %v7211_v61  ;;  %v3473_v36 = vadd.f32 %v3472_v34, %v3432_v5  ;;  %v7283_v61 = vld [vmem:[#allocation8 + $0x468] ss:$16 sps:$4 sm:$0xff]  }
 0x2d9   :  { %v3474_v7 = vpop.f32.mrf.mxu0  ;;  %5333 = vmatprep.subr.bf16.mxu0 %v7219_v63  ;;  %v7291_v63 = vld [vmem:[#allocation8 + $0x44c] ss:$16 sps:$4 sm:$0xff]   ;;  %v7280_v34 = vld [vmem:[#allocation8 + $0x2c8] ss:$16 sps:$4 sm:$0xff]  }
 0x2da   :  { %v3475_v8 = vadd.f32 %v3474_v7, %v3434_v28  ;;  %v7289_v7 = vld [vmem:[#allocation8 + $0x448] ss:$16 sps:$4 sm:$0xff]  }
 0x2db   :  { %v3476_v24 = vpop.f32.mrf.mxu0  ;;  %v7316_v5 = vld [vmem:[#allocation8 + $0x208] ss:$16 sps:$4 sm:$0xff]  }
 0x2dc   :  { %5334 = vmatpush2.bf16.msra.mxu0 %v7217_v3  ;;  %v7288_v3 = vld [vmem:[#allocation8 + $0x2ac] ss:$16 sps:$4 sm:$0xff]   ;;  %v7286_v24 = vld [vmem:[#allocation8 + $0x2a8] ss:$16 sps:$4 sm:$0xff]  }
 0x2dd   :  { %v3477_v9 = vpop.f32.mrf.mxu0  ;;  %5335 = vmatprep.subr.bf16.mxu0 %v7225_v22  ;;  %v7297_v22 = vld [vmem:[#allocation8 + $0x42c] ss:$16 sps:$4 sm:$0xff]   ;;  %v7325_v28 = vld [vmem:[#allocation8 + $0x588] ss:$16 sps:$4 sm:$0xff]  }
 0x2de   :  { %v7295_v9 = vld [vmem:[#allocation8 + $0x428] ss:$16 sps:$4 sm:$0xff]  }
 0x2e0   :  { %5336 = vmatpush2.bf16.msra.mxu0 %v7223_v53  ;;  %v7294_v53 = vld [vmem:[#allocation8 + $0x28c] ss:$16 sps:$4 sm:$0xff]  }
 0x2e1   :  { %5337 = vmatprep.subr.bf16.mxu0 %v7231_v58  ;;  %v7303_v58 = vld [vmem:[#allocation8 + $0x40c] ss:$16 sps:$4 sm:$0xff]  }
 0x2e4   :  { %5338 = vmatpush2.bf16.msra.mxu0 %v7229_v11  ;;  %v7292_v11 = vld [vmem:[#allocation8 + $0x288] ss:$16 sps:$4 sm:$0xff]  }
 0x2e5   :  { %5339 = vmatprep.subr.bf16.mxu0 %v7237_v10  ;;  %v7300_v10 = vld [vmem:[#allocation8 + $0x26c] ss:$16 sps:$4 sm:$0xff]  }
 0x2e8   :  { %5340 = vmatpush2.bf16.msra.mxu0 %v7235_v12  ;;  %v7309_v12 = vld [vmem:[#allocation8 + $0x5ec] ss:$16 sps:$4 sm:$0xff]  }
 0x2e9   :  { %5341 = vmatprep.subr.bf16.mxu0 %v7243_v13  ;;  %v7298_v13 = vld [vmem:[#allocation8 + $0x268] ss:$16 sps:$4 sm:$0xff]  }
 0x2ec   :  { %5342 = vmatpush2.bf16.msra.mxu0 %v7241_v14  ;;  %v7306_v14 = vld [vmem:[#allocation8 + $0x24c] ss:$16 sps:$4 sm:$0xff]  }
 0x2ed   :  { %5343 = vmatprep.subr.bf16.mxu0 %v7249_v15  ;;  %v7307_v15 = vld [vmem:[#allocation8 + $0x5e8] ss:$16 sps:$4 sm:$0xff]  }
 0x2f0   :  { %5344 = vmatpush2.bf16.msra.mxu0 %v7247_v17  ;;  %v7315_v17 = vld [vmem:[#allocation8 + $0x5cc] ss:$16 sps:$4 sm:$0xff]  }
 0x2f1   :  { %5345 = vmatprep.subr.bf16.mxu0 %v7255_v23  ;;  %v7312_v23 = vld [vmem:[#allocation8 + $0x22c] ss:$16 sps:$4 sm:$0xff]  }
 0x2f4   :  { %5346 = vmatpush2.bf16.msra.mxu0 %v7253_v26  ;;  %v7321_v26 = vld [vmem:[#allocation8 + $0x5ac] ss:$16 sps:$4 sm:$0xff]  }
 0x2f5   :  { %5397 = vmatprep.subr.bf16.mxu0 %v7261_v19  ;;  %v7318_v19 = vld [vmem:[#allocation8 + $0x20c] ss:$16 sps:$4 sm:$0xff]  }
 0x2f7   :  { %v3554_v50 = vpop.f32.mrf.mxu0  ;;  %5348 = vmatmul.mubr.bf16.vlgmr.msra.gmra.mxu0 %v7978_v1 }
 0x2f8   :  { %5398 = vmatpush1.bf16.msra.mxu0 %v7259_v30  ;;  %5429 = vmatprep.mubr.bf16.mxu0 %v7993_v16  ;;  %v7327_v30 = vld [vmem:[#allocation8 + $0x58c] ss:$16 sps:$4 sm:$0xff]  }
 0x2f9   :  { %v3513_v41 = vpop.f32.mrf.mxu1  ;;  %v3556_v43 = vpop.f32.mrf.mxu0  ;;  %5399 = vmatprep.subr.bf16.mxu0 %v7267_v31  ;;  %v7324_v31 = vld [vmem:[#allocation8 + $0x3ec] ss:$16 sps:$4 sm:$0xff]  }
 0x2fa   :  { %v3514_v37 = vadd.f32 %v3513_v41, %v3473_v36  ;;  %v7333_v36 = vld [vmem:[#allocation8 + $0x56c] ss:$16 sps:$4 sm:$0xff]  }
 0x2fb   :  { %v3515_v35 = vpop.f32.mrf.mxu1  ;;  %v3558_v44 = vpop.f32.mrf.mxu0  ;;  %v7330_v41 = vld [vmem:[#allocation8 + $0x3cc] ss:$16 sps:$4 sm:$0xff]  }
 0x2fc   :  { %v3555_v40 = vadd.f32 %v3554_v50, %v3514_v37  ;;  %v3516_v57 = vadd.f32 %v3515_v35, %v3475_v8  ;;  %5400 = vmatpush1.bf16.msra.mxu0 %v7265_v29  ;;  %v7322_v50 = vld [vmem:[#allocation8 + $0x3e8] ss:$16 sps:$4 sm:$0xff]   ;;  %v7339_v8 = vld [vmem:[#allocation8 + $0x54c] ss:$16 sps:$4 sm:$0xff]  }
 0x2fd   :  { %v3517_v45 = vpop.f32.mrf.mxu1  ;;  %v3559_v46 = vpop.f32.mrf.mxu0  ;;  %5401 = vmatprep.subr.bf16.mxu0 %v7273_v39  ;;  %v7331_v29 = vld [vmem:[#allocation8 + $0x568] ss:$16 sps:$4 sm:$0xff]   ;;  %v7345_v35 = vld [vmem:[#allocation8 + $0x52c] ss:$16 sps:$4 sm:$0xff]  }
 0x2fe   :  { %vm3567_vm6 = vcmp.gt.f32.partialorder %v3555_v40, 0.0  ;;  %v3575_v21 = vmul.f32 0.2, %v3555_v40  ;;  %v3557_v1 = vadd.f32 %v3556_v43, %v3516_v57  ;;  %v7328_v37 = vld [vmem:[#allocation8 + $0x3c8] ss:$16 sps:$4 sm:$0xff]  }
 0x2ff   :  { %v3518_v16 = vpop.f32.mrf.mxu1  ;;  %v7336_v43 = vld [vmem:[#allocation8 + $0x3ac] ss:$16 sps:$4 sm:$0xff]   ;;  %v7337_v39 = vld [vmem:[#allocation8 + $0x548] ss:$16 sps:$4 sm:$0xff]   ;;  %v8021_v46 = vld [vmem:[#allocation10] sm:$0xf] }
 0x300   :  { %vm3568_vm7 = vcmp.gt.f32.partialorder %v3557_v1, 0.0  ;;  %v3576_v59 = vmul.f32 0.2, %v3557_v1  ;;  %v3583_v48 = vsel %vm3567_vm6, %v3555_v40, %v3575_v21  ;;  %5402 = vmatpush1.bf16.msra.mxu0 %v7271_v42  ;;  %v7334_v40 = vld [vmem:[#allocation8 + $0x3a8] ss:$16 sps:$4 sm:$0xff]  }
 0x301   :  { %5403 = vmatprep.subr.bf16.mxu0 %v7279_v47  ;;  %v8016_v56 = vpack.c.bf16 %v3583_v48, %v3583_v48  ;;  %v7342_v57 = vld [vmem:[#allocation8 + $0x38c] ss:$16 sps:$4 sm:$0xff]   ;;  %v7343_v44 = vld [vmem:[#allocation8 + $0x528] ss:$16 sps:$4 sm:$0xff]   ;;  %v3854_v48 = vrot.slane %v8021_v46, %v7888_v0 }
 0x302   :  { %v3584_v32 = vsel %vm3568_vm7, %v3557_v1, %v3576_v59  ;;  %v7351_v45 = vld [vmem:[#allocation8 + $0x50c] ss:$16 sps:$4 sm:$0xff]   ;;  %v7340_v42 = vld [vmem:[#allocation8 + $0x388] ss:$16 sps:$4 sm:$0xff]  }
 0x303   :  { %v8014_v55 = vpack.c.bf16 %v3584_v32, %v3584_v32  ;;  %v7348_v21 = vld [vmem:[#allocation8 + $0x36c] ss:$16 sps:$4 sm:$0xff]   ;;  %v7349_v1 = vld [vmem:[#allocation8 + $0x508] ss:$16 sps:$4 sm:$0xff]  }
 0x304   :  { %5404 = vmatpush1.bf16.msra.mxu0 %v7277_v49  ;;  %v7411_v47 = vld [vmem:[#allocation11 + $0x74] ss:$8 sps:$4 sm:$0xff]   ;;  %v7354_v59 = vld [vmem:[#allocation8 + $0x34c] ss:$16 sps:$4 sm:$0xff]   ;;  %v7414_v32 = vld [vmem:[#allocation11 + $0x64] ss:$8 sps:$4 sm:$0xff]  }
 0x305   :  { %5306 = vmatprep.mubr.bf16.mxu1 %v8014_v55  ;;  %5405 = vmatprep.subr.bf16.mxu0 %v7285_v52  ;;  %v7346_v16 = vld [vmem:[#allocation8 + $0x368] ss:$16 sps:$4 sm:$0xff]   ;;  %v7409_v49 = vld [vmem:[#allocation11 + $0x70] ss:$8 sps:$4 sm:$0xff]  }
 0x306   :  { %5307 = vmatmul.mubr.bf16.vlgmr.msra.gmra.mxu1 %v8016_v56  ;;  %v7352_v52 = vld [vmem:[#allocation8 + $0x348] ss:$16 sps:$4 sm:$0xff]  }
 0x307   :  { %5357 = vmatpush1.bf16.msra.mxu1 %v7274_v2  ;;  %5388 = vmatprep.mubr.bf16.mxu1 %v7960_v33  ;;  %v7301_v33 = vld [vmem:[#allocation8 + $0x408] ss:$16 sps:$4 sm:$0xff]   ;;  %v3858_v2 = vrot.slane %v8021_v46, %v7893_v6 }
 0x308   :  { %5358 = vmatprep.subr.bf16.mxu1 %v7282_v62  ;;  %5406 = vmatpush1.bf16.msra.mxu0 %v7283_v61  ;;  %v7357_v61 = vld [vmem:[#allocation8 + $0x32c] ss:$16 sps:$4 sm:$0xff]  }
 0x309   :  { %5407 = vmatprep.subr.bf16.mxu0 %v7291_v63 }
 0x30b   :  { %5359 = vmatpush1.bf16.msra.mxu1 %v7280_v34 }
 0x30c   :  { %5360 = vmatprep.subr.bf16.mxu1 %v7288_v3  ;;  %5408 = vmatpush1.bf16.msra.mxu0 %v7289_v7  ;;  %v7412_v3 = vld [vmem:[#allocation11 + $0x60] ss:$8 sps:$4 sm:$0xff]  }
 0x30d   :  { %5409 = vmatprep.subr.bf16.mxu0 %v7297_v22  ;;  %v7417_v22 = vld [vmem:[#allocation11 + $0x54] ss:$8 sps:$4 sm:$0xff]  }
 0x30f   :  { %5361 = vmatpush1.bf16.msra.mxu1 %v7286_v24 }
 0x310   :  { %5362 = vmatprep.subr.bf16.mxu1 %v7294_v53  ;;  %5410 = vmatpush1.bf16.msra.mxu0 %v7295_v9 }
 0x311   :  { %5411 = vmatprep.subr.bf16.mxu0 %v7303_v58  ;;  %v7355_v58 = vld [vmem:[#allocation8 + $0x328] ss:$16 sps:$4 sm:$0xff]  }
 0x313   :  { %5363 = vmatpush1.bf16.msra.mxu1 %v7292_v11 }
 0x314   :  { %5364 = vmatprep.subr.bf16.mxu1 %v7300_v10  ;;  %5412 = vmatpush1.bf16.msra.mxu0 %v7301_v33  ;;  %v7360_v10 = vld [vmem:[#allocation8 + $0x30c] ss:$16 sps:$4 sm:$0xff]  }
 0x315   :  { %5413 = vmatprep.subr.bf16.mxu0 %v7309_v12  ;;  %v7415_v12 = vld [vmem:[#allocation11 + $0x50] ss:$8 sps:$4 sm:$0xff]  }
 0x317   :  { %5365 = vmatpush1.bf16.msra.mxu1 %v7298_v13 }
 0x318   :  { %5366 = vmatprep.subr.bf16.mxu1 %v7306_v14  ;;  %5414 = vmatpush2.bf16.msra.mxu0 %v7307_v15  ;;  %v7420_v14 = vld [vmem:[#allocation11 + $0x44] ss:$8 sps:$4 sm:$0xff]  }
 0x319   :  { %5415 = vmatprep.subr.bf16.mxu0 %v7315_v17  ;;  %v7358_v17 = vld [vmem:[#allocation8 + $0x308] ss:$16 sps:$4 sm:$0xff]  }
 0x31b   :  { %5367 = vmatpush1.bf16.msra.mxu1 %v7304_v18  ;;  %v7363_v18 = vld [vmem:[#allocation8 + $0x6ec] ss:$16 sps:$4 sm:$0xff]  }
 0x31c   :  { %5368 = vmatprep.subr.bf16.mxu1 %v7312_v23  ;;  %5416 = vmatpush2.bf16.msra.mxu0 %v7313_v25  ;;  %v7418_v23 = vld [vmem:[#allocation11 + $0x40] ss:$8 sps:$4 sm:$0xff]   ;;  %v7423_v25 = vld [vmem:[#allocation11 + $0x34] ss:$8 sps:$4 sm:$0xff]  }
 0x31d   :  { %5417 = vmatprep.subr.bf16.mxu0 %v7321_v26  ;;  %v7361_v26 = vld [vmem:[#allocation8 + $0x6e8] ss:$16 sps:$4 sm:$0xff]  }
 0x31f   :  { %5369 = vmatpush1.bf16.msra.mxu1 %v7310_v20  ;;  %v7366_v20 = vld [vmem:[#allocation8 + $0x6cc] ss:$16 sps:$4 sm:$0xff]  }
 0x320   :  { %5370 = vmatprep.subr.bf16.mxu1 %v7318_v19  ;;  %5418 = vmatpush2.bf16.msra.mxu0 %v7319_v27  ;;  %v7421_v19 = vld [vmem:[#allocation11 + $0x30] ss:$8 sps:$4 sm:$0xff]   ;;  %v7426_v27 = vld [vmem:[#allocation11 + $0x24] ss:$8 sps:$4 sm:$0xff]  }
 0x321   :  { %5419 = vmatprep.subr.bf16.mxu0 %v7327_v30  ;;  %v7364_v30 = vld [vmem:[#allocation8 + $0x6c8] ss:$16 sps:$4 sm:$0xff]  }
 0x323   :  { %5371 = vmatpush1.bf16.msra.mxu1 %v7316_v5  ;;  %v7369_v5 = vld [vmem:[#allocation8 + $0x6ac] ss:$16 sps:$4 sm:$0xff]  }
 0x324   :  { %5372 = vmatprep.subr.bf16.mxu1 %v7324_v31  ;;  %5420 = vmatpush2.bf16.msra.mxu0 %v7325_v28  ;;  %v7424_v31 = vld [vmem:[#allocation11 + $0x20] ss:$8 sps:$4 sm:$0xff]   ;;  %v7429_v28 = vld [vmem:[#allocation11 + $0x14] ss:$8 sps:$4 sm:$0xff]  }
 0x325   :  { %5421 = vmatprep.subr.bf16.mxu0 %v7333_v36  ;;  %v7367_v36 = vld [vmem:[#allocation8 + $0x6a8] ss:$16 sps:$4 sm:$0xff]  }
 0x327   :  { %5373 = vmatpush2.bf16.msra.mxu1 %v7322_v50  ;;  %v7372_v50 = vld [vmem:[#allocation8 + $0x68c] ss:$16 sps:$4 sm:$0xff]  }
 0x328   :  { %5374 = vmatprep.subr.bf16.mxu1 %v7330_v41  ;;  %5422 = vmatpush2.bf16.msra.mxu0 %v7331_v29  ;;  %v7427_v41 = vld [vmem:[#allocation11 + $0x10] ss:$8 sps:$4 sm:$0xff]   ;;  %v7370_v29 = vld [vmem:[#allocation8 + $0x688] ss:$16 sps:$4 sm:$0xff]  }
 0x329   :  { %5423 = vmatprep.subr.bf16.mxu0 %v7339_v8  ;;  %v7375_v8 = vld [vmem:[#allocation8 + $0x66c] ss:$16 sps:$4 sm:$0xff]  }
 0x32b   :  { %5375 = vmatpush2.bf16.msra.mxu1 %v7328_v37  ;;  %v7435_v37 = vld [vmem:[#allocation11 + $0xf4] ss:$8 sps:$4 sm:$0xff]  }
 0x32c   :  { %5376 = vmatprep.subr.bf16.mxu1 %v7336_v43  ;;  %5424 = vmatpush2.bf16.msra.mxu0 %v7337_v39  ;;  %v7373_v43 = vld [vmem:[#allocation8 + $0x668] ss:$16 sps:$4 sm:$0xff]   ;;  %v7378_v39 = vld [vmem:[#allocation8 + $0x64c] ss:$16 sps:$4 sm:$0xff]  }
 0x32d   :  { %5425 = vmatprep.subr.bf16.mxu0 %v7345_v35  ;;  %v7433_v35 = vld [vmem:[#allocation11 + $0xf0] ss:$8 sps:$4 sm:$0xff]  }
 0x32f   :  { %5377 = vmatpush2.bf16.msra.mxu1 %v7334_v40  ;;  %v7438_v40 = vld [vmem:[#allocation11 + $0xe4] ss:$8 sps:$4 sm:$0xff]  }
 0x330   :  { %5378 = vmatprep.subr.bf16.mxu1 %v7342_v57  ;;  %5426 = vmatpush2.bf16.msra.mxu0 %v7343_v44  ;;  %v7376_v57 = vld [vmem:[#allocation8 + $0x648] ss:$16 sps:$4 sm:$0xff]   ;;  %v7381_v44 = vld [vmem:[#allocation8 + $0x62c] ss:$16 sps:$4 sm:$0xff]  }
 0x331   :  { %5427 = vmatprep.subr.bf16.mxu0 %v7351_v45  ;;  %v7436_v45 = vld [vmem:[#allocation11 + $0xe0] ss:$8 sps:$4 sm:$0xff]  }
 0x333   :  { %5379 = vmatpush2.bf16.msra.mxu1 %v7340_v42  ;;  %v7441_v42 = vld [vmem:[#allocation11 + $0xd4] ss:$8 sps:$4 sm:$0xff]  }
 0x334   :  { %5380 = vmatprep.subr.bf16.mxu1 %v7348_v21  ;;  %5428 = vmatpush2.bf16.msra.mxu0 %v7349_v1  ;;  %v7379_v21 = vld [vmem:[#allocation8 + $0x628] ss:$16 sps:$4 sm:$0xff]   ;;  %v7384_v1 = vld [vmem:[#allocation8 + $0x60c] ss:$16 sps:$4 sm:$0xff]  }
 0x335   :  { %5891 = vmatprep.subr.bf16.mxu0 %v7411_v47  ;;  %v7439_v47 = vld [vmem:[#allocation11 + $0xd0] ss:$8 sps:$4 sm:$0xff]  }
 0x337   :  { %5381 = vmatpush2.bf16.msra.mxu1 %v7346_v16  ;;  %v5185_v62 = vpop.f32.mrf.mxu0  ;;  %5430 = vmatmul.mubr.bf16.vlgmr.msra.gmra.mxu0 %v7998_v38  ;;  %v7444_v16 = vld [vmem:[#allocation11 + $0xc4] ss:$8 sps:$4 sm:$0xff]  }
 0x338   :  { %5382 = vmatprep.subr.bf16.mxu1 %v7354_v59  ;;  %v5186_v63 = vadd.f32 %v5185_v62, %v3854_v48  ;;  %5892 = vmatpush1.bf16.msra.mxu0 %v7409_v49  ;;  %v7382_v59 = vld [vmem:[#allocation8 + $0x608] ss:$16 sps:$4 sm:$0xff]   ;;  %v7387_v48 = vld [vmem:[#allocation8 + $0x7ec] ss:$16 sps:$4 sm:$0xff]  }
 0x339   :  { %v5226_v34 = vpop.f32.mrf.mxu1  ;;  %v5187_v7 = vpop.f32.mrf.mxu0  ;;  %5893 = vmatprep.subr.bf16.mxu0 %v7414_v32  ;;  %v7442_v49 = vld [vmem:[#allocation11 + $0xc0] ss:$8 sps:$4 sm:$0xff]   ;;  %v7447_v32 = vld [vmem:[#allocation11 + $0xb4] ss:$8 sps:$4 sm:$0xff]   ;;  %v7445_v62 = vld [vmem:[#allocation11 + $0xb0] ss:$8 sps:$4 sm:$0xff]  }
 0x33a   :  { %v8028_v24 = vadd.f32 %v5226_v34, %v5186_v63  ;;  %v5188_v53 = vadd.f32 %v5187_v7, %v3858_v2  ;;  %v7390_v2 = vld [vmem:[#allocation8 + $0x7cc] ss:$16 sps:$4 sm:$0xff]   ;;  %v7388_v63 = vld [vmem:[#allocation8 + $0x7c8] ss:$16 sps:$4 sm:$0xff]  }
 0x33b   :  { %5383 = vmatpush2.bf16.msra.mxu1 %v7352_v52  ;;  %v5228_v9 = vpop.f32.mrf.mxu1  ;;  %v5189_v11 = vpop.f32.mrf.mxu0  ;;  %v7385_v52 = vld [vmem:[#allocation8 + $0x7e8] ss:$16 sps:$4 sm:$0xff]   ;;  %v7393_v34 = vld [vmem:[#allocation8 + $0x7ac] ss:$16 sps:$4 sm:$0xff]  }
 0x33c   :  { %5384 = vmatprep.subr.bf16.mxu1 %v7357_v61  ;;  %v8030_v33 = vadd.f32 %v5228_v9, %v5188_v53  ;;  %5894 = vmatpush1.bf16.msra.mxu0 %v7412_v3  ;;  %v7450_v61 = vld [vmem:[#allocation11 + $0xa4] ss:$8 sps:$4 sm:$0xff]   ;;  %v7448_v3 = vld [vmem:[#allocation11 + $0xa0] ss:$8 sps:$4 sm:$0xff]   ;;  %v7453_v7 = vld [vmem:[#allocation11 + $0x94] ss:$8 sps:$4 sm:$0xff]  }
 0x33d   :  { %v5230_v38 = vpop.f32.mrf.mxu1  ;;  %v5190_v13 = vpop.f32.mrf.mxu0  ;;  %5895 = vmatprep.subr.bf16.mxu0 %v7417_v22  ;;  %v7391_v22 = vld [vmem:[#allocation8 + $0x7a8] ss:$16 sps:$4 sm:$0xff]   ;;  %v7396_v53 = vld [vmem:[#allocation8 + $0x78c] ss:$16 sps:$4 sm:$0xff]  }
 0x33e   :  { %v7451_v9 = vld [vmem:[#allocation11 + $0x90] ss:$8 sps:$4 sm:$0xff]   ;;  %v7394_v11 = vld [vmem:[#allocation8 + $0x788] ss:$16 sps:$4 sm:$0xff]   ;;  %v7454_v38 = vld [vmem:[#allocation11 + $0x80] ss:$8 sps:$4 sm:$0xff]  }
 0x33f   :  { %5385 = vmatpush2.bf16.msra.mxu1 %v7355_v58  ;;  %v5231_v15 = vpop.f32.mrf.mxu1  ;;  %v7456_v58 = vld [vmem:[#allocation11 + $0x84] ss:$8 sps:$4 sm:$0xff]   ;;  %v7402_v13 = vld [vmem:[#allocation8 + $0x74c] ss:$16 sps:$4 sm:$0xff]  }
 0x340   :  { %5386 = vmatprep.subr.bf16.mxu1 %v7360_v10  ;;  %5896 = vmatpush1.bf16.msra.mxu0 %v7415_v12  ;;  %v7399_v10 = vld [vmem:[#allocation8 + $0x76c] ss:$16 sps:$4 sm:$0xff]   ;;  %v7397_v12 = vld [vmem:[#allocation8 + $0x768] ss:$16 sps:$4 sm:$0xff]  }
 0x341   :  { %5897 = vmatprep.subr.bf16.mxu0 %v7420_v14  ;;  %v7400_v14 = vld [vmem:[#allocation8 + $0x748] ss:$16 sps:$4 sm:$0xff]  }
 0x343   :  { %5387 = vmatpush2.bf16.msra.mxu1 %v7358_v17  ;;  %v7405_v17 = vld [vmem:[#allocation8 + $0x72c] ss:$16 sps:$4 sm:$0xff]  }
 0x344   :  { %5438 = vmatprep.subr.bf16.mxu1 %v7363_v18  ;;  %5898 = vmatpush1.bf16.msra.mxu0 %v7418_v23 }
 0x345   :  { %5899 = vmatprep.subr.bf16.mxu0 %v7423_v25 }
 0x346   :  { %5389 = vmatmul.mubr.bf16.vlgmr.msra.gmra.mxu1 %v7980_v4  ;;  %v7432_v4 = vld [vmem:[#allocation11 + $0x4] ss:$8 sps:$4 sm:$0xff]  }
 0x347   :  { %5439 = vmatpush1.bf16.msra.mxu1 %v7361_v26  ;;  %5470 = vmatprep.mubr.bf16.mxu1 %v8014_v55  ;;  %v7430_v55 = vld [vmem:[#allocation11] ss:$8 sps:$4 sm:$0xff]   ;;  %v7403_v26 = vld [vmem:[#allocation8 + $0x728] ss:$16 sps:$4 sm:$0xff]  }
 0x348   :  { %5440 = vmatprep.subr.bf16.mxu1 %v7366_v20  ;;  %5900 = vmatpush1.bf16.msra.mxu0 %v7421_v19  ;;  %v7408_v19 = vld [vmem:[#allocation8 + $0x70c] ss:$16 sps:$4 sm:$0xff]  }
 0x349   :  { %5901 = vmatprep.subr.bf16.mxu0 %v7426_v27 }
 0x34b   :  { %5441 = vmatpush1.bf16.msra.mxu1 %v7364_v30  ;;  %v7406_v30 = vld [vmem:[#allocation8 + $0x708] ss:$16 sps:$4 sm:$0xff]  }
 0x34c   :  { %5442 = vmatprep.subr.bf16.mxu1 %v7369_v5  ;;  %5902 = vmatpush1.bf16.msra.mxu0 %v7424_v31  ;;  %v7457_v5 = vld [vmem:[#allocation11 + $0x170] ss:$8 sps:$4 sm:$0xff]   ;;  %v7459_v31 = vld [vmem:[#allocation11 + $0x174] ss:$8 sps:$4 sm:$0xff]  }
 0x34d   :  { %5903 = vmatprep.subr.bf16.mxu0 %v7429_v28  ;;  %v7460_v28 = vld [vmem:[#allocation11 + $0x160] ss:$8 sps:$4 sm:$0xff]  }
 0x34f   :  { %5443 = vmatpush1.bf16.msra.mxu1 %v7367_v36  ;;  %v7463_v36 = vld [vmem:[#allocation11 + $0x150] ss:$8 sps:$4 sm:$0xff]  }
 0x350   :  { %5444 = vmatprep.subr.bf16.mxu1 %v7372_v50  ;;  %5904 = vmatpush1.bf16.msra.mxu0 %v7427_v41  ;;  %v7468_v50 = vld [vmem:[#allocation11 + $0x144] ss:$8 sps:$4 sm:$0xff]   ;;  %v7466_v41 = vld [vmem:[#allocation11 + $0x140] ss:$8 sps:$4 sm:$0xff]  }
 0x351   :  { %5905 = vmatprep.subr.bf16.mxu0 %v7432_v4  ;;  %v7471_v4 = vld [vmem:[#allocation11 + $0x134] ss:$8 sps:$4 sm:$0xff]  }
 0x353   :  { %5445 = vmatpush1.bf16.msra.mxu1 %v7370_v29  ;;  %v7469_v29 = vld [vmem:[#allocation11 + $0x130] ss:$8 sps:$4 sm:$0xff]  }
 0x354   :  { %5446 = vmatprep.subr.bf16.mxu1 %v7375_v8  ;;  %5906 = vmatpush1.bf16.msra.mxu0 %v7430_v55  ;;  %v7472_v8 = vld [vmem:[#allocation11 + $0x120] ss:$8 sps:$4 sm:$0xff]   ;;  %v7477_v55 = vld [vmem:[#allocation11 + $0x114] ss:$8 sps:$4 sm:$0xff]  }
 0x355   :  { %5907 = vmatprep.subr.bf16.mxu0 %v7435_v37  ;;  %v7475_v37 = vld [vmem:[#allocation11 + $0x110] ss:$8 sps:$4 sm:$0xff]  }
 0x357   :  { %5447 = vmatpush1.bf16.msra.mxu1 %v7373_v43  ;;  %v7480_v43 = vld [vmem:[#allocation11 + $0x104] ss:$8 sps:$4 sm:$0xff]  }
 0x358   :  { %5448 = vmatprep.subr.bf16.mxu1 %v7378_v39  ;;  %5908 = vmatpush2.bf16.msra.mxu0 %v7433_v35  ;;  %v7478_v39 = vld [vmem:[#allocation11 + $0x100] ss:$8 sps:$4 sm:$0xff]   ;;  %v7483_v35 = vld [vmem:[#allocation11 + $0x1f4] ss:$8 sps:$4 sm:$0xff]  }
 0x359   :  { %5909 = vmatprep.subr.bf16.mxu0 %v7438_v40  ;;  %v7481_v40 = vld [vmem:[#allocation11 + $0x1f0] ss:$8 sps:$4 sm:$0xff]  }
 0x35b   :  { %5449 = vmatpush1.bf16.msra.mxu1 %v7376_v57  ;;  %v7486_v57 = vld [vmem:[#allocation11 + $0x1e4] ss:$8 sps:$4 sm:$0xff]  }
 0x35c   :  { %5450 = vmatprep.subr.bf16.mxu1 %v7381_v44  ;;  %5910 = vmatpush2.bf16.msra.mxu0 %v7436_v45  ;;  %v7484_v44 = vld [vmem:[#allocation11 + $0x1e0] ss:$8 sps:$4 sm:$0xff]   ;;  %v7489_v45 = vld [vmem:[#allocation11 + $0x1d4] ss:$8 sps:$4 sm:$0xff]  }
 0x35d   :  { %5911 = vmatprep.subr.bf16.mxu0 %v7441_v42  ;;  %v7487_v42 = vld [vmem:[#allocation11 + $0x1d0] ss:$8 sps:$4 sm:$0xff]  }
 0x35f   :  { %5451 = vmatpush1.bf16.msra.mxu1 %v7379_v21  ;;  %v7492_v21 = vld [vmem:[#allocation11 + $0x1c4] ss:$8 sps:$4 sm:$0xff]  }
 0x360   :  { %5452 = vmatprep.subr.bf16.mxu1 %v7384_v1  ;;  %5912 = vmatpush2.bf16.msra.mxu0 %v7439_v47  ;;  %v7490_v1 = vld [vmem:[#allocation11 + $0x1c0] ss:$8 sps:$4 sm:$0xff]  }
 0x361   :  { %5913 = vmatprep.subr.bf16.mxu0 %v7444_v16  ;;  %v7495_v16 = vld [vmem:[#allocation11 + $0x1b4] ss:$8 sps:$4 sm:$0xff]  }
 0x363   :  { %5453 = vmatpush1.bf16.msra.mxu1 %v7382_v59 }
 0x364   :  { %5454 = vmatprep.subr.bf16.mxu1 %v7387_v48  ;;  %5914 = vmatpush2.bf16.msra.mxu0 %v7442_v49  ;;  %v7493_v48 = vld [vmem:[#allocation11 + $0x1b0] ss:$8 sps:$4 sm:$0xff]  }
 0x365   :  { %5915 = vmatprep.subr.bf16.mxu0 %v7447_v32  ;;  %v7498_v32 = vld [vmem:[#allocation11 + $0x1a4] ss:$8 sps:$4 sm:$0xff]  }
 0x367   :  { %5455 = vmatpush2.bf16.msra.mxu1 %v7385_v52 }
 0x368   :  { %5456 = vmatprep.subr.bf16.mxu1 %v7390_v2  ;;  %5916 = vmatpush2.bf16.msra.mxu0 %v7445_v62  ;;  %v7496_v2 = vld [vmem:[#allocation11 + $0x1a0] ss:$8 sps:$4 sm:$0xff]  }
 0x369   :  { %5917 = vmatprep.subr.bf16.mxu0 %v7450_v61 }
 0x36b   :  { %5457 = vmatpush2.bf16.msra.mxu1 %v7388_v63  ;;  %v7501_v63 = vld [vmem:[#allocation11 + $0x194] ss:$8 sps:$4 sm:$0xff]  }
 0x36c   :  { %5458 = vmatprep.subr.bf16.mxu1 %v7393_v34  ;;  %5918 = vmatpush2.bf16.msra.mxu0 %v7448_v3  ;;  %v7499_v3 = vld [vmem:[#allocation11 + $0x190] ss:$8 sps:$4 sm:$0xff]  }
 0x36d   :  { %5919 = vmatprep.subr.bf16.mxu0 %v7453_v7 }
 0x36f   :  { %5459 = vmatpush2.bf16.msra.mxu1 %v7391_v22 }
 0x370   :  { %5460 = vmatprep.subr.bf16.mxu1 %v7396_v53  ;;  %5920 = vmatpush2.bf16.msra.mxu0 %v7451_v9 }
 0x371   :  { %5921 = vmatprep.subr.bf16.mxu0 %v7456_v58  ;;  %v7504_v58 = vld [vmem:[#allocation11 + $0x184] ss:$8 sps:$4 sm:$0xff]  }
 0x373   :  { %5461 = vmatpush2.bf16.msra.mxu1 %v7394_v11 }
 0x374   :  { %5462 = vmatprep.subr.bf16.mxu1 %v7399_v10  ;;  %5922 = vmatpush2.bf16.msra.mxu0 %v7454_v38  ;;  %v7502_v38 = vld [vmem:[#allocation11 + $0x180] ss:$8 sps:$4 sm:$0xff]  }
 0x377   :  { %5463 = vmatpush2.bf16.msra.mxu1 %v7397_v12  ;;  %v5267_v15 = vpop.f32.mrf.mxu0 }
 0x378   :  { %5464 = vmatprep.subr.bf16.mxu1 %v7402_v13  ;;  %v8035_v18 = vadd.f32 %v5267_v15, %v8028_v24  ;;  %v7462_v24 = vld [vmem:[#allocation11 + $0x164] ss:$8 sps:$4 sm:$0xff]  }
 0x379   :  { %v5269_v23 = vpop.f32.mrf.mxu0 }
 0x37a   :  { %v8038_v25 = vadd.f32 %v5269_v23, %v8030_v33  ;;  %v7465_v33 = vld [vmem:[#allocation11 + $0x154] ss:$8 sps:$4 sm:$0xff]  }
 0x37b   :  { %5465 = vmatpush2.bf16.msra.mxu1 %v7400_v14  ;;  %v5271_v20 = vpop.f32.mrf.mxu0 }
 0x37c   :  { %5466 = vmatprep.subr.bf16.mxu1 %v7405_v17 }
 0x37d   :  { %v5272_v27 = vpop.f32.mrf.mxu0 }
 0x37f   :  { %5467 = vmatpush2.bf16.msra.mxu1 %v7403_v26  ;;  %v3866_v26 = vrot.slane %v8021_v46, %v614_v60  ;;  %v7510_v60 = vld [vmem:[#allocation14 + $0x28] sm:$0xff]  }
 0x380   :  { %5468 = vmatprep.subr.bf16.mxu1 %v7408_v19 }
 0x383   :  { %5469 = vmatpush2.bf16.msra.mxu1 %v7406_v30 }
 0x384   :  { %5932 = vmatprep.subr.bf16.mxu1 %v7459_v31 }
 0x386   :  { %5471 = vmatmul.mubr.bf16.vlgmr.msra.gmra.mxu1 %v8016_v56  ;;  %v7474_v56 = vld [vmem:[#allocation11 + $0x124] ss:$8 sps:$4 sm:$0xff]  }
 0x387   :  { %5933 = vmatpush1.bf16.msra.mxu1 %v7457_v5 }
 0x388   :  { %5934 = vmatprep.subr.bf16.mxu1 %v7462_v24 }
 0x38b   :  { %5935 = vmatpush1.bf16.msra.mxu1 %v7460_v28 }
 0x38c   :  { %5936 = vmatprep.subr.bf16.mxu1 %v7465_v33 }
 0x38f   :  { %5937 = vmatpush1.bf16.msra.mxu1 %v7463_v36 }
 0x390   :  { %5938 = vmatprep.subr.bf16.mxu1 %v7468_v50  ;;  %v7505_v50 = vld [vmem:[#allocation14 + $0x78] sm:$0xff]  }
 0x391   :  { %6977 = vmatprep.subr.bf16.mxu0 %v7505_v50 }
 0x393   :  { %5939 = vmatpush1.bf16.msra.mxu1 %v7466_v41  ;;  %v7506_v41 = vld [vmem:[#allocation14 + $0x38] sm:$0xff]  }
 0x394   :  { %5940 = vmatprep.subr.bf16.mxu1 %v7471_v4  ;;  %v7507_v4 = vld [vmem:[#allocation14 + $0x70] sm:$0xff]  }
 0x397   :  { %5941 = vmatpush1.bf16.msra.mxu1 %v7469_v29  ;;  %v7512_v29 = vld [vmem:[#allocation14 + $0x20] sm:$0xff]  }
 0x398   :  { %5942 = vmatprep.subr.bf16.mxu1 %v7474_v56  ;;  %v7513_v56 = vld [vmem:[#allocation14 + $0x58] sm:$0xff]  }
 0x39b   :  { %5943 = vmatpush1.bf16.msra.mxu1 %v7472_v8  ;;  %v7514_v8 = vld [vmem:[#allocation14 + $0x18] sm:$0xff]  }
 0x39c   :  { %5944 = vmatprep.subr.bf16.mxu1 %v7477_v55  ;;  %v7515_v55 = vld [vmem:[#allocation14 + $0x50] sm:$0xff]  }
 0x39f   :  { %5945 = vmatpush1.bf16.msra.mxu1 %v7475_v37 }
 0x3a0   :  { %5946 = vmatprep.subr.bf16.mxu1 %v7480_v43 }
 0x3a3   :  { %5947 = vmatpush1.bf16.msra.mxu1 %v7478_v39 }
 0x3a4   :  { %5948 = vmatprep.subr.bf16.mxu1 %v7483_v35 }
 0x3a7   :  { %5949 = vmatpush2.bf16.msra.mxu1 %v7481_v40 }
 0x3a8   :  { %5950 = vmatprep.subr.bf16.mxu1 %v7486_v57 }
 0x3ab   :  { %5951 = vmatpush2.bf16.msra.mxu1 %v7484_v44 }
 0x3ac   :  { %5952 = vmatprep.subr.bf16.mxu1 %v7489_v45 }
 0x3af   :  { %5953 = vmatpush2.bf16.msra.mxu1 %v7487_v42 }
 0x3b0   :  { %5954 = vmatprep.subr.bf16.mxu1 %v7492_v21 }
 0x3b3   :  { %5955 = vmatpush2.bf16.msra.mxu1 %v7490_v1 }
 0x3b4   :  { %5956 = vmatprep.subr.bf16.mxu1 %v7495_v16  ;;  %v7516_v16 = vld [vmem:[#allocation14 + $0x10] sm:$0xff]  }
 0x3b7   :  { %v5349_v47 = vpop.f32.mrf.mxu0  ;;  %5957 = vmatpush2.bf16.msra.mxu1 %v7493_v48  ;;  %v7517_v48 = vld [vmem:[#allocation14 + $0x48] sm:$0xff]  }
 0x3b8   :  { %5958 = vmatprep.subr.bf16.mxu1 %v7498_v32  ;;  %v7518_v32 = vld [vmem:[#allocation14 + $0x8] sm:$0xff]  }
 0x3b9   :  { %v5351_v59 = vpop.f32.mrf.mxu0 }
 0x3ba   :  { %v5352_v27 = vadd.f32 %v5351_v59, %v3866_v26 }
 0x3bb   :  { %v5353_v49 = vpop.f32.mrf.mxu0  ;;  %5959 = vmatpush2.bf16.msra.mxu1 %v7496_v2  ;;  %v7519_v2 = vld [vmem:[#allocation14 + $0x40] sm:$0xff]  }
 0x3bc   :  { %5960 = vmatprep.subr.bf16.mxu1 %v7501_v63  ;;  %v5559_v63 = vld [vmem:[#allocation13] sm:$0x3] }
 0x3bd   :  { %v5354_v52 = vpop.f32.mrf.mxu0 }
 0x3bf   :  { %5961 = vmatpush2.bf16.msra.mxu1 %v7499_v3  ;;  %v5568_v3 = vrot.slane %v5559_v63, %v7893_v6  ;;  %v6960_v6 = vld [vmem:[#allocation16] ss:$0 sm:$0xff] }
 0x3c0   :  { %5962 = vmatprep.subr.bf16.mxu1 %v7504_v58 }
 0x3c3   :  { %5963 = vmatpush2.bf16.msra.mxu1 %v7502_v38 }
 0x3c6   :  { %v5308_v62 = vpop.f32.mrf.mxu1 }
 0x3c7   :  { %v5309_v61 = vadd.f32 %v5308_v62, %v8035_v18 }
 0x3c8   :  { %v5310_v34 = vpop.f32.mrf.mxu1 }
 0x3c9   :  { %vm5479_vm8 = vcmp.gt.f32.partialorder %v5309_v61, 0.0  ;;  %v5483_v7 = vmul.f32 0.2, %v5309_v61  ;;  %v5311_v22 = vadd.f32 %v5310_v34, %v8038_v25  ;;  %v3862_v25 = vrot.slane %v8021_v46, %v610_v54  ;;  %v7508_v54 = vld [vmem:[#allocation14 + $0x30] sm:$0xff]   ;;  %v7511_v46 = vld [vmem:[#allocation14 + $0x60] sm:$0xff]  }
 0x3ca   :  { %v5312_v53 = vpop.f32.mrf.mxu1  ;;  %v5564_v34 = vrot.slane %v5559_v63, %v7888_v0 }
 0x3cb   :  { %vm5480_vm9 = vcmp.gt.f32.partialorder %v5311_v22, 0.0  ;;  %v5484_v9 = vmul.f32 0.2, %v5311_v22  ;;  %v5487_v11 = vsel %vm5479_vm8, %v5309_v61, %v5483_v7  ;;  %v5350_v20 = vadd.f32 %v5349_v47, %v3862_v25  ;;  %v7520_v61 = vld [vmem:[#allocation14] sm:$0xff]  }
 0x3cc   :  { %v5313_v10 = vpop.f32.mrf.mxu1  ;;  %v5491_v14 = vpack.c.bf16 %v5487_v11, %v5487_v11 }
 0x3cd   :  { %v5488_v12 = vsel %vm5480_vm9, %v5311_v22, %v5484_v9 }
 0x3ce   :  { %v5492_v13 = vpack.c.bf16 %v5488_v12, %v5488_v12 }
 0x3d0   :  { %5923 = vmatprep.mubr.bf16.mxu0 %v5492_v13 }
 0x3d1   :  { %5924 = vmatmul.mubr.bf16.vlgmr.msra.gmra.mxu0 %v5491_v14 }
 0x3d2   :  { %6978 = vmatpush3.bf16.msra.mxu0 %v7506_v41 }
 0x3d3   :  { %6979 = vmatprep.subr.bf16.mxu0 %v7507_v4 }
 0x3d6   :  { %6980 = vmatpush3.bf16.msra.mxu0 %v7508_v54 }
 0x3d7   :  { %6981 = vmatprep.subr.bf16.mxu0 %v7509_v51 }
 0x3da   :  { %6982 = vmatpush3.bf16.msra.mxu0 %v7510_v60 }
 0x3db   :  { %6983 = vmatprep.subr.bf16.mxu0 %v7511_v46 }
 0x3de   :  { %6984 = vmatpush3.bf16.msra.mxu0 %v7512_v29 }
 0x3df   :  { %6985 = vmatprep.subr.bf16.mxu0 %v7513_v56 }
 0x3e2   :  { %6986 = vmatpush3.bf16.msra.mxu0 %v7514_v8 }
 0x3e3   :  { %6987 = vmatprep.subr.bf16.mxu0 %v7515_v55 }
 0x3e6   :  { %6988 = vmatpush3.bf16.msra.mxu0 %v7516_v16 }
 0x3e7   :  { %6989 = vmatprep.subr.bf16.mxu0 %v7517_v48 }
 0x3ea   :  { %6990 = vmatpush3.bf16.msra.mxu0 %v7518_v32 }
 0x3eb   :  { %6991 = vmatprep.subr.bf16.mxu0 %v7519_v2 }
 0x3ee   :  { %6992 = vmatpush3.bf16.msra.mxu0 %v7520_v61 }
 0x3f7   :  { %v5431_v15 = vpop.f32.mrf.mxu0 }
 0x3f9   :  { %v5433_v17 = vpop.f32.mrf.mxu0 }
 0x3fb   :  { %v5435_v18 = vpop.f32.mrf.mxu0 }
 0x3fd   :  { %v5436_v23 = vpop.f32.mrf.mxu0 }
 0x406   :  { %v5390_v19 = vpop.f32.mrf.mxu1 }
 0x407   :  { %v5391_v30 = vadd.f32 %v5390_v19, %v5350_v20 }
 0x408   :  { %v5392_v5 = vpop.f32.mrf.mxu1 }
 0x409   :  { %v5393_v31 = vadd.f32 %v5392_v5, %v5352_v27  ;;  %v5432_v24 = vadd.f32 %v5431_v15, %v5391_v30 }
 0x40a   :  { %v5394_v28 = vpop.f32.mrf.mxu1 }
 0x40b   :  { %v5434_v33 = vadd.f32 %v5433_v17, %v5393_v31 }
 0x40c   :  { %v5395_v36 = vpop.f32.mrf.mxu1 }
 0x446   :  { %v5472_v37 = vpop.f32.mrf.mxu1 }
 0x447   :  { %v5473_v43 = vadd.f32 %v5472_v37, %v5432_v24 }
 0x448   :  { %v5474_v39 = vpop.f32.mrf.mxu1 }
 0x449   :  { %vm5481_vm10 = vcmp.gt.f32.partialorder %v5473_v43, 0.0  ;;  %v5485_v35 = vmul.f32 0.2, %v5473_v43  ;;  %v5475_v40 = vadd.f32 %v5474_v39, %v5434_v33 }
 0x44a   :  { %v5476_v57 = vpop.f32.mrf.mxu1 }
 0x44b   :  { %vm5482_vm11 = vcmp.gt.f32.partialorder %v5475_v40, 0.0  ;;  %v5486_v44 = vmul.f32 0.2, %v5475_v40  ;;  %v5489_v45 = vsel %vm5481_vm10, %v5473_v43, %v5485_v35 }
 0x44c   :  { %v5477_v42 = vpop.f32.mrf.mxu1  ;;  %v5493_v47 = vpack.c.bf16 %v5489_v45, %v5489_v45 }
 0x44d   :  { %v5490_v21 = vsel %vm5482_vm11, %v5475_v40, %v5486_v44 }
 0x44e   :  { %v5494_v1 = vpack.c.bf16 %v5490_v21, %v5490_v21 }
 0x450   :  { %5964 = vmatprep.mubr.bf16.mxu1 %v5494_v1 }
 0x451   :  { %5965 = vmatmul.mubr.bf16.vlgmr.msra.gmra.mxu1 %v5493_v47 }
 0x491   :  { %v5925_v59 = vpop.f32.mrf.mxu0 }
 0x492   :  { %v5926_v7 = vadd.f32 %v5925_v59, %v5564_v34 }
 0x493   :  { %v5927_v49 = vpop.f32.mrf.mxu0 }
 0x494   :  { %v5928_v53 = vadd.f32 %v5927_v49, %v5568_v3 }
 0x495   :  { %v5929_v52 = vpop.f32.mrf.mxu0 }
 0x497   :  { %v5930_v62 = vpop.f32.mrf.mxu0 }
 0x511   :  { %v5966_v22 = vpop.f32.mrf.mxu1 }
 0x512   :  { %v5967_v9 = vadd.f32 %v5966_v22, %v5926_v7 }
 0x513   :  { %v5968_v58 = vpop.f32.mrf.mxu1 }
 0x514   :  { %vm5973_vm12 = vcmp.gt.f32.partialorder %v5967_v9, 0.0  ;;  %v5975_v11 = vmul.f32 0.2, %v5967_v9  ;;  %v5969_v10 = vadd.f32 %v5968_v58, %v5928_v53 }
 0x515   :  { %v5970_v38 = vpop.f32.mrf.mxu1 }
 0x516   :  { %vm5974_vm13 = vcmp.gt.f32.partialorder %v5969_v10, 0.0  ;;  %v5976_v12 = vmul.f32 0.2, %v5969_v10  ;;  %v5977_v13 = vsel %vm5973_vm12, %v5967_v9, %v5975_v11 }
 0x517   :  { %v5971_v14 = vpop.f32.mrf.mxu1  ;;  %v5979_v18 = vpack.c.bf16 %v5977_v13, %v5977_v13 }
 0x518   :  { %v5978_v15 = vsel %vm5974_vm13, %v5969_v10, %v5976_v12 }
 0x519   :  { %v5980_v17 = vpack.c.bf16 %v5978_v15, %v5978_v15 }
 0x51b   :  { %6148 = vmatprep.mubr.bf16.mxu0 %v5980_v17 }
 0x51c   :  { %6149 = vmatmul.mubr.bf16.vlgmr.msra.gmra.mxu0 %v5979_v18 }
 0x5dc   :  { %v6993_v0 = vpop.f32.mrf.mxu0 }
 0x5de   :  { %v6994_v23 = vpop.f32.mrf.mxu0 }
 0x5df   :  { %v6995_v25 = vadd.f32 %v6994_v23, %v6993_v0 }
 0x5e0   :  { %v6996_v26 = vpop.f32.mrf.mxu0 }
 0x5e1   :  { %v6151_v20 = vadd.f32 %v6995_v25, %v6960_v6 }
 0x5e2   :  { %v6997_v19 = vpop.f32.mrf.mxu0 }
 0x5e3   :  { %v6156_v27 = vand.u32 2147483647, %v6151_v20  ;;  %vm6162_vm14 = vcmp.ge.f32.partialorder %v6151_v20, 0.0 }
 0x5e5   :  { %v6157_v30 = vsub.f32 0.0, %v6156_v27 }
 0x5e7   :  { %v6158_v5 = vmul.f32 1.442695, %v6157_v30 }
 0x5e9   :  { %7521 = vpow2.f32 %v6158_v5 }
 0x5f6   :  { %v7522_v31 = vpop.eup %7521 }
 0x5f7   :  { %v6160_v24 = vadd.f32 1.0, %v7522_v31 }
 0x5f9   :  { %7523 = vrcp.f32 %v6160_v24 }
 0x606   :  { %v7524_v28 = vpop.eup %7523 }
 0x607   :  { %v6163_v33 = vmul.f32 %v7524_v28, %v7522_v31 }
 0x609   :  { %v6164_v36 = vsel %vm6162_vm14, %v7524_v28, %v6163_v33 }
 0x60a   :  { %6165 = vst [vmem:[#allocation17] sm:$0xff] %v6164_v36 }
 0x60b   :  { %7719 = shalt.err (!%p7716_p7)
}
 0x60c   :  { %6175 = dma.vmem_to_hbm [thread:$0]  %s6173_s8, 128, %s8063_s9, [#allocation4]  }
 0x60d   :  { %7738 = dma.done.wait [#allocation4], 128  }
 0x60e   :  { %7739 = vsyncadd [#allocation4], 4294967168 }
 0x60f   :  { %6179 = vsyncpa [#allocation3], 1 }
 0x610   :  { %6180 = vsyncpa [#allocation6], 1 }
 0x611   :  { %6181 = vsyncpa [#allocation9], 1 }
 0x612   :  { %6182 = vsyncpa [#allocation12], 1 }
 0x613   :  { %6183 = vsyncpa [#allocation15], 1 }
 0x614   :  { %6184 = vsyncpa [#allocation4], 1 }

</bundles_post_ra>
